<compile_context>
chip_gen: v7x
topology: tpu7x:2x2x1
jax: 0.10.0
libtpu: 0.0.40
codegen_flags: <defaults>
</compile_context>

<pallas_src>
import jax
import jax.numpy as jnp
from jax.experimental import pallas as pl
from jax.experimental.pallas import tpu as pltpu

EPS = 1e-3


def discriminator_kernel(in_ref, pred_ref, w_f_ref, b_f_ref, w_hh_ref,
                         w1_ref, b1_ref, w2_ref, b2_ref, o_ref):
    """Column-major ('batch on lanes') LSTM encoder + classifier.

    in_ref   : (obs_len, 2, bt)   observed relative displacements
    pred_ref : (pred_len, 2, bt)  predicted relative displacements
    w_f_ref  : (4H, 2)  = W_ih @ W_emb     (embedding folded on the host)
    b_f_ref  : (4H, 1)  = W_ih @ b_emb + b_ih + b_hh
    w_hh_ref : (4H, H)
    w1_ref   : (M, H),  b1_ref : (M, 1)
    w2_ref   : (M, 1),  b2_ref : (1, 1)
    o_ref    : (1, bt)  lane-dense per-tile scores
    """
    obs_len = in_ref.shape[0]
    pred_len = pred_ref.shape[0]
    bt = in_ref.shape[2]
    h_dim = w_hh_ref.shape[1]

    w_f = w_f_ref[...]                                           # (4H, 2)
    b_f = b_f_ref[...]                                           # (4H, 1)
    w_hh = w_hh_ref[...]                                         # (4H, H)

    h = jnp.zeros((h_dim, bt), jnp.float32)
    c = jnp.zeros((h_dim, bt), jnp.float32)

    # Fully unrolled recurrence (seq_len small and static).  Gate slices are
    # row slices at multiples of the 8-sublane fp32 tile -> no relayouts.
    # (For batch_tile >= 128 on v5e a bounded lax.fori_loop would cap vreg
    #  live ranges; unnecessary at these sizes.)
    for t in range(obs_len + pred_len):
        x_t = in_ref[t] if t < obs_len else pred_ref[t - obs_len]  # (2, bt)
        # Input-side projection: no dependence on h/c -> off the serial chain.
        p_t = jnp.dot(w_f, x_t, preferred_element_type=jnp.float32) + b_f
        # ONE MXU push on the critical path per step.
        g_all = p_t + jnp.dot(w_hh, h, preferred_element_type=jnp.float32)
        i_g = jax.nn.sigmoid(g_all[0 * h_dim:1 * h_dim, :])
        f_g = jax.nn.sigmoid(g_all[1 * h_dim:2 * h_dim, :])
        g_g = jnp.tanh(g_all[2 * h_dim:3 * h_dim, :])
        o_g = jax.nn.sigmoid(g_all[3 * h_dim:4 * h_dim, :])
        c = f_g * c + i_g * g_g
        h = o_g * jnp.tanh(c)

    # Classifier (SGAN make_mlp puts a ReLU after every Linear, incl. last).
    z = jnp.maximum(
        jnp.dot(w1_ref[...], h, preferred_element_type=jnp.float32)
        + b1_ref[...], 0.0)                                      # (M, bt)
    # Final Linear(M, 1) as a cross-sublane reduction -> (1, bt) row.
    s = jnp.maximum(
        jnp.sum(z * w2_ref[...], axis=0, keepdims=True) + b2_ref[...], 0.0)

    out = jax.nn.sigmoid(s) * (1.0 - 2.0 * EPS) + EPS            # (1, bt)
    o_ref[...] = out.astype(o_ref.dtype)


def prepare_kernel_params(params):
    """Host-side fold/transpose of PyTorch-convention params into the
    kernel's column-major layout (done once, outside the kernel)."""
    w_f = params["w_ih"] @ params["w_emb"]                       # (4H, 2)
    b_f = (params["w_ih"] @ params["b_emb"]
           + params["b_ih"] + params["b_hh"])[:, None]           # (4H, 1)
    return {
        "w_fused": w_f.astype(jnp.float32),
        "b_fused": b_f.astype(jnp.float32),
        "w_hh": params["w_hh"].astype(jnp.float32),              # (4H, H)
        "w1": params["w1"].astype(jnp.float32),                  # (M, H)
        "b1": params["b1"][:, None].astype(jnp.float32),         # (M, 1)
        "w2": params["w2"].T.astype(jnp.float32),                # (M, 1)
        "b2": params["b2"].reshape(1, 1).astype(jnp.float32),    # (1, 1)
    }


def _default_batch_tile(batch):
    """Generation-aware tile choice.  Batch is lane-mapped, so a tile must be
    either the full batch or a multiple of 128."""
    if batch < 256 or batch % 128 != 0:
        return batch
    try:
        kind = jax.devices()[0].device_kind.lower()
    except Exception:
        kind = ""
    # v6e/v7x have a 256-wide MXU result tile; keep >=2 programs for v7x's
    # two TensorCores (so only go to 256 when batch >= 512).
    if (("v6" in kind) or ("v7" in kind)) and batch % 512 == 0:
        return 256
    return 128


def trajectory_discriminator_forward(in_xy, in_dxdy, pred_xy, pred_dxdy,
                                     params, *, batch_tile=None):
    """d_type='local', num_ds=1, unbound_output=False."""
    del in_xy, pred_xy  # local discriminator uses only relative displacements
    obs_len, batch, _ = in_dxdy.shape
    pred_len = pred_dxdy.shape[0]

    kp = prepare_kernel_params(params)

    if batch_tile is None:
        batch_tile = _default_batch_tile(batch)
    assert batch % batch_tile == 0, "batch must be divisible by batch_tile"
    assert batch_tile == batch or batch_tile % 128 == 0, (
        "lane-mapped batch tiles must be the full batch or a multiple of 128")
    grid = (batch // batch_tile,)

    # Layout plumbing only: put batch on lanes, (x, y) on sublanes.
    in_t = jnp.swapaxes(in_dxdy, 1, 2)       # (obs_len, 2, B)
    pred_t = jnp.swapaxes(pred_dxdy, 1, 2)   # (pred_len, 2, B)

    def full_spec(x):
        shape = x.shape
        return pl.BlockSpec(shape, lambda i: (0,) * len(shape))

    out = pl.pallas_call(
        discriminator_kernel,
        out_shape=jax.ShapeDtypeStruct((1, batch), jnp.float32),
        grid=grid,
        in_specs=[
            pl.BlockSpec((obs_len, 2, batch_tile), lambda i: (0, 0, i)),
            pl.BlockSpec((pred_len, 2, batch_tile), lambda i: (0, 0, i)),
            full_spec(kp["w_fused"]),
            full_spec(kp["b_fused"]),
            full_spec(kp["w_hh"]),
            full_spec(kp["w1"]),
            full_spec(kp["b1"]),
            full_spec(kp["w2"]),
            full_spec(kp["b2"]),
        ],
        out_specs=pl.BlockSpec((1, batch_tile), lambda i: (0, i)),
        compiler_params=pltpu.CompilerParams(
            dimension_semantics=("parallel",)),
    )(in_t, pred_t, kp["w_fused"], kp["b_fused"], kp["w_hh"],
      kp["w1"], kp["b1"], kp["w2"], kp["b2"])

    # num_ds = 1: cat over dim=1 is a no-op, mean(1) squeezes -> (batch,)
    return out.reshape(batch)


def init_params(key, embedding_dim=16, h_dim=48, mlp_dim=64):
    """PyTorch-convention parameters (Linear weight = (out, in))."""
    ks = jax.random.split(key, 10)
    s = 0.1

    def n(k, shape):
        return s * jax.random.normal(k, shape, jnp.float32)

    return {
        "w_emb": n(ks[0], (embedding_dim, 2)),          # Linear(2, E)
        "b_emb": n(ks[1], (embedding_dim,)),
        "w_ih": n(ks[2], (4 * h_dim, embedding_dim)),   # LSTM weight_ih_l0
        "w_hh": n(ks[3], (4 * h_dim, h_dim)),           # LSTM weight_hh_l0
        "b_ih": n(ks[4], (4 * h_dim,)),
        "b_hh": n(ks[5], (4 * h_dim,)),
        "w1": n(ks[6], (mlp_dim, h_dim)),               # Linear(H, M)
        "b1": n(ks[7], (mlp_dim,)),
        "w2": n(ks[8], (1, mlp_dim)),                   # Linear(M, 1)
        "b2": n(ks[9], (1,)),
    }


def reference_forward(in_dxdy, pred_dxdy, params):
    """Plain-JAX reference matching the PyTorch forward (local D, num_ds=1)."""
    traj = jnp.concatenate([in_dxdy, pred_dxdy], axis=0)          # (seq, B, 2)
    seq_len, batch, _ = traj.shape
    h_dim = params["w_hh"].shape[1]
    emb = traj.reshape(-1, 2) @ params["w_emb"].T + params["b_emb"]
    emb = emb.reshape(seq_len, batch, -1)
    h = jnp.zeros((batch, h_dim), jnp.float32)
    c = jnp.zeros((batch, h_dim), jnp.float32)
    for t in range(seq_len):
        gates = (emb[t] @ params["w_ih"].T + h @ params["w_hh"].T
                 + params["b_ih"] + params["b_hh"])
        i_g = jax.nn.sigmoid(gates[:, :h_dim])
        f_g = jax.nn.sigmoid(gates[:, h_dim:2 * h_dim])
        g_g = jnp.tanh(gates[:, 2 * h_dim:3 * h_dim])
        o_g = jax.nn.sigmoid(gates[:, 3 * h_dim:])
        c = f_g * c + i_g * g_g
        h = o_g * jnp.tanh(c)
    z = jnp.maximum(h @ params["w1"].T + params["b1"], 0.0)
    s = jnp.maximum(z @ params["w2"].T + params["b2"], 0.0)
    out = jax.nn.sigmoid(s) * (1.0 - 2.0 * EPS) + EPS
    return out.mean(axis=1)


if __name__ == "__main__":
    obs_len, pred_len, batch = 8, 8, 8

    key = jax.random.PRNGKey(0)
    k_in_xy, k_in_d, k_pr_xy, k_pr_d, k_params = jax.random.split(key, 5)
    in_xy = jax.random.normal(k_in_xy, (obs_len, batch, 2), jnp.float32)
    in_dxdy = jax.random.normal(k_in_d, (obs_len, batch, 2), jnp.float32)
    pred_xy = jax.random.normal(k_pr_xy, (pred_len, batch, 2), jnp.float32)
    pred_dxdy = jax.random.normal(k_pr_d, (pred_len, batch, 2), jnp.float32)

    params = init_params(k_params)

    scores = trajectory_discriminator_forward(
        in_xy, in_dxdy, pred_xy, pred_dxdy, params)
    scores = jax.block_until_ready(scores)

    assert scores.shape == (batch,)
    assert bool(jnp.all(jnp.isfinite(scores)))

    ref = reference_forward(in_dxdy, pred_dxdy, params)
    assert bool(jnp.allclose(scores, ref, rtol=1e-3, atol=1e-3)), (scores, ref)

    # TODO(synk): d_type='global' PoolHiddenNet path (ragged per-sequence max
    # pooling over seq_start_end) and the discs_hist/update_hist EMA
    # bookkeeping are not implemented; only the default 'local' forward is.
    print("KERNEL_OK")
</pallas_src>

<mosaic_0001>
module attributes {stable_mosaic.version = 11 : i64} {
  func.func @discriminator_kernel(%arg0: i32, %arg1: memref<8x2x8xf32, #tpu.memory_space<vmem>>, %arg2: memref<8x2x8xf32, #tpu.memory_space<vmem>>, %arg3: memref<192x2xf32, #tpu.memory_space<vmem>>, %arg4: memref<192x1xf32, #tpu.memory_space<vmem>>, %arg5: memref<192x48xf32, #tpu.memory_space<vmem>>, %arg6: memref<64x48xf32, #tpu.memory_space<vmem>>, %arg7: memref<64x1xf32, #tpu.memory_space<vmem>>, %arg8: memref<64x1xf32, #tpu.memory_space<vmem>>, %arg9: memref<1x1xf32, #tpu.memory_space<vmem>>, %arg10: memref<1x8xf32, #tpu.memory_space<vmem>>) attributes {dimension_semantics = [#tpu.dimension_semantics<parallel>], iteration_bounds = array<i64: 1>, scalar_prefetch = 0 : i64, scratch_operands = 0 : i64, tpu.core_type = #tpu.core_type<tc>, window_params = [{transform_indices = @transform_0, window_bounds = array<i64: 8, 2, 8>}, {transform_indices = @transform_1, window_bounds = array<i64: 8, 2, 8>}, {pipeline_mode = #tpu.pipeline_mode<synchronous>, transform_indices = @transform_2, window_bounds = array<i64: 192, 2>}, {pipeline_mode = #tpu.pipeline_mode<synchronous>, transform_indices = @transform_3, window_bounds = array<i64: 192, 1>}, {pipeline_mode = #tpu.pipeline_mode<synchronous>, transform_indices = @transform_4, window_bounds = array<i64: 192, 48>}, {pipeline_mode = #tpu.pipeline_mode<synchronous>, transform_indices = @transform_5, window_bounds = array<i64: 64, 48>}, {pipeline_mode = #tpu.pipeline_mode<synchronous>, transform_indices = @transform_6, window_bounds = array<i64: 64, 1>}, {pipeline_mode = #tpu.pipeline_mode<synchronous>, transform_indices = @transform_7, window_bounds = array<i64: 64, 1>}, {pipeline_mode = #tpu.pipeline_mode<synchronous>, transform_indices = @transform_8, window_bounds = array<i64: 1, 1>}, {transform_indices = @transform_9, window_bounds = array<i64: 1, 8>}]} {
    %c0 = arith.constant 0 : index
    %c0_0 = arith.constant 0 : index
    %0 = vector.load %arg3[%c0, %c0_0] : memref<192x2xf32, #tpu.memory_space<vmem>>, vector<192x2xf32>
    %c0_1 = arith.constant 0 : index
    %c0_2 = arith.constant 0 : index
    %1 = vector.load %arg4[%c0_1, %c0_2] : memref<192x1xf32, #tpu.memory_space<vmem>>, vector<192x1xf32>
    %c0_3 = arith.constant 0 : index
    %c0_4 = arith.constant 0 : index
    %2 = vector.load %arg5[%c0_3, %c0_4] : memref<192x48xf32, #tpu.memory_space<vmem>>, vector<192x48xf32>
    %cst = arith.constant 0.000000e+00 : f32
    %3 = vector.broadcast %cst : f32 to vector<48x8xf32>
    %cst_5 = arith.constant 0.000000e+00 : f32
    %4 = vector.broadcast %cst_5 : f32 to vector<48x8xf32>
    %c0_6 = arith.constant 0 : index
    %c0_7 = arith.constant 0 : index
    %c0_8 = arith.constant 0 : index
    %5 = vector.load %arg1[%c0_6, %c0_7, %c0_8] : memref<8x2x8xf32, #tpu.memory_space<vmem>>, vector<1x2x8xf32>
    %6 = vector.shape_cast %5 : vector<1x2x8xf32> to vector<2x8xf32>
    %cst_9 = arith.constant dense<0.000000e+00> : vector<192x8xf32>
    %7 = tpu.matmul %0, %6, %cst_9 {dimension_numbers = #tpu.dot_dimension_numbers<[1], [0], [0], [1], [0, 0, 1, 1], [], []>} : vector<192x2xf32>, vector<2x8xf32>, vector<192x8xf32> -> vector<192x8xf32>
    %8 = vector.broadcast %1 : vector<192x1xf32> to vector<192x8xf32>
    %9 = arith.addf %7, %8 : vector<192x8xf32>
    %cst_10 = arith.constant dense<0.000000e+00> : vector<192x8xf32>
    %10 = tpu.matmul %2, %3, %cst_10 {dimension_numbers = #tpu.dot_dimension_numbers<[1], [0], [0], [1], [0, 0, 1, 1], [], []>} : vector<192x48xf32>, vector<48x8xf32>, vector<192x8xf32> -> vector<192x8xf32>
    %11 = arith.addf %9, %10 : vector<192x8xf32>
    %12 = vector.extract_strided_slice %11 {offsets = [0, 0], sizes = [48, 8], strides = [1, 1]} : vector<192x8xf32> to vector<48x8xf32>
    %13 = arith.negf %12 : vector<48x8xf32>
    %14 = math.exp %13 : vector<48x8xf32>
    %cst_11 = arith.constant 1.000000e+00 : f32
    %15 = vector.broadcast %cst_11 : f32 to vector<48x8xf32>
    %16 = arith.addf %15, %14 : vector<48x8xf32>
    %17 = arith.divf %15, %16 : vector<48x8xf32>
    %18 = vector.extract_strided_slice %11 {offsets = [48, 0], sizes = [48, 8], strides = [1, 1]} : vector<192x8xf32> to vector<48x8xf32>
    %19 = arith.negf %18 : vector<48x8xf32>
    %20 = math.exp %19 : vector<48x8xf32>
    %cst_12 = arith.constant 1.000000e+00 : f32
    %21 = vector.broadcast %cst_12 : f32 to vector<48x8xf32>
    %22 = arith.addf %21, %20 : vector<48x8xf32>
    %23 = arith.divf %21, %22 : vector<48x8xf32>
    %24 = vector.extract_strided_slice %11 {offsets = [96, 0], sizes = [48, 8], strides = [1, 1]} : vector<192x8xf32> to vector<48x8xf32>
    %25 = math.tanh %24 : vector<48x8xf32>
    %26 = vector.extract_strided_slice %11 {offsets = [144, 0], sizes = [48, 8], strides = [1, 1]} : vector<192x8xf32> to vector<48x8xf32>
    %27 = arith.negf %26 : vector<48x8xf32>
    %28 = math.exp %27 : vector<48x8xf32>
    %cst_13 = arith.constant 1.000000e+00 : f32
    %29 = vector.broadcast %cst_13 : f32 to vector<48x8xf32>
    %30 = arith.addf %29, %28 : vector<48x8xf32>
    %31 = arith.divf %29, %30 : vector<48x8xf32>
    %32 = arith.mulf %23, %4 : vector<48x8xf32>
    %33 = arith.mulf %17, %25 : vector<48x8xf32>
    %34 = arith.addf %32, %33 : vector<48x8xf32>
    %35 = math.tanh %34 : vector<48x8xf32>
    %36 = arith.mulf %31, %35 : vector<48x8xf32>
    %c1 = arith.constant 1 : index
    %c0_14 = arith.constant 0 : index
    %c0_15 = arith.constant 0 : index
    %37 = vector.load %arg1[%c1, %c0_14, %c0_15] : memref<8x2x8xf32, #tpu.memory_space<vmem>>, vector<1x2x8xf32>
    %38 = vector.shape_cast %37 : vector<1x2x8xf32> to vector<2x8xf32>
    %cst_16 = arith.constant dense<0.000000e+00> : vector<192x8xf32>
    %39 = tpu.matmul %0, %38, %cst_16 {dimension_numbers = #tpu.dot_dimension_numbers<[1], [0], [0], [1], [0, 0, 1, 1], [], []>} : vector<192x2xf32>, vector<2x8xf32>, vector<192x8xf32> -> vector<192x8xf32>
    %40 = vector.broadcast %1 : vector<192x1xf32> to vector<192x8xf32>
    %41 = arith.addf %39, %40 : vector<192x8xf32>
    %cst_17 = arith.constant dense<0.000000e+00> : vector<192x8xf32>
    %42 = tpu.matmul %2, %36, %cst_17 {dimension_numbers = #tpu.dot_dimension_numbers<[1], [0], [0], [1], [0, 0, 1, 1], [], []>} : vector<192x48xf32>, vector<48x8xf32>, vector<192x8xf32> -> vector<192x8xf32>
    %43 = arith.addf %41, %42 : vector<192x8xf32>
    %44 = vector.extract_strided_slice %43 {offsets = [0, 0], sizes = [48, 8], strides = [1, 1]} : vector<192x8xf32> to vector<48x8xf32>
    %45 = arith.negf %44 : vector<48x8xf32>
    %46 = math.exp %45 : vector<48x8xf32>
    %cst_18 = arith.constant 1.000000e+00 : f32
    %47 = vector.broadcast %cst_18 : f32 to vector<48x8xf32>
    %48 = arith.addf %47, %46 : vector<48x8xf32>
    %49 = arith.divf %47, %48 : vector<48x8xf32>
    %50 = vector.extract_strided_slice %43 {offsets = [48, 0], sizes = [48, 8], strides = [1, 1]} : vector<192x8xf32> to vector<48x8xf32>
    %51 = arith.negf %50 : vector<48x8xf32>
    %52 = math.exp %51 : vector<48x8xf32>
    %cst_19 = arith.constant 1.000000e+00 : f32
    %53 = vector.broadcast %cst_19 : f32 to vector<48x8xf32>
    %54 = arith.addf %53, %52 : vector<48x8xf32>
    %55 = arith.divf %53, %54 : vector<48x8xf32>
    %56 = vector.extract_strided_slice %43 {offsets = [96, 0], sizes = [48, 8], strides = [1, 1]} : vector<192x8xf32> to vector<48x8xf32>
    %57 = math.tanh %56 : vector<48x8xf32>
    %58 = vector.extract_strided_slice %43 {offsets = [144, 0], sizes = [48, 8], strides = [1, 1]} : vector<192x8xf32> to vector<48x8xf32>
    %59 = arith.negf %58 : vector<48x8xf32>
    %60 = math.exp %59 : vector<48x8xf32>
    %cst_20 = arith.constant 1.000000e+00 : f32
    %61 = vector.broadcast %cst_20 : f32 to vector<48x8xf32>
    %62 = arith.addf %61, %60 : vector<48x8xf32>
    %63 = arith.divf %61, %62 : vector<48x8xf32>
    %64 = arith.mulf %55, %34 : vector<48x8xf32>
    %65 = arith.mulf %49, %57 : vector<48x8xf32>
    %66 = arith.addf %64, %65 : vector<48x8xf32>
    %67 = math.tanh %66 : vector<48x8xf32>
    %68 = arith.mulf %63, %67 : vector<48x8xf32>
    %c2 = arith.constant 2 : index
    %c0_21 = arith.constant 0 : index
    %c0_22 = arith.constant 0 : index
    %69 = vector.load %arg1[%c2, %c0_21, %c0_22] : memref<8x2x8xf32, #tpu.memory_space<vmem>>, vector<1x2x8xf32>
    %70 = vector.shape_cast %69 : vector<1x2x8xf32> to vector<2x8xf32>
    %cst_23 = arith.constant dense<0.000000e+00> : vector<192x8xf32>
    %71 = tpu.matmul %0, %70, %cst_23 {dimension_numbers = #tpu.dot_dimension_numbers<[1], [0], [0], [1], [0, 0, 1, 1], [], []>} : vector<192x2xf32>, vector<2x8xf32>, vector<192x8xf32> -> vector<192x8xf32>
    %72 = vector.broadcast %1 : vector<192x1xf32> to vector<192x8xf32>
    %73 = arith.addf %71, %72 : vector<192x8xf32>
    %cst_24 = arith.constant dense<0.000000e+00> : vector<192x8xf32>
    %74 = tpu.matmul %2, %68, %cst_24 {dimension_numbers = #tpu.dot_dimension_numbers<[1], [0], [0], [1], [0, 0, 1, 1], [], []>} : vector<192x48xf32>, vector<48x8xf32>, vector<192x8xf32> -> vector<192x8xf32>
    %75 = arith.addf %73, %74 : vector<192x8xf32>
    %76 = vector.extract_strided_slice %75 {offsets = [0, 0], sizes = [48, 8], strides = [1, 1]} : vector<192x8xf32> to vector<48x8xf32>
    %77 = arith.negf %76 : vector<48x8xf32>
    %78 = math.exp %77 : vector<48x8xf32>
    %cst_25 = arith.constant 1.000000e+00 : f32
    %79 = vector.broadcast %cst_25 : f32 to vector<48x8xf32>
    %80 = arith.addf %79, %78 : vector<48x8xf32>
    %81 = arith.divf %79, %80 : vector<48x8xf32>
    %82 = vector.extract_strided_slice %75 {offsets = [48, 0], sizes = [48, 8], strides = [1, 1]} : vector<192x8xf32> to vector<48x8xf32>
    %83 = arith.negf %82 : vector<48x8xf32>
    %84 = math.exp %83 : vector<48x8xf32>
    %cst_26 = arith.constant 1.000000e+00 : f32
    %85 = vector.broadcast %cst_26 : f32 to vector<48x8xf32>
    %86 = arith.addf %85, %84 : vector<48x8xf32>
    %87 = arith.divf %85, %86 : vector<48x8xf32>
    %88 = vector.extract_strided_slice %75 {offsets = [96, 0], sizes = [48, 8], strides = [1, 1]} : vector<192x8xf32> to vector<48x8xf32>
    %89 = math.tanh %88 : vector<48x8xf32>
    %90 = vector.extract_strided_slice %75 {offsets = [144, 0], sizes = [48, 8], strides = [1, 1]} : vector<192x8xf32> to vector<48x8xf32>
    %91 = arith.negf %90 : vector<48x8xf32>
    %92 = math.exp %91 : vector<48x8xf32>
    %cst_27 = arith.constant 1.000000e+00 : f32
    %93 = vector.broadcast %cst_27 : f32 to vector<48x8xf32>
    %94 = arith.addf %93, %92 : vector<48x8xf32>
    %95 = arith.divf %93, %94 : vector<48x8xf32>
    %96 = arith.mulf %87, %66 : vector<48x8xf32>
    %97 = arith.mulf %81, %89 : vector<48x8xf32>
    %98 = arith.addf %96, %97 : vector<48x8xf32>
    %99 = math.tanh %98 : vector<48x8xf32>
    %100 = arith.mulf %95, %99 : vector<48x8xf32>
    %c3 = arith.constant 3 : index
    %c0_28 = arith.constant 0 : index
    %c0_29 = arith.constant 0 : index
    %101 = vector.load %arg1[%c3, %c0_28, %c0_29] : memref<8x2x8xf32, #tpu.memory_space<vmem>>, vector<1x2x8xf32>
    %102 = vector.shape_cast %101 : vector<1x2x8xf32> to vector<2x8xf32>
    %cst_30 = arith.constant dense<0.000000e+00> : vector<192x8xf32>
    %103 = tpu.matmul %0, %102, %cst_30 {dimension_numbers = #tpu.dot_dimension_numbers<[1], [0], [0], [1], [0, 0, 1, 1], [], []>} : vector<192x2xf32>, vector<2x8xf32>, vector<192x8xf32> -> vector<192x8xf32>
    %104 = vector.broadcast %1 : vector<192x1xf32> to vector<192x8xf32>
    %105 = arith.addf %103, %104 : vector<192x8xf32>
    %cst_31 = arith.constant dense<0.000000e+00> : vector<192x8xf32>
    %106 = tpu.matmul %2, %100, %cst_31 {dimension_numbers = #tpu.dot_dimension_numbers<[1], [0], [0], [1], [0, 0, 1, 1], [], []>} : vector<192x48xf32>, vector<48x8xf32>, vector<192x8xf32> -> vector<192x8xf32>
    %107 = arith.addf %105, %106 : vector<192x8xf32>
    %108 = vector.extract_strided_slice %107 {offsets = [0, 0], sizes = [48, 8], strides = [1, 1]} : vector<192x8xf32> to vector<48x8xf32>
    %109 = arith.negf %108 : vector<48x8xf32>
    %110 = math.exp %109 : vector<48x8xf32>
    %cst_32 = arith.constant 1.000000e+00 : f32
    %111 = vector.broadcast %cst_32 : f32 to vector<48x8xf32>
    %112 = arith.addf %111, %110 : vector<48x8xf32>
    %113 = arith.divf %111, %112 : vector<48x8xf32>
    %114 = vector.extract_strided_slice %107 {offsets = [48, 0], sizes = [48, 8], strides = [1, 1]} : vector<192x8xf32> to vector<48x8xf32>
    %115 = arith.negf %114 : vector<48x8xf32>
    %116 = math.exp %115 : vector<48x8xf32>
    %cst_33 = arith.constant 1.000000e+00 : f32
    %117 = vector.broadcast %cst_33 : f32 to vector<48x8xf32>
    %118 = arith.addf %117, %116 : vector<48x8xf32>
    %119 = arith.divf %117, %118 : vector<48x8xf32>
    %120 = vector.extract_strided_slice %107 {offsets = [96, 0], sizes = [48, 8], strides = [1, 1]} : vector<192x8xf32> to vector<48x8xf32>
    %121 = math.tanh %120 : vector<48x8xf32>
    %122 = vector.extract_strided_slice %107 {offsets = [144, 0], sizes = [48, 8], strides = [1, 1]} : vector<192x8xf32> to vector<48x8xf32>
    %123 = arith.negf %122 : vector<48x8xf32>
    %124 = math.exp %123 : vector<48x8xf32>
    %cst_34 = arith.constant 1.000000e+00 : f32
    %125 = vector.broadcast %cst_34 : f32 to vector<48x8xf32>
    %126 = arith.addf %125, %124 : vector<48x8xf32>
    %127 = arith.divf %125, %126 : vector<48x8xf32>
    %128 = arith.mulf %119, %98 : vector<48x8xf32>
    %129 = arith.mulf %113, %121 : vector<48x8xf32>
    %130 = arith.addf %128, %129 : vector<48x8xf32>
    %131 = math.tanh %130 : vector<48x8xf32>
    %132 = arith.mulf %127, %131 : vector<48x8xf32>
    %c4 = arith.constant 4 : index
    %c0_35 = arith.constant 0 : index
    %c0_36 = arith.constant 0 : index
    %133 = vector.load %arg1[%c4, %c0_35, %c0_36] : memref<8x2x8xf32, #tpu.memory_space<vmem>>, vector<1x2x8xf32>
    %134 = vector.shape_cast %133 : vector<1x2x8xf32> to vector<2x8xf32>
    %cst_37 = arith.constant dense<0.000000e+00> : vector<192x8xf32>
    %135 = tpu.matmul %0, %134, %cst_37 {dimension_numbers = #tpu.dot_dimension_numbers<[1], [0], [0], [1], [0, 0, 1, 1], [], []>} : vector<192x2xf32>, vector<2x8xf32>, vector<192x8xf32> -> vector<192x8xf32>
    %136 = vector.broadcast %1 : vector<192x1xf32> to vector<192x8xf32>
    %137 = arith.addf %135, %136 : vector<192x8xf32>
    %cst_38 = arith.constant dense<0.000000e+00> : vector<192x8xf32>
    %138 = tpu.matmul %2, %132, %cst_38 {dimension_numbers = #tpu.dot_dimension_numbers<[1], [0], [0], [1], [0, 0, 1, 1], [], []>} : vector<192x48xf32>, vector<48x8xf32>, vector<192x8xf32> -> vector<192x8xf32>
    %139 = arith.addf %137, %138 : vector<192x8xf32>
    %140 = vector.extract_strided_slice %139 {offsets = [0, 0], sizes = [48, 8], strides = [1, 1]} : vector<192x8xf32> to vector<48x8xf32>
    %141 = arith.negf %140 : vector<48x8xf32>
    %142 = math.exp %141 : vector<48x8xf32>
    %cst_39 = arith.constant 1.000000e+00 : f32
    %143 = vector.broadcast %cst_39 : f32 to vector<48x8xf32>
    %144 = arith.addf %143, %142 : vector<48x8xf32>
    %145 = arith.divf %143, %144 : vector<48x8xf32>
    %146 = vector.extract_strided_slice %139 {offsets = [48, 0], sizes = [48, 8], strides = [1, 1]} : vector<192x8xf32> to vector<48x8xf32>
    %147 = arith.negf %146 : vector<48x8xf32>
    %148 = math.exp %147 : vector<48x8xf32>
    %cst_40 = arith.constant 1.000000e+00 : f32
    %149 = vector.broadcast %cst_40 : f32 to vector<48x8xf32>
    %150 = arith.addf %149, %148 : vector<48x8xf32>
    %151 = arith.divf %149, %150 : vector<48x8xf32>
    %152 = vector.extract_strided_slice %139 {offsets = [96, 0], sizes = [48, 8], strides = [1, 1]} : vector<192x8xf32> to vector<48x8xf32>
    %153 = math.tanh %152 : vector<48x8xf32>
    %154 = vector.extract_strided_slice %139 {offsets = [144, 0], sizes = [48, 8], strides = [1, 1]} : vector<192x8xf32> to vector<48x8xf32>
    %155 = arith.negf %154 : vector<48x8xf32>
    %156 = math.exp %155 : vector<48x8xf32>
    %cst_41 = arith.constant 1.000000e+00 : f32
    %157 = vector.broadcast %cst_41 : f32 to vector<48x8xf32>
    %158 = arith.addf %157, %156 : vector<48x8xf32>
    %159 = arith.divf %157, %158 : vector<48x8xf32>
    %160 = arith.mulf %151, %130 : vector<48x8xf32>
    %161 = arith.mulf %145, %153 : vector<48x8xf32>
    %162 = arith.addf %160, %161 : vector<48x8xf32>
    %163 = math.tanh %162 : vector<48x8xf32>
    %164 = arith.mulf %159, %163 : vector<48x8xf32>
    %c5 = arith.constant 5 : index
    %c0_42 = arith.constant 0 : index
    %c0_43 = arith.constant 0 : index
    %165 = vector.load %arg1[%c5, %c0_42, %c0_43] : memref<8x2x8xf32, #tpu.memory_space<vmem>>, vector<1x2x8xf32>
    %166 = vector.shape_cast %165 : vector<1x2x8xf32> to vector<2x8xf32>
    %cst_44 = arith.constant dense<0.000000e+00> : vector<192x8xf32>
    %167 = tpu.matmul %0, %166, %cst_44 {dimension_numbers = #tpu.dot_dimension_numbers<[1], [0], [0], [1], [0, 0, 1, 1], [], []>} : vector<192x2xf32>, vector<2x8xf32>, vector<192x8xf32> -> vector<192x8xf32>
    %168 = vector.broadcast %1 : vector<192x1xf32> to vector<192x8xf32>
    %169 = arith.addf %167, %168 : vector<192x8xf32>
    %cst_45 = arith.constant dense<0.000000e+00> : vector<192x8xf32>
    %170 = tpu.matmul %2, %164, %cst_45 {dimension_numbers = #tpu.dot_dimension_numbers<[1], [0], [0], [1], [0, 0, 1, 1], [], []>} : vector<192x48xf32>, vector<48x8xf32>, vector<192x8xf32> -> vector<192x8xf32>
    %171 = arith.addf %169, %170 : vector<192x8xf32>
    %172 = vector.extract_strided_slice %171 {offsets = [0, 0], sizes = [48, 8], strides = [1, 1]} : vector<192x8xf32> to vector<48x8xf32>
    %173 = arith.negf %172 : vector<48x8xf32>
    %174 = math.exp %173 : vector<48x8xf32>
    %cst_46 = arith.constant 1.000000e+00 : f32
    %175 = vector.broadcast %cst_46 : f32 to vector<48x8xf32>
    %176 = arith.addf %175, %174 : vector<48x8xf32>
    %177 = arith.divf %175, %176 : vector<48x8xf32>
    %178 = vector.extract_strided_slice %171 {offsets = [48, 0], sizes = [48, 8], strides = [1, 1]} : vector<192x8xf32> to vector<48x8xf32>
    %179 = arith.negf %178 : vector<48x8xf32>
    %180 = math.exp %179 : vector<48x8xf32>
    %cst_47 = arith.constant 1.000000e+00 : f32
    %181 = vector.broadcast %cst_47 : f32 to vector<48x8xf32>
    %182 = arith.addf %181, %180 : vector<48x8xf32>
    %183 = arith.divf %181, %182 : vector<48x8xf32>
    %184 = vector.extract_strided_slice %171 {offsets = [96, 0], sizes = [48, 8], strides = [1, 1]} : vector<192x8xf32> to vector<48x8xf32>
    %185 = math.tanh %184 : vector<48x8xf32>
    %186 = vector.extract_strided_slice %171 {offsets = [144, 0], sizes = [48, 8], strides = [1, 1]} : vector<192x8xf32> to vector<48x8xf32>
    %187 = arith.negf %186 : vector<48x8xf32>
    %188 = math.exp %187 : vector<48x8xf32>
    %cst_48 = arith.constant 1.000000e+00 : f32
    %189 = vector.broadcast %cst_48 : f32 to vector<48x8xf32>
    %190 = arith.addf %189, %188 : vector<48x8xf32>
    %191 = arith.divf %189, %190 : vector<48x8xf32>
    %192 = arith.mulf %183, %162 : vector<48x8xf32>
    %193 = arith.mulf %177, %185 : vector<48x8xf32>
    %194 = arith.addf %192, %193 : vector<48x8xf32>
    %195 = math.tanh %194 : vector<48x8xf32>
    %196 = arith.mulf %191, %195 : vector<48x8xf32>
    %c6 = arith.constant 6 : index
    %c0_49 = arith.constant 0 : index
    %c0_50 = arith.constant 0 : index
    %197 = vector.load %arg1[%c6, %c0_49, %c0_50] : memref<8x2x8xf32, #tpu.memory_space<vmem>>, vector<1x2x8xf32>
    %198 = vector.shape_cast %197 : vector<1x2x8xf32> to vector<2x8xf32>
    %cst_51 = arith.constant dense<0.000000e+00> : vector<192x8xf32>
    %199 = tpu.matmul %0, %198, %cst_51 {dimension_numbers = #tpu.dot_dimension_numbers<[1], [0], [0], [1], [0, 0, 1, 1], [], []>} : vector<192x2xf32>, vector<2x8xf32>, vector<192x8xf32> -> vector<192x8xf32>
    %200 = vector.broadcast %1 : vector<192x1xf32> to vector<192x8xf32>
    %201 = arith.addf %199, %200 : vector<192x8xf32>
    %cst_52 = arith.constant dense<0.000000e+00> : vector<192x8xf32>
    %202 = tpu.matmul %2, %196, %cst_52 {dimension_numbers = #tpu.dot_dimension_numbers<[1], [0], [0], [1], [0, 0, 1, 1], [], []>} : vector<192x48xf32>, vector<48x8xf32>, vector<192x8xf32> -> vector<192x8xf32>
    %203 = arith.addf %201, %202 : vector<192x8xf32>
    %204 = vector.extract_strided_slice %203 {offsets = [0, 0], sizes = [48, 8], strides = [1, 1]} : vector<192x8xf32> to vector<48x8xf32>
    %205 = arith.negf %204 : vector<48x8xf32>
    %206 = math.exp %205 : vector<48x8xf32>
    %cst_53 = arith.constant 1.000000e+00 : f32
    %207 = vector.broadcast %cst_53 : f32 to vector<48x8xf32>
    %208 = arith.addf %207, %206 : vector<48x8xf32>
    %209 = arith.divf %207, %208 : vector<48x8xf32>
    %210 = vector.extract_strided_slice %203 {offsets = [48, 0], sizes = [48, 8], strides = [1, 1]} : vector<192x8xf32> to vector<48x8xf32>
    %211 = arith.negf %210 : vector<48x8xf32>
    %212 = math.exp %211 : vector<48x8xf32>
    %cst_54 = arith.constant 1.000000e+00 : f32
    %213 = vector.broadcast %cst_54 : f32 to vector<48x8xf32>
    %214 = arith.addf %213, %212 : vector<48x8xf32>
    %215 = arith.divf %213, %214 : vector<48x8xf32>
    %216 = vector.extract_strided_slice %203 {offsets = [96, 0], sizes = [48, 8], strides = [1, 1]} : vector<192x8xf32> to vector<48x8xf32>
    %217 = math.tanh %216 : vector<48x8xf32>
    %218 = vector.extract_strided_slice %203 {offsets = [144, 0], sizes = [48, 8], strides = [1, 1]} : vector<192x8xf32> to vector<48x8xf32>
    %219 = arith.negf %218 : vector<48x8xf32>
    %220 = math.exp %219 : vector<48x8xf32>
    %cst_55 = arith.constant 1.000000e+00 : f32
    %221 = vector.broadcast %cst_55 : f32 to vector<48x8xf32>
    %222 = arith.addf %221, %220 : vector<48x8xf32>
    %223 = arith.divf %221, %222 : vector<48x8xf32>
    %224 = arith.mulf %215, %194 : vector<48x8xf32>
    %225 = arith.mulf %209, %217 : vector<48x8xf32>
    %226 = arith.addf %224, %225 : vector<48x8xf32>
    %227 = math.tanh %226 : vector<48x8xf32>
    %228 = arith.mulf %223, %227 : vector<48x8xf32>
    %c7 = arith.constant 7 : index
    %c0_56 = arith.constant 0 : index
    %c0_57 = arith.constant 0 : index
    %229 = vector.load %arg1[%c7, %c0_56, %c0_57] : memref<8x2x8xf32, #tpu.memory_space<vmem>>, vector<1x2x8xf32>
    %230 = vector.shape_cast %229 : vector<1x2x8xf32> to vector<2x8xf32>
    %cst_58 = arith.constant dense<0.000000e+00> : vector<192x8xf32>
    %231 = tpu.matmul %0, %230, %cst_58 {dimension_numbers = #tpu.dot_dimension_numbers<[1], [0], [0], [1], [0, 0, 1, 1], [], []>} : vector<192x2xf32>, vector<2x8xf32>, vector<192x8xf32> -> vector<192x8xf32>
    %232 = vector.broadcast %1 : vector<192x1xf32> to vector<192x8xf32>
    %233 = arith.addf %231, %232 : vector<192x8xf32>
    %cst_59 = arith.constant dense<0.000000e+00> : vector<192x8xf32>
    %234 = tpu.matmul %2, %228, %cst_59 {dimension_numbers = #tpu.dot_dimension_numbers<[1], [0], [0], [1], [0, 0, 1, 1], [], []>} : vector<192x48xf32>, vector<48x8xf32>, vector<192x8xf32> -> vector<192x8xf32>
    %235 = arith.addf %233, %234 : vector<192x8xf32>
    %236 = vector.extract_strided_slice %235 {offsets = [0, 0], sizes = [48, 8], strides = [1, 1]} : vector<192x8xf32> to vector<48x8xf32>
    %237 = arith.negf %236 : vector<48x8xf32>
    %238 = math.exp %237 : vector<48x8xf32>
    %cst_60 = arith.constant 1.000000e+00 : f32
    %239 = vector.broadcast %cst_60 : f32 to vector<48x8xf32>
    %240 = arith.addf %239, %238 : vector<48x8xf32>
    %241 = arith.divf %239, %240 : vector<48x8xf32>
    %242 = vector.extract_strided_slice %235 {offsets = [48, 0], sizes = [48, 8], strides = [1, 1]} : vector<192x8xf32> to vector<48x8xf32>
    %243 = arith.negf %242 : vector<48x8xf32>
    %244 = math.exp %243 : vector<48x8xf32>
    %cst_61 = arith.constant 1.000000e+00 : f32
    %245 = vector.broadcast %cst_61 : f32 to vector<48x8xf32>
    %246 = arith.addf %245, %244 : vector<48x8xf32>
    %247 = arith.divf %245, %246 : vector<48x8xf32>
    %248 = vector.extract_strided_slice %235 {offsets = [96, 0], sizes = [48, 8], strides = [1, 1]} : vector<192x8xf32> to vector<48x8xf32>
    %249 = math.tanh %248 : vector<48x8xf32>
    %250 = vector.extract_strided_slice %235 {offsets = [144, 0], sizes = [48, 8], strides = [1, 1]} : vector<192x8xf32> to vector<48x8xf32>
    %251 = arith.negf %250 : vector<48x8xf32>
    %252 = math.exp %251 : vector<48x8xf32>
    %cst_62 = arith.constant 1.000000e+00 : f32
    %253 = vector.broadcast %cst_62 : f32 to vector<48x8xf32>
    %254 = arith.addf %253, %252 : vector<48x8xf32>
    %255 = arith.divf %253, %254 : vector<48x8xf32>
    %256 = arith.mulf %247, %226 : vector<48x8xf32>
    %257 = arith.mulf %241, %249 : vector<48x8xf32>
    %258 = arith.addf %256, %257 : vector<48x8xf32>
    %259 = math.tanh %258 : vector<48x8xf32>
    %260 = arith.mulf %255, %259 : vector<48x8xf32>
    %c0_63 = arith.constant 0 : index
    %c0_64 = arith.constant 0 : index
    %c0_65 = arith.constant 0 : index
    %261 = vector.load %arg2[%c0_63, %c0_64, %c0_65] : memref<8x2x8xf32, #tpu.memory_space<vmem>>, vector<1x2x8xf32>
    %262 = vector.shape_cast %261 : vector<1x2x8xf32> to vector<2x8xf32>
    %cst_66 = arith.constant dense<0.000000e+00> : vector<192x8xf32>
    %263 = tpu.matmul %0, %262, %cst_66 {dimension_numbers = #tpu.dot_dimension_numbers<[1], [0], [0], [1], [0, 0, 1, 1], [], []>} : vector<192x2xf32>, vector<2x8xf32>, vector<192x8xf32> -> vector<192x8xf32>
    %264 = vector.broadcast %1 : vector<192x1xf32> to vector<192x8xf32>
    %265 = arith.addf %263, %264 : vector<192x8xf32>
    %cst_67 = arith.constant dense<0.000000e+00> : vector<192x8xf32>
    %266 = tpu.matmul %2, %260, %cst_67 {dimension_numbers = #tpu.dot_dimension_numbers<[1], [0], [0], [1], [0, 0, 1, 1], [], []>} : vector<192x48xf32>, vector<48x8xf32>, vector<192x8xf32> -> vector<192x8xf32>
    %267 = arith.addf %265, %266 : vector<192x8xf32>
    %268 = vector.extract_strided_slice %267 {offsets = [0, 0], sizes = [48, 8], strides = [1, 1]} : vector<192x8xf32> to vector<48x8xf32>
    %269 = arith.negf %268 : vector<48x8xf32>
    %270 = math.exp %269 : vector<48x8xf32>
    %cst_68 = arith.constant 1.000000e+00 : f32
    %271 = vector.broadcast %cst_68 : f32 to vector<48x8xf32>
    %272 = arith.addf %271, %270 : vector<48x8xf32>
    %273 = arith.divf %271, %272 : vector<48x8xf32>
    %274 = vector.extract_strided_slice %267 {offsets = [48, 0], sizes = [48, 8], strides = [1, 1]} : vector<192x8xf32> to vector<48x8xf32>
    %275 = arith.negf %274 : vector<48x8xf32>
    %276 = math.exp %275 : vector<48x8xf32>
    %cst_69 = arith.constant 1.000000e+00 : f32
    %277 = vector.broadcast %cst_69 : f32 to vector<48x8xf32>
    %278 = arith.addf %277, %276 : vector<48x8xf32>
    %279 = arith.divf %277, %278 : vector<48x8xf32>
    %280 = vector.extract_strided_slice %267 {offsets = [96, 0], sizes = [48, 8], strides = [1, 1]} : vector<192x8xf32> to vector<48x8xf32>
    %281 = math.tanh %280 : vector<48x8xf32>
    %282 = vector.extract_strided_slice %267 {offsets = [144, 0], sizes = [48, 8], strides = [1, 1]} : vector<192x8xf32> to vector<48x8xf32>
    %283 = arith.negf %282 : vector<48x8xf32>
    %284 = math.exp %283 : vector<48x8xf32>
    %cst_70 = arith.constant 1.000000e+00 : f32
    %285 = vector.broadcast %cst_70 : f32 to vector<48x8xf32>
    %286 = arith.addf %285, %284 : vector<48x8xf32>
    %287 = arith.divf %285, %286 : vector<48x8xf32>
    %288 = arith.mulf %279, %258 : vector<48x8xf32>
    %289 = arith.mulf %273, %281 : vector<48x8xf32>
    %290 = arith.addf %288, %289 : vector<48x8xf32>
    %291 = math.tanh %290 : vector<48x8xf32>
    %292 = arith.mulf %287, %291 : vector<48x8xf32>
    %c1_71 = arith.constant 1 : index
    %c0_72 = arith.constant 0 : index
    %c0_73 = arith.constant 0 : index
    %293 = vector.load %arg2[%c1_71, %c0_72, %c0_73] : memref<8x2x8xf32, #tpu.memory_space<vmem>>, vector<1x2x8xf32>
    %294 = vector.shape_cast %293 : vector<1x2x8xf32> to vector<2x8xf32>
    %cst_74 = arith.constant dense<0.000000e+00> : vector<192x8xf32>
    %295 = tpu.matmul %0, %294, %cst_74 {dimension_numbers = #tpu.dot_dimension_numbers<[1], [0], [0], [1], [0, 0, 1, 1], [], []>} : vector<192x2xf32>, vector<2x8xf32>, vector<192x8xf32> -> vector<192x8xf32>
    %296 = vector.broadcast %1 : vector<192x1xf32> to vector<192x8xf32>
    %297 = arith.addf %295, %296 : vector<192x8xf32>
    %cst_75 = arith.constant dense<0.000000e+00> : vector<192x8xf32>
    %298 = tpu.matmul %2, %292, %cst_75 {dimension_numbers = #tpu.dot_dimension_numbers<[1], [0], [0], [1], [0, 0, 1, 1], [], []>} : vector<192x48xf32>, vector<48x8xf32>, vector<192x8xf32> -> vector<192x8xf32>
    %299 = arith.addf %297, %298 : vector<192x8xf32>
    %300 = vector.extract_strided_slice %299 {offsets = [0, 0], sizes = [48, 8], strides = [1, 1]} : vector<192x8xf32> to vector<48x8xf32>
    %301 = arith.negf %300 : vector<48x8xf32>
    %302 = math.exp %301 : vector<48x8xf32>
    %cst_76 = arith.constant 1.000000e+00 : f32
    %303 = vector.broadcast %cst_76 : f32 to vector<48x8xf32>
    %304 = arith.addf %303, %302 : vector<48x8xf32>
    %305 = arith.divf %303, %304 : vector<48x8xf32>
    %306 = vector.extract_strided_slice %299 {offsets = [48, 0], sizes = [48, 8], strides = [1, 1]} : vector<192x8xf32> to vector<48x8xf32>
    %307 = arith.negf %306 : vector<48x8xf32>
    %308 = math.exp %307 : vector<48x8xf32>
    %cst_77 = arith.constant 1.000000e+00 : f32
    %309 = vector.broadcast %cst_77 : f32 to vector<48x8xf32>
    %310 = arith.addf %309, %308 : vector<48x8xf32>
    %311 = arith.divf %309, %310 : vector<48x8xf32>
    %312 = vector.extract_strided_slice %299 {offsets = [96, 0], sizes = [48, 8], strides = [1, 1]} : vector<192x8xf32> to vector<48x8xf32>
    %313 = math.tanh %312 : vector<48x8xf32>
    %314 = vector.extract_strided_slice %299 {offsets = [144, 0], sizes = [48, 8], strides = [1, 1]} : vector<192x8xf32> to vector<48x8xf32>
    %315 = arith.negf %314 : vector<48x8xf32>
    %316 = math.exp %315 : vector<48x8xf32>
    %cst_78 = arith.constant 1.000000e+00 : f32
    %317 = vector.broadcast %cst_78 : f32 to vector<48x8xf32>
    %318 = arith.addf %317, %316 : vector<48x8xf32>
    %319 = arith.divf %317, %318 : vector<48x8xf32>
    %320 = arith.mulf %311, %290 : vector<48x8xf32>
    %321 = arith.mulf %305, %313 : vector<48x8xf32>
    %322 = arith.addf %320, %321 : vector<48x8xf32>
    %323 = math.tanh %322 : vector<48x8xf32>
    %324 = arith.mulf %319, %323 : vector<48x8xf32>
    %c2_79 = arith.constant 2 : index
    %c0_80 = arith.constant 0 : index
    %c0_81 = arith.constant 0 : index
    %325 = vector.load %arg2[%c2_79, %c0_80, %c0_81] : memref<8x2x8xf32, #tpu.memory_space<vmem>>, vector<1x2x8xf32>
    %326 = vector.shape_cast %325 : vector<1x2x8xf32> to vector<2x8xf32>
    %cst_82 = arith.constant dense<0.000000e+00> : vector<192x8xf32>
    %327 = tpu.matmul %0, %326, %cst_82 {dimension_numbers = #tpu.dot_dimension_numbers<[1], [0], [0], [1], [0, 0, 1, 1], [], []>} : vector<192x2xf32>, vector<2x8xf32>, vector<192x8xf32> -> vector<192x8xf32>
    %328 = vector.broadcast %1 : vector<192x1xf32> to vector<192x8xf32>
    %329 = arith.addf %327, %328 : vector<192x8xf32>
    %cst_83 = arith.constant dense<0.000000e+00> : vector<192x8xf32>
    %330 = tpu.matmul %2, %324, %cst_83 {dimension_numbers = #tpu.dot_dimension_numbers<[1], [0], [0], [1], [0, 0, 1, 1], [], []>} : vector<192x48xf32>, vector<48x8xf32>, vector<192x8xf32> -> vector<192x8xf32>
    %331 = arith.addf %329, %330 : vector<192x8xf32>
    %332 = vector.extract_strided_slice %331 {offsets = [0, 0], sizes = [48, 8], strides = [1, 1]} : vector<192x8xf32> to vector<48x8xf32>
    %333 = arith.negf %332 : vector<48x8xf32>
    %334 = math.exp %333 : vector<48x8xf32>
    %cst_84 = arith.constant 1.000000e+00 : f32
    %335 = vector.broadcast %cst_84 : f32 to vector<48x8xf32>
    %336 = arith.addf %335, %334 : vector<48x8xf32>
    %337 = arith.divf %335, %336 : vector<48x8xf32>
    %338 = vector.extract_strided_slice %331 {offsets = [48, 0], sizes = [48, 8], strides = [1, 1]} : vector<192x8xf32> to vector<48x8xf32>
    %339 = arith.negf %338 : vector<48x8xf32>
    %340 = math.exp %339 : vector<48x8xf32>
    %cst_85 = arith.constant 1.000000e+00 : f32
    %341 = vector.broadcast %cst_85 : f32 to vector<48x8xf32>
    %342 = arith.addf %341, %340 : vector<48x8xf32>
    %343 = arith.divf %341, %342 : vector<48x8xf32>
    %344 = vector.extract_strided_slice %331 {offsets = [96, 0], sizes = [48, 8], strides = [1, 1]} : vector<192x8xf32> to vector<48x8xf32>
    %345 = math.tanh %344 : vector<48x8xf32>
    %346 = vector.extract_strided_slice %331 {offsets = [144, 0], sizes = [48, 8], strides = [1, 1]} : vector<192x8xf32> to vector<48x8xf32>
    %347 = arith.negf %346 : vector<48x8xf32>
    %348 = math.exp %347 : vector<48x8xf32>
    %cst_86 = arith.constant 1.000000e+00 : f32
    %349 = vector.broadcast %cst_86 : f32 to vector<48x8xf32>
    %350 = arith.addf %349, %348 : vector<48x8xf32>
    %351 = arith.divf %349, %350 : vector<48x8xf32>
    %352 = arith.mulf %343, %322 : vector<48x8xf32>
    %353 = arith.mulf %337, %345 : vector<48x8xf32>
    %354 = arith.addf %352, %353 : vector<48x8xf32>
    %355 = math.tanh %354 : vector<48x8xf32>
    %356 = arith.mulf %351, %355 : vector<48x8xf32>
    %c3_87 = arith.constant 3 : index
    %c0_88 = arith.constant 0 : index
    %c0_89 = arith.constant 0 : index
    %357 = vector.load %arg2[%c3_87, %c0_88, %c0_89] : memref<8x2x8xf32, #tpu.memory_space<vmem>>, vector<1x2x8xf32>
    %358 = vector.shape_cast %357 : vector<1x2x8xf32> to vector<2x8xf32>
    %cst_90 = arith.constant dense<0.000000e+00> : vector<192x8xf32>
    %359 = tpu.matmul %0, %358, %cst_90 {dimension_numbers = #tpu.dot_dimension_numbers<[1], [0], [0], [1], [0, 0, 1, 1], [], []>} : vector<192x2xf32>, vector<2x8xf32>, vector<192x8xf32> -> vector<192x8xf32>
    %360 = vector.broadcast %1 : vector<192x1xf32> to vector<192x8xf32>
    %361 = arith.addf %359, %360 : vector<192x8xf32>
    %cst_91 = arith.constant dense<0.000000e+00> : vector<192x8xf32>
    %362 = tpu.matmul %2, %356, %cst_91 {dimension_numbers = #tpu.dot_dimension_numbers<[1], [0], [0], [1], [0, 0, 1, 1], [], []>} : vector<192x48xf32>, vector<48x8xf32>, vector<192x8xf32> -> vector<192x8xf32>
    %363 = arith.addf %361, %362 : vector<192x8xf32>
    %364 = vector.extract_strided_slice %363 {offsets = [0, 0], sizes = [48, 8], strides = [1, 1]} : vector<192x8xf32> to vector<48x8xf32>
    %365 = arith.negf %364 : vector<48x8xf32>
    %366 = math.exp %365 : vector<48x8xf32>
    %cst_92 = arith.constant 1.000000e+00 : f32
    %367 = vector.broadcast %cst_92 : f32 to vector<48x8xf32>
    %368 = arith.addf %367, %366 : vector<48x8xf32>
    %369 = arith.divf %367, %368 : vector<48x8xf32>
    %370 = vector.extract_strided_slice %363 {offsets = [48, 0], sizes = [48, 8], strides = [1, 1]} : vector<192x8xf32> to vector<48x8xf32>
    %371 = arith.negf %370 : vector<48x8xf32>
    %372 = math.exp %371 : vector<48x8xf32>
    %cst_93 = arith.constant 1.000000e+00 : f32
    %373 = vector.broadcast %cst_93 : f32 to vector<48x8xf32>
    %374 = arith.addf %373, %372 : vector<48x8xf32>
    %375 = arith.divf %373, %374 : vector<48x8xf32>
    %376 = vector.extract_strided_slice %363 {offsets = [96, 0], sizes = [48, 8], strides = [1, 1]} : vector<192x8xf32> to vector<48x8xf32>
    %377 = math.tanh %376 : vector<48x8xf32>
    %378 = vector.extract_strided_slice %363 {offsets = [144, 0], sizes = [48, 8], strides = [1, 1]} : vector<192x8xf32> to vector<48x8xf32>
    %379 = arith.negf %378 : vector<48x8xf32>
    %380 = math.exp %379 : vector<48x8xf32>
    %cst_94 = arith.constant 1.000000e+00 : f32
    %381 = vector.broadcast %cst_94 : f32 to vector<48x8xf32>
    %382 = arith.addf %381, %380 : vector<48x8xf32>
    %383 = arith.divf %381, %382 : vector<48x8xf32>
    %384 = arith.mulf %375, %354 : vector<48x8xf32>
    %385 = arith.mulf %369, %377 : vector<48x8xf32>
    %386 = arith.addf %384, %385 : vector<48x8xf32>
    %387 = math.tanh %386 : vector<48x8xf32>
    %388 = arith.mulf %383, %387 : vector<48x8xf32>
    %c4_95 = arith.constant 4 : index
    %c0_96 = arith.constant 0 : index
    %c0_97 = arith.constant 0 : index
    %389 = vector.load %arg2[%c4_95, %c0_96, %c0_97] : memref<8x2x8xf32, #tpu.memory_space<vmem>>, vector<1x2x8xf32>
    %390 = vector.shape_cast %389 : vector<1x2x8xf32> to vector<2x8xf32>
    %cst_98 = arith.constant dense<0.000000e+00> : vector<192x8xf32>
    %391 = tpu.matmul %0, %390, %cst_98 {dimension_numbers = #tpu.dot_dimension_numbers<[1], [0], [0], [1], [0, 0, 1, 1], [], []>} : vector<192x2xf32>, vector<2x8xf32>, vector<192x8xf32> -> vector<192x8xf32>
    %392 = vector.broadcast %1 : vector<192x1xf32> to vector<192x8xf32>
    %393 = arith.addf %391, %392 : vector<192x8xf32>
    %cst_99 = arith.constant dense<0.000000e+00> : vector<192x8xf32>
    %394 = tpu.matmul %2, %388, %cst_99 {dimension_numbers = #tpu.dot_dimension_numbers<[1], [0], [0], [1], [0, 0, 1, 1], [], []>} : vector<192x48xf32>, vector<48x8xf32>, vector<192x8xf32> -> vector<192x8xf32>
    %395 = arith.addf %393, %394 : vector<192x8xf32>
    %396 = vector.extract_strided_slice %395 {offsets = [0, 0], sizes = [48, 8], strides = [1, 1]} : vector<192x8xf32> to vector<48x8xf32>
    %397 = arith.negf %396 : vector<48x8xf32>
    %398 = math.exp %397 : vector<48x8xf32>
    %cst_100 = arith.constant 1.000000e+00 : f32
    %399 = vector.broadcast %cst_100 : f32 to vector<48x8xf32>
    %400 = arith.addf %399, %398 : vector<48x8xf32>
    %401 = arith.divf %399, %400 : vector<48x8xf32>
    %402 = vector.extract_strided_slice %395 {offsets = [48, 0], sizes = [48, 8], strides = [1, 1]} : vector<192x8xf32> to vector<48x8xf32>
    %403 = arith.negf %402 : vector<48x8xf32>
    %404 = math.exp %403 : vector<48x8xf32>
    %cst_101 = arith.constant 1.000000e+00 : f32
    %405 = vector.broadcast %cst_101 : f32 to vector<48x8xf32>
    %406 = arith.addf %405, %404 : vector<48x8xf32>
    %407 = arith.divf %405, %406 : vector<48x8xf32>
    %408 = vector.extract_strided_slice %395 {offsets = [96, 0], sizes = [48, 8], strides = [1, 1]} : vector<192x8xf32> to vector<48x8xf32>
    %409 = math.tanh %408 : vector<48x8xf32>
    %410 = vector.extract_strided_slice %395 {offsets = [144, 0], sizes = [48, 8], strides = [1, 1]} : vector<192x8xf32> to vector<48x8xf32>
    %411 = arith.negf %410 : vector<48x8xf32>
    %412 = math.exp %411 : vector<48x8xf32>
    %cst_102 = arith.constant 1.000000e+00 : f32
    %413 = vector.broadcast %cst_102 : f32 to vector<48x8xf32>
    %414 = arith.addf %413, %412 : vector<48x8xf32>
    %415 = arith.divf %413, %414 : vector<48x8xf32>
    %416 = arith.mulf %407, %386 : vector<48x8xf32>
    %417 = arith.mulf %401, %409 : vector<48x8xf32>
    %418 = arith.addf %416, %417 : vector<48x8xf32>
    %419 = math.tanh %418 : vector<48x8xf32>
    %420 = arith.mulf %415, %419 : vector<48x8xf32>
    %c5_103 = arith.constant 5 : index
    %c0_104 = arith.constant 0 : index
    %c0_105 = arith.constant 0 : index
    %421 = vector.load %arg2[%c5_103, %c0_104, %c0_105] : memref<8x2x8xf32, #tpu.memory_space<vmem>>, vector<1x2x8xf32>
    %422 = vector.shape_cast %421 : vector<1x2x8xf32> to vector<2x8xf32>
    %cst_106 = arith.constant dense<0.000000e+00> : vector<192x8xf32>
    %423 = tpu.matmul %0, %422, %cst_106 {dimension_numbers = #tpu.dot_dimension_numbers<[1], [0], [0], [1], [0, 0, 1, 1], [], []>} : vector<192x2xf32>, vector<2x8xf32>, vector<192x8xf32> -> vector<192x8xf32>
    %424 = vector.broadcast %1 : vector<192x1xf32> to vector<192x8xf32>
    %425 = arith.addf %423, %424 : vector<192x8xf32>
    %cst_107 = arith.constant dense<0.000000e+00> : vector<192x8xf32>
    %426 = tpu.matmul %2, %420, %cst_107 {dimension_numbers = #tpu.dot_dimension_numbers<[1], [0], [0], [1], [0, 0, 1, 1], [], []>} : vector<192x48xf32>, vector<48x8xf32>, vector<192x8xf32> -> vector<192x8xf32>
    %427 = arith.addf %425, %426 : vector<192x8xf32>
    %428 = vector.extract_strided_slice %427 {offsets = [0, 0], sizes = [48, 8], strides = [1, 1]} : vector<192x8xf32> to vector<48x8xf32>
    %429 = arith.negf %428 : vector<48x8xf32>
    %430 = math.exp %429 : vector<48x8xf32>
    %cst_108 = arith.constant 1.000000e+00 : f32
    %431 = vector.broadcast %cst_108 : f32 to vector<48x8xf32>
    %432 = arith.addf %431, %430 : vector<48x8xf32>
    %433 = arith.divf %431, %432 : vector<48x8xf32>
    %434 = vector.extract_strided_slice %427 {offsets = [48, 0], sizes = [48, 8], strides = [1, 1]} : vector<192x8xf32> to vector<48x8xf32>
    %435 = arith.negf %434 : vector<48x8xf32>
    %436 = math.exp %435 : vector<48x8xf32>
    %cst_109 = arith.constant 1.000000e+00 : f32
    %437 = vector.broadcast %cst_109 : f32 to vector<48x8xf32>
    %438 = arith.addf %437, %436 : vector<48x8xf32>
    %439 = arith.divf %437, %438 : vector<48x8xf32>
    %440 = vector.extract_strided_slice %427 {offsets = [96, 0], sizes = [48, 8], strides = [1, 1]} : vector<192x8xf32> to vector<48x8xf32>
    %441 = math.tanh %440 : vector<48x8xf32>
    %442 = vector.extract_strided_slice %427 {offsets = [144, 0], sizes = [48, 8], strides = [1, 1]} : vector<192x8xf32> to vector<48x8xf32>
    %443 = arith.negf %442 : vector<48x8xf32>
    %444 = math.exp %443 : vector<48x8xf32>
    %cst_110 = arith.constant 1.000000e+00 : f32
    %445 = vector.broadcast %cst_110 : f32 to vector<48x8xf32>
    %446 = arith.addf %445, %444 : vector<48x8xf32>
    %447 = arith.divf %445, %446 : vector<48x8xf32>
    %448 = arith.mulf %439, %418 : vector<48x8xf32>
    %449 = arith.mulf %433, %441 : vector<48x8xf32>
    %450 = arith.addf %448, %449 : vector<48x8xf32>
    %451 = math.tanh %450 : vector<48x8xf32>
    %452 = arith.mulf %447, %451 : vector<48x8xf32>
    %c6_111 = arith.constant 6 : index
    %c0_112 = arith.constant 0 : index
    %c0_113 = arith.constant 0 : index
    %453 = vector.load %arg2[%c6_111, %c0_112, %c0_113] : memref<8x2x8xf32, #tpu.memory_space<vmem>>, vector<1x2x8xf32>
    %454 = vector.shape_cast %453 : vector<1x2x8xf32> to vector<2x8xf32>
    %cst_114 = arith.constant dense<0.000000e+00> : vector<192x8xf32>
    %455 = tpu.matmul %0, %454, %cst_114 {dimension_numbers = #tpu.dot_dimension_numbers<[1], [0], [0], [1], [0, 0, 1, 1], [], []>} : vector<192x2xf32>, vector<2x8xf32>, vector<192x8xf32> -> vector<192x8xf32>
    %456 = vector.broadcast %1 : vector<192x1xf32> to vector<192x8xf32>
    %457 = arith.addf %455, %456 : vector<192x8xf32>
    %cst_115 = arith.constant dense<0.000000e+00> : vector<192x8xf32>
    %458 = tpu.matmul %2, %452, %cst_115 {dimension_numbers = #tpu.dot_dimension_numbers<[1], [0], [0], [1], [0, 0, 1, 1], [], []>} : vector<192x48xf32>, vector<48x8xf32>, vector<192x8xf32> -> vector<192x8xf32>
    %459 = arith.addf %457, %458 : vector<192x8xf32>
    %460 = vector.extract_strided_slice %459 {offsets = [0, 0], sizes = [48, 8], strides = [1, 1]} : vector<192x8xf32> to vector<48x8xf32>
    %461 = arith.negf %460 : vector<48x8xf32>
    %462 = math.exp %461 : vector<48x8xf32>
    %cst_116 = arith.constant 1.000000e+00 : f32
    %463 = vector.broadcast %cst_116 : f32 to vector<48x8xf32>
    %464 = arith.addf %463, %462 : vector<48x8xf32>
    %465 = arith.divf %463, %464 : vector<48x8xf32>
    %466 = vector.extract_strided_slice %459 {offsets = [48, 0], sizes = [48, 8], strides = [1, 1]} : vector<192x8xf32> to vector<48x8xf32>
    %467 = arith.negf %466 : vector<48x8xf32>
    %468 = math.exp %467 : vector<48x8xf32>
    %cst_117 = arith.constant 1.000000e+00 : f32
    %469 = vector.broadcast %cst_117 : f32 to vector<48x8xf32>
    %470 = arith.addf %469, %468 : vector<48x8xf32>
    %471 = arith.divf %469, %470 : vector<48x8xf32>
    %472 = vector.extract_strided_slice %459 {offsets = [96, 0], sizes = [48, 8], strides = [1, 1]} : vector<192x8xf32> to vector<48x8xf32>
    %473 = math.tanh %472 : vector<48x8xf32>
    %474 = vector.extract_strided_slice %459 {offsets = [144, 0], sizes = [48, 8], strides = [1, 1]} : vector<192x8xf32> to vector<48x8xf32>
    %475 = arith.negf %474 : vector<48x8xf32>
    %476 = math.exp %475 : vector<48x8xf32>
    %cst_118 = arith.constant 1.000000e+00 : f32
    %477 = vector.broadcast %cst_118 : f32 to vector<48x8xf32>
    %478 = arith.addf %477, %476 : vector<48x8xf32>
    %479 = arith.divf %477, %478 : vector<48x8xf32>
    %480 = arith.mulf %471, %450 : vector<48x8xf32>
    %481 = arith.mulf %465, %473 : vector<48x8xf32>
    %482 = arith.addf %480, %481 : vector<48x8xf32>
    %483 = math.tanh %482 : vector<48x8xf32>
    %484 = arith.mulf %479, %483 : vector<48x8xf32>
    %c7_119 = arith.constant 7 : index
    %c0_120 = arith.constant 0 : index
    %c0_121 = arith.constant 0 : index
    %485 = vector.load %arg2[%c7_119, %c0_120, %c0_121] : memref<8x2x8xf32, #tpu.memory_space<vmem>>, vector<1x2x8xf32>
    %486 = vector.shape_cast %485 : vector<1x2x8xf32> to vector<2x8xf32>
    %cst_122 = arith.constant dense<0.000000e+00> : vector<192x8xf32>
    %487 = tpu.matmul %0, %486, %cst_122 {dimension_numbers = #tpu.dot_dimension_numbers<[1], [0], [0], [1], [0, 0, 1, 1], [], []>} : vector<192x2xf32>, vector<2x8xf32>, vector<192x8xf32> -> vector<192x8xf32>
    %488 = vector.broadcast %1 : vector<192x1xf32> to vector<192x8xf32>
    %489 = arith.addf %487, %488 : vector<192x8xf32>
    %cst_123 = arith.constant dense<0.000000e+00> : vector<192x8xf32>
    %490 = tpu.matmul %2, %484, %cst_123 {dimension_numbers = #tpu.dot_dimension_numbers<[1], [0], [0], [1], [0, 0, 1, 1], [], []>} : vector<192x48xf32>, vector<48x8xf32>, vector<192x8xf32> -> vector<192x8xf32>
    %491 = arith.addf %489, %490 : vector<192x8xf32>
    %492 = vector.extract_strided_slice %491 {offsets = [0, 0], sizes = [48, 8], strides = [1, 1]} : vector<192x8xf32> to vector<48x8xf32>
    %493 = arith.negf %492 : vector<48x8xf32>
    %494 = math.exp %493 : vector<48x8xf32>
    %cst_124 = arith.constant 1.000000e+00 : f32
    %495 = vector.broadcast %cst_124 : f32 to vector<48x8xf32>
    %496 = arith.addf %495, %494 : vector<48x8xf32>
    %497 = arith.divf %495, %496 : vector<48x8xf32>
    %498 = vector.extract_strided_slice %491 {offsets = [48, 0], sizes = [48, 8], strides = [1, 1]} : vector<192x8xf32> to vector<48x8xf32>
    %499 = arith.negf %498 : vector<48x8xf32>
    %500 = math.exp %499 : vector<48x8xf32>
    %cst_125 = arith.constant 1.000000e+00 : f32
    %501 = vector.broadcast %cst_125 : f32 to vector<48x8xf32>
    %502 = arith.addf %501, %500 : vector<48x8xf32>
    %503 = arith.divf %501, %502 : vector<48x8xf32>
    %504 = vector.extract_strided_slice %491 {offsets = [96, 0], sizes = [48, 8], strides = [1, 1]} : vector<192x8xf32> to vector<48x8xf32>
    %505 = math.tanh %504 : vector<48x8xf32>
    %506 = vector.extract_strided_slice %491 {offsets = [144, 0], sizes = [48, 8], strides = [1, 1]} : vector<192x8xf32> to vector<48x8xf32>
    %507 = arith.negf %506 : vector<48x8xf32>
    %508 = math.exp %507 : vector<48x8xf32>
    %cst_126 = arith.constant 1.000000e+00 : f32
    %509 = vector.broadcast %cst_126 : f32 to vector<48x8xf32>
    %510 = arith.addf %509, %508 : vector<48x8xf32>
    %511 = arith.divf %509, %510 : vector<48x8xf32>
    %512 = arith.mulf %503, %482 : vector<48x8xf32>
    %513 = arith.mulf %497, %505 : vector<48x8xf32>
    %514 = arith.addf %512, %513 : vector<48x8xf32>
    %515 = math.tanh %514 : vector<48x8xf32>
    %516 = arith.mulf %511, %515 : vector<48x8xf32>
    %c0_127 = arith.constant 0 : index
    %c0_128 = arith.constant 0 : index
    %517 = vector.load %arg6[%c0_127, %c0_128] : memref<64x48xf32, #tpu.memory_space<vmem>>, vector<64x48xf32>
    %cst_129 = arith.constant dense<0.000000e+00> : vector<64x8xf32>
    %518 = tpu.matmul %517, %516, %cst_129 {dimension_numbers = #tpu.dot_dimension_numbers<[1], [0], [0], [1], [0, 0, 1, 1], [], []>} : vector<64x48xf32>, vector<48x8xf32>, vector<64x8xf32> -> vector<64x8xf32>
    %c0_130 = arith.constant 0 : index
    %c0_131 = arith.constant 0 : index
    %519 = vector.load %arg7[%c0_130, %c0_131] : memref<64x1xf32, #tpu.memory_space<vmem>>, vector<64x1xf32>
    %520 = vector.broadcast %519 : vector<64x1xf32> to vector<64x8xf32>
    %521 = arith.addf %518, %520 : vector<64x8xf32>
    %cst_132 = arith.constant 0.000000e+00 : f32
    %522 = vector.broadcast %cst_132 : f32 to vector<64x8xf32>
    %523 = arith.maximumf %521, %522 : vector<64x8xf32>
    %c0_133 = arith.constant 0 : index
    %c0_134 = arith.constant 0 : index
    %524 = vector.load %arg8[%c0_133, %c0_134] : memref<64x1xf32, #tpu.memory_space<vmem>>, vector<64x1xf32>
    %525 = vector.broadcast %524 : vector<64x1xf32> to vector<64x8xf32>
    %526 = arith.mulf %523, %525 : vector<64x8xf32>
    %cst_135 = arith.constant dense<0.000000e+00> : vector<8xf32>
    %527 = vector.multi_reduction <add>, %526, %cst_135 [0] : vector<64x8xf32> to vector<8xf32>
    %528 = vector.shape_cast %527 : vector<8xf32> to vector<1x8xf32>
    %c0_136 = arith.constant 0 : index
    %c0_137 = arith.constant 0 : index
    %529 = vector.load %arg9[%c0_136, %c0_137] : memref<1x1xf32, #tpu.memory_space<vmem>>, vector<1x1xf32>
    %530 = vector.broadcast %529 : vector<1x1xf32> to vector<1x8xf32>
    %531 = arith.addf %528, %530 : vector<1x8xf32>
    %cst_138 = arith.constant 0.000000e+00 : f32
    %532 = vector.broadcast %cst_138 : f32 to vector<1x8xf32>
    %533 = arith.maximumf %531, %532 : vector<1x8xf32>
    %534 = arith.negf %533 : vector<1x8xf32>
    %535 = math.exp %534 : vector<1x8xf32>
    %cst_139 = arith.constant 1.000000e+00 : f32
    %536 = vector.broadcast %cst_139 : f32 to vector<1x8xf32>
    %537 = arith.addf %536, %535 : vector<1x8xf32>
    %538 = arith.divf %536, %537 : vector<1x8xf32>
    %cst_140 = arith.constant 9.980000e-01 : f32
    %539 = vector.broadcast %cst_140 : f32 to vector<1x8xf32>
    %540 = arith.mulf %538, %539 : vector<1x8xf32>
    %cst_141 = arith.constant 1.000000e-03 : f32
    %541 = vector.broadcast %cst_141 : f32 to vector<1x8xf32>
    %542 = arith.addf %540, %541 : vector<1x8xf32>
    %c0_142 = arith.constant 0 : index
    %c0_143 = arith.constant 0 : index
    %543 = vector.load %arg10[%c0_142, %c0_143] : memref<1x8xf32, #tpu.memory_space<vmem>>, vector<1x8xf32>
    tpu.vector_store %arg10[%c0_142, %c0_143], %542 {strides = array<i32>} : memref<1x8xf32, #tpu.memory_space<vmem>>, vector<1x8xf32>,
    return
  }
  func.func @transform_0(%arg0: i32) -> (i32, i32, i32) {
    %c0_i32 = arith.constant 0 : i32
    %c0_i32_0 = arith.constant 0 : i32
    %c0_i32_1 = arith.constant 0 : i32
    return %c0_i32, %c0_i32_0, %arg0 : i32, i32, i32
  }
  func.func @transform_1(%arg0: i32) -> (i32, i32, i32) {
    %c0_i32 = arith.constant 0 : i32
    %c0_i32_0 = arith.constant 0 : i32
    %c0_i32_1 = arith.constant 0 : i32
    return %c0_i32, %c0_i32_0, %arg0 : i32, i32, i32
  }
  func.func @transform_2(%arg0: i32) -> (i32, i32) {
    %c0_i32 = arith.constant 0 : i32
    %c0_i32_0 = arith.constant 0 : i32
    %c0_i32_1 = arith.constant 0 : i32
    return %c0_i32, %c0_i32_0 : i32, i32
  }
  func.func @transform_3(%arg0: i32) -> (i32, i32) {
    %c0_i32 = arith.constant 0 : i32
    %c0_i32_0 = arith.constant 0 : i32
    %c0_i32_1 = arith.constant 0 : i32
    return %c0_i32, %c0_i32_0 : i32, i32
  }
  func.func @transform_4(%arg0: i32) -> (i32, i32) {
    %c0_i32 = arith.constant 0 : i32
    %c0_i32_0 = arith.constant 0 : i32
    %c0_i32_1 = arith.constant 0 : i32
    return %c0_i32, %c0_i32_0 : i32, i32
  }
  func.func @transform_5(%arg0: i32) -> (i32, i32) {
    %c0_i32 = arith.constant 0 : i32
    %c0_i32_0 = arith.constant 0 : i32
    %c0_i32_1 = arith.constant 0 : i32
    return %c0_i32, %c0_i32_0 : i32, i32
  }
  func.func @transform_6(%arg0: i32) -> (i32, i32) {
    %c0_i32 = arith.constant 0 : i32
    %c0_i32_0 = arith.constant 0 : i32
    %c0_i32_1 = arith.constant 0 : i32
    return %c0_i32, %c0_i32_0 : i32, i32
  }
  func.func @transform_7(%arg0: i32) -> (i32, i32) {
    %c0_i32 = arith.constant 0 : i32
    %c0_i32_0 = arith.constant 0 : i32
    %c0_i32_1 = arith.constant 0 : i32
    return %c0_i32, %c0_i32_0 : i32, i32
  }
  func.func @transform_8(%arg0: i32) -> (i32, i32) {
    %c0_i32 = arith.constant 0 : i32
    %c0_i32_0 = arith.constant 0 : i32
    %c0_i32_1 = arith.constant 0 : i32
    return %c0_i32, %c0_i32_0 : i32, i32
  }
  func.func @transform_9(%arg0: i32) -> (i32, i32) {
    %c0_i32 = arith.constant 0 : i32
    %c0_i32_0 = arith.constant 0 : i32
    return %c0_i32, %arg0 : i32, i32
  }
}

</mosaic_0001>

<bundles_post_ra>
// kernel: tpu_custom_call.1
= control target key start
LH: loop header
LB: loop body
LE: loop exit
PB: predicated region body
PF: predicated region fallthrough
CT: control target
= control target key end

     0   :  { %s20100_s0 = inlined_call_operand.vmem [shape: f32[8,2,8], index: 0, kind: input, shape index: {}]   ;;  %s20101_s1 = inlined_call_operand.vmem [shape: f32[8,2,8], index: 1, kind: input, shape index: {}]   ;;  %s20102_s2 = inlined_call_operand.vmem [shape: f32[192,2], index: 2, kind: input, shape index: {}]   ;;  %s20103_s3 = inlined_call_operand.vmem [shape: f32[192,1], index: 3, kind: input, shape index: {}]   ;;  %s20104_s4 = inlined_call_operand.vmem [shape: f32[192,48], index: 4, kind: input, shape index: {}]   ;;  %s20105_s5 = inlined_call_operand.vmem [shape: f32[64,48], index: 5, kind: input, shape index: {}]   ;;  %s20106_s6 = inlined_call_operand.vmem [shape: f32[64,1], index: 6, kind: input, shape index: {}]   ;;  %s20107_s7 = inlined_call_operand.vmem [shape: f32[64,1], index: 7, kind: input, shape index: {}]   ;;  %s20108_s8 = inlined_call_operand.<no memory space> [shape: f32[1,1], index: 8, kind: input, shape index: {}]   ;;  %s20109_s9 = inlined_call_operand.hbm [shape: f32[1,8], index: 9, kind: output, shape index: {}]  }
   0x1   :  { %v14_v0 = vstv %s20108_s8 }
   0x2   :  { %15 = vst [vmem:[#allocation2] sm:$0x1] %v14_v0 }
   0x3   :  { %v107_v1 = vld [vmem:[%s20100_s0] sm:$0x3]  ;;  %vm301_vm0 = vcmask 1041408   ;;  %vm228_vm1 = vcmask 15360   ;;  %v15674_v3 = vld [vmem:[%s20102_s2 + $0x8] sm:$0xff]  ;;  %v15682_v4 = vld [vmem:[%s20102_s2 + $0x10] sm:$0xff] }
   0x4   :  { %v15669_v2 = vld [vmem:[%s20102_s2] sm:$0xff]  ;;  %11351 = vmatprep.subr.msk.mxu0 %vm301_vm0, %v107_v1  ;;  %12933 = vmatprep.subr.msk.mxu1 %vm301_vm0, %v107_v1  ;;  %v15694_v5 = vld [vmem:[%s20102_s2 + $0x18] sm:$0xff]  ;;  %v15607_v6 = vmov 0.0   ;;  %v15608_v8 = vmov 0   ;;  %v15713_v10 = vld [vmem:[%s20102_s2 + $0xa8] sm:$0xff] }
   0x5   :  { %11353 = vmatprep.mubr.msk.f32.mxu0 %vm228_vm1, %v15669_v2  ;;  %11352 = vmatpush3.msk.msra.mxu0 %vm301_vm0, %v107_v1  ;;  %v15699_v7 = vld [vmem:[%s20102_s2 + $0x20] sm:$0xff]  ;;  %20420 = vst [vmem:[#allocation7_spill] sm:$0xff] %v15713_v10  ;;  %v15718_v11 = vld [vmem:[%s20102_s2 + $0xb0] sm:$0xff]  ;;  %v15725_v12 = vld [vmem:[%s20102_s2 + $0x28] sm:$0xff] }
   0x6   :  { %11354 = vmatmul.mubr.msk.f32.vlgmr.msra.gmra.mrb[0].mxu0 %vm228_vm1, %v15674_v3  ;;  %12934 = vmatpush3.msk.msra.mxu1 %vm301_vm0, %v107_v1  ;;  %v15704_v9 = vld [vmem:[%s20102_s2 + $0xa0] sm:$0xff]  ;;  %20421 = vst [vmem:[#allocation8_spill] sm:$0xff] %v15718_v11  ;;  %v15732_v13 = vld [vmem:[%s20102_s2 + $0x30] sm:$0xff]  ;;  %v15739_v14 = vld [vmem:[%s20102_s2 + $0xb8] sm:$0xff] }
   0x7   :  { %11356 = vmatprep.mubr.msk.f32.mxu0 %vm228_vm1, %v15682_v4  ;;  %11389 = vmatprep.subr.mxu0 %v15607_v6  ;;  %20419 = vst [vmem:[#allocation6_spill] sm:$0xff] %v15704_v9  ;;  %20422 = vst [vmem:[#allocation9_spill] sm:$0xff] %v15739_v14  ;;  %v59_v15 = vld [vmem:[%s20103_s3] sm:$0xff]  ;;  %v65_v16 = vld [vmem:[%s20103_s3 + $0x30] sm:$0xff] }
   0x8   :  { %11390 = vmatpush3.msra.mxu0 %v15607_v6  ;;  %13706 = vset.pattern.permute.xlu0 %v15608_v8  ;;  %v60_v17 = vld [vmem:[%s20103_s3 + $0x8] sm:$0xff]  ;;  %v15757_v18 = vld [vmem:[%s20102_s2 + $0x38] sm:$0xff]  ;;  %v15767_v20 = vld [vmem:[%s20102_s2 + $0x40] sm:$0xff] }
   0x9   :  { %13707 = vset.pattern.permute.xlu1 %v15608_v8  ;;  %11383 = vmatprep.mubr.msk.f32.mxu1 %vm228_vm1, %v15704_v9  ;;  %v66_v19 = vld [vmem:[%s20103_s3 + $0x38] sm:$0xff]  ;;  %20423 = vst [vmem:[#allocation10_spill] sm:$0xff] %v15767_v20  ;;  %v61_v21 = vld [vmem:[%s20103_s3 + $0x10] sm:$0xff]  ;;  %v15781_v22 = vld [vmem:[%s20102_s2 + $0x48] sm:$0xff] }
   0xa   :  { %11357 = vmatmul.mubr.msk.f32.gmra.mrb[2].mxu0 %vm228_vm1, %v15694_v5  ;;  %11384 = vmatmul.mubr.msk.f32.vlgmr.msra.gmra.mrb[0].mxu1 %vm228_vm1, %v15713_v10  ;;  %20424 = vst [vmem:[#allocation11_spill] sm:$0xff] %v15781_v22  ;;  %v62_v23 = vld [vmem:[%s20103_s3 + $0x18] sm:$0xff]  ;;  %v15789_v24 = vld [vmem:[%s20102_s2 + $0x50] sm:$0xff]  ;;  %v67_v25 = vld [vmem:[%s20103_s3 + $0x40] sm:$0xff] }
   0xb   :  { %11359 = vmatprep.mubr.msk.f32.mxu0 %vm228_vm1, %v15699_v7  ;;  %11386 = vmatprep.mubr.msk.f32.mxu1 %vm228_vm1, %v15718_v11  ;;  %20425 = vst [vmem:[#allocation12_spill] sm:$0xff] %v15789_v24  ;;  %v15801_v26 = vld [vmem:[%s20102_s2 + $0x58] sm:$0xff]  ;;  %v68_v27 = vld [vmem:[%s20103_s3 + $0x48] sm:$0xff]  ;;  %v15809_v28 = vld [vmem:[%s20102_s2 + $0x60] sm:$0xff] }
   0xc   :  { %110 = vperm.xlu0 %13706, %v59_v15   ;;  %140 = vperm.xlu1 %13707, %v65_v16   ;;  %20426 = vst [vmem:[#allocation13_spill] sm:$0xff] %v15801_v26  ;;  %20427 = vst [vmem:[#allocation14_spill] sm:$0xff] %v15809_v28  ;;  %v63_v29 = vld [vmem:[%s20103_s3 + $0x20] sm:$0xff]  ;;  %v15821_v30 = vld [vmem:[%s20102_s2 + $0x68] sm:$0xff] }
   0xd   :  { %20428 = vst [vmem:[#allocation15_spill] sm:$0xff] %v15821_v30  ;;  %v64_v31 = vld [vmem:[%s20103_s3 + $0x28] sm:$0xff]  ;;  %v15829_v32 = vld [vmem:[%s20102_s2 + $0x70] sm:$0xff]  ;;  %v15841_v34 = vld [vmem:[%s20102_s2 + $0x78] sm:$0xff] }
   0xe   :  { %11360 = vmatmul.mubr.msk.f32.gmra.mrb[4].mxu0 %vm228_vm1, %v15725_v12  ;;  %11387 = vmatmul.mubr.msk.f32.gmra.mrb[2].mxu1 %vm228_vm1, %v15739_v14  ;;  %20429 = vst [vmem:[#allocation16_spill] sm:$0xff] %v15829_v32  ;;  %v69_v33 = vld [vmem:[%s20103_s3 + $0x50] sm:$0xff]  ;;  %20430 = vst [vmem:[#allocation17_spill] sm:$0xff] %v15841_v34  ;;  %v70_v35 = vld [vmem:[%s20103_s3 + $0x58] sm:$0xff] }
   0xf   :  { %11362 = vmatprep.mubr.msk.f32.mxu0 %vm228_vm1, %v15732_v13  ;;  %11429 = vmatprep.mubr.msk.f32.mxu1 %vm228_vm1, %v15669_v2  ;;  %v15849_v36 = vld [vmem:[%s20102_s2 + $0x80] sm:$0xff] }
  0x10   :  { %115 = vperm.xlu0 %13706, %v60_v17   ;;  %145 = vperm.xlu1 %13707, %v66_v19   ;;  %20431 = vst [vmem:[#allocation18_spill] sm:$0xff] %v15849_v36 }
  0x12   :  { %11363 = vmatmul.mubr.msk.f32.gmra.mrb[6].mxu0 %vm228_vm1, %v15757_v18 }
  0x13   :  { %11365 = vmatprep.mubr.msk.f32.mxu0 %vm228_vm1, %v15767_v20 }
  0x14   :  { %120 = vperm.xlu0 %13706, %v61_v21   ;;  %125 = vperm.xlu1 %13707, %v62_v23  }
  0x16   :  { %11366 = vmatmul.mubr.msk.f32.gmra.mrb[8].mxu0 %vm228_vm1, %v15781_v22 }
  0x17   :  { %11368 = vmatprep.mubr.msk.f32.mxu0 %vm228_vm1, %v15789_v24 }
  0x18   :  { %150 = vperm.xlu0 %13706, %v67_v25   ;;  %155 = vperm.xlu1 %13707, %v68_v27  }
  0x1a   :  { %11369 = vmatmul.mubr.msk.f32.gmra.mrb[10].mxu0 %vm228_vm1, %v15801_v26 }
  0x1b   :  { %11371 = vmatprep.mubr.msk.f32.mxu0 %vm228_vm1, %v15809_v28 }
  0x1c   :  { %130 = vperm.xlu0 %13706, %v63_v29   ;;  %135 = vperm.xlu1 %13707, %v64_v31  }
  0x1e   :  { %11372 = vmatmul.mubr.msk.f32.gmra.mrb[12].mxu0 %vm228_vm1, %v15821_v30 }
  0x1f   :  { %11374 = vmatprep.mubr.msk.f32.mxu0 %vm228_vm1, %v15829_v32 }
  0x20   :  { %160 = vperm.xlu0 %13706, %v69_v33  }
  0x21   :  { %16 = vsyncpa [#allocation4], 0  ;;  %165 = vperm.xlu1 %13707, %v70_v35   ;;  %v71_v37 = vld [vmem:[%s20103_s3 + $0x60] sm:$0xff]  ;;  %v15861_v38 = vld [vmem:[%s20102_s2 + $0x88] sm:$0xff]  ;;  %vm490_vm2 = vcmask 392192   ;;  %vm9309_vm3 = vcmask 64512  }
  0x22   :  { %11375 = vmatmul.mubr.msk.f32.gmra.mrb[14].mxu0 %vm228_vm1, %v15841_v34  ;;  %20432 = vst [vmem:[#allocation19_spill] sm:$0xff] %v15861_v38  ;;  %v72_v39 = vld [vmem:[%s20103_s3 + $0x68] sm:$0xff]  ;;  %v15869_v40 = vld [vmem:[%s20102_s2 + $0x90] sm:$0xff]  ;;  %v15881_v42 = vld [vmem:[%s20102_s2 + $0x98] sm:$0xff]  ;;  %vm9351_vm4 = vcmask 57344  }
  0x23   :  { %11377 = vmatprep.mubr.msk.f32.mxu0 %vm228_vm1, %v15849_v36  ;;  %20433 = vst [vmem:[#allocation20_spill] sm:$0xff] %v15869_v40  ;;  %v77_v41 = vld [vmem:[%s20103_s3 + $0x90] sm:$0xff]  ;;  %20434 = vst [vmem:[#allocation21_spill] sm:$0xff] %v15881_v42  ;;  %v78_v43 = vld [vmem:[%s20103_s3 + $0x98] sm:$0xff] }
  0x24   :  { %170 = vperm.xlu0 %13706, %v71_v37   ;;  %v15889_v44 = vld [vmem:[%s20104_s4] sm:$0xff]  ;;  %v15901_v46 = vld [vmem:[%s20104_s4 + $0x8] sm:$0xff]  ;;  %v15909_v48 = vld [vmem:[%s20104_s4 + $0x10] sm:$0xff] }
  0x25   :  { %175 = vperm.xlu1 %13707, %v72_v39   ;;  %20435 = vst [vmem:[#allocation22_spill] sm:$0xff] %v15889_v44  ;;  %v79_v45 = vld [vmem:[%s20103_s3 + $0xa0] sm:$0xff]  ;;  %v80_v47 = vld [vmem:[%s20103_s3 + $0xa8] sm:$0xff]  ;;  %v73_v49 = vld [vmem:[%s20103_s3 + $0x70] sm:$0xff] }
  0x26   :  { %11378 = vmatmul.mubr.msk.f32.gmra.mrb[16].mxu0 %vm228_vm1, %v15861_v38  ;;  %v15921_v50 = vld [vmem:[%s20104_s4 + $0x18] sm:$0xff]  ;;  %v15929_v52 = vld [vmem:[%s20104_s4 + $0x20] sm:$0xff]  ;;  %v81_v53 = vld [vmem:[%s20103_s3 + $0xb0] sm:$0xff] }
  0x27   :  { %11380 = vmatprep.mubr.msk.f32.mxu0 %vm228_vm1, %v15869_v40  ;;  %v74_v51 = vld [vmem:[%s20103_s3 + $0x78] sm:$0xff]  ;;  %v15941_v54 = vld [vmem:[%s20104_s4 + $0x28] sm:$0xff]  ;;  %v15949_v56 = vld [vmem:[%s20104_s4 + $0x30] sm:$0xff] }
  0x28   :  { %200 = vperm.xlu0 %13706, %v77_v41   ;;  %v82_v55 = vld [vmem:[%s20103_s3 + $0xb8] sm:$0xff]  ;;  %v75_v57 = vld [vmem:[%s20103_s3 + $0x80] sm:$0xff]  ;;  %v76_v59 = vld [vmem:[%s20103_s3 + $0x88] sm:$0xff] }
  0x29   :  { %205 = vperm.xlu1 %13707, %v78_v43   ;;  %v15961_v58 = vld [vmem:[%s20104_s4 + $0x38] sm:$0xff]  ;;  %v15969_v60 = vld [vmem:[%s20104_s4 + $0x40] sm:$0xff]  ;;  %v15981_v62 = vld [vmem:[%s20104_s4 + $0x48] sm:$0xff] }
  0x2a   :  { %11381 = vmatmul.mubr.msk.f32.gmra.mrb[18].mxu0 %vm228_vm1, %v15881_v42  ;;  %v9068_v61 = vld [vmem:[%s20106_s6] sm:$0xff]  ;;  %v9069_v63 = vld [vmem:[%s20106_s6 + $0x8] sm:$0xff]  ;;  %v15989_v0 = vld [vmem:[%s20104_s4 + $0x50] sm:$0xff] }
  0x2b   :  { %11391 = vmatprep.mubr.msk.f32.mxu0 %vm490_vm2, %v15889_v44  ;;  %v9070_v1 = vld [vmem:[%s20106_s6 + $0x10] sm:$0xff]  ;;  %v16001_v6 = vld [vmem:[%s20104_s4 + $0x58] sm:$0xff]  ;;  %v16009_v15 = vld [vmem:[%s20104_s4 + $0x60] sm:$0xff] }
  0x2c   :  { %210 = vperm.xlu0 %13706, %v79_v45   ;;  %v9071_v8 = vld [vmem:[%s20106_s6 + $0x18] sm:$0xff]  ;;  %v9253_v16 = vld [vmem:[%s20107_s7] sm:$0xff]  ;;  %v16021_v17 = vld [vmem:[%s20104_s4 + $0x68] sm:$0xff] }
  0x2d   :  { %215 = vperm.xlu1 %13707, %v80_v47   ;;  %v9254_v19 = vld [vmem:[%s20107_s7 + $0x8] sm:$0xff]  ;;  %v16029_v21 = vld [vmem:[%s20104_s4 + $0x70] sm:$0xff]  ;;  %v9072_v23 = vld [vmem:[%s20106_s6 + $0x20] sm:$0xff] }
  0x2e   :  { %11392 = vmatmul.mubr.msk.f32.vlgmr.msra.gmra.mrb[0].mxu0 %vm490_vm2, %v15901_v46  ;;  %v16041_v25 = vld [vmem:[%s20104_s4 + $0x78] sm:$0xff]  ;;  %v9255_v27 = vld [vmem:[%s20107_s7 + $0x10] sm:$0xff]  ;;  %v16049_v29 = vld [vmem:[%s20104_s4 + $0x80] sm:$0xff] }
  0x2f   :  { %11394 = vmatprep.mubr.msk.f32.mxu0 %vm490_vm2, %v15909_v48  ;;  %v9073_v31 = vld [vmem:[%s20106_s6 + $0x28] sm:$0xff]  ;;  %v9256_v35 = vld [vmem:[%s20107_s7 + $0x18] sm:$0xff]  ;;  %v16069_v37 = vld [vmem:[%s20104_s4 + $0x90] sm:$0xff] }
  0x30   :  { %180 = vperm.xlu0 %13706, %v73_v49   ;;  %v16061_v33 = vld [vmem:[%s20104_s4 + $0x88] sm:$0xff]  ;;  %v9074_v39 = vld [vmem:[%s20106_s6 + $0x30] sm:$0xff]  ;;  %v16081_v41 = vld [vmem:[%s20104_s4 + $0x98] sm:$0xff] }
  0x31   :  { %185 = vperm.xlu1 %13707, %v74_v51   ;;  %v9257_v43 = vld [vmem:[%s20107_s7 + $0x20] sm:$0xff]  ;;  %v9075_v47 = vld [vmem:[%s20106_s6 + $0x38] sm:$0xff]  ;;  %v16101_v49 = vld [vmem:[%s20104_s4 + $0xa8] sm:$0xff] }
  0x32   :  { %11395 = vmatmul.mubr.msk.f32.gmra.mrb[2].mxu0 %vm490_vm2, %v15921_v50  ;;  %v16089_v45 = vld [vmem:[%s20104_s4 + $0xa0] sm:$0xff]  ;;  %v9258_v51 = vld [vmem:[%s20107_s7 + $0x28] sm:$0xff] }
  0x33   :  { %11397 = vmatprep.mubr.msk.f32.mxu0 %vm490_vm2, %v15929_v52 }
  0x34   :  { %220 = vperm.xlu0 %13706, %v81_v53   ;;  %v16109_v53 = vld [vmem:[%s20104_s4 + $0xb0] sm:$0xff] }
  0x35   :  { %225 = vperm.xlu1 %13707, %v82_v55   ;;  %v9259_v55 = vld [vmem:[%s20107_s7 + $0x30] sm:$0xff] }
  0x36   :  { %11398 = vmatmul.mubr.msk.f32.gmra.mrb[4].mxu0 %vm490_vm2, %v15941_v54 }
  0x37   :  { %11400 = vmatprep.mubr.msk.f32.mxu0 %vm490_vm2, %v15949_v56 }
  0x38   :  { %190 = vperm.xlu0 %13706, %v75_v57   ;;  %v16121_v57 = vld [vmem:[%s20104_s4 + $0xb8] sm:$0xff] }
  0x39   :  { %195 = vperm.xlu1 %13707, %v76_v59   ;;  %v9260_v59 = vld [vmem:[%s20107_s7 + $0x38] sm:$0xff] }
  0x3a   :  { %11401 = vmatmul.mubr.msk.f32.gmra.mrb[6].mxu0 %vm490_vm2, %v15961_v58 }
  0x3b   :  { %11403 = vmatprep.mubr.msk.f32.mxu0 %vm490_vm2, %v15969_v60 }
  0x3c   :  { %9078 = vperm.xlu0 %13706, %v9068_v61   ;;  %v9331_v61 = vld [vmem:[#allocation2] sm:$0x1] }
  0x3d   :  { %9083 = vperm.xlu1 %13707, %v9069_v63   ;;  %v9434_v63 = vld [vmem:[%s20100_s0 + $0x2] sm:$0x3] }
  0x3e   :  { %11404 = vmatmul.mubr.msk.f32.gmra.mrb[8].mxu0 %vm490_vm2, %v15981_v62  ;;  %11427 = vmatprep.subr.msk.mxu1 %vm301_vm0, %v9434_v63 }
  0x3f   :  { %11406 = vmatprep.mubr.msk.f32.mxu0 %vm490_vm2, %v15989_v0  ;;  %11428 = vmatpush3.msk.msra.mxu1 %vm301_vm0, %v9434_v63 }
  0x40   :  { %9088 = vperm.xlu0 %13706, %v9070_v1   ;;  %11430 = vmatmul.mubr.msk.f32.vlgmr.msra.gmra.mrb[4].mxu1 %vm228_vm1, %v15674_v3 }
  0x41   :  { %9093 = vperm.xlu1 %13707, %v9071_v8   ;;  %11432 = vmatprep.mubr.msk.f32.mxu1 %vm228_vm1, %v15682_v4 }
  0x42   :  { %11407 = vmatmul.mubr.msk.f32.gmra.mrb[10].mxu0 %vm490_vm2, %v16001_v6 }
  0x43   :  { %11409 = vmatprep.mubr.msk.f32.mxu0 %vm490_vm2, %v16009_v15 }
  0x44   :  { %9263 = vperm.xlu0 %13706, %v9253_v16   ;;  %11433 = vmatmul.mubr.msk.f32.gmra.mrb[6].mxu1 %vm228_vm1, %v15694_v5 }
  0x45   :  { %9268 = vperm.xlu1 %13707, %v9254_v19   ;;  %11435 = vmatprep.mubr.msk.f32.mxu1 %vm228_vm1, %v15699_v7 }
  0x46   :  { %11410 = vmatmul.mubr.msk.f32.gmra.mrb[12].mxu0 %vm490_vm2, %v16021_v17 }
  0x47   :  { %11412 = vmatprep.mubr.msk.f32.mxu0 %vm490_vm2, %v16029_v21 }
  0x48   :  { %9098 = vperm.xlu0 %13706, %v9072_v23   ;;  %11436 = vmatmul.mubr.msk.f32.gmra.mrb[8].mxu1 %vm228_vm1, %v15725_v12 }
  0x49   :  { %9273 = vperm.xlu1 %13707, %v9255_v27   ;;  %11438 = vmatprep.mubr.msk.f32.mxu1 %vm228_vm1, %v15732_v13 }
  0x4a   :  { %11413 = vmatmul.mubr.msk.f32.gmra.mrb[14].mxu0 %vm490_vm2, %v16041_v25 }
  0x4b   :  { %11415 = vmatprep.mubr.msk.f32.mxu0 %vm490_vm2, %v16049_v29 }
  0x4c   :  { %9103 = vperm.xlu0 %13706, %v9073_v31   ;;  %11439 = vmatmul.mubr.msk.f32.gmra.mrb[10].mxu1 %vm228_vm1, %v15757_v18 }
  0x4d   :  { %9278 = vperm.xlu1 %13707, %v9256_v35   ;;  %11441 = vmatprep.mubr.msk.f32.mxu1 %vm228_vm1, %v15767_v20 }
  0x4e   :  { %11416 = vmatmul.mubr.msk.f32.gmra.mrb[16].mxu0 %vm490_vm2, %v16061_v33 }
  0x4f   :  { %11418 = vmatprep.mubr.msk.f32.mxu0 %vm490_vm2, %v16069_v37 }
  0x50   :  { %9108 = vperm.xlu0 %13706, %v9074_v39   ;;  %11442 = vmatmul.mubr.msk.f32.gmra.mrb[12].mxu1 %vm228_vm1, %v15781_v22 }
  0x51   :  { %9283 = vperm.xlu1 %13707, %v9257_v43   ;;  %11444 = vmatprep.mubr.msk.f32.mxu1 %vm228_vm1, %v15789_v24 }
  0x52   :  { %11419 = vmatmul.mubr.msk.f32.gmra.mrb[18].mxu0 %vm490_vm2, %v16081_v41 }
  0x53   :  { %11421 = vmatprep.mubr.msk.f32.mxu0 %vm490_vm2, %v16089_v45 }
  0x54   :  { %9113 = vperm.xlu0 %13706, %v9075_v47   ;;  %11445 = vmatmul.mubr.msk.f32.gmra.mrb[14].mxu1 %vm228_vm1, %v15801_v26 }
  0x55   :  { %9288 = vperm.xlu1 %13707, %v9258_v51   ;;  %11447 = vmatprep.mubr.msk.f32.mxu1 %vm228_vm1, %v15809_v28 }
  0x56   :  { %11422 = vmatmul.mubr.msk.f32.gmra.mrb[20].mxu0 %vm490_vm2, %v16101_v49 }
  0x57   :  { %11424 = vmatprep.mubr.msk.f32.mxu0 %vm490_vm2, %v16109_v53 }
  0x58   :  { %9293 = vperm.xlu0 %13706, %v9259_v55   ;;  %11448 = vmatmul.mubr.msk.f32.gmra.mrb[16].mxu1 %vm228_vm1, %v15821_v30 }
  0x59   :  { %9298 = vperm.xlu1 %13707, %v9260_v59   ;;  %11450 = vmatprep.mubr.msk.f32.mxu1 %vm228_vm1, %v15829_v32 }
  0x5a   :  { %11425 = vmatmul.mubr.msk.f32.gmra.mrb[22].mxu0 %vm490_vm2, %v16121_v57 }
  0x5b   :  { %11515 = vmatprep.mubr.msk.f32.mxu0 %vm228_vm1, %v15669_v2 }
  0x5c   :  { %9334 = vperm.xlu0 %13706, %v9331_v61   ;;  %11451 = vmatmul.mubr.msk.f32.gmra.mrb[18].mxu1 %vm228_vm1, %v15841_v34 }
  0x5d   :  { %11453 = vmatprep.mubr.msk.f32.mxu1 %vm228_vm1, %v15849_v36 }
  0x60   :  { %11454 = vmatmul.mubr.msk.f32.gmra.mrb[20].mxu1 %vm228_vm1, %v15861_v38 }
  0x61   :  { %11456 = vmatprep.mubr.msk.f32.mxu1 %vm228_vm1, %v15869_v40 }
  0x64   :  { %11457 = vmatmul.mubr.msk.f32.gmra.mrb[22].mxu1 %vm228_vm1, %v15881_v42 }
  0x65   :  { %11459 = vmatprep.mubr.msk.f32.mxu1 %vm228_vm1, %v15704_v9 }
  0x68   :  { %11460 = vmatmul.mubr.msk.f32.gmra.mrb[24].mxu1 %vm228_vm1, %v15713_v10 }
  0x69   :  { %11462 = vmatprep.mubr.msk.f32.mxu1 %vm228_vm1, %v15718_v11 }
  0x6c   :  { %11463 = vmatmul.mubr.msk.f32.gmra.mrb[26].mxu1 %vm228_vm1, %v15739_v14 }
  0x6d   :  { %11477 = vmatprep.mubr.msk.f32.mxu1 %vm490_vm2, %v15889_v44 }
  0x8b   :  { %v16185_v8 = vpop.permute.xlu1 %140  ;;  %v16189_v19 = vpop.permute.xlu0 %110 }
  0x8c   :  { %20436 = vst [vmem:[#allocation23_spill] sm:$0xff] %v16185_v8  ;;  %20437 = vst [vmem:[#allocation24_spill] sm:$0xff] %v16189_v19 }
  0x8f   :  { %v16195_v31 = vpop.permute.xlu1 %145  ;;  %v16197_v35 = vpop.permute.xlu0 %115 }
  0x90   :  { %20438 = vst [vmem:[#allocation25_spill] sm:$0xff] %v16195_v31  ;;  %20439 = vst [vmem:[#allocation26_spill] sm:$0xff] %v16197_v35 }
  0x93   :  { %v16199_v39 = vpop.permute.xlu1 %125  ;;  %v16201_v43 = vpop.permute.xlu0 %120 }
  0x94   :  { %20440 = vst [vmem:[#allocation27_spill] sm:$0xff] %v16199_v39  ;;  %20441 = vst [vmem:[#allocation28_spill] sm:$0xff] %v16201_v43 }
  0x97   :  { %v16203_v47 = vpop.permute.xlu1 %155  ;;  %v16205_v51 = vpop.permute.xlu0 %150 }
  0x98   :  { %20442 = vst [vmem:[#allocation29_spill] sm:$0xff] %v16203_v47  ;;  %20443 = vst [vmem:[#allocation30_spill] sm:$0xff] %v16205_v51 }
  0x9b   :  { %v16207_v55 = vpop.permute.xlu1 %135  ;;  %v16209_v59 = vpop.permute.xlu0 %130 }
  0x9c   :  { %20444 = vst [vmem:[#allocation31_spill] sm:$0xff] %v16207_v55  ;;  %20445 = vst [vmem:[#allocation32_spill] sm:$0xff] %v16209_v59 }
  0x9f   :  { %v16213_v63 = vpop.permute.xlu0 %160 }
  0xa0   :  { %v16211_v61 = vpop.permute.xlu1 %165  ;;  %20447 = vst [vmem:[#allocation34_spill] sm:$0xff] %v16213_v63 }
  0xa1   :  { %20446 = vst [vmem:[#allocation33_spill] sm:$0xff] %v16211_v61 }
  0xa3   :  { %v16219_v40 = vpop.permute.xlu0 %170 }
  0xa4   :  { %v16216_v10 = vpop.permute.xlu1 %175  ;;  %20449 = vst [vmem:[#allocation36_spill] sm:$0xff] %v16219_v40 }
  0xa5   :  { %20448 = vst [vmem:[#allocation35_spill] sm:$0xff] %v16216_v10 }
  0xa8   :  { %v16223_v26 = vpop.permute.xlu1 %205 }
  0xa9   :  { %20450 = vst [vmem:[#allocation37_spill] sm:$0xff] %v16223_v26 }
  0xdd   :  { %v16183_v1 = vpop.f32.mrb[0].mxu1 }
  0xde   :  { %v16187_v16 = vpop.f32.mrb[1].mxu1 }
  0xe1   :  { %v16191_v23 = vpop.f32.mrb[2].mxu1 }
  0xe2   :  { %v16193_v27 = vpop.f32.mrb[3].mxu1 }
 0x101   :  { %v11393_v44 = vpop.f32.mrb[0].mxu0 }
 0x102   :  { %v12935_v14 = vadd.f32 %v11393_v44, %v16197_v35  ;;  %v629_v11 = vpop.f32.mrb[1].mxu0 }
 0x103   :  { %v12936_v9 = vadd.f32 %v629_v11, %v16189_v19  ;;  %v16226_v19 = vpop.permute.xlu0 %200 }
 0x104   :  { %v9417_v42 = vmul.f32 -1.442695, %v12935_v14  ;;  %20451 = vst [vmem:[#allocation38_spill] sm:$0xff] %v16226_v19 }
 0x105   :  { %v9416_v38 = vmul.f32 -1.442695, %v12936_v9  ;;  %v11396_v36 = vpop.f32.mrb[2].mxu0 }
 0x106   :  { %13708 = vpow2.f32 %v9417_v42  ;;  %v12937_v34 = vadd.f32 %v11396_v36, %v16199_v39  ;;  %v639_v32 = vpop.f32.mrb[3].mxu0 }
 0x107   :  { %13710 = vpow2.f32 %v9416_v38  ;;  %v12938_v30 = vadd.f32 %v639_v32, %v16201_v43  ;;  %v16230_v38 = vpop.permute.xlu1 %215  ;;  %v16233_v43 = vpop.permute.xlu0 %210 }
 0x108   :  { %v9419_v28 = vmul.f32 -1.442695, %v12937_v34  ;;  %20452 = vst [vmem:[#allocation39_spill] sm:$0xff] %v16230_v38  ;;  %20453 = vst [vmem:[#allocation40_spill] sm:$0xff] %v16233_v43 }
 0x109   :  { %v9418_v44 = vmul.f32 -1.442695, %v12938_v30  ;;  %v11399_v35 = vpop.f32.mrb[4].mxu0 }
 0x10a   :  { %13712 = vpow2.f32 %v9419_v28  ;;  %v12939_v11 = vadd.f32 %v11399_v35, %v16207_v55  ;;  %v649_v14 = vpop.f32.mrb[5].mxu0 }
 0x10b   :  { %13714 = vpow2.f32 %v9418_v44  ;;  %v12940_v9 = vadd.f32 %v649_v14, %v16209_v59 }
 0x10c   :  { %v9421_v42 = vmul.f32 -1.442695, %v12939_v11 }
 0x10d   :  { %v9420_v36 = vmul.f32 -1.442695, %v12940_v9  ;;  %v11402_v39 = vpop.f32.mrb[6].mxu0 }
 0x10e   :  { %13716 = vpow2.f32 %v9421_v42  ;;  %v12941_v32 = vadd.f32 %v11402_v39, %v16195_v31  ;;  %v659_v34 = vpop.f32.mrb[7].mxu0 }
 0x10f   :  { %13718 = vpow2.f32 %v9420_v36  ;;  %v12942_v28 = vadd.f32 %v659_v34, %v16185_v8  ;;  %v16237_v8 = vpop.permute.xlu1 %185 }
 0x110   :  { %v13709_v30 = vpop.eup %13708  ;;  %v9423_v35 = vmul.f32 -1.442695, %v12941_v32  ;;  %20454 = vst [vmem:[#allocation41_spill] sm:$0xff] %v16237_v8 }
 0x111   :  { %v13711_v55 = vpop.eup %13710  ;;  %v791_v44 = vadd.f32 1.0, %v13709_v30  ;;  %v9422_v24 = vmul.f32 -1.442695, %v12942_v28  ;;  %v11405_v14 = vpop.f32.mrb[8].mxu0 }
 0x112   :  { %v790_v11 = vadd.f32 1.0, %v13711_v55  ;;  %13720 = vpow2.f32 %v9423_v35  ;;  %v12943_v9 = vadd.f32 %v11405_v14, %v16203_v47  ;;  %v669_v42 = vpop.f32.mrb[9].mxu0  ;;  %v16240_v14 = vpop.permute.xlu0 %180 }
 0x113   :  { %13722 = vrcp.f32 %v791_v44  ;;  %v12944_v39 = vadd.f32 %v669_v42, %v16205_v51  ;;  %20455 = vst [vmem:[#allocation42_spill] sm:$0xff] %v16240_v14 }
 0x114   :  { %v13713_v31 = vpop.eup %13712  ;;  %13724 = vrcp.f32 %v790_v11  ;;  %v9425_v36 = vmul.f32 -1.442695, %v12943_v9 }
 0x115   :  { %v13715_v34 = vpop.eup %13714  ;;  %v793_v32 = vadd.f32 1.0, %v13713_v31  ;;  %13726 = vpow2.f32 %v9422_v24  ;;  %v9424_v59 = vmul.f32 -1.442695, %v12944_v39  ;;  %v11408_v30 = vpop.f32.mrb[10].mxu0 }
 0x116   :  { %v792_v28 = vadd.f32 1.0, %v13715_v34  ;;  %13728 = vpow2.f32 %v9425_v36  ;;  %v12945_v55 = vadd.f32 %v11408_v30, %v16211_v61  ;;  %v679_v35 = vpop.f32.mrb[11].mxu0  ;;  %v16244_v30 = vpop.permute.xlu1 %225 }
 0x117   :  { %13730 = vrcp.f32 %v793_v32  ;;  %v12946_v44 = vadd.f32 %v679_v35, %v16213_v63 }
 0x118   :  { %v13717_v42 = vpop.eup %13716  ;;  %13732 = vrcp.f32 %v792_v28  ;;  %v9427_v11 = vmul.f32 -1.442695, %v12945_v55  ;;  %v16247_v28 = vpop.permute.xlu0 %220 }
 0x119   :  { %v13719_v9 = vpop.eup %13718  ;;  %v795_v51 = vadd.f32 1.0, %v13717_v42  ;;  %13734 = vpow2.f32 %v9424_v59  ;;  %v9426_v31 = vmul.f32 -1.442695, %v12946_v44  ;;  %v11411_v24 = vpop.f32.mrb[12].mxu0 }
 0x11a   :  { %v794_v39 = vadd.f32 1.0, %v13719_v9  ;;  %13736 = vpow2.f32 %v9427_v11  ;;  %v12947_v36 = vadd.f32 %v11411_v24, %v16216_v10  ;;  %v689_v34 = vpop.f32.mrb[13].mxu0 }
 0x11b   :  { %13738 = vrcp.f32 %v795_v51  ;;  %v12948_v32 = vadd.f32 %v689_v34, %v16219_v40  ;;  %v16251_v34 = vpop.permute.xlu1 %195 }
 0x11c   :  { %v13721_v61 = vpop.eup %13720  ;;  %13740 = vrcp.f32 %v794_v39  ;;  %20456 = vst [vmem:[#allocation43_spill] sm:$0xff] %v16251_v34 }
 0x11d   :  { %v13723_v35 = vpop.eup %13722  ;;  %v827_v55 = vadd.f32 1.0, %v13721_v61  ;;  %13742 = vpow2.f32 %v9426_v31  ;;  %v11414_v59 = vpop.f32.mrb[14].mxu0 }
 0x11e   :  { %v13725_v44 = vpop.eup %13724  ;;  %13744 = vtanh.f32 %v12947_v36  ;;  %v12949_v42 = vadd.f32 %v11414_v59, %v16237_v8  ;;  %v699_v11 = vpop.f32.mrb[15].mxu0 }
 0x11f   :  { %v13727_v9 = vpop.eup %13726  ;;  %13746 = vrcp.f32 %v827_v55  ;;  %v12950_v51 = vadd.f32 %v699_v11, %v16240_v14  ;;  %v16254_v8 = vpop.permute.xlu0 %190 }
 0x120   :  { %v13729_v24 = vpop.eup %13728  ;;  %v826_v10 = vadd.f32 1.0, %v13727_v9  ;;  %13748 = vtanh.f32 %v12948_v32  ;;  %20457 = vst [vmem:[#allocation44_spill] sm:$0xff] %v16254_v8 }
 0x121   :  { %v13731_v39 = vpop.eup %13730  ;;  %v829_v40 = vadd.f32 1.0, %v13729_v24  ;;  %13750 = vtanh.f32 %v12949_v42  ;;  %v11417_v61 = vpop.f32.mrb[16].mxu0 }
 0x122   :  { %v13733_v31 = vpop.eup %13732  ;;  %13752 = vrcp.f32 %v826_v10  ;;  %v12951_v36 = vadd.f32 %v11417_v61, %v16251_v34  ;;  %v709_v63 = vpop.f32.mrb[17].mxu0 }
 0x123   :  { %v13735_v59 = vpop.eup %13734  ;;  %13754 = vrcp.f32 %v829_v40  ;;  %v12952_v32 = vadd.f32 %v709_v63, %v16254_v8  ;;  %v477_v40 = vadd.f32 %v16183_v1, %v16230_v38 }
 0x124   :  { %v13737_v55 = vpop.eup %13736  ;;  %v828_v9 = vadd.f32 1.0, %v13735_v59  ;;  %13756 = vtanh.f32 %v12950_v51 }
 0x125   :  { %v13739_v11 = vpop.eup %13738  ;;  %v831_v14 = vadd.f32 1.0, %v13737_v55  ;;  %13758 = vtanh.f32 %v12951_v36  ;;  %v11420_v24 = vpop.f32.mrb[18].mxu0  ;;  %v472_v36 = vadd.f32 %v16187_v16, %v16233_v43 }
 0x126   :  { %v13741_v42 = vpop.eup %13740  ;;  %13760 = vrcp.f32 %v828_v9  ;;  %v12953_v10 = vadd.f32 %v11420_v24, %v16223_v26  ;;  %v719_v47 = vpop.f32.mrb[19].mxu0 }
 0x127   :  { %v13743_v61 = vpop.eup %13742  ;;  %13762 = vrcp.f32 %v831_v14  ;;  %v12954_v34 = vadd.f32 %v719_v47, %v16226_v19  ;;  %v487_v19 = vadd.f32 %v16191_v23, %v16244_v30 }
 0x128   :  { %v13745_v22 = vpop.eup %13744  ;;  %v830_v51 = vadd.f32 1.0, %v13743_v61  ;;  %13764 = vtanh.f32 %v12952_v32  ;;  %v9429_v63 = vmul.f32 -1.442695, %v12953_v10 }
 0x129   :  { %v13747_v59 = vpop.eup %13746  ;;  %v893_v55 = vmul.f32 %v13745_v22, %v13723_v35  ;;  %v9428_v9 = vmul.f32 -1.442695, %v12954_v34  ;;  %v11423_v8 = vpop.f32.mrb[20].mxu0  ;;  %v482_v35 = vadd.f32 %v16193_v27, %v16247_v28 }
 0x12a   :  { %v13749_v24 = vpop.eup %13748  ;;  %v887_v26 = vmul.f32 0.0, %v13747_v59  ;;  %13766 = vrcp.f32 %v830_v51  ;;  %v769_v14 = vadd.f32 %v11423_v8, %v477_v40  ;;  %v729_v20 = vpop.f32.mrb[21].mxu0 }
 0x12b   :  { %v13751_v47 = vpop.eup %13750  ;;  %v892_v1 = vmul.f32 %v13749_v24, %v13725_v44  ;;  %13768 = vpow2.f32 %v9429_v63  ;;  %v768_v32 = vadd.f32 %v729_v20, %v472_v36 }
 0x12c   :  { %v13753_v10 = vpop.eup %13752  ;;  %v16265_v61 = vadd.f32 %v893_v55, %v887_v26  ;;  %v895_v38 = vmul.f32 %v13751_v47, %v13731_v39  ;;  %13770 = vpow2.f32 %v9428_v9  ;;  %v9431_v22 = vmul.f32 -1.442695, %v769_v14 }
 0x12d   :  { %v13755_v16 = vpop.eup %13754  ;;  %v886_v34 = vmul.f32 0.0, %v13753_v10  ;;  %v9430_v8 = vmul.f32 -1.442695, %v768_v32  ;;  %v11426_v40 = vpop.f32.mrb[22].mxu0 }
 0x12e   :  { %v13757_v51 = vpop.eup %13756  ;;  %v889_v59 = vmul.f32 0.0, %v13755_v16  ;;  %v771_v43 = vadd.f32 %v11426_v40, %v487_v19  ;;  %v739_v23 = vpop.f32.mrb[23].mxu0  ;;  %13772 = vpow2.f32 %v9431_v22 }
 0x12f   :  { %v13759_v44 = vpop.eup %13758  ;;  %v16269_v63 = vadd.f32 %v892_v1, %v886_v34  ;;  %v894_v20 = vmul.f32 %v13757_v51, %v13733_v31  ;;  %v770_v26 = vadd.f32 %v739_v23, %v482_v35  ;;  %13774 = vpow2.f32 %v9430_v8 }
 0x130   :  { %v13761_v39 = vpop.eup %13760  ;;  %v16271_v36 = vadd.f32 %v895_v38, %v889_v59  ;;  %v897_v55 = vmul.f32 %v13759_v44, %v13739_v11  ;;  %v9433_v9 = vmul.f32 -1.442695, %v771_v43 }
 0x131   :  { %v13763_v27 = vpop.eup %13762  ;;  %v888_v24 = vmul.f32 0.0, %v13761_v39  ;;  %v9432_v14 = vmul.f32 -1.442695, %v770_v26 }
 0x132   :  { %v13765_v47 = vpop.eup %13764  ;;  %v891_v32 = vmul.f32 0.0, %v13763_v27  ;;  %13776 = vpow2.f32 %v9433_v9 }
 0x133   :  { %v16273_v10 = vadd.f32 %v894_v20, %v888_v24  ;;  %v896_v19 = vmul.f32 %v13765_v47, %v13741_v42  ;;  %13778 = vpow2.f32 %v9432_v14 }
 0x134   :  { %v13767_v1 = vpop.eup %13766  ;;  %v16275_v16 = vadd.f32 %v897_v55, %v891_v32  ;;  %13780 = vtanh.f32 %v16265_v61 }
 0x135   :  { %v13769_v31 = vpop.eup %13768  ;;  %v890_v22 = vmul.f32 0.0, %v13767_v1  ;;  %13782 = vtanh.f32 %v16269_v63 }
 0x136   :  { %v13771_v38 = vpop.eup %13770  ;;  %v869_v11 = vadd.f32 1.0, %v13769_v31 }
 0x137   :  { %v16279_v43 = vadd.f32 %v896_v19, %v890_v22  ;;  %v868_v35 = vadd.f32 1.0, %v13771_v38 }
 0x138   :  { %13784 = vrcp.f32 %v869_v11  ;;  %v13773_v34 = vpop.eup %13772 }
 0x139   :  { %13786 = vtanh.f32 %v16271_v36  ;;  %v13775_v42 = vpop.eup %13774  ;;  %v871_v8 = vadd.f32 1.0, %v13773_v34 }
 0x13a   :  { %13788 = vrcp.f32 %v868_v35  ;;  %v870_v40 = vadd.f32 1.0, %v13775_v42 }
 0x13b   :  { %13790 = vtanh.f32 %v16273_v10 }
 0x13c   :  { %13792 = vrcp.f32 %v871_v8  ;;  %v13777_v51 = vpop.eup %13776 }
 0x13d   :  { %13794 = vrcp.f32 %v870_v40  ;;  %v13779_v59 = vpop.eup %13778  ;;  %v873_v23 = vadd.f32 1.0, %v13777_v51 }
 0x13e   :  { %13796 = vtanh.f32 %v16275_v16  ;;  %v872_v44 = vadd.f32 1.0, %v13779_v59  ;;  %v13781_v20 = vpop.eup %13780 }
 0x13f   :  { %13798 = vtanh.f32 %v16279_v43  ;;  %v13783_v26 = vpop.eup %13782 }
 0x140   :  { %13800 = vrcp.f32 %v873_v23 }
 0x141   :  { %13802 = vrcp.f32 %v872_v44 }
 0x142   :  { %v13785_v39 = vpop.eup %13784 }
 0x143   :  { %v13787_v55 = vpop.eup %13786  ;;  %v911_v9 = vmul.f32 %v13785_v39, %v13781_v20  ;;  %v20479_v20 = vld [vmem:[#allocation31_spill] sm:$0xff] }
 0x144   :  { %v13789_v27 = vpop.eup %13788 }
 0x145   :  { %v13791_v24 = vpop.eup %13790  ;;  %v910_v14 = vmul.f32 %v13789_v27, %v13783_v26 }
 0x146   :  { %v13793_v47 = vpop.eup %13792 }
 0x147   :  { %v13795_v32 = vpop.eup %13794  ;;  %v12741_v19 = vpack.c.bf16 %v911_v9, %v910_v14  ;;  %v913_v1 = vmul.f32 %v13793_v47, %v13787_v55  ;;  %v20480_v55 = vld [vmem:[#allocation32_spill] sm:$0xff]  ;;  %v20481_v47 = vld [vmem:[#allocation25_spill] sm:$0xff] }
 0x148   :  { %v13797_v31 = vpop.eup %13796  ;;  %v912_v22 = vmul.f32 %v13795_v32, %v13791_v24 }
 0x149   :  { %v13799_v38 = vpop.eup %13798  ;;  %12742 = vmatprep.subr.bf16.mxu1 %v12741_v19 }
 0x14a   :  { %v13801_v11 = vpop.eup %13800  ;;  %12744 = vmatpush3.bf16.msra.mxu1 %v12741_v19  ;;  %v12745_v35 = vpack.c.bf16 %v913_v1, %v912_v22  ;;  %v20482_v1 = vld [vmem:[#allocation23_spill] sm:$0xff] }
 0x14b   :  { %v13803_v34 = vpop.eup %13802  ;;  %v915_v42 = vmul.f32 %v13801_v11, %v13797_v31 }
 0x14c   :  { %12746 = vmatprep.subr.bf16.mxu1 %v12745_v35  ;;  %v914_v8 = vmul.f32 %v13803_v34, %v13799_v38 }
 0x14e   :  { %12748 = vmatpush3.bf16.msra.mxu1 %v12745_v35  ;;  %v12749_v40 = vpack.c.bf16 %v915_v42, %v914_v8 }
 0x150   :  { %12750 = vmatprep.subr.bf16.mxu1 %v12749_v40 }
 0x152   :  { %12752 = vmatpush3.bf16.msra.mxu1 %v12749_v40  ;;  %v20483_v40 = vld [vmem:[#allocation29_spill] sm:$0xff] }
 0x155   :  { %11478 = vmatmul.mubr.msk.f32.vlgmr.msra.gmra.mrb[4].mxu1 %vm490_vm2, %v15901_v46  ;;  %v9502_v46 = vld [vmem:[%s20100_s0 + $0x4] sm:$0x3] }
 0x156   :  { %11480 = vmatprep.mubr.msk.f32.mxu1 %vm490_vm2, %v15909_v48  ;;  %11513 = vmatprep.subr.msk.mxu0 %vm301_vm0, %v9502_v46  ;;  %v20466_v48 = vld [vmem:[#allocation18_spill] sm:$0xff] }
 0x157   :  { %11514 = vmatpush3.msk.msra.mxu0 %vm301_vm0, %v9502_v46 }
 0x158   :  { %11516 = vmatmul.mubr.msk.f32.vlgmr.msra.gmra.mrb[24].mxu0 %vm228_vm1, %v15674_v3  ;;  %v20459_v3 = vld [vmem:[#allocation11_spill] sm:$0xff] }
 0x159   :  { %11481 = vmatmul.mubr.msk.f32.gmra.mrb[6].mxu1 %vm490_vm2, %v15921_v50  ;;  %11518 = vmatprep.mubr.msk.f32.mxu0 %vm228_vm1, %v15682_v4  ;;  %v20460_v4 = vld [vmem:[#allocation12_spill] sm:$0xff]  ;;  %v20467_v50 = vld [vmem:[#allocation19_spill] sm:$0xff] }
 0x15a   :  { %11483 = vmatprep.mubr.msk.f32.mxu1 %vm490_vm2, %v15929_v52  ;;  %v20468_v52 = vld [vmem:[#allocation20_spill] sm:$0xff] }
 0x15c   :  { %11519 = vmatmul.mubr.msk.f32.gmra.mrb[26].mxu0 %vm228_vm1, %v15694_v5  ;;  %v20461_v5 = vld [vmem:[#allocation13_spill] sm:$0xff] }
 0x15d   :  { %11484 = vmatmul.mubr.msk.f32.gmra.mrb[8].mxu1 %vm490_vm2, %v15941_v54  ;;  %11521 = vmatprep.mubr.msk.f32.mxu0 %vm228_vm1, %v15699_v7  ;;  %v20462_v7 = vld [vmem:[#allocation14_spill] sm:$0xff]  ;;  %v20469_v54 = vld [vmem:[#allocation21_spill] sm:$0xff] }
 0x15e   :  { %11486 = vmatprep.mubr.msk.f32.mxu1 %vm490_vm2, %v15949_v56  ;;  %v20470_v56 = vld [vmem:[#allocation6_spill] sm:$0xff] }
 0x160   :  { %11522 = vmatmul.mubr.msk.f32.gmra.mrb[28].mxu0 %vm228_vm1, %v15725_v12  ;;  %v20463_v12 = vld [vmem:[#allocation15_spill] sm:$0xff] }
 0x161   :  { %11487 = vmatmul.mubr.msk.f32.gmra.mrb[10].mxu1 %vm490_vm2, %v15961_v58  ;;  %11524 = vmatprep.mubr.msk.f32.mxu0 %vm228_vm1, %v15732_v13  ;;  %v20464_v13 = vld [vmem:[#allocation16_spill] sm:$0xff]  ;;  %v20471_v58 = vld [vmem:[#allocation7_spill] sm:$0xff] }
 0x162   :  { %11489 = vmatprep.mubr.msk.f32.mxu1 %vm490_vm2, %v15969_v60  ;;  %v20472_v60 = vld [vmem:[#allocation8_spill] sm:$0xff] }
 0x164   :  { %11525 = vmatmul.mubr.msk.f32.gmra.mrb[30].mxu0 %vm228_vm1, %v15757_v18  ;;  %v20465_v18 = vld [vmem:[#allocation17_spill] sm:$0xff] }
 0x165   :  { %11490 = vmatmul.mubr.msk.f32.gmra.mrb[12].mxu1 %vm490_vm2, %v15981_v62  ;;  %v20473_v62 = vld [vmem:[#allocation9_spill] sm:$0xff] }
 0x166   :  { %11492 = vmatprep.mubr.msk.f32.mxu1 %vm490_vm2, %v15989_v0  ;;  %v20474_v0 = vld [vmem:[#allocation22_spill] sm:$0xff] }
 0x169   :  { %11493 = vmatmul.mubr.msk.f32.gmra.mrb[14].mxu1 %vm490_vm2, %v16001_v6 }
 0x16a   :  { %11495 = vmatprep.mubr.msk.f32.mxu1 %vm490_vm2, %v16009_v15  ;;  %v20475_v15 = vld [vmem:[#allocation26_spill] sm:$0xff] }
 0x16d   :  { %11496 = vmatmul.mubr.msk.f32.gmra.mrb[16].mxu1 %vm490_vm2, %v16021_v17 }
 0x16e   :  { %11498 = vmatprep.mubr.msk.f32.mxu1 %vm490_vm2, %v16029_v21 }
 0x171   :  { %11499 = vmatmul.mubr.msk.f32.gmra.mrb[18].mxu1 %vm490_vm2, %v16041_v25  ;;  %v20476_v25 = vld [vmem:[#allocation24_spill] sm:$0xff] }
 0x172   :  { %11501 = vmatprep.mubr.msk.f32.mxu1 %vm490_vm2, %v16049_v29 }
 0x175   :  { %11502 = vmatmul.mubr.msk.f32.gmra.mrb[20].mxu1 %vm490_vm2, %v16061_v33 }
 0x176   :  { %11504 = vmatprep.mubr.msk.f32.mxu1 %vm490_vm2, %v16069_v37 }
 0x179   :  { %11505 = vmatmul.mubr.msk.f32.gmra.mrb[22].mxu1 %vm490_vm2, %v16081_v41 }
 0x17a   :  { %11507 = vmatprep.mubr.msk.f32.mxu1 %vm490_vm2, %v16089_v45  ;;  %v20477_v45 = vld [vmem:[#allocation27_spill] sm:$0xff] }
 0x17d   :  { %11508 = vmatmul.mubr.msk.f32.gmra.mrb[24].mxu1 %vm490_vm2, %v16101_v49 }
 0x17e   :  { %11510 = vmatprep.mubr.msk.f32.mxu1 %vm490_vm2, %v16109_v53 }
 0x181   :  { %11511 = vmatmul.mubr.msk.f32.gmra.mrb[26].mxu1 %vm490_vm2, %v16121_v57  ;;  %v20478_v57 = vld [vmem:[#allocation28_spill] sm:$0xff] }
 0x182   :  { %11601 = vmatprep.mubr.msk.f32.mxu1 %vm228_vm1, %v15669_v2  ;;  %v20458_v2 = vld [vmem:[#allocation10_spill] sm:$0xff] }
 0x183   :  { %11527 = vmatprep.mubr.msk.f32.mxu0 %vm228_vm1, %v20458_v2 }
 0x184   :  { %11528 = vmatmul.mubr.msk.f32.gmra.mrb[32].mxu0 %vm228_vm1, %v20459_v3  ;;  %v20484_v3 = vld [vmem:[#allocation30_spill] sm:$0xff] }
 0x185   :  { %11530 = vmatprep.mubr.msk.f32.mxu0 %vm228_vm1, %v20460_v4 }
 0x188   :  { %11531 = vmatmul.mubr.msk.f32.gmra.mrb[34].mxu0 %vm228_vm1, %v20461_v5 }
 0x189   :  { %11533 = vmatprep.mubr.msk.f32.mxu0 %vm228_vm1, %v20462_v7 }
 0x18c   :  { %11534 = vmatmul.mubr.msk.f32.gmra.mrb[36].mxu0 %vm228_vm1, %v20463_v12 }
 0x18d   :  { %11536 = vmatprep.mubr.msk.f32.mxu0 %vm228_vm1, %v20464_v13 }
 0x190   :  { %11537 = vmatmul.mubr.msk.f32.gmra.mrb[38].mxu0 %vm228_vm1, %v20465_v18 }
 0x191   :  { %11539 = vmatprep.mubr.msk.f32.mxu0 %vm228_vm1, %v20466_v48 }
 0x194   :  { %11540 = vmatmul.mubr.msk.f32.gmra.mrb[40].mxu0 %vm228_vm1, %v20467_v50 }
 0x195   :  { %11542 = vmatprep.mubr.msk.f32.mxu0 %vm228_vm1, %v20468_v52  ;;  %v20485_v52 = vld [vmem:[#allocation33_spill] sm:$0xff] }
 0x198   :  { %11543 = vmatmul.mubr.msk.f32.gmra.mrb[42].mxu0 %vm228_vm1, %v20469_v54 }
 0x199   :  { %11545 = vmatprep.mubr.msk.f32.mxu0 %vm228_vm1, %v20470_v56 }
 0x19c   :  { %11546 = vmatmul.mubr.msk.f32.gmra.mrb[44].mxu0 %vm228_vm1, %v20471_v58  ;;  %v20486_v58 = vld [vmem:[#allocation34_spill] sm:$0xff] }
 0x19d   :  { %11548 = vmatprep.mubr.msk.f32.mxu0 %vm228_vm1, %v20472_v60 }
 0x1a0   :  { %11549 = vmatmul.mubr.msk.f32.gmra.mrb[46].mxu0 %vm228_vm1, %v20473_v62 }
 0x1a1   :  { %11563 = vmatprep.mubr.msk.f32.mxu0 %vm490_vm2, %v20474_v0 }
 0x228   :  { %v11479_v6 = vpop.f32.mrb[4].mxu1 }
 0x229   :  { %v12963_v17 = vadd.f32 %v11479_v6, %v20475_v15  ;;  %v1172_v21 = vpop.f32.mrb[5].mxu1 }
 0x22a   :  { %v12964_v29 = vadd.f32 %v1172_v21, %v20476_v25 }
 0x22b   :  { %v9485_v33 = vmul.f32 -1.442695, %v12963_v17 }
 0x22c   :  { %v9484_v37 = vmul.f32 -1.442695, %v12964_v29  ;;  %v11482_v41 = vpop.f32.mrb[6].mxu1 }
 0x22d   :  { %13804 = vpow2.f32 %v9485_v33  ;;  %v12965_v49 = vadd.f32 %v11482_v41, %v20477_v45  ;;  %v1182_v53 = vpop.f32.mrb[7].mxu1 }
 0x22e   :  { %13806 = vpow2.f32 %v9484_v37  ;;  %v12966_v51 = vadd.f32 %v1182_v53, %v20478_v57  ;;  %v20487_v37 = vld [vmem:[#allocation35_spill] sm:$0xff] }
 0x22f   :  { %v9487_v59 = vmul.f32 -1.442695, %v12965_v49 }
 0x230   :  { %v9486_v23 = vmul.f32 -1.442695, %v12966_v51  ;;  %v11485_v44 = vpop.f32.mrb[8].mxu1  ;;  %v20488_v51 = vld [vmem:[#allocation36_spill] sm:$0xff] }
 0x231   :  { %13808 = vpow2.f32 %v9487_v59  ;;  %v12967_v26 = vadd.f32 %v11485_v44, %v20479_v20  ;;  %v1192_v39 = vpop.f32.mrb[9].mxu1 }
 0x232   :  { %13810 = vpow2.f32 %v9486_v23  ;;  %v12968_v9 = vadd.f32 %v1192_v39, %v20480_v55 }
 0x233   :  { %v9489_v27 = vmul.f32 -1.442695, %v12967_v26 }
 0x234   :  { %v9488_v24 = vmul.f32 -1.442695, %v12968_v9  ;;  %v11488_v14 = vpop.f32.mrb[10].mxu1  ;;  %v20489_v9 = vld [vmem:[#allocation41_spill] sm:$0xff] }
 0x235   :  { %13812 = vpow2.f32 %v9489_v27  ;;  %v12969_v32 = vadd.f32 %v11488_v14, %v20481_v47  ;;  %v1202_v19 = vpop.f32.mrb[11].mxu1 }
 0x236   :  { %13814 = vpow2.f32 %v9488_v24  ;;  %v12970_v31 = vadd.f32 %v1202_v19, %v20482_v1 }
 0x237   :  { %v13805_v22 = vpop.eup %13804  ;;  %v9491_v38 = vmul.f32 -1.442695, %v12969_v32 }
 0x238   :  { %v13807_v11 = vpop.eup %13806  ;;  %v1334_v35 = vadd.f32 1.0, %v13805_v22  ;;  %v9490_v34 = vmul.f32 -1.442695, %v12970_v31  ;;  %v11491_v42 = vpop.f32.mrb[12].mxu1  ;;  %v20490_v31 = vld [vmem:[#allocation42_spill] sm:$0xff] }
 0x239   :  { %v1333_v8 = vadd.f32 1.0, %v13807_v11  ;;  %13816 = vpow2.f32 %v9491_v38  ;;  %v12971_v46 = vadd.f32 %v11491_v42, %v20483_v40  ;;  %v1212_v2 = vpop.f32.mrb[13].mxu1  ;;  %v20491_v42 = vld [vmem:[#allocation43_spill] sm:$0xff] }
 0x23a   :  { %13818 = vrcp.f32 %v1334_v35  ;;  %v12972_v4 = vadd.f32 %v1212_v2, %v20484_v3 }
 0x23b   :  { %v13809_v5 = vpop.eup %13808  ;;  %13820 = vrcp.f32 %v1333_v8  ;;  %v9493_v7 = vmul.f32 -1.442695, %v12971_v46 }
 0x23c   :  { %v13811_v12 = vpop.eup %13810  ;;  %v1336_v13 = vadd.f32 1.0, %v13809_v5  ;;  %13822 = vpow2.f32 %v9490_v34  ;;  %v9492_v18 = vmul.f32 -1.442695, %v12972_v4  ;;  %v11494_v48 = vpop.f32.mrb[14].mxu1 }
 0x23d   :  { %v1335_v50 = vadd.f32 1.0, %v13811_v12  ;;  %13824 = vpow2.f32 %v9493_v7  ;;  %v12973_v54 = vadd.f32 %v11494_v48, %v20485_v52  ;;  %v1222_v56 = vpop.f32.mrb[15].mxu1  ;;  %v20492_v7 = vld [vmem:[#allocation44_spill] sm:$0xff] }
 0x23e   :  { %13826 = vrcp.f32 %v1336_v13  ;;  %v12974_v60 = vadd.f32 %v1222_v56, %v20486_v58 }
 0x23f   :  { %v13813_v62 = vpop.eup %13812  ;;  %13828 = vrcp.f32 %v1335_v50  ;;  %v9495_v0 = vmul.f32 -1.442695, %v12973_v54  ;;  %v20493_v54 = vld [vmem:[#allocation37_spill] sm:$0xff] }
 0x240   :  { %v13815_v6 = vpop.eup %13814  ;;  %v1338_v17 = vadd.f32 1.0, %v13813_v62  ;;  %13830 = vpow2.f32 %v9492_v18  ;;  %v9494_v21 = vmul.f32 -1.442695, %v12974_v60  ;;  %v11497_v29 = vpop.f32.mrb[16].mxu1 }
 0x241   :  { %v1337_v33 = vadd.f32 1.0, %v13815_v6  ;;  %13832 = vpow2.f32 %v9495_v0  ;;  %v12975_v41 = vadd.f32 %v11497_v29, %v20487_v37  ;;  %v1232_v49 = vpop.f32.mrb[17].mxu1  ;;  %v20494_v0 = vld [vmem:[#allocation38_spill] sm:$0xff] }
 0x242   :  { %13834 = vrcp.f32 %v1338_v17  ;;  %v12976_v59 = vadd.f32 %v1232_v49, %v20488_v51 }
 0x243   :  { %v13817_v53 = vpop.eup %13816  ;;  %13836 = vrcp.f32 %v1337_v33 }
 0x244   :  { %v13819_v23 = vpop.eup %13818  ;;  %v1370_v44 = vadd.f32 1.0, %v13817_v53  ;;  %13838 = vpow2.f32 %v9494_v21  ;;  %v11500_v26 = vpop.f32.mrb[18].mxu1 }
 0x245   :  { %v13821_v39 = vpop.eup %13820  ;;  %13840 = vtanh.f32 %v12975_v41  ;;  %v12977_v27 = vadd.f32 %v11500_v26, %v20489_v9  ;;  %v1242_v24 = vpop.f32.mrb[19].mxu1  ;;  %v20495_v26 = vld [vmem:[#allocation39_spill] sm:$0xff] }
 0x246   :  { %v13823_v14 = vpop.eup %13822  ;;  %13842 = vrcp.f32 %v1370_v44  ;;  %v12978_v22 = vadd.f32 %v1242_v24, %v20490_v31 }
 0x247   :  { %v13825_v32 = vpop.eup %13824  ;;  %v1369_v19 = vadd.f32 1.0, %v13823_v14  ;;  %13844 = vtanh.f32 %v12976_v59 }
 0x248   :  { %v13827_v38 = vpop.eup %13826  ;;  %v1372_v11 = vadd.f32 1.0, %v13825_v32  ;;  %13846 = vtanh.f32 %v12977_v27  ;;  %v11503_v35 = vpop.f32.mrb[20].mxu1 }
 0x249   :  { %v13829_v34 = vpop.eup %13828  ;;  %13848 = vrcp.f32 %v1369_v19  ;;  %v12979_v8 = vadd.f32 %v11503_v35, %v20491_v42  ;;  %v1252_v46 = vpop.f32.mrb[21].mxu1  ;;  %v20496_v19 = vld [vmem:[#allocation40_spill] sm:$0xff] }
 0x24a   :  { %v13831_v2 = vpop.eup %13830  ;;  %13850 = vrcp.f32 %v1372_v11  ;;  %v12980_v12 = vadd.f32 %v1252_v46, %v20492_v7 }
 0x24b   :  { %v13833_v4 = vpop.eup %13832  ;;  %v1371_v5 = vadd.f32 1.0, %v13831_v2  ;;  %13852 = vtanh.f32 %v12978_v22 }
 0x24c   :  { %v13835_v13 = vpop.eup %13834  ;;  %v1374_v18 = vadd.f32 1.0, %v13833_v4  ;;  %13854 = vtanh.f32 %v12979_v8  ;;  %v11506_v48 = vpop.f32.mrb[22].mxu1 }
 0x24d   :  { %v13837_v50 = vpop.eup %13836  ;;  %13856 = vrcp.f32 %v1371_v5  ;;  %v12981_v56 = vadd.f32 %v11506_v48, %v20493_v54  ;;  %v1262_v60 = vpop.f32.mrb[23].mxu1 }
 0x24e   :  { %v13839_v62 = vpop.eup %13838  ;;  %13858 = vrcp.f32 %v1374_v18  ;;  %v12982_v6 = vadd.f32 %v1262_v60, %v20494_v0 }
 0x24f   :  { %v13841_v17 = vpop.eup %13840  ;;  %v1373_v21 = vadd.f32 1.0, %v13839_v62  ;;  %13860 = vtanh.f32 %v12980_v12  ;;  %v9497_v29 = vmul.f32 -1.442695, %v12981_v56 }
 0x250   :  { %v13843_v33 = vpop.eup %13842  ;;  %v1436_v41 = vmul.f32 %v13841_v17, %v13819_v23  ;;  %v9496_v49 = vmul.f32 -1.442695, %v12982_v6  ;;  %v11509_v53 = vpop.f32.mrb[24].mxu1 }
 0x251   :  { %v13845_v59 = vpop.eup %13844  ;;  %v1430_v44 = vmul.f32 %v13843_v33, %v16265_v61  ;;  %13862 = vrcp.f32 %v1373_v21  ;;  %v12983_v27 = vadd.f32 %v11509_v53, %v20495_v26  ;;  %v1272_v24 = vpop.f32.mrb[25].mxu1 }
 0x252   :  { %v13847_v14 = vpop.eup %13846  ;;  %v1435_v32 = vmul.f32 %v13845_v59, %v13821_v39  ;;  %13864 = vpow2.f32 %v9497_v29  ;;  %v12984_v22 = vadd.f32 %v1272_v24, %v20496_v19 }
 0x253   :  { %v13849_v11 = vpop.eup %13848  ;;  %v16409_v35 = vadd.f32 %v1436_v41, %v1430_v44  ;;  %v1438_v8 = vmul.f32 %v13847_v14, %v13827_v38  ;;  %13866 = vpow2.f32 %v9496_v49  ;;  %v9499_v23 = vmul.f32 -1.442695, %v12983_v27 }
 0x254   :  { %v13851_v46 = vpop.eup %13850  ;;  %v1429_v2 = vmul.f32 %v13849_v11, %v16269_v63  ;;  %v9498_v4 = vmul.f32 -1.442695, %v12984_v22  ;;  %v11512_v61 = vpop.f32.mrb[26].mxu1 }
 0x255   :  { %v13853_v5 = vpop.eup %13852  ;;  %v1432_v12 = vmul.f32 %v13851_v46, %v16271_v36  ;;  %v12985_v18 = vadd.f32 %v11512_v61, %v16244_v30  ;;  %v1282_v39 = vpop.f32.mrb[27].mxu1  ;;  %13868 = vpow2.f32 %v9499_v23 }
 0x256   :  { %v13855_v48 = vpop.eup %13854  ;;  %v16414_v56 = vadd.f32 %v1435_v32, %v1429_v2  ;;  %v1437_v60 = vmul.f32 %v13853_v5, %v13829_v34  ;;  %v12986_v38 = vadd.f32 %v1282_v39, %v16247_v28  ;;  %13870 = vpow2.f32 %v9498_v4 }
 0x257   :  { %v13857_v62 = vpop.eup %13856  ;;  %v16417_v6 = vadd.f32 %v1438_v8, %v1432_v12  ;;  %v1440_v17 = vmul.f32 %v13855_v48, %v13835_v13  ;;  %v9501_v63 = vmul.f32 -1.442695, %v12985_v18 }
 0x258   :  { %v13859_v21 = vpop.eup %13858  ;;  %v1431_v29 = vmul.f32 %v13857_v62, %v16273_v10  ;;  %v9500_v36 = vmul.f32 -1.442695, %v12986_v38 }
 0x259   :  { %v13861_v33 = vpop.eup %13860  ;;  %v1434_v41 = vmul.f32 %v13859_v21, %v16275_v16  ;;  %13872 = vpow2.f32 %v9501_v63 }
 0x25a   :  { %v16421_v49 = vadd.f32 %v1437_v60, %v1431_v29  ;;  %v1439_v53 = vmul.f32 %v13861_v33, %v13837_v50  ;;  %13874 = vpow2.f32 %v9500_v36 }
 0x25b   :  { %v13863_v34 = vpop.eup %13862  ;;  %v16423_v59 = vadd.f32 %v1440_v17, %v1434_v41  ;;  %13876 = vtanh.f32 %v16409_v35 }
 0x25c   :  { %v13865_v44 = vpop.eup %13864  ;;  %v1433_v13 = vmul.f32 %v13863_v34, %v16279_v43  ;;  %13878 = vtanh.f32 %v16414_v56 }
 0x25d   :  { %v13867_v27 = vpop.eup %13866  ;;  %v1412_v24 = vadd.f32 1.0, %v13865_v44  ;;  %v16437_v44 = vld [vmem:[%s20104_s4 + $0x8] sm:$0xff] }
 0x25e   :  { %v16428_v10 = vadd.f32 %v1439_v53, %v1433_v13  ;;  %v1411_v16 = vadd.f32 1.0, %v13867_v27  ;;  %v16444_v13 = vld [vmem:[%s20104_s4 + $0x10] sm:$0xff]  ;;  %v16451_v27 = vld [vmem:[%s20104_s4 + $0x18] sm:$0xff] }
 0x25f   :  { %13880 = vrcp.f32 %v1412_v24  ;;  %v13869_v14 = vpop.eup %13868  ;;  %v16458_v24 = vld [vmem:[%s20104_s4 + $0x20] sm:$0xff] }
 0x260   :  { %13882 = vtanh.f32 %v16417_v6  ;;  %v13871_v50 = vpop.eup %13870  ;;  %v1414_v32 = vadd.f32 1.0, %v13869_v14  ;;  %v16472_v14 = vld [vmem:[%s20104_s4 + $0x30] sm:$0xff] }
 0x261   :  { %13884 = vrcp.f32 %v1411_v16  ;;  %v1413_v22 = vadd.f32 1.0, %v13871_v50  ;;  %v16465_v16 = vld [vmem:[%s20104_s4 + $0x28] sm:$0xff]  ;;  %v16479_v50 = vld [vmem:[%s20104_s4 + $0x38] sm:$0xff] }
 0x262   :  { %13886 = vtanh.f32 %v16421_v49 }
 0x263   :  { %13888 = vrcp.f32 %v1414_v32  ;;  %v13873_v43 = vpop.eup %13872  ;;  %v16486_v32 = vld [vmem:[%s20104_s4 + $0x40] sm:$0xff] }
 0x264   :  { %13890 = vrcp.f32 %v1413_v22  ;;  %v13875_v11 = vpop.eup %13874  ;;  %v1416_v8 = vadd.f32 1.0, %v13873_v43  ;;  %v16493_v22 = vld [vmem:[%s20104_s4 + $0x48] sm:$0xff]  ;;  %v16500_v43 = vld [vmem:[%s20104_s4 + $0x50] sm:$0xff] }
 0x265   :  { %13892 = vtanh.f32 %v16423_v59  ;;  %v1415_v23 = vadd.f32 1.0, %v13875_v11  ;;  %v13877_v46 = vpop.eup %13876  ;;  %v16507_v11 = vld [vmem:[%s20104_s4 + $0x58] sm:$0xff] }
 0x266   :  { %13894 = vtanh.f32 %v16428_v10  ;;  %v13879_v2 = vpop.eup %13878 }
 0x267   :  { %13896 = vrcp.f32 %v1416_v8  ;;  %v16514_v8 = vld [vmem:[%s20104_s4 + $0x60] sm:$0xff] }
 0x268   :  { %13898 = vrcp.f32 %v1415_v23  ;;  %v16521_v23 = vld [vmem:[%s20104_s4 + $0x68] sm:$0xff] }
 0x269   :  { %v13881_v4 = vpop.eup %13880 }
 0x26a   :  { %v13883_v61 = vpop.eup %13882  ;;  %v1454_v5 = vmul.f32 %v13881_v4, %v13877_v46  ;;  %v16528_v46 = vld [vmem:[%s20104_s4 + $0x70] sm:$0xff]  ;;  %v16542_v4 = vld [vmem:[%s20104_s4 + $0x80] sm:$0xff] }
 0x26b   :  { %v13885_v12 = vpop.eup %13884 }
 0x26c   :  { %v13887_v18 = vpop.eup %13886  ;;  %v1453_v39 = vmul.f32 %v13885_v12, %v13879_v2  ;;  %v16535_v2 = vld [vmem:[%s20104_s4 + $0x78] sm:$0xff] }
 0x26d   :  { %v13889_v48 = vpop.eup %13888  ;;  %v16563_v12 = vld [vmem:[%s20104_s4 + $0x98] sm:$0xff] }
 0x26e   :  { %v13891_v60 = vpop.eup %13890  ;;  %v12753_v38 = vpack.c.bf16 %v1454_v5, %v1453_v39  ;;  %v1456_v62 = vmul.f32 %v13889_v48, %v13883_v61  ;;  %v16549_v61 = vld [vmem:[%s20104_s4 + $0x88] sm:$0xff]  ;;  %v16556_v5 = vld [vmem:[%s20104_s4 + $0x90] sm:$0xff] }
 0x26f   :  { %v13893_v17 = vpop.eup %13892  ;;  %v1455_v63 = vmul.f32 %v13891_v60, %v13887_v18  ;;  %v16570_v18 = vld [vmem:[%s20104_s4 + $0xa0] sm:$0xff]  ;;  %v16577_v39 = vld [vmem:[%s20104_s4 + $0xa8] sm:$0xff]  ;;  %v16584_v48 = vld [vmem:[%s20104_s4 + $0xb0] sm:$0xff] }
 0x270   :  { %v13895_v21 = vpop.eup %13894  ;;  %12754 = vmatprep.subr.bf16.mxu0 %v12753_v38  ;;  %20497 = vst [vmem:[#allocation10_spill] sm:$0xff] %v16577_v39  ;;  %20498 = vst [vmem:[#allocation11_spill] sm:$0xff] %v16584_v48  ;;  %v16591_v60 = vld [vmem:[%s20104_s4 + $0xb8] sm:$0xff] }
 0x271   :  { %v13897_v29 = vpop.eup %13896  ;;  %12756 = vmatpush3.bf16.msra.mxu0 %v12753_v38  ;;  %v12757_v36 = vpack.c.bf16 %v1456_v62, %v1455_v63  ;;  %20499 = vst [vmem:[#allocation12_spill] sm:$0xff] %v16591_v60  ;;  %v16598_v38 = vld [vmem:[%s20102_s2] sm:$0xff]  ;;  %v16617_v63 = vld [vmem:[%s20102_s2 + $0x10] sm:$0xff] }
 0x272   :  { %v13899_v33 = vpop.eup %13898  ;;  %v1458_v41 = vmul.f32 %v13897_v29, %v13893_v17  ;;  %20500 = vst [vmem:[#allocation13_spill] sm:$0xff] %v16598_v38  ;;  %v9570_v62 = vld [vmem:[%s20100_s0 + $0x6] sm:$0x3]  ;;  %v16610_v17 = vld [vmem:[%s20102_s2 + $0x8] sm:$0xff]  ;;  %20502 = vst [vmem:[#allocation15_spill] sm:$0xff] %v16617_v63 }
 0x273   :  { %12758 = vmatprep.subr.bf16.mxu0 %v12757_v36  ;;  %v1457_v53 = vmul.f32 %v13899_v33, %v13895_v21  ;;  %11599 = vmatprep.subr.msk.mxu1 %vm301_vm0, %v9570_v62  ;;  %20501 = vst [vmem:[#allocation14_spill] sm:$0xff] %v16610_v17  ;;  %v16624_v21 = vld [vmem:[%s20102_s2 + $0x18] sm:$0xff]  ;;  %v16631_v29 = vld [vmem:[%s20102_s2 + $0x20] sm:$0xff]  ;;  %v16645_v33 = vld [vmem:[%s20102_s2 + $0x30] sm:$0xff] }
 0x274   :  { %11600 = vmatpush3.msk.msra.mxu1 %vm301_vm0, %v9570_v62  ;;  %20503 = vst [vmem:[#allocation16_spill] sm:$0xff] %v16624_v21  ;;  %20504 = vst [vmem:[#allocation17_spill] sm:$0xff] %v16631_v29  ;;  %v16673_v62 = vld [vmem:[%s20102_s2 + $0x50] sm:$0xff] }
 0x275   :  { %12760 = vmatpush3.bf16.msra.mxu0 %v12757_v36  ;;  %v12761_v34 = vpack.c.bf16 %v1458_v41, %v1457_v53  ;;  %11602 = vmatmul.mubr.msk.f32.vlgmr.msra.gmra.mrb[28].mxu1 %vm228_vm1, %v16610_v17  ;;  %v16638_v36 = vld [vmem:[%s20102_s2 + $0x28] sm:$0xff]  ;;  %20506 = vst [vmem:[#allocation19_spill] sm:$0xff] %v16645_v33  ;;  %v16652_v41 = vld [vmem:[%s20102_s2 + $0x38] sm:$0xff]  ;;  %v16659_v53 = vld [vmem:[%s20102_s2 + $0x40] sm:$0xff] }
 0x276   :  { %11604 = vmatprep.mubr.msk.f32.mxu1 %vm228_vm1, %v16617_v63  ;;  %20505 = vst [vmem:[#allocation18_spill] sm:$0xff] %v16638_v36  ;;  %20507 = vst [vmem:[#allocation20_spill] sm:$0xff] %v16652_v41 }
 0x277   :  { %12762 = vmatprep.subr.bf16.mxu0 %v12761_v34  ;;  %20508 = vst [vmem:[#allocation21_spill] sm:$0xff] %v16659_v53  ;;  %20510 = vst [vmem:[#allocation7_spill] sm:$0xff] %v16673_v62 }
 0x279   :  { %12764 = vmatpush3.bf16.msra.mxu0 %v12761_v34  ;;  %11605 = vmatmul.mubr.msk.f32.gmra.mrb[30].mxu1 %vm228_vm1, %v16624_v21  ;;  %v16666_v34 = vld [vmem:[%s20102_s2 + $0x48] sm:$0xff] }
 0x27a   :  { %11607 = vmatprep.mubr.msk.f32.mxu1 %vm228_vm1, %v16631_v29  ;;  %20509 = vst [vmem:[#allocation6_spill] sm:$0xff] %v16666_v34 }
 0x27c   :  { %11564 = vmatmul.mubr.msk.f32.vlgmr.msra.gmra.mrb[24].mxu0 %vm490_vm2, %v16437_v44 }
 0x27d   :  { %11566 = vmatprep.mubr.msk.f32.mxu0 %vm490_vm2, %v16444_v13  ;;  %11608 = vmatmul.mubr.msk.f32.gmra.mrb[32].mxu1 %vm228_vm1, %v16638_v36 }
 0x27e   :  { %11610 = vmatprep.mubr.msk.f32.mxu1 %vm228_vm1, %v16645_v33 }
 0x280   :  { %11567 = vmatmul.mubr.msk.f32.gmra.mrb[26].mxu0 %vm490_vm2, %v16451_v27 }
 0x281   :  { %11569 = vmatprep.mubr.msk.f32.mxu0 %vm490_vm2, %v16458_v24  ;;  %11611 = vmatmul.mubr.msk.f32.gmra.mrb[34].mxu1 %vm228_vm1, %v16652_v41 }
 0x282   :  { %11613 = vmatprep.mubr.msk.f32.mxu1 %vm228_vm1, %v16659_v53  ;;  %v16680_v53 = vld [vmem:[%s20102_s2 + $0x58] sm:$0xff] }
 0x283   :  { %20511 = vst [vmem:[#allocation8_spill] sm:$0xff] %v16680_v53 }
 0x284   :  { %11570 = vmatmul.mubr.msk.f32.gmra.mrb[28].mxu0 %vm490_vm2, %v16465_v16 }
 0x285   :  { %11572 = vmatprep.mubr.msk.f32.mxu0 %vm490_vm2, %v16472_v14  ;;  %11614 = vmatmul.mubr.msk.f32.gmra.mrb[36].mxu1 %vm228_vm1, %v16666_v34  ;;  %v16687_v34 = vld [vmem:[%s20102_s2 + $0x60] sm:$0xff] }
 0x286   :  { %11616 = vmatprep.mubr.msk.f32.mxu1 %vm228_vm1, %v16673_v62  ;;  %20512 = vst [vmem:[#allocation9_spill] sm:$0xff] %v16687_v34  ;;  %v16694_v62 = vld [vmem:[%s20102_s2 + $0x68] sm:$0xff] }
 0x287   :  { %20513 = vst [vmem:[#allocation22_spill] sm:$0xff] %v16694_v62 }
 0x288   :  { %11573 = vmatmul.mubr.msk.f32.gmra.mrb[30].mxu0 %vm490_vm2, %v16479_v50 }
 0x289   :  { %11575 = vmatprep.mubr.msk.f32.mxu0 %vm490_vm2, %v16486_v32  ;;  %11617 = vmatmul.mubr.msk.f32.gmra.mrb[38].mxu1 %vm228_vm1, %v16680_v53  ;;  %v16701_v53 = vld [vmem:[%s20102_s2 + $0x70] sm:$0xff] }
 0x28a   :  { %11619 = vmatprep.mubr.msk.f32.mxu1 %vm228_vm1, %v16687_v34  ;;  %20514 = vst [vmem:[#allocation26_spill] sm:$0xff] %v16701_v53  ;;  %v16708_v34 = vld [vmem:[%s20102_s2 + $0x78] sm:$0xff] }
 0x28b   :  { %20515 = vst [vmem:[#allocation27_spill] sm:$0xff] %v16708_v34 }
 0x28c   :  { %11576 = vmatmul.mubr.msk.f32.gmra.mrb[32].mxu0 %vm490_vm2, %v16493_v22 }
 0x28d   :  { %11578 = vmatprep.mubr.msk.f32.mxu0 %vm490_vm2, %v16500_v43  ;;  %11620 = vmatmul.mubr.msk.f32.gmra.mrb[40].mxu1 %vm228_vm1, %v16694_v62  ;;  %v16715_v62 = vld [vmem:[%s20102_s2 + $0x80] sm:$0xff] }
 0x28e   :  { %11622 = vmatprep.mubr.msk.f32.mxu1 %vm228_vm1, %v16701_v53  ;;  %20516 = vst [vmem:[#allocation32_spill] sm:$0xff] %v16715_v62  ;;  %v16722_v53 = vld [vmem:[%s20102_s2 + $0x88] sm:$0xff] }
 0x28f   :  { %20517 = vst [vmem:[#allocation25_spill] sm:$0xff] %v16722_v53 }
 0x290   :  { %11579 = vmatmul.mubr.msk.f32.gmra.mrb[34].mxu0 %vm490_vm2, %v16507_v11 }
 0x291   :  { %11581 = vmatprep.mubr.msk.f32.mxu0 %vm490_vm2, %v16514_v8  ;;  %11623 = vmatmul.mubr.msk.f32.gmra.mrb[42].mxu1 %vm228_vm1, %v16708_v34  ;;  %v16729_v34 = vld [vmem:[%s20102_s2 + $0x90] sm:$0xff] }
 0x292   :  { %11625 = vmatprep.mubr.msk.f32.mxu1 %vm228_vm1, %v16715_v62  ;;  %20518 = vst [vmem:[#allocation29_spill] sm:$0xff] %v16729_v34  ;;  %v16736_v62 = vld [vmem:[%s20102_s2 + $0x98] sm:$0xff] }
 0x293   :  { %20519 = vst [vmem:[#allocation30_spill] sm:$0xff] %v16736_v62 }
 0x294   :  { %11582 = vmatmul.mubr.msk.f32.gmra.mrb[36].mxu0 %vm490_vm2, %v16521_v23 }
 0x295   :  { %11584 = vmatprep.mubr.msk.f32.mxu0 %vm490_vm2, %v16528_v46  ;;  %11626 = vmatmul.mubr.msk.f32.gmra.mrb[44].mxu1 %vm228_vm1, %v16722_v53  ;;  %v16743_v53 = vld [vmem:[%s20102_s2 + $0xa0] sm:$0xff] }
 0x296   :  { %11628 = vmatprep.mubr.msk.f32.mxu1 %vm228_vm1, %v16729_v34  ;;  %20520 = vst [vmem:[#allocation33_spill] sm:$0xff] %v16743_v53  ;;  %v16750_v34 = vld [vmem:[%s20102_s2 + $0xa8] sm:$0xff] }
 0x297   :  { %20521 = vst [vmem:[#allocation34_spill] sm:$0xff] %v16750_v34 }
 0x298   :  { %11585 = vmatmul.mubr.msk.f32.gmra.mrb[38].mxu0 %vm490_vm2, %v16535_v2 }
 0x299   :  { %11587 = vmatprep.mubr.msk.f32.mxu0 %vm490_vm2, %v16542_v4  ;;  %11629 = vmatmul.mubr.msk.f32.gmra.mrb[46].mxu1 %vm228_vm1, %v16736_v62  ;;  %v16757_v62 = vld [vmem:[%s20102_s2 + $0xb0] sm:$0xff] }
 0x29a   :  { %11631 = vmatprep.mubr.msk.f32.mxu1 %vm228_vm1, %v16743_v53  ;;  %20522 = vst [vmem:[#allocation38_spill] sm:$0xff] %v16757_v62  ;;  %v16764_v53 = vld [vmem:[%s20102_s2 + $0xb8] sm:$0xff] }
 0x29b   :  { %20523 = vst [vmem:[#allocation39_spill] sm:$0xff] %v16764_v53 }
 0x29c   :  { %11588 = vmatmul.mubr.msk.f32.gmra.mrb[40].mxu0 %vm490_vm2, %v16549_v61 }
 0x29d   :  { %11590 = vmatprep.mubr.msk.f32.mxu0 %vm490_vm2, %v16556_v5  ;;  %11632 = vmatmul.mubr.msk.f32.gmra.mrb[48].mxu1 %vm228_vm1, %v16750_v34  ;;  %v16771_v34 = vld [vmem:[%s20104_s4] sm:$0xff] }
 0x29e   :  { %11634 = vmatprep.mubr.msk.f32.mxu1 %vm228_vm1, %v16757_v62  ;;  %20524 = vst [vmem:[#allocation40_spill] sm:$0xff] %v16771_v34 }
 0x2a0   :  { %11591 = vmatmul.mubr.msk.f32.gmra.mrb[42].mxu0 %vm490_vm2, %v16563_v12 }
 0x2a1   :  { %11593 = vmatprep.mubr.msk.f32.mxu0 %vm490_vm2, %v16570_v18  ;;  %11635 = vmatmul.mubr.msk.f32.gmra.mrb[50].mxu1 %vm228_vm1, %v16764_v53 }
 0x2a2   :  { %11649 = vmatprep.mubr.msk.f32.mxu1 %vm490_vm2, %v16771_v34 }
 0x2a4   :  { %11594 = vmatmul.mubr.msk.f32.gmra.mrb[44].mxu0 %vm490_vm2, %v16577_v39 }
 0x2a5   :  { %11596 = vmatprep.mubr.msk.f32.mxu0 %vm490_vm2, %v16584_v48 }
 0x2a8   :  { %11597 = vmatmul.mubr.msk.f32.gmra.mrb[46].mxu0 %vm490_vm2, %v16591_v60 }
 0x2a9   :  { %11687 = vmatprep.mubr.msk.f32.mxu0 %vm228_vm1, %v16598_v38 }
 0x34f   :  { %v11565_v41 = vpop.f32.mrb[24].mxu0 }
 0x350   :  { %v12987_v33 = vadd.f32 %v11565_v41, %v20475_v15  ;;  %v1715_v62 = vpop.f32.mrb[25].mxu0 }
 0x351   :  { %v12988_v36 = vadd.f32 %v1715_v62, %v20476_v25 }
 0x352   :  { %v9553_v29 = vmul.f32 -1.442695, %v12987_v33 }
 0x353   :  { %v9552_v21 = vmul.f32 -1.442695, %v12988_v36  ;;  %v11568_v63 = vpop.f32.mrb[26].mxu0 }
 0x354   :  { %13900 = vpow2.f32 %v9553_v29  ;;  %v12989_v53 = vadd.f32 %v11568_v63, %v20477_v45  ;;  %v1725_v17 = vpop.f32.mrb[27].mxu0 }
 0x355   :  { %13902 = vpow2.f32 %v9552_v21  ;;  %v12990_v38 = vadd.f32 %v1725_v17, %v20478_v57 }
 0x356   :  { %v9555_v60 = vmul.f32 -1.442695, %v12989_v53 }
 0x357   :  { %v9554_v48 = vmul.f32 -1.442695, %v12990_v38  ;;  %v11571_v39 = vpop.f32.mrb[28].mxu0 }
 0x358   :  { %13904 = vpow2.f32 %v9555_v60  ;;  %v12991_v34 = vadd.f32 %v11571_v39, %v20479_v20  ;;  %v1735_v41 = vpop.f32.mrb[29].mxu0 }
 0x359   :  { %13906 = vpow2.f32 %v9554_v48  ;;  %v12992_v62 = vadd.f32 %v1735_v41, %v20480_v55 }
 0x35a   :  { %v9557_v33 = vmul.f32 -1.442695, %v12991_v34 }
 0x35b   :  { %v9556_v36 = vmul.f32 -1.442695, %v12992_v62  ;;  %v11574_v25 = vpop.f32.mrb[30].mxu0 }
 0x35c   :  { %13908 = vpow2.f32 %v9557_v33  ;;  %v12993_v63 = vadd.f32 %v11574_v25, %v20481_v47  ;;  %v1745_v29 = vpop.f32.mrb[31].mxu0 }
 0x35d   :  { %13910 = vpow2.f32 %v9556_v36  ;;  %v12994_v17 = vadd.f32 %v1745_v29, %v20482_v1 }
 0x35e   :  { %v13901_v21 = vpop.eup %13900  ;;  %v9559_v38 = vmul.f32 -1.442695, %v12993_v63 }
 0x35f   :  { %v13903_v53 = vpop.eup %13902  ;;  %v1877_v60 = vadd.f32 1.0, %v13901_v21  ;;  %v9558_v57 = vmul.f32 -1.442695, %v12994_v17  ;;  %v11577_v39 = vpop.f32.mrb[32].mxu0 }
 0x360   :  { %v1876_v20 = vadd.f32 1.0, %v13903_v53  ;;  %13912 = vpow2.f32 %v9559_v38  ;;  %v12995_v48 = vadd.f32 %v11577_v39, %v20483_v40  ;;  %v1755_v34 = vpop.f32.mrb[33].mxu0 }
 0x361   :  { %13914 = vrcp.f32 %v1877_v60  ;;  %v12996_v41 = vadd.f32 %v1755_v34, %v20484_v3 }
 0x362   :  { %v13905_v62 = vpop.eup %13904  ;;  %13916 = vrcp.f32 %v1876_v20  ;;  %v9561_v25 = vmul.f32 -1.442695, %v12995_v48 }
 0x363   :  { %v13907_v33 = vpop.eup %13906  ;;  %v1879_v36 = vadd.f32 1.0, %v13905_v62  ;;  %13918 = vpow2.f32 %v9558_v57  ;;  %v9560_v29 = vmul.f32 -1.442695, %v12996_v41  ;;  %v11580_v63 = vpop.f32.mrb[34].mxu0 }
 0x364   :  { %v1878_v1 = vadd.f32 1.0, %v13907_v33  ;;  %13920 = vpow2.f32 %v9561_v25  ;;  %v12997_v17 = vadd.f32 %v11580_v63, %v20485_v52  ;;  %v1765_v21 = vpop.f32.mrb[35].mxu0 }
 0x365   :  { %13922 = vrcp.f32 %v1879_v36  ;;  %v12998_v38 = vadd.f32 %v1765_v21, %v20486_v58 }
 0x366   :  { %v13909_v53 = vpop.eup %13908  ;;  %13924 = vrcp.f32 %v1878_v1  ;;  %v9563_v60 = vmul.f32 -1.442695, %v12997_v17 }
 0x367   :  { %v13911_v39 = vpop.eup %13910  ;;  %v1881_v34 = vadd.f32 1.0, %v13909_v53  ;;  %13926 = vpow2.f32 %v9560_v29  ;;  %v9562_v20 = vmul.f32 -1.442695, %v12998_v38  ;;  %v11583_v48 = vpop.f32.mrb[36].mxu0 }
 0x368   :  { %v1880_v62 = vadd.f32 1.0, %v13911_v39  ;;  %13928 = vpow2.f32 %v9563_v60  ;;  %v12999_v57 = vadd.f32 %v11583_v48, %v20487_v37  ;;  %v1775_v41 = vpop.f32.mrb[37].mxu0 }
 0x369   :  { %13930 = vrcp.f32 %v1881_v34  ;;  %v13000_v33 = vadd.f32 %v1775_v41, %v20488_v51 }
 0x36a   :  { %v13913_v25 = vpop.eup %13912  ;;  %13932 = vrcp.f32 %v1880_v62 }
 0x36b   :  { %v13915_v36 = vpop.eup %13914  ;;  %v1913_v63 = vadd.f32 1.0, %v13913_v25  ;;  %13934 = vpow2.f32 %v9562_v20  ;;  %v11586_v1 = vpop.f32.mrb[38].mxu0 }
 0x36c   :  { %v13917_v17 = vpop.eup %13916  ;;  %13936 = vtanh.f32 %v12999_v57  ;;  %v13001_v29 = vadd.f32 %v11586_v1, %v20489_v9  ;;  %v1785_v21 = vpop.f32.mrb[39].mxu0 }
 0x36d   :  { %v13919_v38 = vpop.eup %13918  ;;  %13938 = vrcp.f32 %v1913_v63  ;;  %v13002_v39 = vadd.f32 %v1785_v21, %v20490_v31 }
 0x36e   :  { %v13921_v53 = vpop.eup %13920  ;;  %v1912_v60 = vadd.f32 1.0, %v13919_v38  ;;  %13940 = vtanh.f32 %v13000_v33 }
 0x36f   :  { %v13923_v34 = vpop.eup %13922  ;;  %v1915_v48 = vadd.f32 1.0, %v13921_v53  ;;  %13942 = vtanh.f32 %v13001_v29  ;;  %v11589_v62 = vpop.f32.mrb[40].mxu0 }
 0x370   :  { %v13925_v41 = vpop.eup %13924  ;;  %13944 = vrcp.f32 %v1912_v60  ;;  %v13003_v20 = vadd.f32 %v11589_v62, %v20491_v42  ;;  %v1795_v25 = vpop.f32.mrb[41].mxu0 }
 0x371   :  { %v13927_v57 = vpop.eup %13926  ;;  %13946 = vrcp.f32 %v1915_v48  ;;  %v13004_v63 = vadd.f32 %v1795_v25, %v20492_v7 }
 0x372   :  { %v13929_v1 = vpop.eup %13928  ;;  %v1914_v9 = vadd.f32 1.0, %v13927_v57  ;;  %13948 = vtanh.f32 %v13002_v39 }
 0x373   :  { %v13931_v38 = vpop.eup %13930  ;;  %v1917_v33 = vadd.f32 1.0, %v13929_v1  ;;  %13950 = vtanh.f32 %v13003_v20  ;;  %v11592_v21 = vpop.f32.mrb[42].mxu0 }
 0x374   :  { %v13933_v31 = vpop.eup %13932  ;;  %13952 = vrcp.f32 %v1914_v9  ;;  %v13005_v29 = vadd.f32 %v11592_v21, %v20493_v54  ;;  %v1805_v53 = vpop.f32.mrb[43].mxu0 }
 0x375   :  { %v13935_v60 = vpop.eup %13934  ;;  %13954 = vrcp.f32 %v1917_v33  ;;  %v13006_v62 = vadd.f32 %v1805_v53, %v20494_v0 }
 0x376   :  { %v13937_v42 = vpop.eup %13936  ;;  %v1916_v48 = vadd.f32 1.0, %v13935_v60  ;;  %13956 = vtanh.f32 %v13004_v63  ;;  %v9565_v57 = vmul.f32 -1.442695, %v13005_v29 }
 0x377   :  { %v13939_v39 = vpop.eup %13938  ;;  %v1979_v51 = vmul.f32 %v13937_v42, %v13915_v36  ;;  %v9564_v25 = vmul.f32 -1.442695, %v13006_v62  ;;  %v11595_v7 = vpop.f32.mrb[44].mxu0 }
 0x378   :  { %v13941_v1 = vpop.eup %13940  ;;  %v1973_v20 = vmul.f32 %v13939_v39, %v16409_v35  ;;  %13958 = vrcp.f32 %v1916_v48  ;;  %v13007_v9 = vadd.f32 %v11595_v7, %v20495_v26  ;;  %v1815_v21 = vpop.f32.mrb[45].mxu0 }
 0x379   :  { %v13943_v54 = vpop.eup %13942  ;;  %v1978_v37 = vmul.f32 %v13941_v1, %v13917_v17  ;;  %13960 = vpow2.f32 %v9565_v57  ;;  %v13008_v33 = vadd.f32 %v1815_v21, %v20496_v19 }
 0x37a   :  { %v13945_v53 = vpop.eup %13944  ;;  %v16798_v60 = vadd.f32 %v1979_v51, %v1973_v20  ;;  %v1981_v63 = vmul.f32 %v13943_v54, %v13923_v34  ;;  %13962 = vpow2.f32 %v9564_v25  ;;  %v9567_v42 = vmul.f32 -1.442695, %v13007_v9 }
 0x37b   :  { %v13947_v36 = vpop.eup %13946  ;;  %v1972_v29 = vmul.f32 %v13945_v53, %v16414_v56  ;;  %v9566_v62 = vmul.f32 -1.442695, %v13008_v33  ;;  %v11598_v35 = vpop.f32.mrb[46].mxu0 }
 0x37c   :  { %v13949_v48 = vpop.eup %13948  ;;  %v1975_v7 = vmul.f32 %v13947_v36, %v16417_v6  ;;  %v13009_v39 = vadd.f32 %v11598_v35, %v16244_v30  ;;  %v1825_v17 = vpop.f32.mrb[47].mxu0  ;;  %13964 = vpow2.f32 %v9567_v42 }
 0x37d   :  { %v13951_v57 = vpop.eup %13950  ;;  %v16803_v1 = vadd.f32 %v1978_v37, %v1972_v29  ;;  %v1980_v21 = vmul.f32 %v13949_v48, %v13925_v41  ;;  %v13010_v51 = vadd.f32 %v1825_v17, %v16247_v28  ;;  %13966 = vpow2.f32 %v9566_v62 }
 0x37e   :  { %v13953_v54 = vpop.eup %13952  ;;  %v16806_v34 = vadd.f32 %v1981_v63, %v1975_v7  ;;  %v1983_v25 = vmul.f32 %v13951_v57, %v13931_v38  ;;  %v9569_v56 = vmul.f32 -1.442695, %v13009_v39 }
 0x37f   :  { %v13955_v20 = vpop.eup %13954  ;;  %v1974_v9 = vmul.f32 %v13953_v54, %v16421_v49  ;;  %v9568_v6 = vmul.f32 -1.442695, %v13010_v51 }
 0x380   :  { %v13957_v33 = vpop.eup %13956  ;;  %v1977_v53 = vmul.f32 %v13955_v20, %v16423_v59  ;;  %13968 = vpow2.f32 %v9569_v56 }
 0x381   :  { %v16810_v36 = vadd.f32 %v1980_v21, %v1974_v9  ;;  %v1982_v37 = vmul.f32 %v13957_v33, %v13933_v31  ;;  %13970 = vpow2.f32 %v9568_v6 }
 0x382   :  { %v13959_v41 = vpop.eup %13958  ;;  %v16812_v42 = vadd.f32 %v1983_v25, %v1977_v53  ;;  %13972 = vtanh.f32 %v16798_v60 }
 0x383   :  { %v13961_v63 = vpop.eup %13960  ;;  %v1976_v38 = vmul.f32 %v13959_v41, %v16428_v10  ;;  %13974 = vtanh.f32 %v16803_v1 }
 0x384   :  { %v13963_v29 = vpop.eup %13962  ;;  %v1955_v62 = vadd.f32 1.0, %v13961_v63 }
 0x385   :  { %v16817_v49 = vadd.f32 %v1982_v37, %v1976_v38  ;;  %v1954_v59 = vadd.f32 1.0, %v13963_v29 }
 0x386   :  { %13976 = vrcp.f32 %v1955_v62  ;;  %v13965_v35 = vpop.eup %13964 }
 0x387   :  { %13978 = vtanh.f32 %v16806_v34  ;;  %v13967_v31 = vpop.eup %13966  ;;  %v1957_v48 = vadd.f32 1.0, %v13965_v35 }
 0x388   :  { %13980 = vrcp.f32 %v1954_v59  ;;  %v1956_v7 = vadd.f32 1.0, %v13967_v31 }
 0x389   :  { %13982 = vtanh.f32 %v16810_v36 }
 0x38a   :  { %13984 = vrcp.f32 %v1957_v48  ;;  %v13969_v10 = vpop.eup %13968 }
 0x38b   :  { %13986 = vrcp.f32 %v1956_v7  ;;  %v13971_v39 = vpop.eup %13970  ;;  %v1959_v17 = vadd.f32 1.0, %v13969_v10  ;;  %v20544_v10 = vld [vmem:[#allocation32_spill] sm:$0xff] }
 0x38c   :  { %13988 = vtanh.f32 %v16812_v42  ;;  %v1958_v57 = vadd.f32 1.0, %v13971_v39  ;;  %v13973_v21 = vpop.eup %13972  ;;  %v20545_v39 = vld [vmem:[#allocation25_spill] sm:$0xff] }
 0x38d   :  { %13990 = vtanh.f32 %v16817_v49  ;;  %v13975_v51 = vpop.eup %13974 }
 0x38e   :  { %13992 = vrcp.f32 %v1959_v17  ;;  %v20546_v17 = vld [vmem:[#allocation29_spill] sm:$0xff] }
 0x38f   :  { %13994 = vrcp.f32 %v1958_v57  ;;  %v20547_v57 = vld [vmem:[#allocation30_spill] sm:$0xff] }
 0x390   :  { %v13977_v54 = vpop.eup %13976 }
 0x391   :  { %v13979_v25 = vpop.eup %13978  ;;  %v1997_v56 = vmul.f32 %v13977_v54, %v13973_v21  ;;  %v20548_v21 = vld [vmem:[#allocation33_spill] sm:$0xff]  ;;  %v20550_v54 = vld [vmem:[#allocation38_spill] sm:$0xff] }
 0x392   :  { %v13981_v20 = vpop.eup %13980 }
 0x393   :  { %v13983_v9 = vpop.eup %13982  ;;  %v1996_v6 = vmul.f32 %v13981_v20, %v13975_v51  ;;  %v20549_v51 = vld [vmem:[#allocation34_spill] sm:$0xff] }
 0x394   :  { %v13985_v33 = vpop.eup %13984 }
 0x395   :  { %v13987_v53 = vpop.eup %13986  ;;  %v12765_v37 = vpack.c.bf16 %v1997_v56, %v1996_v6  ;;  %v1999_v41 = vmul.f32 %v13985_v33, %v13979_v25  ;;  %v20551_v25 = vld [vmem:[#allocation39_spill] sm:$0xff]  ;;  %v20552_v56 = vld [vmem:[#allocation40_spill] sm:$0xff] }
 0x396   :  { %v13989_v63 = vpop.eup %13988  ;;  %v1998_v38 = vmul.f32 %v13987_v53, %v13983_v9  ;;  %v20553_v33 = vld [vmem:[#allocation24_spill] sm:$0xff] }
 0x397   :  { %v13991_v29 = vpop.eup %13990  ;;  %12766 = vmatprep.subr.bf16.mxu1 %v12765_v37 }
 0x398   :  { %v13993_v62 = vpop.eup %13992  ;;  %12768 = vmatpush3.bf16.msra.mxu1 %v12765_v37  ;;  %v12769_v59 = vpack.c.bf16 %v1999_v41, %v1998_v38 }
 0x399   :  { %v13995_v35 = vpop.eup %13994  ;;  %v2001_v31 = vmul.f32 %v13993_v62, %v13989_v63  ;;  %v20554_v62 = vld [vmem:[#allocation28_spill] sm:$0xff] }
 0x39a   :  { %12770 = vmatprep.subr.bf16.mxu1 %v12769_v59  ;;  %v2000_v48 = vmul.f32 %v13995_v35, %v13991_v29 }
 0x39c   :  { %12772 = vmatpush3.bf16.msra.mxu1 %v12769_v59  ;;  %v12773_v7 = vpack.c.bf16 %v2001_v31, %v2000_v48 }
 0x39e   :  { %12774 = vmatprep.subr.bf16.mxu1 %v12773_v7 }
 0x3a0   :  { %12776 = vmatpush3.bf16.msra.mxu1 %v12773_v7  ;;  %v20555_v7 = vld [vmem:[#allocation31_spill] sm:$0xff] }
 0x3a3   :  { %11650 = vmatmul.mubr.msk.f32.vlgmr.msra.gmra.mrb[28].mxu1 %vm490_vm2, %v16437_v44  ;;  %v20525_v44 = vld [vmem:[#allocation10_spill] sm:$0xff] }
 0x3a4   :  { %11652 = vmatprep.mubr.msk.f32.mxu1 %vm490_vm2, %v16444_v13  ;;  %v20526_v13 = vld [vmem:[#allocation11_spill] sm:$0xff] }
 0x3a7   :  { %11653 = vmatmul.mubr.msk.f32.gmra.mrb[30].mxu1 %vm490_vm2, %v16451_v27  ;;  %v20527_v27 = vld [vmem:[#allocation12_spill] sm:$0xff] }
 0x3a8   :  { %11655 = vmatprep.mubr.msk.f32.mxu1 %vm490_vm2, %v16458_v24  ;;  %v20528_v24 = vld [vmem:[#allocation13_spill] sm:$0xff] }
 0x3ab   :  { %11656 = vmatmul.mubr.msk.f32.gmra.mrb[32].mxu1 %vm490_vm2, %v16465_v16  ;;  %v9638_v16 = vld [vmem:[%s20100_s0 + $0x8] sm:$0x3] }
 0x3ac   :  { %11658 = vmatprep.mubr.msk.f32.mxu1 %vm490_vm2, %v16472_v14  ;;  %11685 = vmatprep.subr.msk.mxu0 %vm301_vm0, %v9638_v16  ;;  %v20529_v14 = vld [vmem:[#allocation14_spill] sm:$0xff] }
 0x3ad   :  { %11686 = vmatpush3.msk.msra.mxu0 %vm301_vm0, %v9638_v16 }
 0x3ae   :  { %11688 = vmatmul.mubr.msk.f32.vlgmr.msra.gmra.mrb[48].mxu0 %vm228_vm1, %v20529_v14 }
 0x3af   :  { %11659 = vmatmul.mubr.msk.f32.gmra.mrb[34].mxu1 %vm490_vm2, %v16479_v50  ;;  %v20530_v50 = vld [vmem:[#allocation15_spill] sm:$0xff] }
 0x3b0   :  { %11661 = vmatprep.mubr.msk.f32.mxu1 %vm490_vm2, %v16486_v32  ;;  %11690 = vmatprep.mubr.msk.f32.mxu0 %vm228_vm1, %v20530_v50  ;;  %v20531_v32 = vld [vmem:[#allocation16_spill] sm:$0xff] }
 0x3b2   :  { %11691 = vmatmul.mubr.msk.f32.gmra.mrb[50].mxu0 %vm228_vm1, %v20531_v32 }
 0x3b3   :  { %11662 = vmatmul.mubr.msk.f32.gmra.mrb[36].mxu1 %vm490_vm2, %v16493_v22  ;;  %v20532_v22 = vld [vmem:[#allocation17_spill] sm:$0xff] }
 0x3b4   :  { %11664 = vmatprep.mubr.msk.f32.mxu1 %vm490_vm2, %v16500_v43  ;;  %11693 = vmatprep.mubr.msk.f32.mxu0 %vm228_vm1, %v20532_v22  ;;  %v20533_v43 = vld [vmem:[#allocation18_spill] sm:$0xff]  ;;  %v20556_v22 = vld [vmem:[#allocation23_spill] sm:$0xff] }
 0x3b6   :  { %11694 = vmatmul.mubr.msk.f32.gmra.mrb[52].mxu0 %vm228_vm1, %v20533_v43 }
 0x3b7   :  { %11665 = vmatmul.mubr.msk.f32.gmra.mrb[38].mxu1 %vm490_vm2, %v16507_v11  ;;  %v20534_v11 = vld [vmem:[#allocation19_spill] sm:$0xff] }
 0x3b8   :  { %11667 = vmatprep.mubr.msk.f32.mxu1 %vm490_vm2, %v16514_v8  ;;  %11696 = vmatprep.mubr.msk.f32.mxu0 %vm228_vm1, %v20534_v11  ;;  %v20535_v8 = vld [vmem:[#allocation20_spill] sm:$0xff] }
 0x3ba   :  { %11697 = vmatmul.mubr.msk.f32.gmra.mrb[54].mxu0 %vm228_vm1, %v20535_v8 }
 0x3bb   :  { %11668 = vmatmul.mubr.msk.f32.gmra.mrb[40].mxu1 %vm490_vm2, %v16521_v23  ;;  %v20536_v23 = vld [vmem:[#allocation21_spill] sm:$0xff] }
 0x3bc   :  { %11670 = vmatprep.mubr.msk.f32.mxu1 %vm490_vm2, %v16528_v46  ;;  %11699 = vmatprep.mubr.msk.f32.mxu0 %vm228_vm1, %v20536_v23  ;;  %v20537_v46 = vld [vmem:[#allocation6_spill] sm:$0xff] }
 0x3be   :  { %11700 = vmatmul.mubr.msk.f32.gmra.mrb[56].mxu0 %vm228_vm1, %v20537_v46 }
 0x3bf   :  { %11671 = vmatmul.mubr.msk.f32.gmra.mrb[42].mxu1 %vm490_vm2, %v16535_v2  ;;  %v20538_v2 = vld [vmem:[#allocation7_spill] sm:$0xff] }
 0x3c0   :  { %11673 = vmatprep.mubr.msk.f32.mxu1 %vm490_vm2, %v16542_v4  ;;  %11702 = vmatprep.mubr.msk.f32.mxu0 %vm228_vm1, %v20538_v2  ;;  %v20539_v4 = vld [vmem:[#allocation8_spill] sm:$0xff] }
 0x3c2   :  { %11703 = vmatmul.mubr.msk.f32.gmra.mrb[58].mxu0 %vm228_vm1, %v20539_v4 }
 0x3c3   :  { %11674 = vmatmul.mubr.msk.f32.gmra.mrb[44].mxu1 %vm490_vm2, %v16549_v61  ;;  %v20540_v61 = vld [vmem:[#allocation9_spill] sm:$0xff] }
 0x3c4   :  { %11676 = vmatprep.mubr.msk.f32.mxu1 %vm490_vm2, %v16556_v5  ;;  %11705 = vmatprep.mubr.msk.f32.mxu0 %vm228_vm1, %v20540_v61  ;;  %v20541_v5 = vld [vmem:[#allocation22_spill] sm:$0xff] }
 0x3c6   :  { %11706 = vmatmul.mubr.msk.f32.gmra.mrb[60].mxu0 %vm228_vm1, %v20541_v5 }
 0x3c7   :  { %11677 = vmatmul.mubr.msk.f32.gmra.mrb[46].mxu1 %vm490_vm2, %v16563_v12  ;;  %v20542_v12 = vld [vmem:[#allocation26_spill] sm:$0xff] }
 0x3c8   :  { %11679 = vmatprep.mubr.msk.f32.mxu1 %vm490_vm2, %v16570_v18  ;;  %11708 = vmatprep.mubr.msk.f32.mxu0 %vm228_vm1, %v20542_v12  ;;  %v20543_v18 = vld [vmem:[#allocation27_spill] sm:$0xff] }
 0x3ca   :  { %11709 = vmatmul.mubr.msk.f32.gmra.mrb[62].mxu0 %vm228_vm1, %v20543_v18 }
 0x3cb   :  { %11680 = vmatmul.mubr.msk.f32.gmra.mrb[48].mxu1 %vm490_vm2, %v20525_v44  ;;  %11711 = vmatprep.mubr.msk.f32.mxu0 %vm228_vm1, %v20544_v10 }
 0x3cc   :  { %11682 = vmatprep.mubr.msk.f32.mxu1 %vm490_vm2, %v20526_v13 }
 0x3ce   :  { %11712 = vmatmul.mubr.msk.f32.gmra.mrb[64].mxu0 %vm228_vm1, %v20545_v39 }
 0x3cf   :  { %11683 = vmatmul.mubr.msk.f32.gmra.mrb[50].mxu1 %vm490_vm2, %v20527_v27  ;;  %11714 = vmatprep.mubr.msk.f32.mxu0 %vm228_vm1, %v20546_v17 }
 0x3d0   :  { %11773 = vmatprep.mubr.msk.f32.mxu1 %vm228_vm1, %v20528_v24 }
 0x3d2   :  { %11715 = vmatmul.mubr.msk.f32.gmra.mrb[66].mxu0 %vm228_vm1, %v20547_v57 }
 0x3d3   :  { %11717 = vmatprep.mubr.msk.f32.mxu0 %vm228_vm1, %v20548_v21 }
 0x3d6   :  { %11718 = vmatmul.mubr.msk.f32.gmra.mrb[68].mxu0 %vm228_vm1, %v20549_v51 }
 0x3d7   :  { %11720 = vmatprep.mubr.msk.f32.mxu0 %vm228_vm1, %v20550_v54 }
 0x3da   :  { %11721 = vmatmul.mubr.msk.f32.gmra.mrb[70].mxu0 %vm228_vm1, %v20551_v25 }
 0x3db   :  { %11735 = vmatprep.mubr.msk.f32.mxu0 %vm490_vm2, %v20552_v56 }
 0x476   :  { %v11651_v20 = vpop.f32.mrb[28].mxu1 }
 0x477   :  { %v13011_v9 = vadd.f32 %v11651_v20, %v20475_v15  ;;  %v2258_v6 = vpop.f32.mrb[29].mxu1 }
 0x478   :  { %v13012_v53 = vadd.f32 %v2258_v6, %v20553_v33 }
 0x479   :  { %v9621_v37 = vmul.f32 -1.442695, %v13011_v9 }
 0x47a   :  { %v9620_v41 = vmul.f32 -1.442695, %v13012_v53  ;;  %v11654_v63 = vpop.f32.mrb[30].mxu1 }
 0x47b   :  { %13996 = vpow2.f32 %v9621_v37  ;;  %v13013_v38 = vadd.f32 %v11654_v63, %v20477_v45  ;;  %v2268_v29 = vpop.f32.mrb[31].mxu1 }
 0x47c   :  { %13998 = vpow2.f32 %v9620_v41  ;;  %v13014_v59 = vadd.f32 %v2268_v29, %v20554_v62  ;;  %v20557_v29 = vld [vmem:[#allocation35_spill] sm:$0xff] }
 0x47d   :  { %v9623_v35 = vmul.f32 -1.442695, %v13013_v38 }
 0x47e   :  { %v9622_v31 = vmul.f32 -1.442695, %v13014_v59  ;;  %v11657_v48 = vpop.f32.mrb[32].mxu1 }
 0x47f   :  { %14000 = vpow2.f32 %v9623_v35  ;;  %v13015_v44 = vadd.f32 %v11657_v48, %v20555_v7  ;;  %v2278_v13 = vpop.f32.mrb[33].mxu1  ;;  %v20558_v48 = vld [vmem:[#allocation36_spill] sm:$0xff] }
 0x480   :  { %14002 = vpow2.f32 %v9622_v31  ;;  %v13016_v27 = vadd.f32 %v2278_v13, %v20480_v55 }
 0x481   :  { %v9625_v24 = vmul.f32 -1.442695, %v13015_v44 }
 0x482   :  { %v9624_v16 = vmul.f32 -1.442695, %v13016_v27  ;;  %v11660_v14 = vpop.f32.mrb[34].mxu1 }
 0x483   :  { %14004 = vpow2.f32 %v9625_v24  ;;  %v13017_v50 = vadd.f32 %v11660_v14, %v20481_v47  ;;  %v2288_v32 = vpop.f32.mrb[35].mxu1  ;;  %v20559_v14 = vld [vmem:[#allocation41_spill] sm:$0xff] }
 0x484   :  { %14006 = vpow2.f32 %v9624_v16  ;;  %v13018_v43 = vadd.f32 %v2288_v32, %v20556_v22 }
 0x485   :  { %v13997_v11 = vpop.eup %13996  ;;  %v9627_v8 = vmul.f32 -1.442695, %v13017_v50 }
 0x486   :  { %v13999_v23 = vpop.eup %13998  ;;  %v2420_v46 = vadd.f32 1.0, %v13997_v11  ;;  %v9626_v2 = vmul.f32 -1.442695, %v13018_v43  ;;  %v11663_v4 = vpop.f32.mrb[36].mxu1 }
 0x487   :  { %v2419_v61 = vadd.f32 1.0, %v13999_v23  ;;  %14008 = vpow2.f32 %v9627_v8  ;;  %v13019_v5 = vadd.f32 %v11663_v4, %v20483_v40  ;;  %v2298_v12 = vpop.f32.mrb[37].mxu1  ;;  %v20560_v23 = vld [vmem:[#allocation42_spill] sm:$0xff] }
 0x488   :  { %14010 = vrcp.f32 %v2420_v46  ;;  %v13020_v18 = vadd.f32 %v2298_v12, %v20484_v3  ;;  %v20561_v12 = vld [vmem:[#allocation43_spill] sm:$0xff] }
 0x489   :  { %v14001_v10 = vpop.eup %14000  ;;  %14012 = vrcp.f32 %v2419_v61  ;;  %v9629_v39 = vmul.f32 -1.442695, %v13019_v5 }
 0x48a   :  { %v14003_v17 = vpop.eup %14002  ;;  %v2422_v57 = vadd.f32 1.0, %v14001_v10  ;;  %14014 = vpow2.f32 %v9626_v2  ;;  %v9628_v21 = vmul.f32 -1.442695, %v13020_v18  ;;  %v11666_v51 = vpop.f32.mrb[38].mxu1 }
 0x48b   :  { %v2421_v54 = vadd.f32 1.0, %v14003_v17  ;;  %14016 = vpow2.f32 %v9629_v39  ;;  %v13021_v25 = vadd.f32 %v11666_v51, %v20485_v52  ;;  %v2308_v56 = vpop.f32.mrb[39].mxu1 }
 0x48c   :  { %14018 = vrcp.f32 %v2422_v57  ;;  %v13022_v20 = vadd.f32 %v2308_v56, %v20486_v58 }
 0x48d   :  { %v14005_v9 = vpop.eup %14004  ;;  %14020 = vrcp.f32 %v2421_v54  ;;  %v9631_v6 = vmul.f32 -1.442695, %v13021_v25 }
 0x48e   :  { %v14007_v53 = vpop.eup %14006  ;;  %v2424_v37 = vadd.f32 1.0, %v14005_v9  ;;  %14022 = vpow2.f32 %v9628_v21  ;;  %v9630_v41 = vmul.f32 -1.442695, %v13022_v20  ;;  %v11669_v63 = vpop.f32.mrb[40].mxu1  ;;  %v20562_v21 = vld [vmem:[#allocation44_spill] sm:$0xff]  ;;  %v20563_v9 = vld [vmem:[#allocation37_spill] sm:$0xff] }
 0x48f   :  { %v2423_v38 = vadd.f32 1.0, %v14007_v53  ;;  %14024 = vpow2.f32 %v9631_v6  ;;  %v13023_v59 = vadd.f32 %v11669_v63, %v20557_v29  ;;  %v2318_v35 = vpop.f32.mrb[41].mxu1 }
 0x490   :  { %14026 = vrcp.f32 %v2424_v37  ;;  %v13024_v44 = vadd.f32 %v2318_v35, %v20558_v48 }
 0x491   :  { %v14009_v31 = vpop.eup %14008  ;;  %14028 = vrcp.f32 %v2423_v38 }
 0x492   :  { %v14011_v13 = vpop.eup %14010  ;;  %v2456_v27 = vadd.f32 1.0, %v14009_v31  ;;  %14030 = vpow2.f32 %v9630_v41  ;;  %v11672_v24 = vpop.f32.mrb[42].mxu1 }
 0x493   :  { %v14013_v16 = vpop.eup %14012  ;;  %14032 = vtanh.f32 %v13023_v59  ;;  %v13025_v50 = vadd.f32 %v11672_v24, %v20559_v14  ;;  %v2328_v32 = vpop.f32.mrb[43].mxu1 }
 0x494   :  { %v14015_v43 = vpop.eup %14014  ;;  %14034 = vrcp.f32 %v2456_v27  ;;  %v13026_v46 = vadd.f32 %v2328_v32, %v20560_v23 }
 0x495   :  { %v14017_v11 = vpop.eup %14016  ;;  %v2455_v8 = vadd.f32 1.0, %v14015_v43  ;;  %14036 = vtanh.f32 %v13024_v44 }
 0x496   :  { %v14019_v2 = vpop.eup %14018  ;;  %v2458_v4 = vadd.f32 1.0, %v14017_v11  ;;  %14038 = vtanh.f32 %v13025_v50  ;;  %v11675_v61 = vpop.f32.mrb[44].mxu1 }
 0x497   :  { %v14021_v5 = vpop.eup %14020  ;;  %14040 = vrcp.f32 %v2455_v8  ;;  %v13027_v18 = vadd.f32 %v11675_v61, %v20561_v12  ;;  %v2338_v10 = vpop.f32.mrb[45].mxu1 }
 0x498   :  { %v14023_v39 = vpop.eup %14022  ;;  %14042 = vrcp.f32 %v2458_v4  ;;  %v13028_v51 = vadd.f32 %v2338_v10, %v20562_v21 }
 0x499   :  { %v14025_v17 = vpop.eup %14024  ;;  %v2457_v57 = vadd.f32 1.0, %v14023_v39  ;;  %14044 = vtanh.f32 %v13026_v46 }
 0x49a   :  { %v14027_v54 = vpop.eup %14026  ;;  %v2460_v25 = vadd.f32 1.0, %v14025_v17  ;;  %14046 = vtanh.f32 %v13027_v18  ;;  %v11678_v56 = vpop.f32.mrb[46].mxu1 }
 0x49b   :  { %v14029_v20 = vpop.eup %14028  ;;  %14048 = vrcp.f32 %v2457_v57  ;;  %v13029_v6 = vadd.f32 %v11678_v56, %v20563_v9  ;;  %v2348_v53 = vpop.f32.mrb[47].mxu1 }
 0x49c   :  { %v14031_v37 = vpop.eup %14030  ;;  %14050 = vrcp.f32 %v2460_v25  ;;  %v13030_v41 = vadd.f32 %v2348_v53, %v20494_v0 }
 0x49d   :  { %v14033_v63 = vpop.eup %14032  ;;  %v2459_v38 = vadd.f32 1.0, %v14031_v37  ;;  %14052 = vtanh.f32 %v13028_v51  ;;  %v9633_v59 = vmul.f32 -1.442695, %v13029_v6 }
 0x49e   :  { %v14035_v35 = vpop.eup %14034  ;;  %v2522_v31 = vmul.f32 %v14033_v63, %v14011_v13  ;;  %v9632_v44 = vmul.f32 -1.442695, %v13030_v41  ;;  %v11681_v27 = vpop.f32.mrb[48].mxu1 }
 0x49f   :  { %v14037_v24 = vpop.eup %14036  ;;  %v2516_v50 = vmul.f32 %v14035_v35, %v16798_v60  ;;  %14054 = vrcp.f32 %v2459_v38  ;;  %v13031_v32 = vadd.f32 %v11681_v27, %v20495_v26  ;;  %v2358_v43 = vpop.f32.mrb[49].mxu1 }
 0x4a0   :  { %v14039_v11 = vpop.eup %14038  ;;  %v2521_v8 = vmul.f32 %v14037_v24, %v14013_v16  ;;  %14056 = vpow2.f32 %v9633_v59  ;;  %v13032_v46 = vadd.f32 %v2358_v43, %v20496_v19 }
 0x4a1   :  { %v14041_v4 = vpop.eup %14040  ;;  %v16947_v61 = vadd.f32 %v2522_v31, %v2516_v50  ;;  %v2524_v18 = vmul.f32 %v14039_v11, %v14019_v2  ;;  %14058 = vpow2.f32 %v9632_v44  ;;  %v9635_v13 = vmul.f32 -1.442695, %v13031_v32 }
 0x4a2   :  { %v14043_v10 = vpop.eup %14042  ;;  %v2515_v39 = vmul.f32 %v14041_v4, %v16803_v1  ;;  %v9634_v17 = vmul.f32 -1.442695, %v13032_v46  ;;  %v11684_v60 = vpop.f32.mrb[50].mxu1 }
 0x4a3   :  { %v14045_v57 = vpop.eup %14044  ;;  %v2518_v51 = vmul.f32 %v14043_v10, %v16806_v34  ;;  %v13033_v25 = vadd.f32 %v11684_v60, %v16244_v30  ;;  %v2368_v16 = vpop.f32.mrb[51].mxu1  ;;  %14060 = vpow2.f32 %v9635_v13 }
 0x4a4   :  { %v14047_v56 = vpop.eup %14046  ;;  %v16952_v6 = vadd.f32 %v2521_v8, %v2515_v39  ;;  %v2523_v53 = vmul.f32 %v14045_v57, %v14021_v5  ;;  %v13034_v2 = vadd.f32 %v2368_v16, %v16247_v28  ;;  %14062 = vpow2.f32 %v9634_v17 }
 0x4a5   :  { %v14049_v37 = vpop.eup %14048  ;;  %v16955_v41 = vadd.f32 %v2524_v18, %v2518_v51  ;;  %v2526_v63 = vmul.f32 %v14047_v56, %v14027_v54  ;;  %v9637_v1 = vmul.f32 -1.442695, %v13033_v25 }
 0x4a6   :  { %v14051_v38 = vpop.eup %14050  ;;  %v2517_v59 = vmul.f32 %v14049_v37, %v16810_v36  ;;  %v9636_v34 = vmul.f32 -1.442695, %v13034_v2 }
 0x4a7   :  { %v14053_v35 = vpop.eup %14052  ;;  %v2520_v31 = vmul.f32 %v14051_v38, %v16812_v42  ;;  %14064 = vpow2.f32 %v9637_v1 }
 0x4a8   :  { %v16959_v44 = vadd.f32 %v2523_v53, %v2517_v59  ;;  %v2525_v27 = vmul.f32 %v14053_v35, %v14029_v20  ;;  %14066 = vpow2.f32 %v9636_v34 }
 0x4a9   :  { %v14055_v5 = vpop.eup %14054  ;;  %v16961_v24 = vadd.f32 %v2526_v63, %v2520_v31  ;;  %14068 = vtanh.f32 %v16947_v61 }
 0x4aa   :  { %v14057_v50 = vpop.eup %14056  ;;  %v2519_v54 = vmul.f32 %v14055_v5, %v16817_v49  ;;  %14070 = vtanh.f32 %v16952_v6 }
 0x4ab   :  { %v14059_v32 = vpop.eup %14058  ;;  %v2498_v43 = vadd.f32 1.0, %v14057_v50  ;;  %v16975_v50 = vld [vmem:[%s20104_s4 + $0x8] sm:$0xff] }
 0x4ac   :  { %v16966_v36 = vadd.f32 %v2525_v27, %v2519_v54  ;;  %v2497_v42 = vadd.f32 1.0, %v14059_v32  ;;  %v16982_v54 = vld [vmem:[%s20104_s4 + $0x10] sm:$0xff]  ;;  %v16989_v32 = vld [vmem:[%s20104_s4 + $0x18] sm:$0xff] }
 0x4ad   :  { %14072 = vrcp.f32 %v2498_v43  ;;  %v14061_v11 = vpop.eup %14060  ;;  %v16996_v43 = vld [vmem:[%s20104_s4 + $0x20] sm:$0xff] }
 0x4ae   :  { %14074 = vtanh.f32 %v16955_v41  ;;  %v14063_v20 = vpop.eup %14062  ;;  %v2500_v8 = vadd.f32 1.0, %v14061_v11  ;;  %v17010_v11 = vld [vmem:[%s20104_s4 + $0x30] sm:$0xff] }
 0x4af   :  { %14076 = vrcp.f32 %v2497_v42  ;;  %v2499_v46 = vadd.f32 1.0, %v14063_v20  ;;  %v17003_v42 = vld [vmem:[%s20104_s4 + $0x28] sm:$0xff]  ;;  %v17017_v20 = vld [vmem:[%s20104_s4 + $0x38] sm:$0xff] }
 0x4b0   :  { %14078 = vtanh.f32 %v16959_v44 }
 0x4b1   :  { %14080 = vrcp.f32 %v2500_v8  ;;  %v14065_v49 = vpop.eup %14064  ;;  %v17024_v8 = vld [vmem:[%s20104_s4 + $0x40] sm:$0xff] }
 0x4b2   :  { %14082 = vrcp.f32 %v2499_v46  ;;  %v14067_v4 = vpop.eup %14066  ;;  %v2502_v18 = vadd.f32 1.0, %v14065_v49  ;;  %v17031_v46 = vld [vmem:[%s20104_s4 + $0x48] sm:$0xff]  ;;  %v17038_v49 = vld [vmem:[%s20104_s4 + $0x50] sm:$0xff] }
 0x4b3   :  { %14084 = vtanh.f32 %v16961_v24  ;;  %v2501_v13 = vadd.f32 1.0, %v14067_v4  ;;  %v14069_v10 = vpop.eup %14068  ;;  %v17045_v4 = vld [vmem:[%s20104_s4 + $0x58] sm:$0xff] }
 0x4b4   :  { %14086 = vtanh.f32 %v16966_v36  ;;  %v14071_v39 = vpop.eup %14070 }
 0x4b5   :  { %14088 = vrcp.f32 %v2502_v18  ;;  %v17052_v18 = vld [vmem:[%s20104_s4 + $0x60] sm:$0xff] }
 0x4b6   :  { %14090 = vrcp.f32 %v2501_v13  ;;  %v17059_v13 = vld [vmem:[%s20104_s4 + $0x68] sm:$0xff] }
 0x4b7   :  { %v14073_v17 = vpop.eup %14072 }
 0x4b8   :  { %v14075_v60 = vpop.eup %14074  ;;  %v2540_v57 = vmul.f32 %v14073_v17, %v14069_v10  ;;  %v17066_v10 = vld [vmem:[%s20104_s4 + $0x70] sm:$0xff]  ;;  %v17080_v17 = vld [vmem:[%s20104_s4 + $0x80] sm:$0xff] }
 0x4b9   :  { %v14077_v51 = vpop.eup %14076 }
 0x4ba   :  { %v14079_v25 = vpop.eup %14078  ;;  %v2539_v16 = vmul.f32 %v14077_v51, %v14071_v39  ;;  %v17073_v39 = vld [vmem:[%s20104_s4 + $0x78] sm:$0xff] }
 0x4bb   :  { %v14081_v56 = vpop.eup %14080  ;;  %v17101_v51 = vld [vmem:[%s20104_s4 + $0x98] sm:$0xff] }
 0x4bc   :  { %v14083_v53 = vpop.eup %14082  ;;  %v12777_v2 = vpack.c.bf16 %v2540_v57, %v2539_v16  ;;  %v2542_v37 = vmul.f32 %v14081_v56, %v14075_v60  ;;  %v17087_v60 = vld [vmem:[%s20104_s4 + $0x88] sm:$0xff]  ;;  %v17094_v57 = vld [vmem:[%s20104_s4 + $0x90] sm:$0xff] }
 0x4bd   :  { %v14085_v63 = vpop.eup %14084  ;;  %v2541_v1 = vmul.f32 %v14083_v53, %v14079_v25  ;;  %v17108_v25 = vld [vmem:[%s20104_s4 + $0xa0] sm:$0xff]  ;;  %v17115_v16 = vld [vmem:[%s20104_s4 + $0xa8] sm:$0xff]  ;;  %v17122_v56 = vld [vmem:[%s20104_s4 + $0xb0] sm:$0xff] }
 0x4be   :  { %v14087_v38 = vpop.eup %14086  ;;  %12778 = vmatprep.subr.bf16.mxu0 %v12777_v2  ;;  %20564 = vst [vmem:[#allocation10_spill] sm:$0xff] %v17115_v16  ;;  %20565 = vst [vmem:[#allocation11_spill] sm:$0xff] %v17122_v56  ;;  %v17129_v53 = vld [vmem:[%s20104_s4 + $0xb8] sm:$0xff] }
 0x4bf   :  { %v14089_v59 = vpop.eup %14088  ;;  %12780 = vmatpush3.bf16.msra.mxu0 %v12777_v2  ;;  %v12781_v34 = vpack.c.bf16 %v2542_v37, %v2541_v1  ;;  %20566 = vst [vmem:[#allocation12_spill] sm:$0xff] %v17129_v53  ;;  %v17136_v2 = vld [vmem:[%s20102_s2] sm:$0xff]  ;;  %v9706_v37 = vld [vmem:[%s20100_s0 + $0xa] sm:$0x3]  ;;  %v17155_v1 = vld [vmem:[%s20102_s2 + $0x10] sm:$0xff] }
 0x4c0   :  { %v14091_v35 = vpop.eup %14090  ;;  %v2544_v31 = vmul.f32 %v14089_v59, %v14085_v63  ;;  %20567 = vst [vmem:[#allocation13_spill] sm:$0xff] %v17136_v2  ;;  %11771 = vmatprep.subr.msk.mxu1 %vm301_vm0, %v9706_v37  ;;  %v17148_v63 = vld [vmem:[%s20102_s2 + $0x8] sm:$0xff]  ;;  %20569 = vst [vmem:[#allocation15_spill] sm:$0xff] %v17155_v1  ;;  %v17169_v59 = vld [vmem:[%s20102_s2 + $0x20] sm:$0xff] }
 0x4c1   :  { %12782 = vmatprep.subr.bf16.mxu0 %v12781_v34  ;;  %v2543_v27 = vmul.f32 %v14091_v35, %v14087_v38  ;;  %11772 = vmatpush3.msk.msra.mxu1 %vm301_vm0, %v9706_v37  ;;  %20568 = vst [vmem:[#allocation14_spill] sm:$0xff] %v17148_v63  ;;  %v17162_v38 = vld [vmem:[%s20102_s2 + $0x18] sm:$0xff]  ;;  %20571 = vst [vmem:[#allocation17_spill] sm:$0xff] %v17169_v59  ;;  %v17183_v35 = vld [vmem:[%s20102_s2 + $0x30] sm:$0xff] }
 0x4c2   :  { %11774 = vmatmul.mubr.msk.f32.vlgmr.msra.gmra.mrb[52].mxu1 %vm228_vm1, %v17148_v63  ;;  %20570 = vst [vmem:[#allocation16_spill] sm:$0xff] %v17162_v38  ;;  %20573 = vst [vmem:[#allocation19_spill] sm:$0xff] %v17183_v35  ;;  %v17211_v37 = vld [vmem:[%s20102_s2 + $0x50] sm:$0xff] }
 0x4c3   :  { %12784 = vmatpush3.bf16.msra.mxu0 %v12781_v34  ;;  %v12785_v5 = vpack.c.bf16 %v2544_v31, %v2543_v27  ;;  %11776 = vmatprep.mubr.msk.f32.mxu1 %vm228_vm1, %v17155_v1  ;;  %v17176_v34 = vld [vmem:[%s20102_s2 + $0x28] sm:$0xff]  ;;  %v17190_v31 = vld [vmem:[%s20102_s2 + $0x38] sm:$0xff]  ;;  %v17197_v27 = vld [vmem:[%s20102_s2 + $0x40] sm:$0xff]  ;;  %20577 = vst [vmem:[#allocation7_spill] sm:$0xff] %v17211_v37 }
 0x4c4   :  { %20572 = vst [vmem:[#allocation18_spill] sm:$0xff] %v17176_v34  ;;  %20574 = vst [vmem:[#allocation20_spill] sm:$0xff] %v17190_v31 }
 0x4c5   :  { %12786 = vmatprep.subr.bf16.mxu0 %v12785_v5  ;;  %20575 = vst [vmem:[#allocation21_spill] sm:$0xff] %v17197_v27 }
 0x4c6   :  { %11777 = vmatmul.mubr.msk.f32.gmra.mrb[54].mxu1 %vm228_vm1, %v17162_v38 }
 0x4c7   :  { %12788 = vmatpush3.bf16.msra.mxu0 %v12785_v5  ;;  %11779 = vmatprep.mubr.msk.f32.mxu1 %vm228_vm1, %v17169_v59  ;;  %v17204_v5 = vld [vmem:[%s20102_s2 + $0x48] sm:$0xff] }
 0x4c8   :  { %20576 = vst [vmem:[#allocation6_spill] sm:$0xff] %v17204_v5 }
 0x4ca   :  { %11736 = vmatmul.mubr.msk.f32.vlgmr.msra.gmra.mrb[48].mxu0 %vm490_vm2, %v16975_v50  ;;  %11780 = vmatmul.mubr.msk.f32.gmra.mrb[56].mxu1 %vm228_vm1, %v17176_v34 }
 0x4cb   :  { %11738 = vmatprep.mubr.msk.f32.mxu0 %vm490_vm2, %v16982_v54  ;;  %11782 = vmatprep.mubr.msk.f32.mxu1 %vm228_vm1, %v17183_v35 }
 0x4ce   :  { %11739 = vmatmul.mubr.msk.f32.gmra.mrb[50].mxu0 %vm490_vm2, %v16989_v32  ;;  %11783 = vmatmul.mubr.msk.f32.gmra.mrb[58].mxu1 %vm228_vm1, %v17190_v31 }
 0x4cf   :  { %11741 = vmatprep.mubr.msk.f32.mxu0 %vm490_vm2, %v16996_v43  ;;  %11785 = vmatprep.mubr.msk.f32.mxu1 %vm228_vm1, %v17197_v27  ;;  %v17218_v27 = vld [vmem:[%s20102_s2 + $0x58] sm:$0xff] }
 0x4d0   :  { %20578 = vst [vmem:[#allocation8_spill] sm:$0xff] %v17218_v27 }
 0x4d2   :  { %11742 = vmatmul.mubr.msk.f32.gmra.mrb[52].mxu0 %vm490_vm2, %v17003_v42  ;;  %11786 = vmatmul.mubr.msk.f32.gmra.mrb[60].mxu1 %vm228_vm1, %v17204_v5  ;;  %v17225_v5 = vld [vmem:[%s20102_s2 + $0x60] sm:$0xff] }
 0x4d3   :  { %11744 = vmatprep.mubr.msk.f32.mxu0 %vm490_vm2, %v17010_v11  ;;  %11788 = vmatprep.mubr.msk.f32.mxu1 %vm228_vm1, %v17211_v37  ;;  %20579 = vst [vmem:[#allocation9_spill] sm:$0xff] %v17225_v5  ;;  %v17232_v37 = vld [vmem:[%s20102_s2 + $0x68] sm:$0xff] }
 0x4d4   :  { %20580 = vst [vmem:[#allocation22_spill] sm:$0xff] %v17232_v37 }
 0x4d6   :  { %11745 = vmatmul.mubr.msk.f32.gmra.mrb[54].mxu0 %vm490_vm2, %v17017_v20  ;;  %11789 = vmatmul.mubr.msk.f32.gmra.mrb[62].mxu1 %vm228_vm1, %v17218_v27  ;;  %v17239_v27 = vld [vmem:[%s20102_s2 + $0x70] sm:$0xff] }
 0x4d7   :  { %11747 = vmatprep.mubr.msk.f32.mxu0 %vm490_vm2, %v17024_v8  ;;  %11791 = vmatprep.mubr.msk.f32.mxu1 %vm228_vm1, %v17225_v5  ;;  %20581 = vst [vmem:[#allocation26_spill] sm:$0xff] %v17239_v27  ;;  %v17246_v5 = vld [vmem:[%s20102_s2 + $0x78] sm:$0xff] }
 0x4d8   :  { %20582 = vst [vmem:[#allocation27_spill] sm:$0xff] %v17246_v5 }
 0x4da   :  { %11748 = vmatmul.mubr.msk.f32.gmra.mrb[56].mxu0 %vm490_vm2, %v17031_v46  ;;  %11792 = vmatmul.mubr.msk.f32.gmra.mrb[64].mxu1 %vm228_vm1, %v17232_v37  ;;  %v17253_v37 = vld [vmem:[%s20102_s2 + $0x80] sm:$0xff] }
 0x4db   :  { %11750 = vmatprep.mubr.msk.f32.mxu0 %vm490_vm2, %v17038_v49  ;;  %11794 = vmatprep.mubr.msk.f32.mxu1 %vm228_vm1, %v17239_v27  ;;  %20583 = vst [vmem:[#allocation32_spill] sm:$0xff] %v17253_v37  ;;  %v17260_v27 = vld [vmem:[%s20102_s2 + $0x88] sm:$0xff] }
 0x4dc   :  { %20584 = vst [vmem:[#allocation25_spill] sm:$0xff] %v17260_v27 }
 0x4de   :  { %11751 = vmatmul.mubr.msk.f32.gmra.mrb[58].mxu0 %vm490_vm2, %v17045_v4  ;;  %11795 = vmatmul.mubr.msk.f32.gmra.mrb[66].mxu1 %vm228_vm1, %v17246_v5  ;;  %v17267_v5 = vld [vmem:[%s20102_s2 + $0x90] sm:$0xff] }
 0x4df   :  { %11753 = vmatprep.mubr.msk.f32.mxu0 %vm490_vm2, %v17052_v18  ;;  %11797 = vmatprep.mubr.msk.f32.mxu1 %vm228_vm1, %v17253_v37  ;;  %20585 = vst [vmem:[#allocation29_spill] sm:$0xff] %v17267_v5  ;;  %v17274_v37 = vld [vmem:[%s20102_s2 + $0x98] sm:$0xff] }
 0x4e0   :  { %20586 = vst [vmem:[#allocation30_spill] sm:$0xff] %v17274_v37 }
 0x4e2   :  { %11754 = vmatmul.mubr.msk.f32.gmra.mrb[60].mxu0 %vm490_vm2, %v17059_v13  ;;  %11798 = vmatmul.mubr.msk.f32.gmra.mrb[68].mxu1 %vm228_vm1, %v17260_v27  ;;  %v17281_v27 = vld [vmem:[%s20102_s2 + $0xa0] sm:$0xff] }
 0x4e3   :  { %11756 = vmatprep.mubr.msk.f32.mxu0 %vm490_vm2, %v17066_v10  ;;  %11800 = vmatprep.mubr.msk.f32.mxu1 %vm228_vm1, %v17267_v5  ;;  %20587 = vst [vmem:[#allocation33_spill] sm:$0xff] %v17281_v27  ;;  %v17288_v5 = vld [vmem:[%s20102_s2 + $0xa8] sm:$0xff] }
 0x4e4   :  { %20588 = vst [vmem:[#allocation34_spill] sm:$0xff] %v17288_v5 }
 0x4e6   :  { %11757 = vmatmul.mubr.msk.f32.gmra.mrb[62].mxu0 %vm490_vm2, %v17073_v39  ;;  %11801 = vmatmul.mubr.msk.f32.gmra.mrb[70].mxu1 %vm228_vm1, %v17274_v37  ;;  %v17295_v37 = vld [vmem:[%s20102_s2 + $0xb0] sm:$0xff] }
 0x4e7   :  { %11759 = vmatprep.mubr.msk.f32.mxu0 %vm490_vm2, %v17080_v17  ;;  %11803 = vmatprep.mubr.msk.f32.mxu1 %vm228_vm1, %v17281_v27  ;;  %20589 = vst [vmem:[#allocation38_spill] sm:$0xff] %v17295_v37  ;;  %v17302_v27 = vld [vmem:[%s20102_s2 + $0xb8] sm:$0xff] }
 0x4e8   :  { %20590 = vst [vmem:[#allocation39_spill] sm:$0xff] %v17302_v27 }
 0x4ea   :  { %11760 = vmatmul.mubr.msk.f32.gmra.mrb[64].mxu0 %vm490_vm2, %v17087_v60  ;;  %11804 = vmatmul.mubr.msk.f32.gmra.mrb[72].mxu1 %vm228_vm1, %v17288_v5  ;;  %v17309_v5 = vld [vmem:[%s20104_s4] sm:$0xff] }
 0x4eb   :  { %11762 = vmatprep.mubr.msk.f32.mxu0 %vm490_vm2, %v17094_v57  ;;  %11806 = vmatprep.mubr.msk.f32.mxu1 %vm228_vm1, %v17295_v37  ;;  %20591 = vst [vmem:[#allocation40_spill] sm:$0xff] %v17309_v5 }
 0x4ee   :  { %11763 = vmatmul.mubr.msk.f32.gmra.mrb[66].mxu0 %vm490_vm2, %v17101_v51  ;;  %11807 = vmatmul.mubr.msk.f32.gmra.mrb[74].mxu1 %vm228_vm1, %v17302_v27 }
 0x4ef   :  { %11765 = vmatprep.mubr.msk.f32.mxu0 %vm490_vm2, %v17108_v25  ;;  %11821 = vmatprep.mubr.msk.f32.mxu1 %vm490_vm2, %v17309_v5 }
 0x4f2   :  { %11766 = vmatmul.mubr.msk.f32.gmra.mrb[68].mxu0 %vm490_vm2, %v17115_v16 }
 0x4f3   :  { %11768 = vmatprep.mubr.msk.f32.mxu0 %vm490_vm2, %v17122_v56 }
 0x4f6   :  { %11769 = vmatmul.mubr.msk.f32.gmra.mrb[70].mxu0 %vm490_vm2, %v17129_v53 }
 0x4f7   :  { %11859 = vmatprep.mubr.msk.f32.mxu0 %vm228_vm1, %v17136_v2 }
 0x59d   :  { %v11737_v31 = vpop.f32.mrb[48].mxu0 }
 0x59e   :  { %v13035_v35 = vadd.f32 %v11737_v31, %v20475_v15  ;;  %v2801_v37 = vpop.f32.mrb[49].mxu0 }
 0x59f   :  { %v13036_v34 = vadd.f32 %v2801_v37, %v20553_v33 }
 0x5a0   :  { %v9689_v59 = vmul.f32 -1.442695, %v13035_v35 }
 0x5a1   :  { %v9688_v38 = vmul.f32 -1.442695, %v13036_v34  ;;  %v11740_v1 = vpop.f32.mrb[50].mxu0 }
 0x5a2   :  { %14092 = vpow2.f32 %v9689_v59  ;;  %v13037_v27 = vadd.f32 %v11740_v1, %v20477_v45  ;;  %v2811_v63 = vpop.f32.mrb[51].mxu0 }
 0x5a3   :  { %14094 = vpow2.f32 %v9688_v38  ;;  %v13038_v2 = vadd.f32 %v2811_v63, %v20554_v62 }
 0x5a4   :  { %v9691_v53 = vmul.f32 -1.442695, %v13037_v27 }
 0x5a5   :  { %v9690_v56 = vmul.f32 -1.442695, %v13038_v2  ;;  %v11743_v16 = vpop.f32.mrb[52].mxu0 }
 0x5a6   :  { %14096 = vpow2.f32 %v9691_v53  ;;  %v13039_v5 = vadd.f32 %v11743_v16, %v20555_v7  ;;  %v2821_v31 = vpop.f32.mrb[53].mxu0 }
 0x5a7   :  { %14098 = vpow2.f32 %v9690_v56  ;;  %v13040_v37 = vadd.f32 %v2821_v31, %v20480_v55 }
 0x5a8   :  { %v9693_v35 = vmul.f32 -1.442695, %v13039_v5 }
 0x5a9   :  { %v9692_v34 = vmul.f32 -1.442695, %v13040_v37  ;;  %v11746_v33 = vpop.f32.mrb[54].mxu0 }
 0x5aa   :  { %14100 = vpow2.f32 %v9693_v35  ;;  %v13041_v1 = vadd.f32 %v11746_v33, %v20481_v47  ;;  %v2831_v59 = vpop.f32.mrb[55].mxu0 }
 0x5ab   :  { %14102 = vpow2.f32 %v9692_v34  ;;  %v13042_v63 = vadd.f32 %v2831_v59, %v20556_v22 }
 0x5ac   :  { %v14093_v38 = vpop.eup %14092  ;;  %v9695_v2 = vmul.f32 -1.442695, %v13041_v1 }
 0x5ad   :  { %v14095_v27 = vpop.eup %14094  ;;  %v2963_v53 = vadd.f32 1.0, %v14093_v38  ;;  %v9694_v62 = vmul.f32 -1.442695, %v13042_v63  ;;  %v11749_v16 = vpop.f32.mrb[56].mxu0 }
 0x5ae   :  { %v2962_v7 = vadd.f32 1.0, %v14095_v27  ;;  %14104 = vpow2.f32 %v9695_v2  ;;  %v13043_v56 = vadd.f32 %v11749_v16, %v20483_v40  ;;  %v2841_v5 = vpop.f32.mrb[57].mxu0 }
 0x5af   :  { %14106 = vrcp.f32 %v2963_v53  ;;  %v13044_v31 = vadd.f32 %v2841_v5, %v20484_v3 }
 0x5b0   :  { %v14097_v37 = vpop.eup %14096  ;;  %14108 = vrcp.f32 %v2962_v7  ;;  %v9697_v33 = vmul.f32 -1.442695, %v13043_v56 }
 0x5b1   :  { %v14099_v35 = vpop.eup %14098  ;;  %v2965_v34 = vadd.f32 1.0, %v14097_v37  ;;  %14110 = vpow2.f32 %v9694_v62  ;;  %v9696_v59 = vmul.f32 -1.442695, %v13044_v31  ;;  %v11752_v1 = vpop.f32.mrb[58].mxu0 }
 0x5b2   :  { %v2964_v22 = vadd.f32 1.0, %v14099_v35  ;;  %14112 = vpow2.f32 %v9697_v33  ;;  %v13045_v63 = vadd.f32 %v11752_v1, %v20485_v52  ;;  %v2851_v38 = vpop.f32.mrb[59].mxu0 }
 0x5b3   :  { %14114 = vrcp.f32 %v2965_v34  ;;  %v13046_v2 = vadd.f32 %v2851_v38, %v20486_v58 }
 0x5b4   :  { %v14101_v27 = vpop.eup %14100  ;;  %14116 = vrcp.f32 %v2964_v22  ;;  %v9699_v53 = vmul.f32 -1.442695, %v13045_v63 }
 0x5b5   :  { %v14103_v16 = vpop.eup %14102  ;;  %v2967_v5 = vadd.f32 1.0, %v14101_v27  ;;  %14118 = vpow2.f32 %v9696_v59  ;;  %v9698_v7 = vmul.f32 -1.442695, %v13046_v2  ;;  %v11755_v56 = vpop.f32.mrb[60].mxu0 }
 0x5b6   :  { %v2966_v37 = vadd.f32 1.0, %v14103_v16  ;;  %14120 = vpow2.f32 %v9699_v53  ;;  %v13047_v62 = vadd.f32 %v11755_v56, %v20557_v29  ;;  %v2861_v31 = vpop.f32.mrb[61].mxu0 }
 0x5b7   :  { %14122 = vrcp.f32 %v2967_v5  ;;  %v13048_v35 = vadd.f32 %v2861_v31, %v20558_v48 }
 0x5b8   :  { %v14105_v33 = vpop.eup %14104  ;;  %14124 = vrcp.f32 %v2966_v37 }
 0x5b9   :  { %v14107_v34 = vpop.eup %14106  ;;  %v2999_v1 = vadd.f32 1.0, %v14105_v33  ;;  %14126 = vpow2.f32 %v9698_v7  ;;  %v11758_v22 = vpop.f32.mrb[62].mxu0 }
 0x5ba   :  { %v14109_v63 = vpop.eup %14108  ;;  %14128 = vtanh.f32 %v13047_v62  ;;  %v13049_v59 = vadd.f32 %v11758_v22, %v20559_v14  ;;  %v2871_v38 = vpop.f32.mrb[63].mxu0 }
 0x5bb   :  { %v14111_v2 = vpop.eup %14110  ;;  %14130 = vrcp.f32 %v2999_v1  ;;  %v13050_v16 = vadd.f32 %v2871_v38, %v20560_v23 }
 0x5bc   :  { %v14113_v27 = vpop.eup %14112  ;;  %v2998_v53 = vadd.f32 1.0, %v14111_v2  ;;  %14132 = vtanh.f32 %v13048_v35 }
 0x5bd   :  { %v14115_v5 = vpop.eup %14114  ;;  %v3001_v56 = vadd.f32 1.0, %v14113_v27  ;;  %14134 = vtanh.f32 %v13049_v59  ;;  %v11761_v37 = vpop.f32.mrb[64].mxu0 }
 0x5be   :  { %v14117_v31 = vpop.eup %14116  ;;  %14136 = vrcp.f32 %v2998_v53  ;;  %v13051_v7 = vadd.f32 %v11761_v37, %v20561_v12  ;;  %v2881_v33 = vpop.f32.mrb[65].mxu0 }
 0x5bf   :  { %v14119_v62 = vpop.eup %14118  ;;  %14138 = vrcp.f32 %v3001_v56  ;;  %v13052_v1 = vadd.f32 %v2881_v33, %v20562_v21 }
 0x5c0   :  { %v14121_v22 = vpop.eup %14120  ;;  %v3000_v14 = vadd.f32 1.0, %v14119_v62  ;;  %14140 = vtanh.f32 %v13050_v16 }
 0x5c1   :  { %v14123_v2 = vpop.eup %14122  ;;  %v3003_v35 = vadd.f32 1.0, %v14121_v22  ;;  %14142 = vtanh.f32 %v13051_v7  ;;  %v11764_v38 = vpop.f32.mrb[66].mxu0 }
 0x5c2   :  { %v14125_v23 = vpop.eup %14124  ;;  %14144 = vrcp.f32 %v3000_v14  ;;  %v13053_v59 = vadd.f32 %v11764_v38, %v20563_v9  ;;  %v2891_v27 = vpop.f32.mrb[67].mxu0 }
 0x5c3   :  { %v14127_v53 = vpop.eup %14126  ;;  %14146 = vrcp.f32 %v3003_v35  ;;  %v13054_v37 = vadd.f32 %v2891_v27, %v20494_v0 }
 0x5c4   :  { %v14129_v12 = vpop.eup %14128  ;;  %v3002_v56 = vadd.f32 1.0, %v14127_v53  ;;  %14148 = vtanh.f32 %v13052_v1  ;;  %v9701_v62 = vmul.f32 -1.442695, %v13053_v59 }
 0x5c5   :  { %v14131_v16 = vpop.eup %14130  ;;  %v3065_v48 = vmul.f32 %v14129_v12, %v14107_v34  ;;  %v9700_v33 = vmul.f32 -1.442695, %v13054_v37  ;;  %v11767_v21 = vpop.f32.mrb[68].mxu0 }
 0x5c6   :  { %v14133_v22 = vpop.eup %14132  ;;  %v3059_v7 = vmul.f32 %v14131_v16, %v16947_v61  ;;  %14150 = vrcp.f32 %v3002_v56  ;;  %v13055_v14 = vadd.f32 %v11767_v21, %v20495_v26  ;;  %v2901_v38 = vpop.f32.mrb[69].mxu0 }
 0x5c7   :  { %v14135_v9 = vpop.eup %14134  ;;  %v3064_v29 = vmul.f32 %v14133_v22, %v14109_v63  ;;  %14152 = vpow2.f32 %v9701_v62  ;;  %v13056_v35 = vadd.f32 %v2901_v38, %v20496_v19 }
 0x5c8   :  { %v14137_v27 = vpop.eup %14136  ;;  %v17336_v53 = vadd.f32 %v3065_v48, %v3059_v7  ;;  %v3067_v1 = vmul.f32 %v14135_v9, %v14115_v5  ;;  %14154 = vpow2.f32 %v9700_v33  ;;  %v9703_v12 = vmul.f32 -1.442695, %v13055_v14 }
 0x5c9   :  { %v14139_v34 = vpop.eup %14138  ;;  %v3058_v59 = vmul.f32 %v14137_v27, %v16952_v6  ;;  %v9702_v37 = vmul.f32 -1.442695, %v13056_v35  ;;  %v11770_v61 = vpop.f32.mrb[70].mxu0 }
 0x5ca   :  { %v14141_v56 = vpop.eup %14140  ;;  %v3061_v21 = vmul.f32 %v14139_v34, %v16955_v41  ;;  %v13057_v16 = vadd.f32 %v11770_v61, %v16244_v30  ;;  %v2911_v63 = vpop.f32.mrb[71].mxu0  ;;  %14156 = vpow2.f32 %v9703_v12 }
 0x5cb   :  { %v14143_v62 = vpop.eup %14142  ;;  %v17341_v22 = vadd.f32 %v3064_v29, %v3058_v59  ;;  %v3066_v38 = vmul.f32 %v14141_v56, %v14117_v31  ;;  %v13058_v48 = vadd.f32 %v2911_v63, %v16247_v28  ;;  %14158 = vpow2.f32 %v9702_v37 }
 0x5cc   :  { %v14145_v9 = vpop.eup %14144  ;;  %v17344_v5 = vadd.f32 %v3067_v1, %v3061_v21  ;;  %v3069_v33 = vmul.f32 %v14143_v62, %v14123_v2  ;;  %v9705_v6 = vmul.f32 -1.442695, %v13057_v16 }
 0x5cd   :  { %v14147_v7 = vpop.eup %14146  ;;  %v3060_v14 = vmul.f32 %v14145_v9, %v16959_v44  ;;  %v9704_v41 = vmul.f32 -1.442695, %v13058_v48 }
 0x5ce   :  { %v14149_v35 = vpop.eup %14148  ;;  %v3063_v27 = vmul.f32 %v14147_v7, %v16961_v24  ;;  %14160 = vpow2.f32 %v9705_v6 }
 0x5cf   :  { %v17348_v34 = vadd.f32 %v3066_v38, %v3060_v14  ;;  %v3068_v29 = vmul.f32 %v14149_v35, %v14125_v23  ;;  %14162 = vpow2.f32 %v9704_v41 }
 0x5d0   :  { %v14151_v31 = vpop.eup %14150  ;;  %v17350_v12 = vadd.f32 %v3069_v33, %v3063_v27  ;;  %14164 = vtanh.f32 %v17336_v53 }
 0x5d1   :  { %v14153_v1 = vpop.eup %14152  ;;  %v3062_v2 = vmul.f32 %v14151_v31, %v16966_v36  ;;  %14166 = vtanh.f32 %v17341_v22 }
 0x5d2   :  { %v14155_v59 = vpop.eup %14154  ;;  %v3041_v37 = vadd.f32 1.0, %v14153_v1 }
 0x5d3   :  { %v17355_v44 = vadd.f32 %v3068_v29, %v3062_v2  ;;  %v3040_v24 = vadd.f32 1.0, %v14155_v59 }
 0x5d4   :  { %14168 = vrcp.f32 %v3041_v37  ;;  %v14157_v61 = vpop.eup %14156 }
 0x5d5   :  { %14170 = vtanh.f32 %v17344_v5  ;;  %v14159_v23 = vpop.eup %14158  ;;  %v3043_v56 = vadd.f32 1.0, %v14157_v61 }
 0x5d6   :  { %14172 = vrcp.f32 %v3040_v24  ;;  %v3042_v21 = vadd.f32 1.0, %v14159_v23 }
 0x5d7   :  { %14174 = vtanh.f32 %v17348_v34 }
 0x5d8   :  { %14176 = vrcp.f32 %v3043_v56  ;;  %v14161_v36 = vpop.eup %14160 }
 0x5d9   :  { %14178 = vrcp.f32 %v3042_v21  ;;  %v14163_v16 = vpop.eup %14162  ;;  %v3045_v63 = vadd.f32 1.0, %v14161_v36  ;;  %v20611_v36 = vld [vmem:[#allocation32_spill] sm:$0xff] }
 0x5da   :  { %14180 = vtanh.f32 %v17350_v12  ;;  %v3044_v62 = vadd.f32 1.0, %v14163_v16  ;;  %v14165_v38 = vpop.eup %14164  ;;  %v20612_v16 = vld [vmem:[#allocation25_spill] sm:$0xff] }
 0x5db   :  { %14182 = vtanh.f32 %v17355_v44  ;;  %v14167_v48 = vpop.eup %14166 }
 0x5dc   :  { %14184 = vrcp.f32 %v3045_v63  ;;  %v20613_v63 = vld [vmem:[#allocation29_spill] sm:$0xff] }
 0x5dd   :  { %14186 = vrcp.f32 %v3044_v62  ;;  %v20614_v62 = vld [vmem:[#allocation30_spill] sm:$0xff] }
 0x5de   :  { %v14169_v9 = vpop.eup %14168 }
 0x5df   :  { %v14171_v33 = vpop.eup %14170  ;;  %v3083_v6 = vmul.f32 %v14169_v9, %v14165_v38  ;;  %v20615_v38 = vld [vmem:[#allocation33_spill] sm:$0xff]  ;;  %v20617_v9 = vld [vmem:[#allocation38_spill] sm:$0xff] }
 0x5e0   :  { %v14173_v7 = vpop.eup %14172 }
 0x5e1   :  { %v14175_v14 = vpop.eup %14174  ;;  %v3082_v41 = vmul.f32 %v14173_v7, %v14167_v48  ;;  %v20616_v48 = vld [vmem:[#allocation34_spill] sm:$0xff] }
 0x5e2   :  { %v14177_v35 = vpop.eup %14176 }
 0x5e3   :  { %v14179_v27 = vpop.eup %14178  ;;  %v12789_v29 = vpack.c.bf16 %v3083_v6, %v3082_v41  ;;  %v3085_v31 = vmul.f32 %v14177_v35, %v14171_v33  ;;  %v20618_v33 = vld [vmem:[#allocation39_spill] sm:$0xff]  ;;  %v20619_v6 = vld [vmem:[#allocation40_spill] sm:$0xff] }
 0x5e4   :  { %v14181_v1 = vpop.eup %14180  ;;  %v3084_v2 = vmul.f32 %v14179_v27, %v14175_v14  ;;  %v20620_v35 = vld [vmem:[#allocation24_spill] sm:$0xff] }
 0x5e5   :  { %v14183_v59 = vpop.eup %14182  ;;  %12790 = vmatprep.subr.bf16.mxu1 %v12789_v29 }
 0x5e6   :  { %v14185_v37 = vpop.eup %14184  ;;  %12792 = vmatpush3.bf16.msra.mxu1 %v12789_v29  ;;  %v12793_v24 = vpack.c.bf16 %v3085_v31, %v3084_v2 }
 0x5e7   :  { %v14187_v61 = vpop.eup %14186  ;;  %v3087_v23 = vmul.f32 %v14185_v37, %v14181_v1  ;;  %v20621_v37 = vld [vmem:[#allocation28_spill] sm:$0xff] }
 0x5e8   :  { %12794 = vmatprep.subr.bf16.mxu1 %v12793_v24  ;;  %v3086_v56 = vmul.f32 %v14187_v61, %v14183_v59 }
 0x5ea   :  { %12796 = vmatpush3.bf16.msra.mxu1 %v12793_v24  ;;  %v12797_v21 = vpack.c.bf16 %v3087_v23, %v3086_v56 }
 0x5ec   :  { %12798 = vmatprep.subr.bf16.mxu1 %v12797_v21 }
 0x5ee   :  { %12800 = vmatpush3.bf16.msra.mxu1 %v12797_v21  ;;  %v20622_v21 = vld [vmem:[#allocation31_spill] sm:$0xff] }
 0x5f1   :  { %11822 = vmatmul.mubr.msk.f32.vlgmr.msra.gmra.mrb[52].mxu1 %vm490_vm2, %v16975_v50  ;;  %v20592_v50 = vld [vmem:[#allocation10_spill] sm:$0xff] }
 0x5f2   :  { %11824 = vmatprep.mubr.msk.f32.mxu1 %vm490_vm2, %v16982_v54  ;;  %v20593_v54 = vld [vmem:[#allocation11_spill] sm:$0xff] }
 0x5f5   :  { %11825 = vmatmul.mubr.msk.f32.gmra.mrb[54].mxu1 %vm490_vm2, %v16989_v32  ;;  %v20594_v32 = vld [vmem:[#allocation12_spill] sm:$0xff] }
 0x5f6   :  { %11827 = vmatprep.mubr.msk.f32.mxu1 %vm490_vm2, %v16996_v43  ;;  %v20595_v43 = vld [vmem:[#allocation13_spill] sm:$0xff] }
 0x5f9   :  { %11828 = vmatmul.mubr.msk.f32.gmra.mrb[56].mxu1 %vm490_vm2, %v17003_v42  ;;  %v9774_v42 = vld [vmem:[%s20100_s0 + $0xc] sm:$0x3] }
 0x5fa   :  { %11830 = vmatprep.mubr.msk.f32.mxu1 %vm490_vm2, %v17010_v11  ;;  %11857 = vmatprep.subr.msk.mxu0 %vm301_vm0, %v9774_v42  ;;  %v20596_v11 = vld [vmem:[#allocation14_spill] sm:$0xff] }
 0x5fb   :  { %11858 = vmatpush3.msk.msra.mxu0 %vm301_vm0, %v9774_v42 }
 0x5fc   :  { %11860 = vmatmul.mubr.msk.f32.vlgmr.msra.gmra.mrb[72].mxu0 %vm228_vm1, %v20596_v11 }
 0x5fd   :  { %11831 = vmatmul.mubr.msk.f32.gmra.mrb[58].mxu1 %vm490_vm2, %v17017_v20  ;;  %v20597_v20 = vld [vmem:[#allocation15_spill] sm:$0xff] }
 0x5fe   :  { %11833 = vmatprep.mubr.msk.f32.mxu1 %vm490_vm2, %v17024_v8  ;;  %11862 = vmatprep.mubr.msk.f32.mxu0 %vm228_vm1, %v20597_v20  ;;  %v20598_v8 = vld [vmem:[#allocation16_spill] sm:$0xff] }
 0x600   :  { %11863 = vmatmul.mubr.msk.f32.gmra.mrb[74].mxu0 %vm228_vm1, %v20598_v8 }
 0x601   :  { %11834 = vmatmul.mubr.msk.f32.gmra.mrb[60].mxu1 %vm490_vm2, %v17031_v46  ;;  %v20599_v46 = vld [vmem:[#allocation17_spill] sm:$0xff] }
 0x602   :  { %11836 = vmatprep.mubr.msk.f32.mxu1 %vm490_vm2, %v17038_v49  ;;  %11865 = vmatprep.mubr.msk.f32.mxu0 %vm228_vm1, %v20599_v46  ;;  %v20600_v49 = vld [vmem:[#allocation18_spill] sm:$0xff]  ;;  %v20623_v46 = vld [vmem:[#allocation23_spill] sm:$0xff] }
 0x604   :  { %11866 = vmatmul.mubr.msk.f32.gmra.mrb[76].mxu0 %vm228_vm1, %v20600_v49 }
 0x605   :  { %11837 = vmatmul.mubr.msk.f32.gmra.mrb[62].mxu1 %vm490_vm2, %v17045_v4  ;;  %v20601_v4 = vld [vmem:[#allocation19_spill] sm:$0xff] }
 0x606   :  { %11839 = vmatprep.mubr.msk.f32.mxu1 %vm490_vm2, %v17052_v18  ;;  %11868 = vmatprep.mubr.msk.f32.mxu0 %vm228_vm1, %v20601_v4  ;;  %v20602_v18 = vld [vmem:[#allocation20_spill] sm:$0xff] }
 0x608   :  { %11869 = vmatmul.mubr.msk.f32.gmra.mrb[78].mxu0 %vm228_vm1, %v20602_v18 }
 0x609   :  { %11840 = vmatmul.mubr.msk.f32.gmra.mrb[64].mxu1 %vm490_vm2, %v17059_v13  ;;  %v20603_v13 = vld [vmem:[#allocation21_spill] sm:$0xff] }
 0x60a   :  { %11842 = vmatprep.mubr.msk.f32.mxu1 %vm490_vm2, %v17066_v10  ;;  %11871 = vmatprep.mubr.msk.f32.mxu0 %vm228_vm1, %v20603_v13  ;;  %v20604_v10 = vld [vmem:[#allocation6_spill] sm:$0xff] }
 0x60c   :  { %11872 = vmatmul.mubr.msk.f32.gmra.mrb[80].mxu0 %vm228_vm1, %v20604_v10 }
 0x60d   :  { %11843 = vmatmul.mubr.msk.f32.gmra.mrb[66].mxu1 %vm490_vm2, %v17073_v39  ;;  %v20605_v39 = vld [vmem:[#allocation7_spill] sm:$0xff] }
 0x60e   :  { %11845 = vmatprep.mubr.msk.f32.mxu1 %vm490_vm2, %v17080_v17  ;;  %11874 = vmatprep.mubr.msk.f32.mxu0 %vm228_vm1, %v20605_v39  ;;  %v20606_v17 = vld [vmem:[#allocation8_spill] sm:$0xff] }
 0x610   :  { %11875 = vmatmul.mubr.msk.f32.gmra.mrb[82].mxu0 %vm228_vm1, %v20606_v17 }
 0x611   :  { %11846 = vmatmul.mubr.msk.f32.gmra.mrb[68].mxu1 %vm490_vm2, %v17087_v60  ;;  %v20607_v60 = vld [vmem:[#allocation9_spill] sm:$0xff] }
 0x612   :  { %11848 = vmatprep.mubr.msk.f32.mxu1 %vm490_vm2, %v17094_v57  ;;  %11877 = vmatprep.mubr.msk.f32.mxu0 %vm228_vm1, %v20607_v60  ;;  %v20608_v57 = vld [vmem:[#allocation22_spill] sm:$0xff] }
 0x614   :  { %11878 = vmatmul.mubr.msk.f32.gmra.mrb[84].mxu0 %vm228_vm1, %v20608_v57 }
 0x615   :  { %11849 = vmatmul.mubr.msk.f32.gmra.mrb[70].mxu1 %vm490_vm2, %v17101_v51  ;;  %v20609_v51 = vld [vmem:[#allocation26_spill] sm:$0xff] }
 0x616   :  { %11851 = vmatprep.mubr.msk.f32.mxu1 %vm490_vm2, %v17108_v25  ;;  %11880 = vmatprep.mubr.msk.f32.mxu0 %vm228_vm1, %v20609_v51  ;;  %v20610_v25 = vld [vmem:[#allocation27_spill] sm:$0xff] }
 0x618   :  { %11881 = vmatmul.mubr.msk.f32.gmra.mrb[86].mxu0 %vm228_vm1, %v20610_v25 }
 0x619   :  { %11852 = vmatmul.mubr.msk.f32.gmra.mrb[72].mxu1 %vm490_vm2, %v20592_v50  ;;  %11883 = vmatprep.mubr.msk.f32.mxu0 %vm228_vm1, %v20611_v36 }
 0x61a   :  { %11854 = vmatprep.mubr.msk.f32.mxu1 %vm490_vm2, %v20593_v54 }
 0x61c   :  { %11884 = vmatmul.mubr.msk.f32.gmra.mrb[88].mxu0 %vm228_vm1, %v20612_v16 }
 0x61d   :  { %11855 = vmatmul.mubr.msk.f32.gmra.mrb[74].mxu1 %vm490_vm2, %v20594_v32  ;;  %11886 = vmatprep.mubr.msk.f32.mxu0 %vm228_vm1, %v20613_v63 }
 0x61e   :  { %11945 = vmatprep.mubr.msk.f32.mxu1 %vm228_vm1, %v20595_v43 }
 0x620   :  { %11887 = vmatmul.mubr.msk.f32.gmra.mrb[90].mxu0 %vm228_vm1, %v20614_v62 }
 0x621   :  { %11889 = vmatprep.mubr.msk.f32.mxu0 %vm228_vm1, %v20615_v38 }
 0x624   :  { %11890 = vmatmul.mubr.msk.f32.gmra.mrb[92].mxu0 %vm228_vm1, %v20616_v48 }
 0x625   :  { %11892 = vmatprep.mubr.msk.f32.mxu0 %vm228_vm1, %v20617_v9 }
 0x628   :  { %11893 = vmatmul.mubr.msk.f32.gmra.mrb[94].mxu0 %vm228_vm1, %v20618_v33 }
 0x629   :  { %11907 = vmatprep.mubr.msk.f32.mxu0 %vm490_vm2, %v20619_v6 }
 0x6c4   :  { %v11823_v7 = vpop.f32.mrb[52].mxu1 }
 0x6c5   :  { %v13059_v14 = vadd.f32 %v11823_v7, %v20475_v15  ;;  %v3344_v41 = vpop.f32.mrb[53].mxu1 }
 0x6c6   :  { %v13060_v27 = vadd.f32 %v3344_v41, %v20620_v35 }
 0x6c7   :  { %v9757_v29 = vmul.f32 -1.442695, %v13059_v14 }
 0x6c8   :  { %v9756_v31 = vmul.f32 -1.442695, %v13060_v27  ;;  %v11826_v1 = vpop.f32.mrb[54].mxu1 }
 0x6c9   :  { %14188 = vpow2.f32 %v9757_v29  ;;  %v13061_v2 = vadd.f32 %v11826_v1, %v20477_v45  ;;  %v3354_v59 = vpop.f32.mrb[55].mxu1 }
 0x6ca   :  { %14190 = vpow2.f32 %v9756_v31  ;;  %v13062_v24 = vadd.f32 %v3354_v59, %v20621_v37  ;;  %v20624_v59 = vld [vmem:[#allocation35_spill] sm:$0xff] }
 0x6cb   :  { %v9759_v61 = vmul.f32 -1.442695, %v13061_v2 }
 0x6cc   :  { %v9758_v23 = vmul.f32 -1.442695, %v13062_v24  ;;  %v11829_v56 = vpop.f32.mrb[56].mxu1 }
 0x6cd   :  { %14192 = vpow2.f32 %v9759_v61  ;;  %v13063_v50 = vadd.f32 %v11829_v56, %v20622_v21  ;;  %v3364_v54 = vpop.f32.mrb[57].mxu1  ;;  %v20625_v56 = vld [vmem:[#allocation36_spill] sm:$0xff] }
 0x6ce   :  { %14194 = vpow2.f32 %v9758_v23  ;;  %v13064_v32 = vadd.f32 %v3364_v54, %v20480_v55 }
 0x6cf   :  { %v9761_v43 = vmul.f32 -1.442695, %v13063_v50 }
 0x6d0   :  { %v9760_v42 = vmul.f32 -1.442695, %v13064_v32  ;;  %v11832_v11 = vpop.f32.mrb[58].mxu1 }
 0x6d1   :  { %14196 = vpow2.f32 %v9761_v43  ;;  %v13065_v20 = vadd.f32 %v11832_v11, %v20481_v47  ;;  %v3374_v8 = vpop.f32.mrb[59].mxu1  ;;  %v20626_v11 = vld [vmem:[#allocation41_spill] sm:$0xff] }
 0x6d2   :  { %14198 = vpow2.f32 %v9760_v42  ;;  %v13066_v49 = vadd.f32 %v3374_v8, %v20623_v46 }
 0x6d3   :  { %v14189_v4 = vpop.eup %14188  ;;  %v9763_v18 = vmul.f32 -1.442695, %v13065_v20 }
 0x6d4   :  { %v14191_v13 = vpop.eup %14190  ;;  %v3506_v10 = vadd.f32 1.0, %v14189_v4  ;;  %v9762_v39 = vmul.f32 -1.442695, %v13066_v49  ;;  %v11835_v17 = vpop.f32.mrb[60].mxu1 }
 0x6d5   :  { %v3505_v60 = vadd.f32 1.0, %v14191_v13  ;;  %14200 = vpow2.f32 %v9763_v18  ;;  %v13067_v57 = vadd.f32 %v11835_v17, %v20483_v40  ;;  %v3384_v51 = vpop.f32.mrb[61].mxu1  ;;  %v20627_v13 = vld [vmem:[#allocation42_spill] sm:$0xff] }
 0x6d6   :  { %14202 = vrcp.f32 %v3506_v10  ;;  %v13068_v25 = vadd.f32 %v3384_v51, %v20484_v3  ;;  %v20628_v51 = vld [vmem:[#allocation43_spill] sm:$0xff] }
 0x6d7   :  { %v14193_v36 = vpop.eup %14192  ;;  %14204 = vrcp.f32 %v3505_v60  ;;  %v9765_v16 = vmul.f32 -1.442695, %v13067_v57 }
 0x6d8   :  { %v14195_v63 = vpop.eup %14194  ;;  %v3508_v62 = vadd.f32 1.0, %v14193_v36  ;;  %14206 = vpow2.f32 %v9762_v39  ;;  %v9764_v38 = vmul.f32 -1.442695, %v13068_v25  ;;  %v11838_v48 = vpop.f32.mrb[62].mxu1 }
 0x6d9   :  { %v3507_v9 = vadd.f32 1.0, %v14195_v63  ;;  %14208 = vpow2.f32 %v9765_v16  ;;  %v13069_v33 = vadd.f32 %v11838_v48, %v20485_v52  ;;  %v3394_v6 = vpop.f32.mrb[63].mxu1 }
 0x6da   :  { %14210 = vrcp.f32 %v3508_v62  ;;  %v13070_v7 = vadd.f32 %v3394_v6, %v20486_v58 }
 0x6db   :  { %v14197_v14 = vpop.eup %14196  ;;  %14212 = vrcp.f32 %v3507_v9  ;;  %v9767_v41 = vmul.f32 -1.442695, %v13069_v33 }
 0x6dc   :  { %v14199_v27 = vpop.eup %14198  ;;  %v3510_v29 = vadd.f32 1.0, %v14197_v14  ;;  %14214 = vpow2.f32 %v9764_v38  ;;  %v9766_v31 = vmul.f32 -1.442695, %v13070_v7  ;;  %v11841_v1 = vpop.f32.mrb[64].mxu1  ;;  %v20629_v38 = vld [vmem:[#allocation44_spill] sm:$0xff]  ;;  %v20630_v14 = vld [vmem:[#allocation37_spill] sm:$0xff] }
 0x6dd   :  { %v3509_v2 = vadd.f32 1.0, %v14199_v27  ;;  %14216 = vpow2.f32 %v9767_v41  ;;  %v13071_v24 = vadd.f32 %v11841_v1, %v20624_v59  ;;  %v3404_v61 = vpop.f32.mrb[65].mxu1 }
 0x6de   :  { %14218 = vrcp.f32 %v3510_v29  ;;  %v13072_v50 = vadd.f32 %v3404_v61, %v20625_v56 }
 0x6df   :  { %v14201_v23 = vpop.eup %14200  ;;  %14220 = vrcp.f32 %v3509_v2 }
 0x6e0   :  { %v14203_v54 = vpop.eup %14202  ;;  %v3542_v32 = vadd.f32 1.0, %v14201_v23  ;;  %14222 = vpow2.f32 %v9766_v31  ;;  %v11844_v43 = vpop.f32.mrb[66].mxu1 }
 0x6e1   :  { %v14205_v42 = vpop.eup %14204  ;;  %14224 = vtanh.f32 %v13071_v24  ;;  %v13073_v20 = vadd.f32 %v11844_v43, %v20626_v11  ;;  %v3414_v8 = vpop.f32.mrb[67].mxu1 }
 0x6e2   :  { %v14207_v49 = vpop.eup %14206  ;;  %14226 = vrcp.f32 %v3542_v32  ;;  %v13074_v10 = vadd.f32 %v3414_v8, %v20627_v13 }
 0x6e3   :  { %v14209_v4 = vpop.eup %14208  ;;  %v3541_v18 = vadd.f32 1.0, %v14207_v49  ;;  %14228 = vtanh.f32 %v13072_v50 }
 0x6e4   :  { %v14211_v39 = vpop.eup %14210  ;;  %v3544_v17 = vadd.f32 1.0, %v14209_v4  ;;  %14230 = vtanh.f32 %v13073_v20  ;;  %v11847_v60 = vpop.f32.mrb[68].mxu1 }
 0x6e5   :  { %v14213_v57 = vpop.eup %14212  ;;  %14232 = vrcp.f32 %v3541_v18  ;;  %v13075_v25 = vadd.f32 %v11847_v60, %v20628_v51  ;;  %v3424_v36 = vpop.f32.mrb[69].mxu1 }
 0x6e6   :  { %v14215_v16 = vpop.eup %14214  ;;  %14234 = vrcp.f32 %v3544_v17  ;;  %v13076_v48 = vadd.f32 %v3424_v36, %v20629_v38 }
 0x6e7   :  { %v14217_v63 = vpop.eup %14216  ;;  %v3543_v62 = vadd.f32 1.0, %v14215_v16  ;;  %14236 = vtanh.f32 %v13074_v10 }
 0x6e8   :  { %v14219_v9 = vpop.eup %14218  ;;  %v3546_v33 = vadd.f32 1.0, %v14217_v63  ;;  %14238 = vtanh.f32 %v13075_v25  ;;  %v11850_v6 = vpop.f32.mrb[70].mxu1 }
 0x6e9   :  { %v14221_v7 = vpop.eup %14220  ;;  %14240 = vrcp.f32 %v3543_v62  ;;  %v13077_v41 = vadd.f32 %v11850_v6, %v20630_v14  ;;  %v3434_v27 = vpop.f32.mrb[71].mxu1 }
 0x6ea   :  { %v14223_v29 = vpop.eup %14222  ;;  %14242 = vrcp.f32 %v3546_v33  ;;  %v13078_v31 = vadd.f32 %v3434_v27, %v20494_v0 }
 0x6eb   :  { %v14225_v1 = vpop.eup %14224  ;;  %v3545_v2 = vadd.f32 1.0, %v14223_v29  ;;  %14244 = vtanh.f32 %v13076_v48  ;;  %v9769_v24 = vmul.f32 -1.442695, %v13077_v41 }
 0x6ec   :  { %v14227_v61 = vpop.eup %14226  ;;  %v3608_v23 = vmul.f32 %v14225_v1, %v14203_v54  ;;  %v9768_v50 = vmul.f32 -1.442695, %v13078_v31  ;;  %v11853_v32 = vpop.f32.mrb[72].mxu1 }
 0x6ed   :  { %v14229_v43 = vpop.eup %14228  ;;  %v3602_v20 = vmul.f32 %v14227_v61, %v17336_v53  ;;  %14246 = vrcp.f32 %v3545_v2  ;;  %v13079_v8 = vadd.f32 %v11853_v32, %v20495_v26  ;;  %v3444_v49 = vpop.f32.mrb[73].mxu1 }
 0x6ee   :  { %v14231_v4 = vpop.eup %14230  ;;  %v3607_v18 = vmul.f32 %v14229_v43, %v14205_v42  ;;  %14248 = vpow2.f32 %v9769_v24  ;;  %v13080_v10 = vadd.f32 %v3444_v49, %v20496_v19 }
 0x6ef   :  { %v14233_v17 = vpop.eup %14232  ;;  %v17485_v60 = vadd.f32 %v3608_v23, %v3602_v20  ;;  %v3610_v25 = vmul.f32 %v14231_v4, %v14211_v39  ;;  %14250 = vpow2.f32 %v9768_v50  ;;  %v9771_v54 = vmul.f32 -1.442695, %v13079_v8 }
 0x6f0   :  { %v14235_v36 = vpop.eup %14234  ;;  %v3601_v16 = vmul.f32 %v14233_v17, %v17341_v22  ;;  %v9770_v63 = vmul.f32 -1.442695, %v13080_v10  ;;  %v11856_v53 = vpop.f32.mrb[74].mxu1 }
 0x6f1   :  { %v14237_v62 = vpop.eup %14236  ;;  %v3604_v48 = vmul.f32 %v14235_v36, %v17344_v5  ;;  %v13081_v33 = vadd.f32 %v11856_v53, %v16244_v30  ;;  %v3454_v42 = vpop.f32.mrb[75].mxu1  ;;  %14252 = vpow2.f32 %v9771_v54 }
 0x6f2   :  { %v14239_v6 = vpop.eup %14238  ;;  %v17490_v41 = vadd.f32 %v3607_v18, %v3601_v16  ;;  %v3609_v27 = vmul.f32 %v14237_v62, %v14213_v57  ;;  %v13082_v39 = vadd.f32 %v3454_v42, %v16247_v28  ;;  %14254 = vpow2.f32 %v9770_v63 }
 0x6f3   :  { %v14241_v29 = vpop.eup %14240  ;;  %v17493_v31 = vadd.f32 %v3610_v25, %v3604_v48  ;;  %v3612_v1 = vmul.f32 %v14239_v6, %v14219_v9  ;;  %v9773_v22 = vmul.f32 -1.442695, %v13081_v33 }
 0x6f4   :  { %v14243_v2 = vpop.eup %14242  ;;  %v3603_v24 = vmul.f32 %v14241_v29, %v17348_v34  ;;  %v9772_v5 = vmul.f32 -1.442695, %v13082_v39 }
 0x6f5   :  { %v14245_v61 = vpop.eup %14244  ;;  %v3606_v23 = vmul.f32 %v14243_v2, %v17350_v12  ;;  %14256 = vpow2.f32 %v9773_v22 }
 0x6f6   :  { %v17497_v50 = vadd.f32 %v3609_v27, %v3603_v24  ;;  %v3611_v32 = vmul.f32 %v14245_v61, %v14221_v7  ;;  %14258 = vpow2.f32 %v9772_v5 }
 0x6f7   :  { %v14247_v57 = vpop.eup %14246  ;;  %v17499_v43 = vadd.f32 %v3612_v1, %v3606_v23  ;;  %14260 = vtanh.f32 %v17485_v60 }
 0x6f8   :  { %v14249_v20 = vpop.eup %14248  ;;  %v3605_v9 = vmul.f32 %v14247_v57, %v17355_v44  ;;  %14262 = vtanh.f32 %v17490_v41 }
 0x6f9   :  { %v14251_v8 = vpop.eup %14250  ;;  %v3584_v49 = vadd.f32 1.0, %v14249_v20  ;;  %v17513_v20 = vld [vmem:[%s20104_s4 + $0x8] sm:$0xff] }
 0x6fa   :  { %v17504_v34 = vadd.f32 %v3611_v32, %v3605_v9  ;;  %v3583_v12 = vadd.f32 1.0, %v14251_v8  ;;  %v17520_v9 = vld [vmem:[%s20104_s4 + $0x10] sm:$0xff]  ;;  %v17527_v8 = vld [vmem:[%s20104_s4 + $0x18] sm:$0xff] }
 0x6fb   :  { %14264 = vrcp.f32 %v3584_v49  ;;  %v14253_v4 = vpop.eup %14252  ;;  %v17534_v49 = vld [vmem:[%s20104_s4 + $0x20] sm:$0xff] }
 0x6fc   :  { %14266 = vtanh.f32 %v17493_v31  ;;  %v14255_v7 = vpop.eup %14254  ;;  %v3586_v18 = vadd.f32 1.0, %v14253_v4  ;;  %v17548_v4 = vld [vmem:[%s20104_s4 + $0x30] sm:$0xff] }
 0x6fd   :  { %14268 = vrcp.f32 %v3583_v12  ;;  %v3585_v10 = vadd.f32 1.0, %v14255_v7  ;;  %v17541_v12 = vld [vmem:[%s20104_s4 + $0x28] sm:$0xff]  ;;  %v17555_v7 = vld [vmem:[%s20104_s4 + $0x38] sm:$0xff] }
 0x6fe   :  { %14270 = vtanh.f32 %v17497_v50 }
 0x6ff   :  { %14272 = vrcp.f32 %v3586_v18  ;;  %v14257_v44 = vpop.eup %14256  ;;  %v17562_v18 = vld [vmem:[%s20104_s4 + $0x40] sm:$0xff] }
 0x700   :  { %14274 = vrcp.f32 %v3585_v10  ;;  %v14259_v17 = vpop.eup %14258  ;;  %v3588_v25 = vadd.f32 1.0, %v14257_v44  ;;  %v17569_v10 = vld [vmem:[%s20104_s4 + $0x48] sm:$0xff]  ;;  %v17576_v44 = vld [vmem:[%s20104_s4 + $0x50] sm:$0xff] }
 0x701   :  { %14276 = vtanh.f32 %v17499_v43  ;;  %v3587_v54 = vadd.f32 1.0, %v14259_v17  ;;  %v14261_v36 = vpop.eup %14260  ;;  %v17583_v17 = vld [vmem:[%s20104_s4 + $0x58] sm:$0xff] }
 0x702   :  { %14278 = vtanh.f32 %v17504_v34  ;;  %v14263_v16 = vpop.eup %14262 }
 0x703   :  { %14280 = vrcp.f32 %v3588_v25  ;;  %v17590_v25 = vld [vmem:[%s20104_s4 + $0x60] sm:$0xff] }
 0x704   :  { %14282 = vrcp.f32 %v3587_v54  ;;  %v17597_v54 = vld [vmem:[%s20104_s4 + $0x68] sm:$0xff] }
 0x705   :  { %v14265_v63 = vpop.eup %14264 }
 0x706   :  { %v14267_v53 = vpop.eup %14266  ;;  %v3626_v62 = vmul.f32 %v14265_v63, %v14261_v36  ;;  %v17604_v36 = vld [vmem:[%s20104_s4 + $0x70] sm:$0xff]  ;;  %v17618_v63 = vld [vmem:[%s20104_s4 + $0x80] sm:$0xff] }
 0x707   :  { %v14269_v48 = vpop.eup %14268 }
 0x708   :  { %v14271_v33 = vpop.eup %14270  ;;  %v3625_v42 = vmul.f32 %v14269_v48, %v14263_v16  ;;  %v17611_v16 = vld [vmem:[%s20104_s4 + $0x78] sm:$0xff] }
 0x709   :  { %v14273_v6 = vpop.eup %14272  ;;  %v17639_v48 = vld [vmem:[%s20104_s4 + $0x98] sm:$0xff] }
 0x70a   :  { %v14275_v27 = vpop.eup %14274  ;;  %v12801_v39 = vpack.c.bf16 %v3626_v62, %v3625_v42  ;;  %v3628_v29 = vmul.f32 %v14273_v6, %v14267_v53  ;;  %v17625_v53 = vld [vmem:[%s20104_s4 + $0x88] sm:$0xff]  ;;  %v17632_v62 = vld [vmem:[%s20104_s4 + $0x90] sm:$0xff] }
 0x70b   :  { %v14277_v1 = vpop.eup %14276  ;;  %v3627_v22 = vmul.f32 %v14275_v27, %v14271_v33  ;;  %v17646_v33 = vld [vmem:[%s20104_s4 + $0xa0] sm:$0xff]  ;;  %v17653_v42 = vld [vmem:[%s20104_s4 + $0xa8] sm:$0xff]  ;;  %v17660_v6 = vld [vmem:[%s20104_s4 + $0xb0] sm:$0xff] }
 0x70c   :  { %v14279_v2 = vpop.eup %14278  ;;  %12802 = vmatprep.subr.bf16.mxu0 %v12801_v39  ;;  %20631 = vst [vmem:[#allocation10_spill] sm:$0xff] %v17653_v42  ;;  %20632 = vst [vmem:[#allocation11_spill] sm:$0xff] %v17660_v6  ;;  %v17667_v27 = vld [vmem:[%s20104_s4 + $0xb8] sm:$0xff] }
 0x70d   :  { %v14281_v24 = vpop.eup %14280  ;;  %12804 = vmatpush3.bf16.msra.mxu0 %v12801_v39  ;;  %v12805_v5 = vpack.c.bf16 %v3628_v29, %v3627_v22  ;;  %20633 = vst [vmem:[#allocation12_spill] sm:$0xff] %v17667_v27  ;;  %v17674_v39 = vld [vmem:[%s20102_s2] sm:$0xff]  ;;  %v9842_v29 = vld [vmem:[%s20100_s0 + $0xe] sm:$0x3]  ;;  %v17693_v22 = vld [vmem:[%s20102_s2 + $0x10] sm:$0xff] }
 0x70e   :  { %v14283_v61 = vpop.eup %14282  ;;  %v3630_v23 = vmul.f32 %v14281_v24, %v14277_v1  ;;  %20634 = vst [vmem:[#allocation13_spill] sm:$0xff] %v17674_v39  ;;  %11943 = vmatprep.subr.msk.mxu1 %vm301_vm0, %v9842_v29  ;;  %v17686_v1 = vld [vmem:[%s20102_s2 + $0x8] sm:$0xff]  ;;  %20636 = vst [vmem:[#allocation15_spill] sm:$0xff] %v17693_v22  ;;  %v17707_v24 = vld [vmem:[%s20102_s2 + $0x20] sm:$0xff] }
 0x70f   :  { %12806 = vmatprep.subr.bf16.mxu0 %v12805_v5  ;;  %v3629_v32 = vmul.f32 %v14283_v61, %v14279_v2  ;;  %11944 = vmatpush3.msk.msra.mxu1 %vm301_vm0, %v9842_v29  ;;  %20635 = vst [vmem:[#allocation14_spill] sm:$0xff] %v17686_v1  ;;  %v17700_v2 = vld [vmem:[%s20102_s2 + $0x18] sm:$0xff]  ;;  %20638 = vst [vmem:[#allocation17_spill] sm:$0xff] %v17707_v24  ;;  %v17721_v61 = vld [vmem:[%s20102_s2 + $0x30] sm:$0xff] }
 0x710   :  { %11946 = vmatmul.mubr.msk.f32.vlgmr.msra.gmra.mrb[76].mxu1 %vm228_vm1, %v17686_v1  ;;  %20637 = vst [vmem:[#allocation16_spill] sm:$0xff] %v17700_v2  ;;  %20640 = vst [vmem:[#allocation19_spill] sm:$0xff] %v17721_v61  ;;  %v17749_v29 = vld [vmem:[%s20102_s2 + $0x50] sm:$0xff] }
 0x711   :  { %12808 = vmatpush3.bf16.msra.mxu0 %v12805_v5  ;;  %v12809_v57 = vpack.c.bf16 %v3630_v23, %v3629_v32  ;;  %11948 = vmatprep.mubr.msk.f32.mxu1 %vm228_vm1, %v17693_v22  ;;  %v17714_v5 = vld [vmem:[%s20102_s2 + $0x28] sm:$0xff]  ;;  %v17728_v23 = vld [vmem:[%s20102_s2 + $0x38] sm:$0xff]  ;;  %v17735_v32 = vld [vmem:[%s20102_s2 + $0x40] sm:$0xff]  ;;  %20644 = vst [vmem:[#allocation7_spill] sm:$0xff] %v17749_v29 }
 0x712   :  { %20639 = vst [vmem:[#allocation18_spill] sm:$0xff] %v17714_v5  ;;  %20641 = vst [vmem:[#allocation20_spill] sm:$0xff] %v17728_v23 }
 0x713   :  { %12810 = vmatprep.subr.bf16.mxu0 %v12809_v57  ;;  %20642 = vst [vmem:[#allocation21_spill] sm:$0xff] %v17735_v32 }
 0x714   :  { %11949 = vmatmul.mubr.msk.f32.gmra.mrb[78].mxu1 %vm228_vm1, %v17700_v2 }
 0x715   :  { %12812 = vmatpush3.bf16.msra.mxu0 %v12809_v57  ;;  %11951 = vmatprep.mubr.msk.f32.mxu1 %vm228_vm1, %v17707_v24  ;;  %v17742_v57 = vld [vmem:[%s20102_s2 + $0x48] sm:$0xff] }
 0x716   :  { %20643 = vst [vmem:[#allocation6_spill] sm:$0xff] %v17742_v57 }
 0x718   :  { %11908 = vmatmul.mubr.msk.f32.vlgmr.msra.gmra.mrb[72].mxu0 %vm490_vm2, %v17513_v20  ;;  %11952 = vmatmul.mubr.msk.f32.gmra.mrb[80].mxu1 %vm228_vm1, %v17714_v5 }
 0x719   :  { %11910 = vmatprep.mubr.msk.f32.mxu0 %vm490_vm2, %v17520_v9  ;;  %11954 = vmatprep.mubr.msk.f32.mxu1 %vm228_vm1, %v17721_v61 }
 0x71c   :  { %11911 = vmatmul.mubr.msk.f32.gmra.mrb[74].mxu0 %vm490_vm2, %v17527_v8  ;;  %11955 = vmatmul.mubr.msk.f32.gmra.mrb[82].mxu1 %vm228_vm1, %v17728_v23 }
 0x71d   :  { %11913 = vmatprep.mubr.msk.f32.mxu0 %vm490_vm2, %v17534_v49  ;;  %11957 = vmatprep.mubr.msk.f32.mxu1 %vm228_vm1, %v17735_v32  ;;  %v17756_v32 = vld [vmem:[%s20102_s2 + $0x58] sm:$0xff] }
 0x71e   :  { %20645 = vst [vmem:[#allocation8_spill] sm:$0xff] %v17756_v32 }
 0x720   :  { %11914 = vmatmul.mubr.msk.f32.gmra.mrb[76].mxu0 %vm490_vm2, %v17541_v12  ;;  %11958 = vmatmul.mubr.msk.f32.gmra.mrb[84].mxu1 %vm228_vm1, %v17742_v57  ;;  %v17763_v57 = vld [vmem:[%s20102_s2 + $0x60] sm:$0xff] }
 0x721   :  { %11916 = vmatprep.mubr.msk.f32.mxu0 %vm490_vm2, %v17548_v4  ;;  %11960 = vmatprep.mubr.msk.f32.mxu1 %vm228_vm1, %v17749_v29  ;;  %20646 = vst [vmem:[#allocation9_spill] sm:$0xff] %v17763_v57  ;;  %v17770_v29 = vld [vmem:[%s20102_s2 + $0x68] sm:$0xff] }
 0x722   :  { %20647 = vst [vmem:[#allocation22_spill] sm:$0xff] %v17770_v29 }
 0x724   :  { %11917 = vmatmul.mubr.msk.f32.gmra.mrb[78].mxu0 %vm490_vm2, %v17555_v7  ;;  %11961 = vmatmul.mubr.msk.f32.gmra.mrb[86].mxu1 %vm228_vm1, %v17756_v32  ;;  %v17777_v32 = vld [vmem:[%s20102_s2 + $0x70] sm:$0xff] }
 0x725   :  { %11919 = vmatprep.mubr.msk.f32.mxu0 %vm490_vm2, %v17562_v18  ;;  %11963 = vmatprep.mubr.msk.f32.mxu1 %vm228_vm1, %v17763_v57  ;;  %20648 = vst [vmem:[#allocation26_spill] sm:$0xff] %v17777_v32  ;;  %v17784_v57 = vld [vmem:[%s20102_s2 + $0x78] sm:$0xff] }
 0x726   :  { %20649 = vst [vmem:[#allocation27_spill] sm:$0xff] %v17784_v57 }
 0x728   :  { %11920 = vmatmul.mubr.msk.f32.gmra.mrb[80].mxu0 %vm490_vm2, %v17569_v10  ;;  %11964 = vmatmul.mubr.msk.f32.gmra.mrb[88].mxu1 %vm228_vm1, %v17770_v29  ;;  %v17791_v29 = vld [vmem:[%s20102_s2 + $0x80] sm:$0xff] }
 0x729   :  { %11922 = vmatprep.mubr.msk.f32.mxu0 %vm490_vm2, %v17576_v44  ;;  %11966 = vmatprep.mubr.msk.f32.mxu1 %vm228_vm1, %v17777_v32  ;;  %20650 = vst [vmem:[#allocation32_spill] sm:$0xff] %v17791_v29  ;;  %v17798_v32 = vld [vmem:[%s20102_s2 + $0x88] sm:$0xff] }
 0x72a   :  { %20651 = vst [vmem:[#allocation25_spill] sm:$0xff] %v17798_v32 }
 0x72c   :  { %11923 = vmatmul.mubr.msk.f32.gmra.mrb[82].mxu0 %vm490_vm2, %v17583_v17  ;;  %11967 = vmatmul.mubr.msk.f32.gmra.mrb[90].mxu1 %vm228_vm1, %v17784_v57  ;;  %v17805_v57 = vld [vmem:[%s20102_s2 + $0x90] sm:$0xff] }
 0x72d   :  { %11925 = vmatprep.mubr.msk.f32.mxu0 %vm490_vm2, %v17590_v25  ;;  %11969 = vmatprep.mubr.msk.f32.mxu1 %vm228_vm1, %v17791_v29  ;;  %20652 = vst [vmem:[#allocation29_spill] sm:$0xff] %v17805_v57  ;;  %v17812_v29 = vld [vmem:[%s20102_s2 + $0x98] sm:$0xff] }
 0x72e   :  { %20653 = vst [vmem:[#allocation30_spill] sm:$0xff] %v17812_v29 }
 0x730   :  { %11926 = vmatmul.mubr.msk.f32.gmra.mrb[84].mxu0 %vm490_vm2, %v17597_v54  ;;  %11970 = vmatmul.mubr.msk.f32.gmra.mrb[92].mxu1 %vm228_vm1, %v17798_v32  ;;  %v17819_v32 = vld [vmem:[%s20102_s2 + $0xa0] sm:$0xff] }
 0x731   :  { %11928 = vmatprep.mubr.msk.f32.mxu0 %vm490_vm2, %v17604_v36  ;;  %11972 = vmatprep.mubr.msk.f32.mxu1 %vm228_vm1, %v17805_v57  ;;  %20654 = vst [vmem:[#allocation33_spill] sm:$0xff] %v17819_v32  ;;  %v17826_v57 = vld [vmem:[%s20102_s2 + $0xa8] sm:$0xff] }
 0x732   :  { %20655 = vst [vmem:[#allocation34_spill] sm:$0xff] %v17826_v57 }
 0x734   :  { %11929 = vmatmul.mubr.msk.f32.gmra.mrb[86].mxu0 %vm490_vm2, %v17611_v16  ;;  %11973 = vmatmul.mubr.msk.f32.gmra.mrb[94].mxu1 %vm228_vm1, %v17812_v29  ;;  %v17833_v29 = vld [vmem:[%s20102_s2 + $0xb0] sm:$0xff] }
 0x735   :  { %11931 = vmatprep.mubr.msk.f32.mxu0 %vm490_vm2, %v17618_v63  ;;  %11975 = vmatprep.mubr.msk.f32.mxu1 %vm228_vm1, %v17819_v32  ;;  %20656 = vst [vmem:[#allocation38_spill] sm:$0xff] %v17833_v29  ;;  %v17840_v32 = vld [vmem:[%s20102_s2 + $0xb8] sm:$0xff] }
 0x736   :  { %20657 = vst [vmem:[#allocation39_spill] sm:$0xff] %v17840_v32 }
 0x738   :  { %11932 = vmatmul.mubr.msk.f32.gmra.mrb[88].mxu0 %vm490_vm2, %v17625_v53  ;;  %11976 = vmatmul.mubr.msk.f32.gmra.mrb[96].mxu1 %vm228_vm1, %v17826_v57  ;;  %v17847_v57 = vld [vmem:[%s20104_s4] sm:$0xff] }
 0x739   :  { %11934 = vmatprep.mubr.msk.f32.mxu0 %vm490_vm2, %v17632_v62  ;;  %11978 = vmatprep.mubr.msk.f32.mxu1 %vm228_vm1, %v17833_v29  ;;  %20658 = vst [vmem:[#allocation40_spill] sm:$0xff] %v17847_v57 }
 0x73c   :  { %11935 = vmatmul.mubr.msk.f32.gmra.mrb[90].mxu0 %vm490_vm2, %v17639_v48  ;;  %11979 = vmatmul.mubr.msk.f32.gmra.mrb[98].mxu1 %vm228_vm1, %v17840_v32 }
 0x73d   :  { %11937 = vmatprep.mubr.msk.f32.mxu0 %vm490_vm2, %v17646_v33  ;;  %11993 = vmatprep.mubr.msk.f32.mxu1 %vm490_vm2, %v17847_v57 }
 0x740   :  { %11938 = vmatmul.mubr.msk.f32.gmra.mrb[92].mxu0 %vm490_vm2, %v17653_v42 }
 0x741   :  { %11940 = vmatprep.mubr.msk.f32.mxu0 %vm490_vm2, %v17660_v6 }
 0x744   :  { %11941 = vmatmul.mubr.msk.f32.gmra.mrb[94].mxu0 %vm490_vm2, %v17667_v27 }
 0x745   :  { %12031 = vmatprep.mubr.msk.f32.mxu0 %vm228_vm1, %v17674_v39 }
 0x7eb   :  { %v11909_v23 = vpop.f32.mrb[72].mxu0 }
 0x7ec   :  { %v13083_v61 = vadd.f32 %v11909_v23, %v20475_v15  ;;  %v3887_v29 = vpop.f32.mrb[73].mxu0 }
 0x7ed   :  { %v13084_v5 = vadd.f32 %v3887_v29, %v20620_v35 }
 0x7ee   :  { %v9825_v24 = vmul.f32 -1.442695, %v13083_v61 }
 0x7ef   :  { %v9824_v2 = vmul.f32 -1.442695, %v13084_v5  ;;  %v11912_v22 = vpop.f32.mrb[74].mxu0 }
 0x7f0   :  { %14284 = vpow2.f32 %v9825_v24  ;;  %v13085_v32 = vadd.f32 %v11912_v22, %v20477_v45  ;;  %v3897_v1 = vpop.f32.mrb[75].mxu0 }
 0x7f1   :  { %14286 = vpow2.f32 %v9824_v2  ;;  %v13086_v39 = vadd.f32 %v3897_v1, %v20621_v37 }
 0x7f2   :  { %v9827_v27 = vmul.f32 -1.442695, %v13085_v32 }
 0x7f3   :  { %v9826_v6 = vmul.f32 -1.442695, %v13086_v39  ;;  %v11915_v42 = vpop.f32.mrb[76].mxu0 }
 0x7f4   :  { %14288 = vpow2.f32 %v9827_v27  ;;  %v13087_v57 = vadd.f32 %v11915_v42, %v20622_v21  ;;  %v3907_v23 = vpop.f32.mrb[77].mxu0 }
 0x7f5   :  { %14290 = vpow2.f32 %v9826_v6  ;;  %v13088_v29 = vadd.f32 %v3907_v23, %v20480_v55 }
 0x7f6   :  { %v9829_v61 = vmul.f32 -1.442695, %v13087_v57 }
 0x7f7   :  { %v9828_v5 = vmul.f32 -1.442695, %v13088_v29  ;;  %v11918_v35 = vpop.f32.mrb[78].mxu0 }
 0x7f8   :  { %14292 = vpow2.f32 %v9829_v61  ;;  %v13089_v22 = vadd.f32 %v11918_v35, %v20481_v47  ;;  %v3917_v24 = vpop.f32.mrb[79].mxu0 }
 0x7f9   :  { %14294 = vpow2.f32 %v9828_v5  ;;  %v13090_v1 = vadd.f32 %v3917_v24, %v20623_v46 }
 0x7fa   :  { %v14285_v2 = vpop.eup %14284  ;;  %v9831_v39 = vmul.f32 -1.442695, %v13089_v22 }
 0x7fb   :  { %v14287_v32 = vpop.eup %14286  ;;  %v4049_v27 = vadd.f32 1.0, %v14285_v2  ;;  %v9830_v37 = vmul.f32 -1.442695, %v13090_v1  ;;  %v11921_v42 = vpop.f32.mrb[80].mxu0 }
 0x7fc   :  { %v4048_v21 = vadd.f32 1.0, %v14287_v32  ;;  %14296 = vpow2.f32 %v9831_v39  ;;  %v13091_v6 = vadd.f32 %v11921_v42, %v20483_v40  ;;  %v3927_v57 = vpop.f32.mrb[81].mxu0 }
 0x7fd   :  { %14298 = vrcp.f32 %v4049_v27  ;;  %v13092_v23 = vadd.f32 %v3927_v57, %v20484_v3 }
 0x7fe   :  { %v14289_v29 = vpop.eup %14288  ;;  %14300 = vrcp.f32 %v4048_v21  ;;  %v9833_v35 = vmul.f32 -1.442695, %v13091_v6 }
 0x7ff   :  { %v14291_v61 = vpop.eup %14290  ;;  %v4051_v5 = vadd.f32 1.0, %v14289_v29  ;;  %14302 = vpow2.f32 %v9830_v37  ;;  %v9832_v24 = vmul.f32 -1.442695, %v13092_v23  ;;  %v11924_v22 = vpop.f32.mrb[82].mxu0 }
 0x800   :  { %v4050_v46 = vadd.f32 1.0, %v14291_v61  ;;  %14304 = vpow2.f32 %v9833_v35  ;;  %v13093_v1 = vadd.f32 %v11924_v22, %v20485_v52  ;;  %v3937_v2 = vpop.f32.mrb[83].mxu0 }
 0x801   :  { %14306 = vrcp.f32 %v4051_v5  ;;  %v13094_v39 = vadd.f32 %v3937_v2, %v20486_v58 }
 0x802   :  { %v14293_v32 = vpop.eup %14292  ;;  %14308 = vrcp.f32 %v4050_v46  ;;  %v9835_v27 = vmul.f32 -1.442695, %v13093_v1 }
 0x803   :  { %v14295_v42 = vpop.eup %14294  ;;  %v4053_v57 = vadd.f32 1.0, %v14293_v32  ;;  %14310 = vpow2.f32 %v9832_v24  ;;  %v9834_v21 = vmul.f32 -1.442695, %v13094_v39  ;;  %v11927_v6 = vpop.f32.mrb[84].mxu0 }
 0x804   :  { %v4052_v29 = vadd.f32 1.0, %v14295_v42  ;;  %14312 = vpow2.f32 %v9835_v27  ;;  %v13095_v37 = vadd.f32 %v11927_v6, %v20624_v59  ;;  %v3947_v23 = vpop.f32.mrb[85].mxu0 }
 0x805   :  { %14314 = vrcp.f32 %v4053_v57  ;;  %v13096_v61 = vadd.f32 %v3947_v23, %v20625_v56 }
 0x806   :  { %v14297_v35 = vpop.eup %14296  ;;  %14316 = vrcp.f32 %v4052_v29 }
 0x807   :  { %v14299_v5 = vpop.eup %14298  ;;  %v4085_v22 = vadd.f32 1.0, %v14297_v35  ;;  %14318 = vpow2.f32 %v9834_v21  ;;  %v11930_v46 = vpop.f32.mrb[86].mxu0 }
 0x808   :  { %v14301_v1 = vpop.eup %14300  ;;  %14320 = vtanh.f32 %v13095_v37  ;;  %v13097_v24 = vadd.f32 %v11930_v46, %v20626_v11  ;;  %v3957_v2 = vpop.f32.mrb[87].mxu0 }
 0x809   :  { %v14303_v39 = vpop.eup %14302  ;;  %14322 = vrcp.f32 %v4085_v22  ;;  %v13098_v42 = vadd.f32 %v3957_v2, %v20627_v13 }
 0x80a   :  { %v14305_v32 = vpop.eup %14304  ;;  %v4084_v27 = vadd.f32 1.0, %v14303_v39  ;;  %14324 = vtanh.f32 %v13096_v61 }
 0x80b   :  { %v14307_v57 = vpop.eup %14306  ;;  %v4087_v6 = vadd.f32 1.0, %v14305_v32  ;;  %14326 = vtanh.f32 %v13097_v24  ;;  %v11933_v29 = vpop.f32.mrb[88].mxu0 }
 0x80c   :  { %v14309_v23 = vpop.eup %14308  ;;  %14328 = vrcp.f32 %v4084_v27  ;;  %v13099_v21 = vadd.f32 %v11933_v29, %v20628_v51  ;;  %v3967_v35 = vpop.f32.mrb[89].mxu0 }
 0x80d   :  { %v14311_v37 = vpop.eup %14310  ;;  %14330 = vrcp.f32 %v4087_v6  ;;  %v13100_v22 = vadd.f32 %v3967_v35, %v20629_v38 }
 0x80e   :  { %v14313_v46 = vpop.eup %14312  ;;  %v4086_v11 = vadd.f32 1.0, %v14311_v37  ;;  %14332 = vtanh.f32 %v13098_v42 }
 0x80f   :  { %v14315_v39 = vpop.eup %14314  ;;  %v4089_v61 = vadd.f32 1.0, %v14313_v46  ;;  %14334 = vtanh.f32 %v13099_v21  ;;  %v11936_v2 = vpop.f32.mrb[90].mxu0 }
 0x810   :  { %v14317_v13 = vpop.eup %14316  ;;  %14336 = vrcp.f32 %v4086_v11  ;;  %v13101_v24 = vadd.f32 %v11936_v2, %v20630_v14  ;;  %v3977_v32 = vpop.f32.mrb[91].mxu0 }
 0x811   :  { %v14319_v27 = vpop.eup %14318  ;;  %14338 = vrcp.f32 %v4089_v61  ;;  %v13102_v29 = vadd.f32 %v3977_v32, %v20494_v0 }
 0x812   :  { %v14321_v51 = vpop.eup %14320  ;;  %v4088_v6 = vadd.f32 1.0, %v14319_v27  ;;  %14340 = vtanh.f32 %v13100_v22  ;;  %v9837_v37 = vmul.f32 -1.442695, %v13101_v24 }
 0x813   :  { %v14323_v42 = vpop.eup %14322  ;;  %v4151_v56 = vmul.f32 %v14321_v51, %v14299_v5  ;;  %v9836_v35 = vmul.f32 -1.442695, %v13102_v29  ;;  %v11939_v38 = vpop.f32.mrb[92].mxu0 }
 0x814   :  { %v14325_v46 = vpop.eup %14324  ;;  %v4145_v21 = vmul.f32 %v14323_v42, %v17485_v60  ;;  %14342 = vrcp.f32 %v4088_v6  ;;  %v13103_v11 = vadd.f32 %v11939_v38, %v20495_v26  ;;  %v3987_v2 = vpop.f32.mrb[93].mxu0 }
 0x815   :  { %v14327_v14 = vpop.eup %14326  ;;  %v4150_v59 = vmul.f32 %v14325_v46, %v14301_v1  ;;  %14344 = vpow2.f32 %v9837_v37  ;;  %v13104_v61 = vadd.f32 %v3987_v2, %v20496_v19 }
 0x816   :  { %v14329_v32 = vpop.eup %14328  ;;  %v17874_v27 = vadd.f32 %v4151_v56, %v4145_v21  ;;  %v4153_v22 = vmul.f32 %v14327_v14, %v14307_v57  ;;  %14346 = vpow2.f32 %v9836_v35  ;;  %v9839_v51 = vmul.f32 -1.442695, %v13103_v11 }
 0x817   :  { %v14331_v5 = vpop.eup %14330  ;;  %v4144_v24 = vmul.f32 %v14329_v32, %v17490_v41  ;;  %v9838_v29 = vmul.f32 -1.442695, %v13104_v61  ;;  %v11942_v60 = vpop.f32.mrb[94].mxu0 }
 0x818   :  { %v14333_v6 = vpop.eup %14332  ;;  %v4147_v38 = vmul.f32 %v14331_v5, %v17493_v31  ;;  %v13105_v42 = vadd.f32 %v11942_v60, %v16244_v30  ;;  %v3997_v1 = vpop.f32.mrb[95].mxu0  ;;  %14348 = vpow2.f32 %v9839_v51 }
 0x819   :  { %v14335_v37 = vpop.eup %14334  ;;  %v17879_v46 = vadd.f32 %v4150_v59, %v4144_v24  ;;  %v4152_v2 = vmul.f32 %v14333_v6, %v14309_v23  ;;  %v13106_v56 = vadd.f32 %v3997_v1, %v16247_v28  ;;  %14350 = vpow2.f32 %v9838_v29 }
 0x81a   :  { %v14337_v14 = vpop.eup %14336  ;;  %v17882_v57 = vadd.f32 %v4153_v22, %v4147_v38  ;;  %v4155_v35 = vmul.f32 %v14335_v37, %v14315_v39  ;;  %v9841_v41 = vmul.f32 -1.442695, %v13105_v42 }
 0x81b   :  { %v14339_v21 = vpop.eup %14338  ;;  %v4146_v11 = vmul.f32 %v14337_v14, %v17497_v50  ;;  %v9840_v31 = vmul.f32 -1.442695, %v13106_v56 }
 0x81c   :  { %v14341_v61 = vpop.eup %14340  ;;  %v4149_v32 = vmul.f32 %v14339_v21, %v17499_v43  ;;  %14352 = vpow2.f32 %v9841_v41 }
 0x81d   :  { %v17886_v5 = vadd.f32 %v4152_v2, %v4146_v11  ;;  %v4154_v59 = vmul.f32 %v14341_v61, %v14317_v13  ;;  %14354 = vpow2.f32 %v9840_v31 }
 0x81e   :  { %v14343_v23 = vpop.eup %14342  ;;  %v17888_v51 = vadd.f32 %v4155_v35, %v4149_v32  ;;  %14356 = vtanh.f32 %v17874_v27 }
 0x81f   :  { %v14345_v22 = vpop.eup %14344  ;;  %v4148_v39 = vmul.f32 %v14343_v23, %v17504_v34  ;;  %14358 = vtanh.f32 %v17879_v46 }
 0x820   :  { %v14347_v24 = vpop.eup %14346  ;;  %v4127_v29 = vadd.f32 1.0, %v14345_v22 }
 0x821   :  { %v17893_v50 = vadd.f32 %v4154_v59, %v4148_v39  ;;  %v4126_v43 = vadd.f32 1.0, %v14347_v24 }
 0x822   :  { %14360 = vrcp.f32 %v4127_v29  ;;  %v14349_v60 = vpop.eup %14348 }
 0x823   :  { %14362 = vtanh.f32 %v17882_v57  ;;  %v14351_v13 = vpop.eup %14350  ;;  %v4129_v6 = vadd.f32 1.0, %v14349_v60 }
 0x824   :  { %14364 = vrcp.f32 %v4126_v43  ;;  %v4128_v38 = vadd.f32 1.0, %v14351_v13 }
 0x825   :  { %14366 = vtanh.f32 %v17886_v5 }
 0x826   :  { %14368 = vrcp.f32 %v4129_v6  ;;  %v14353_v34 = vpop.eup %14352 }
 0x827   :  { %14370 = vrcp.f32 %v4128_v38  ;;  %v14355_v42 = vpop.eup %14354  ;;  %v4131_v1 = vadd.f32 1.0, %v14353_v34  ;;  %v20678_v34 = vld [vmem:[#allocation32_spill] sm:$0xff] }
 0x828   :  { %14372 = vtanh.f32 %v17888_v51  ;;  %v4130_v37 = vadd.f32 1.0, %v14355_v42  ;;  %v14357_v2 = vpop.eup %14356  ;;  %v20679_v42 = vld [vmem:[#allocation25_spill] sm:$0xff] }
 0x829   :  { %14374 = vtanh.f32 %v17893_v50  ;;  %v14359_v56 = vpop.eup %14358 }
 0x82a   :  { %14376 = vrcp.f32 %v4131_v1  ;;  %v20680_v1 = vld [vmem:[#allocation29_spill] sm:$0xff] }
 0x82b   :  { %14378 = vrcp.f32 %v4130_v37  ;;  %v20681_v37 = vld [vmem:[#allocation30_spill] sm:$0xff] }
 0x82c   :  { %v14361_v14 = vpop.eup %14360 }
 0x82d   :  { %v14363_v35 = vpop.eup %14362  ;;  %v4169_v41 = vmul.f32 %v14361_v14, %v14357_v2  ;;  %v20682_v2 = vld [vmem:[#allocation33_spill] sm:$0xff]  ;;  %v20684_v14 = vld [vmem:[#allocation38_spill] sm:$0xff] }
 0x82e   :  { %v14365_v21 = vpop.eup %14364 }
 0x82f   :  { %v14367_v11 = vpop.eup %14366  ;;  %v4168_v31 = vmul.f32 %v14365_v21, %v14359_v56  ;;  %v20683_v56 = vld [vmem:[#allocation34_spill] sm:$0xff] }
 0x830   :  { %v14369_v61 = vpop.eup %14368 }
 0x831   :  { %v14371_v32 = vpop.eup %14370  ;;  %v12813_v59 = vpack.c.bf16 %v4169_v41, %v4168_v31  ;;  %v4171_v23 = vmul.f32 %v14369_v61, %v14363_v35  ;;  %v20685_v35 = vld [vmem:[#allocation39_spill] sm:$0xff]  ;;  %v20686_v41 = vld [vmem:[#allocation40_spill] sm:$0xff] }
 0x832   :  { %v14373_v22 = vpop.eup %14372  ;;  %v4170_v39 = vmul.f32 %v14371_v32, %v14367_v11  ;;  %v20687_v61 = vld [vmem:[#allocation24_spill] sm:$0xff] }
 0x833   :  { %v14375_v24 = vpop.eup %14374  ;;  %12814 = vmatprep.subr.bf16.mxu1 %v12813_v59 }
 0x834   :  { %v14377_v29 = vpop.eup %14376  ;;  %12816 = vmatpush3.bf16.msra.mxu1 %v12813_v59  ;;  %v12817_v43 = vpack.c.bf16 %v4171_v23, %v4170_v39 }
 0x835   :  { %v14379_v60 = vpop.eup %14378  ;;  %v4173_v13 = vmul.f32 %v14377_v29, %v14373_v22  ;;  %v20688_v29 = vld [vmem:[#allocation28_spill] sm:$0xff] }
 0x836   :  { %12818 = vmatprep.subr.bf16.mxu1 %v12817_v43  ;;  %v4172_v6 = vmul.f32 %v14379_v60, %v14375_v24 }
 0x838   :  { %12820 = vmatpush3.bf16.msra.mxu1 %v12817_v43  ;;  %v12821_v38 = vpack.c.bf16 %v4173_v13, %v4172_v6 }
 0x83a   :  { %12822 = vmatprep.subr.bf16.mxu1 %v12821_v38 }
 0x83c   :  { %12824 = vmatpush3.bf16.msra.mxu1 %v12821_v38  ;;  %v20689_v38 = vld [vmem:[#allocation31_spill] sm:$0xff] }
 0x83f   :  { %11994 = vmatmul.mubr.msk.f32.vlgmr.msra.gmra.mrb[76].mxu1 %vm490_vm2, %v17513_v20  ;;  %v20659_v20 = vld [vmem:[#allocation10_spill] sm:$0xff] }
 0x840   :  { %11996 = vmatprep.mubr.msk.f32.mxu1 %vm490_vm2, %v17520_v9  ;;  %v20660_v9 = vld [vmem:[#allocation11_spill] sm:$0xff] }
 0x843   :  { %11997 = vmatmul.mubr.msk.f32.gmra.mrb[78].mxu1 %vm490_vm2, %v17527_v8  ;;  %v20661_v8 = vld [vmem:[#allocation12_spill] sm:$0xff] }
 0x844   :  { %11999 = vmatprep.mubr.msk.f32.mxu1 %vm490_vm2, %v17534_v49  ;;  %v20662_v49 = vld [vmem:[#allocation13_spill] sm:$0xff] }
 0x847   :  { %12000 = vmatmul.mubr.msk.f32.gmra.mrb[80].mxu1 %vm490_vm2, %v17541_v12  ;;  %v4717_v12 = vld [vmem:[%s20101_s1] sm:$0x3] }
 0x848   :  { %12002 = vmatprep.mubr.msk.f32.mxu1 %vm490_vm2, %v17548_v4  ;;  %12029 = vmatprep.subr.msk.mxu0 %vm301_vm0, %v4717_v12  ;;  %v20663_v4 = vld [vmem:[#allocation14_spill] sm:$0xff] }
 0x849   :  { %12030 = vmatpush3.msk.msra.mxu0 %vm301_vm0, %v4717_v12 }
 0x84a   :  { %12032 = vmatmul.mubr.msk.f32.vlgmr.msra.gmra.mrb[96].mxu0 %vm228_vm1, %v20663_v4 }
 0x84b   :  { %12003 = vmatmul.mubr.msk.f32.gmra.mrb[82].mxu1 %vm490_vm2, %v17555_v7  ;;  %v20664_v7 = vld [vmem:[#allocation15_spill] sm:$0xff] }
 0x84c   :  { %12005 = vmatprep.mubr.msk.f32.mxu1 %vm490_vm2, %v17562_v18  ;;  %12034 = vmatprep.mubr.msk.f32.mxu0 %vm228_vm1, %v20664_v7  ;;  %v20665_v18 = vld [vmem:[#allocation16_spill] sm:$0xff] }
 0x84e   :  { %12035 = vmatmul.mubr.msk.f32.gmra.mrb[98].mxu0 %vm228_vm1, %v20665_v18 }
 0x84f   :  { %12006 = vmatmul.mubr.msk.f32.gmra.mrb[84].mxu1 %vm490_vm2, %v17569_v10  ;;  %v20666_v10 = vld [vmem:[#allocation17_spill] sm:$0xff] }
 0x850   :  { %12008 = vmatprep.mubr.msk.f32.mxu1 %vm490_vm2, %v17576_v44  ;;  %12037 = vmatprep.mubr.msk.f32.mxu0 %vm228_vm1, %v20666_v10  ;;  %v20667_v44 = vld [vmem:[#allocation18_spill] sm:$0xff]  ;;  %v20690_v10 = vld [vmem:[#allocation23_spill] sm:$0xff] }
 0x852   :  { %12038 = vmatmul.mubr.msk.f32.gmra.mrb[100].mxu0 %vm228_vm1, %v20667_v44 }
 0x853   :  { %12009 = vmatmul.mubr.msk.f32.gmra.mrb[86].mxu1 %vm490_vm2, %v17583_v17  ;;  %v20668_v17 = vld [vmem:[#allocation19_spill] sm:$0xff] }
 0x854   :  { %12011 = vmatprep.mubr.msk.f32.mxu1 %vm490_vm2, %v17590_v25  ;;  %12040 = vmatprep.mubr.msk.f32.mxu0 %vm228_vm1, %v20668_v17  ;;  %v20669_v25 = vld [vmem:[#allocation20_spill] sm:$0xff] }
 0x856   :  { %12041 = vmatmul.mubr.msk.f32.gmra.mrb[102].mxu0 %vm228_vm1, %v20669_v25 }
 0x857   :  { %12012 = vmatmul.mubr.msk.f32.gmra.mrb[88].mxu1 %vm490_vm2, %v17597_v54  ;;  %v20670_v54 = vld [vmem:[#allocation21_spill] sm:$0xff] }
 0x858   :  { %12014 = vmatprep.mubr.msk.f32.mxu1 %vm490_vm2, %v17604_v36  ;;  %12043 = vmatprep.mubr.msk.f32.mxu0 %vm228_vm1, %v20670_v54  ;;  %v20671_v36 = vld [vmem:[#allocation6_spill] sm:$0xff] }
 0x85a   :  { %12044 = vmatmul.mubr.msk.f32.gmra.mrb[104].mxu0 %vm228_vm1, %v20671_v36 }
 0x85b   :  { %12015 = vmatmul.mubr.msk.f32.gmra.mrb[90].mxu1 %vm490_vm2, %v17611_v16  ;;  %v20672_v16 = vld [vmem:[#allocation7_spill] sm:$0xff] }
 0x85c   :  { %12017 = vmatprep.mubr.msk.f32.mxu1 %vm490_vm2, %v17618_v63  ;;  %12046 = vmatprep.mubr.msk.f32.mxu0 %vm228_vm1, %v20672_v16  ;;  %v20673_v63 = vld [vmem:[#allocation8_spill] sm:$0xff] }
 0x85e   :  { %12047 = vmatmul.mubr.msk.f32.gmra.mrb[106].mxu0 %vm228_vm1, %v20673_v63 }
 0x85f   :  { %12018 = vmatmul.mubr.msk.f32.gmra.mrb[92].mxu1 %vm490_vm2, %v17625_v53  ;;  %v20674_v53 = vld [vmem:[#allocation9_spill] sm:$0xff] }
 0x860   :  { %12020 = vmatprep.mubr.msk.f32.mxu1 %vm490_vm2, %v17632_v62  ;;  %12049 = vmatprep.mubr.msk.f32.mxu0 %vm228_vm1, %v20674_v53  ;;  %v20675_v62 = vld [vmem:[#allocation22_spill] sm:$0xff] }
 0x862   :  { %12050 = vmatmul.mubr.msk.f32.gmra.mrb[108].mxu0 %vm228_vm1, %v20675_v62 }
 0x863   :  { %12021 = vmatmul.mubr.msk.f32.gmra.mrb[94].mxu1 %vm490_vm2, %v17639_v48  ;;  %v20676_v48 = vld [vmem:[#allocation26_spill] sm:$0xff] }
 0x864   :  { %12023 = vmatprep.mubr.msk.f32.mxu1 %vm490_vm2, %v17646_v33  ;;  %12052 = vmatprep.mubr.msk.f32.mxu0 %vm228_vm1, %v20676_v48  ;;  %v20677_v33 = vld [vmem:[#allocation27_spill] sm:$0xff] }
 0x866   :  { %12053 = vmatmul.mubr.msk.f32.gmra.mrb[110].mxu0 %vm228_vm1, %v20677_v33 }
 0x867   :  { %12024 = vmatmul.mubr.msk.f32.gmra.mrb[96].mxu1 %vm490_vm2, %v20659_v20  ;;  %12055 = vmatprep.mubr.msk.f32.mxu0 %vm228_vm1, %v20678_v34 }
 0x868   :  { %12026 = vmatprep.mubr.msk.f32.mxu1 %vm490_vm2, %v20660_v9 }
 0x86a   :  { %12056 = vmatmul.mubr.msk.f32.gmra.mrb[112].mxu0 %vm228_vm1, %v20679_v42 }
 0x86b   :  { %12027 = vmatmul.mubr.msk.f32.gmra.mrb[98].mxu1 %vm490_vm2, %v20661_v8  ;;  %12058 = vmatprep.mubr.msk.f32.mxu0 %vm228_vm1, %v20680_v1 }
 0x86c   :  { %12117 = vmatprep.mubr.msk.f32.mxu1 %vm228_vm1, %v20662_v49 }
 0x86e   :  { %12059 = vmatmul.mubr.msk.f32.gmra.mrb[114].mxu0 %vm228_vm1, %v20681_v37 }
 0x86f   :  { %12061 = vmatprep.mubr.msk.f32.mxu0 %vm228_vm1, %v20682_v2 }
 0x872   :  { %12062 = vmatmul.mubr.msk.f32.gmra.mrb[116].mxu0 %vm228_vm1, %v20683_v56 }
 0x873   :  { %12064 = vmatprep.mubr.msk.f32.mxu0 %vm228_vm1, %v20684_v14 }
 0x876   :  { %12065 = vmatmul.mubr.msk.f32.gmra.mrb[118].mxu0 %vm228_vm1, %v20685_v35 }
 0x877   :  { %12079 = vmatprep.mubr.msk.f32.mxu0 %vm490_vm2, %v20686_v41 }
 0x912   :  { %v11995_v21 = vpop.f32.mrb[76].mxu1 }
 0x913   :  { %v13107_v11 = vadd.f32 %v11995_v21, %v20475_v15  ;;  %v4430_v31 = vpop.f32.mrb[77].mxu1 }
 0x914   :  { %v13108_v32 = vadd.f32 %v4430_v31, %v20687_v61 }
 0x915   :  { %v9893_v59 = vmul.f32 -1.442695, %v13107_v11 }
 0x916   :  { %v9892_v23 = vmul.f32 -1.442695, %v13108_v32  ;;  %v11998_v22 = vpop.f32.mrb[78].mxu1 }
 0x917   :  { %14380 = vpow2.f32 %v9893_v59  ;;  %v13109_v39 = vadd.f32 %v11998_v22, %v20477_v45  ;;  %v4440_v24 = vpop.f32.mrb[79].mxu1 }
 0x918   :  { %14382 = vpow2.f32 %v9892_v23  ;;  %v13110_v43 = vadd.f32 %v4440_v24, %v20688_v29  ;;  %v20691_v24 = vld [vmem:[#allocation35_spill] sm:$0xff] }
 0x919   :  { %v9895_v60 = vmul.f32 -1.442695, %v13109_v39 }
 0x91a   :  { %v9894_v13 = vmul.f32 -1.442695, %v13110_v43  ;;  %v12001_v6 = vpop.f32.mrb[80].mxu1 }
 0x91b   :  { %14384 = vpow2.f32 %v9895_v60  ;;  %v13111_v20 = vadd.f32 %v12001_v6, %v20689_v38  ;;  %v4450_v9 = vpop.f32.mrb[81].mxu1  ;;  %v20692_v6 = vld [vmem:[#allocation36_spill] sm:$0xff] }
 0x91c   :  { %14386 = vpow2.f32 %v9894_v13  ;;  %v13112_v8 = vadd.f32 %v4450_v9, %v20480_v55 }
 0x91d   :  { %v9897_v49 = vmul.f32 -1.442695, %v13111_v20 }
 0x91e   :  { %v9896_v12 = vmul.f32 -1.442695, %v13112_v8  ;;  %v12004_v4 = vpop.f32.mrb[82].mxu1 }
 0x91f   :  { %14388 = vpow2.f32 %v9897_v49  ;;  %v13113_v7 = vadd.f32 %v12004_v4, %v20481_v47  ;;  %v4460_v18 = vpop.f32.mrb[83].mxu1  ;;  %v20693_v4 = vld [vmem:[#allocation41_spill] sm:$0xff] }
 0x920   :  { %14390 = vpow2.f32 %v9896_v12  ;;  %v13114_v44 = vadd.f32 %v4460_v18, %v20690_v10 }
 0x921   :  { %v14381_v17 = vpop.eup %14380  ;;  %v9899_v25 = vmul.f32 -1.442695, %v13113_v7 }
 0x922   :  { %v14383_v54 = vpop.eup %14382  ;;  %v4592_v36 = vadd.f32 1.0, %v14381_v17  ;;  %v9898_v16 = vmul.f32 -1.442695, %v13114_v44  ;;  %v12007_v63 = vpop.f32.mrb[84].mxu1 }
 0x923   :  { %v4591_v53 = vadd.f32 1.0, %v14383_v54  ;;  %14392 = vpow2.f32 %v9899_v25  ;;  %v13115_v62 = vadd.f32 %v12007_v63, %v20483_v40  ;;  %v4470_v48 = vpop.f32.mrb[85].mxu1  ;;  %v20694_v54 = vld [vmem:[#allocation42_spill] sm:$0xff] }
 0x924   :  { %14394 = vrcp.f32 %v4592_v36  ;;  %v13116_v33 = vadd.f32 %v4470_v48, %v20484_v3  ;;  %v20695_v48 = vld [vmem:[#allocation43_spill] sm:$0xff] }
 0x925   :  { %v14385_v34 = vpop.eup %14384  ;;  %14396 = vrcp.f32 %v4591_v53  ;;  %v9901_v42 = vmul.f32 -1.442695, %v13115_v62 }
 0x926   :  { %v14387_v1 = vpop.eup %14386  ;;  %v4594_v37 = vadd.f32 1.0, %v14385_v34  ;;  %14398 = vpow2.f32 %v9898_v16  ;;  %v9900_v2 = vmul.f32 -1.442695, %v13116_v33  ;;  %v12010_v56 = vpop.f32.mrb[86].mxu1 }
 0x927   :  { %v4593_v14 = vadd.f32 1.0, %v14387_v1  ;;  %14400 = vpow2.f32 %v9901_v42  ;;  %v13117_v35 = vadd.f32 %v12010_v56, %v20485_v52  ;;  %v4480_v41 = vpop.f32.mrb[87].mxu1 }
 0x928   :  { %14402 = vrcp.f32 %v4594_v37  ;;  %v13118_v21 = vadd.f32 %v4480_v41, %v20486_v58 }
 0x929   :  { %v14389_v11 = vpop.eup %14388  ;;  %14404 = vrcp.f32 %v4593_v14  ;;  %v9903_v31 = vmul.f32 -1.442695, %v13117_v35 }
 0x92a   :  { %v14391_v32 = vpop.eup %14390  ;;  %v4596_v59 = vadd.f32 1.0, %v14389_v11  ;;  %14406 = vpow2.f32 %v9900_v2  ;;  %v9902_v23 = vmul.f32 -1.442695, %v13118_v21  ;;  %v12013_v22 = vpop.f32.mrb[88].mxu1  ;;  %v20696_v2 = vld [vmem:[#allocation44_spill] sm:$0xff]  ;;  %v20697_v11 = vld [vmem:[#allocation37_spill] sm:$0xff] }
 0x92b   :  { %v4595_v39 = vadd.f32 1.0, %v14391_v32  ;;  %14408 = vpow2.f32 %v9903_v31  ;;  %v13119_v43 = vadd.f32 %v12013_v22, %v20691_v24  ;;  %v4490_v60 = vpop.f32.mrb[89].mxu1 }
 0x92c   :  { %14410 = vrcp.f32 %v4596_v59  ;;  %v13120_v20 = vadd.f32 %v4490_v60, %v20692_v6 }
 0x92d   :  { %v14393_v13 = vpop.eup %14392  ;;  %14412 = vrcp.f32 %v4595_v39 }
 0x92e   :  { %v14395_v9 = vpop.eup %14394  ;;  %v4628_v8 = vadd.f32 1.0, %v14393_v13  ;;  %14414 = vpow2.f32 %v9902_v23  ;;  %v12016_v49 = vpop.f32.mrb[90].mxu1 }
 0x92f   :  { %v14397_v12 = vpop.eup %14396  ;;  %14416 = vtanh.f32 %v13119_v43  ;;  %v13121_v7 = vadd.f32 %v12016_v49, %v20693_v4  ;;  %v4500_v18 = vpop.f32.mrb[91].mxu1 }
 0x930   :  { %v14399_v44 = vpop.eup %14398  ;;  %14418 = vrcp.f32 %v4628_v8  ;;  %v13122_v36 = vadd.f32 %v4500_v18, %v20694_v54 }
 0x931   :  { %v14401_v17 = vpop.eup %14400  ;;  %v4627_v25 = vadd.f32 1.0, %v14399_v44  ;;  %14420 = vtanh.f32 %v13120_v20 }
 0x932   :  { %v14403_v16 = vpop.eup %14402  ;;  %v4630_v63 = vadd.f32 1.0, %v14401_v17  ;;  %14422 = vtanh.f32 %v13121_v7  ;;  %v12019_v53 = vpop.f32.mrb[92].mxu1 }
 0x933   :  { %v14405_v62 = vpop.eup %14404  ;;  %14424 = vrcp.f32 %v4627_v25  ;;  %v13123_v33 = vadd.f32 %v12019_v53, %v20695_v48  ;;  %v4510_v34 = vpop.f32.mrb[93].mxu1 }
 0x934   :  { %v14407_v42 = vpop.eup %14406  ;;  %14426 = vrcp.f32 %v4630_v63  ;;  %v13124_v56 = vadd.f32 %v4510_v34, %v20696_v2 }
 0x935   :  { %v14409_v1 = vpop.eup %14408  ;;  %v4629_v37 = vadd.f32 1.0, %v14407_v42  ;;  %14428 = vtanh.f32 %v13122_v36 }
 0x936   :  { %v14411_v14 = vpop.eup %14410  ;;  %v4632_v35 = vadd.f32 1.0, %v14409_v1  ;;  %14430 = vtanh.f32 %v13123_v33  ;;  %v12022_v41 = vpop.f32.mrb[94].mxu1 }
 0x937   :  { %v14413_v21 = vpop.eup %14412  ;;  %14432 = vrcp.f32 %v4629_v37  ;;  %v13125_v31 = vadd.f32 %v12022_v41, %v20697_v11  ;;  %v4520_v32 = vpop.f32.mrb[95].mxu1 }
 0x938   :  { %v14415_v59 = vpop.eup %14414  ;;  %14434 = vrcp.f32 %v4632_v35  ;;  %v13126_v23 = vadd.f32 %v4520_v32, %v20494_v0 }
 0x939   :  { %v14417_v22 = vpop.eup %14416  ;;  %v4631_v39 = vadd.f32 1.0, %v14415_v59  ;;  %14436 = vtanh.f32 %v13124_v56  ;;  %v9905_v43 = vmul.f32 -1.442695, %v13125_v31 }
 0x93a   :  { %v14419_v60 = vpop.eup %14418  ;;  %v4694_v13 = vmul.f32 %v14417_v22, %v14395_v9  ;;  %v9904_v20 = vmul.f32 -1.442695, %v13126_v23  ;;  %v12025_v8 = vpop.f32.mrb[96].mxu1 }
 0x93b   :  { %v14421_v49 = vpop.eup %14420  ;;  %v4688_v7 = vmul.f32 %v14419_v60, %v17874_v27  ;;  %14438 = vrcp.f32 %v4631_v39  ;;  %v13127_v18 = vadd.f32 %v12025_v8, %v20495_v26  ;;  %v4530_v44 = vpop.f32.mrb[97].mxu1 }
 0x93c   :  { %v14423_v17 = vpop.eup %14422  ;;  %v4693_v25 = vmul.f32 %v14421_v49, %v14397_v12  ;;  %14440 = vpow2.f32 %v9905_v43  ;;  %v13128_v36 = vadd.f32 %v4530_v44, %v20496_v19 }
 0x93d   :  { %v14425_v63 = vpop.eup %14424  ;;  %v18023_v53 = vadd.f32 %v4694_v13, %v4688_v7  ;;  %v4696_v33 = vmul.f32 %v14423_v17, %v14403_v16  ;;  %14442 = vpow2.f32 %v9904_v20  ;;  %v9907_v9 = vmul.f32 -1.442695, %v13127_v18 }
 0x93e   :  { %v14427_v34 = vpop.eup %14426  ;;  %v4687_v42 = vmul.f32 %v14425_v63, %v17879_v46  ;;  %v9906_v1 = vmul.f32 -1.442695, %v13128_v36  ;;  %v12028_v27 = vpop.f32.mrb[98].mxu1 }
 0x93f   :  { %v14429_v37 = vpop.eup %14428  ;;  %v4690_v56 = vmul.f32 %v14427_v34, %v17882_v57  ;;  %v13129_v35 = vadd.f32 %v12028_v27, %v16244_v30  ;;  %v4540_v12 = vpop.f32.mrb[99].mxu1  ;;  %14444 = vpow2.f32 %v9907_v9 }
 0x940   :  { %v14431_v41 = vpop.eup %14430  ;;  %v18028_v31 = vadd.f32 %v4693_v25, %v4687_v42  ;;  %v4695_v32 = vmul.f32 %v14429_v37, %v14405_v62  ;;  %v13130_v16 = vadd.f32 %v4540_v12, %v16247_v28  ;;  %14446 = vpow2.f32 %v9906_v1 }
 0x941   :  { %v14433_v59 = vpop.eup %14432  ;;  %v18031_v23 = vadd.f32 %v4696_v33, %v4690_v56  ;;  %v4698_v22 = vmul.f32 %v14431_v41, %v14411_v14  ;;  %v9909_v46 = vmul.f32 -1.442695, %v13129_v35 }
 0x942   :  { %v14435_v39 = vpop.eup %14434  ;;  %v4689_v43 = vmul.f32 %v14433_v59, %v17886_v5  ;;  %v9908_v57 = vmul.f32 -1.442695, %v13130_v16 }
 0x943   :  { %v14437_v60 = vpop.eup %14436  ;;  %v4692_v13 = vmul.f32 %v14435_v39, %v17888_v51  ;;  %14448 = vpow2.f32 %v9909_v46 }
 0x944   :  { %v18035_v20 = vadd.f32 %v4695_v32, %v4689_v43  ;;  %v4697_v8 = vmul.f32 %v14437_v60, %v14413_v21  ;;  %14450 = vpow2.f32 %v9908_v57 }
 0x945   :  { %v14439_v62 = vpop.eup %14438  ;;  %v18037_v49 = vadd.f32 %v4698_v22, %v4692_v13  ;;  %14452 = vtanh.f32 %v18023_v53 }
 0x946   :  { %v14441_v7 = vpop.eup %14440  ;;  %v4691_v14 = vmul.f32 %v14439_v62, %v17893_v50  ;;  %14454 = vtanh.f32 %v18028_v31 }
 0x947   :  { %v14443_v18 = vpop.eup %14442  ;;  %v4670_v44 = vadd.f32 1.0, %v14441_v7  ;;  %v18051_v7 = vld [vmem:[%s20104_s4 + $0x8] sm:$0xff] }
 0x948   :  { %v18042_v5 = vadd.f32 %v4697_v8, %v4691_v14  ;;  %v4669_v51 = vadd.f32 1.0, %v14443_v18  ;;  %v18058_v14 = vld [vmem:[%s20104_s4 + $0x10] sm:$0xff]  ;;  %v18065_v18 = vld [vmem:[%s20104_s4 + $0x18] sm:$0xff] }
 0x949   :  { %14456 = vrcp.f32 %v4670_v44  ;;  %v14445_v17 = vpop.eup %14444  ;;  %v18072_v44 = vld [vmem:[%s20104_s4 + $0x20] sm:$0xff] }
 0x94a   :  { %14458 = vtanh.f32 %v18031_v23  ;;  %v14447_v21 = vpop.eup %14446  ;;  %v4672_v25 = vadd.f32 1.0, %v14445_v17  ;;  %v18086_v17 = vld [vmem:[%s20104_s4 + $0x30] sm:$0xff] }
 0x94b   :  { %14460 = vrcp.f32 %v4669_v51  ;;  %v4671_v36 = vadd.f32 1.0, %v14447_v21  ;;  %v18079_v51 = vld [vmem:[%s20104_s4 + $0x28] sm:$0xff]  ;;  %v18093_v21 = vld [vmem:[%s20104_s4 + $0x38] sm:$0xff] }
 0x94c   :  { %14462 = vtanh.f32 %v18035_v20 }
 0x94d   :  { %14464 = vrcp.f32 %v4672_v25  ;;  %v14449_v50 = vpop.eup %14448  ;;  %v18100_v25 = vld [vmem:[%s20104_s4 + $0x40] sm:$0xff] }
 0x94e   :  { %14466 = vrcp.f32 %v4671_v36  ;;  %v14451_v63 = vpop.eup %14450  ;;  %v4674_v33 = vadd.f32 1.0, %v14449_v50  ;;  %v18107_v36 = vld [vmem:[%s20104_s4 + $0x48] sm:$0xff]  ;;  %v18114_v50 = vld [vmem:[%s20104_s4 + $0x50] sm:$0xff] }
 0x94f   :  { %14468 = vtanh.f32 %v18037_v49  ;;  %v4673_v9 = vadd.f32 1.0, %v14451_v63  ;;  %v14453_v34 = vpop.eup %14452  ;;  %v18121_v63 = vld [vmem:[%s20104_s4 + $0x58] sm:$0xff] }
 0x950   :  { %14470 = vtanh.f32 %v18042_v5  ;;  %v14455_v42 = vpop.eup %14454 }
 0x951   :  { %14472 = vrcp.f32 %v4674_v33  ;;  %v18128_v33 = vld [vmem:[%s20104_s4 + $0x60] sm:$0xff] }
 0x952   :  { %14474 = vrcp.f32 %v4673_v9  ;;  %v18135_v9 = vld [vmem:[%s20104_s4 + $0x68] sm:$0xff] }
 0x953   :  { %v14457_v1 = vpop.eup %14456 }
 0x954   :  { %v14459_v27 = vpop.eup %14458  ;;  %v4712_v37 = vmul.f32 %v14457_v1, %v14453_v34  ;;  %v18142_v34 = vld [vmem:[%s20104_s4 + $0x70] sm:$0xff]  ;;  %v18156_v1 = vld [vmem:[%s20104_s4 + $0x80] sm:$0xff] }
 0x955   :  { %v14461_v56 = vpop.eup %14460 }
 0x956   :  { %v14463_v35 = vpop.eup %14462  ;;  %v4711_v12 = vmul.f32 %v14461_v56, %v14455_v42  ;;  %v18149_v42 = vld [vmem:[%s20104_s4 + $0x78] sm:$0xff] }
 0x957   :  { %v14465_v41 = vpop.eup %14464  ;;  %v18177_v56 = vld [vmem:[%s20104_s4 + $0x98] sm:$0xff] }
 0x958   :  { %v14467_v32 = vpop.eup %14466  ;;  %v12825_v16 = vpack.c.bf16 %v4712_v37, %v4711_v12  ;;  %v4714_v59 = vmul.f32 %v14465_v41, %v14459_v27  ;;  %v18163_v27 = vld [vmem:[%s20104_s4 + $0x88] sm:$0xff]  ;;  %v18170_v37 = vld [vmem:[%s20104_s4 + $0x90] sm:$0xff] }
 0x959   :  { %v14469_v22 = vpop.eup %14468  ;;  %v4713_v46 = vmul.f32 %v14467_v32, %v14463_v35  ;;  %v18184_v35 = vld [vmem:[%s20104_s4 + $0xa0] sm:$0xff]  ;;  %v18191_v12 = vld [vmem:[%s20104_s4 + $0xa8] sm:$0xff]  ;;  %v18198_v41 = vld [vmem:[%s20104_s4 + $0xb0] sm:$0xff] }
 0x95a   :  { %v14471_v39 = vpop.eup %14470  ;;  %12826 = vmatprep.subr.bf16.mxu0 %v12825_v16  ;;  %20698 = vst [vmem:[#allocation10_spill] sm:$0xff] %v18191_v12  ;;  %20699 = vst [vmem:[#allocation11_spill] sm:$0xff] %v18198_v41  ;;  %v18205_v32 = vld [vmem:[%s20104_s4 + $0xb8] sm:$0xff] }
 0x95b   :  { %v14473_v43 = vpop.eup %14472  ;;  %12828 = vmatpush3.bf16.msra.mxu0 %v12825_v16  ;;  %v12829_v57 = vpack.c.bf16 %v4714_v59, %v4713_v46  ;;  %20700 = vst [vmem:[#allocation12_spill] sm:$0xff] %v18205_v32  ;;  %v18212_v16 = vld [vmem:[%s20102_s2] sm:$0xff]  ;;  %v18231_v46 = vld [vmem:[%s20102_s2 + $0x10] sm:$0xff] }
 0x95c   :  { %v14475_v60 = vpop.eup %14474  ;;  %v4716_v13 = vmul.f32 %v14473_v43, %v14469_v22  ;;  %20701 = vst [vmem:[#allocation13_spill] sm:$0xff] %v18212_v16  ;;  %v9977_v59 = vld [vmem:[%s20101_s1 + $0x2] sm:$0x3]  ;;  %v18224_v22 = vld [vmem:[%s20102_s2 + $0x8] sm:$0xff]  ;;  %20703 = vst [vmem:[#allocation15_spill] sm:$0xff] %v18231_v46 }
 0x95d   :  { %12830 = vmatprep.subr.bf16.mxu0 %v12829_v57  ;;  %v4715_v8 = vmul.f32 %v14475_v60, %v14471_v39  ;;  %12115 = vmatprep.subr.msk.mxu1 %vm301_vm0, %v9977_v59  ;;  %20702 = vst [vmem:[#allocation14_spill] sm:$0xff] %v18224_v22  ;;  %v18238_v39 = vld [vmem:[%s20102_s2 + $0x18] sm:$0xff]  ;;  %v18245_v43 = vld [vmem:[%s20102_s2 + $0x20] sm:$0xff]  ;;  %v18259_v60 = vld [vmem:[%s20102_s2 + $0x30] sm:$0xff] }
 0x95e   :  { %12116 = vmatpush3.msk.msra.mxu1 %vm301_vm0, %v9977_v59  ;;  %20704 = vst [vmem:[#allocation16_spill] sm:$0xff] %v18238_v39  ;;  %20705 = vst [vmem:[#allocation17_spill] sm:$0xff] %v18245_v43  ;;  %v18287_v59 = vld [vmem:[%s20102_s2 + $0x50] sm:$0xff] }
 0x95f   :  { %12832 = vmatpush3.bf16.msra.mxu0 %v12829_v57  ;;  %v12833_v62 = vpack.c.bf16 %v4716_v13, %v4715_v8  ;;  %12118 = vmatmul.mubr.msk.f32.vlgmr.msra.gmra.mrb[100].mxu1 %vm228_vm1, %v18224_v22  ;;  %v18252_v57 = vld [vmem:[%s20102_s2 + $0x28] sm:$0xff]  ;;  %20707 = vst [vmem:[#allocation19_spill] sm:$0xff] %v18259_v60  ;;  %v18266_v13 = vld [vmem:[%s20102_s2 + $0x38] sm:$0xff]  ;;  %v18273_v8 = vld [vmem:[%s20102_s2 + $0x40] sm:$0xff] }
 0x960   :  { %12120 = vmatprep.mubr.msk.f32.mxu1 %vm228_vm1, %v18231_v46  ;;  %20706 = vst [vmem:[#allocation18_spill] sm:$0xff] %v18252_v57  ;;  %20708 = vst [vmem:[#allocation20_spill] sm:$0xff] %v18266_v13 }
 0x961   :  { %12834 = vmatprep.subr.bf16.mxu0 %v12833_v62  ;;  %20709 = vst [vmem:[#allocation21_spill] sm:$0xff] %v18273_v8  ;;  %20711 = vst [vmem:[#allocation7_spill] sm:$0xff] %v18287_v59 }
 0x963   :  { %12836 = vmatpush3.bf16.msra.mxu0 %v12833_v62  ;;  %12121 = vmatmul.mubr.msk.f32.gmra.mrb[102].mxu1 %vm228_vm1, %v18238_v39  ;;  %v18280_v62 = vld [vmem:[%s20102_s2 + $0x48] sm:$0xff] }
 0x964   :  { %12123 = vmatprep.mubr.msk.f32.mxu1 %vm228_vm1, %v18245_v43  ;;  %20710 = vst [vmem:[#allocation6_spill] sm:$0xff] %v18280_v62 }
 0x966   :  { %12080 = vmatmul.mubr.msk.f32.vlgmr.msra.gmra.mrb[96].mxu0 %vm490_vm2, %v18051_v7 }
 0x967   :  { %12082 = vmatprep.mubr.msk.f32.mxu0 %vm490_vm2, %v18058_v14  ;;  %12124 = vmatmul.mubr.msk.f32.gmra.mrb[104].mxu1 %vm228_vm1, %v18252_v57 }
 0x968   :  { %12126 = vmatprep.mubr.msk.f32.mxu1 %vm228_vm1, %v18259_v60 }
 0x96a   :  { %12083 = vmatmul.mubr.msk.f32.gmra.mrb[98].mxu0 %vm490_vm2, %v18065_v18 }
 0x96b   :  { %12085 = vmatprep.mubr.msk.f32.mxu0 %vm490_vm2, %v18072_v44  ;;  %12127 = vmatmul.mubr.msk.f32.gmra.mrb[106].mxu1 %vm228_vm1, %v18266_v13 }
 0x96c   :  { %12129 = vmatprep.mubr.msk.f32.mxu1 %vm228_vm1, %v18273_v8  ;;  %v18294_v8 = vld [vmem:[%s20102_s2 + $0x58] sm:$0xff] }
 0x96d   :  { %20712 = vst [vmem:[#allocation8_spill] sm:$0xff] %v18294_v8 }
 0x96e   :  { %12086 = vmatmul.mubr.msk.f32.gmra.mrb[100].mxu0 %vm490_vm2, %v18079_v51 }
 0x96f   :  { %12088 = vmatprep.mubr.msk.f32.mxu0 %vm490_vm2, %v18086_v17  ;;  %12130 = vmatmul.mubr.msk.f32.gmra.mrb[108].mxu1 %vm228_vm1, %v18280_v62  ;;  %v18301_v62 = vld [vmem:[%s20102_s2 + $0x60] sm:$0xff] }
 0x970   :  { %12132 = vmatprep.mubr.msk.f32.mxu1 %vm228_vm1, %v18287_v59  ;;  %20713 = vst [vmem:[#allocation9_spill] sm:$0xff] %v18301_v62  ;;  %v18308_v59 = vld [vmem:[%s20102_s2 + $0x68] sm:$0xff] }
 0x971   :  { %20714 = vst [vmem:[#allocation22_spill] sm:$0xff] %v18308_v59 }
 0x972   :  { %12089 = vmatmul.mubr.msk.f32.gmra.mrb[102].mxu0 %vm490_vm2, %v18093_v21 }
 0x973   :  { %12091 = vmatprep.mubr.msk.f32.mxu0 %vm490_vm2, %v18100_v25  ;;  %12133 = vmatmul.mubr.msk.f32.gmra.mrb[110].mxu1 %vm228_vm1, %v18294_v8  ;;  %v18315_v8 = vld [vmem:[%s20102_s2 + $0x70] sm:$0xff] }
 0x974   :  { %12135 = vmatprep.mubr.msk.f32.mxu1 %vm228_vm1, %v18301_v62  ;;  %20715 = vst [vmem:[#allocation26_spill] sm:$0xff] %v18315_v8  ;;  %v18322_v62 = vld [vmem:[%s20102_s2 + $0x78] sm:$0xff] }
 0x975   :  { %20716 = vst [vmem:[#allocation27_spill] sm:$0xff] %v18322_v62 }
 0x976   :  { %12092 = vmatmul.mubr.msk.f32.gmra.mrb[104].mxu0 %vm490_vm2, %v18107_v36 }
 0x977   :  { %12094 = vmatprep.mubr.msk.f32.mxu0 %vm490_vm2, %v18114_v50  ;;  %12136 = vmatmul.mubr.msk.f32.gmra.mrb[112].mxu1 %vm228_vm1, %v18308_v59  ;;  %v18329_v59 = vld [vmem:[%s20102_s2 + $0x80] sm:$0xff] }
 0x978   :  { %12138 = vmatprep.mubr.msk.f32.mxu1 %vm228_vm1, %v18315_v8  ;;  %20717 = vst [vmem:[#allocation32_spill] sm:$0xff] %v18329_v59  ;;  %v18336_v8 = vld [vmem:[%s20102_s2 + $0x88] sm:$0xff] }
 0x979   :  { %20718 = vst [vmem:[#allocation25_spill] sm:$0xff] %v18336_v8 }
 0x97a   :  { %12095 = vmatmul.mubr.msk.f32.gmra.mrb[106].mxu0 %vm490_vm2, %v18121_v63 }
 0x97b   :  { %12097 = vmatprep.mubr.msk.f32.mxu0 %vm490_vm2, %v18128_v33  ;;  %12139 = vmatmul.mubr.msk.f32.gmra.mrb[114].mxu1 %vm228_vm1, %v18322_v62  ;;  %v18343_v62 = vld [vmem:[%s20102_s2 + $0x90] sm:$0xff] }
 0x97c   :  { %12141 = vmatprep.mubr.msk.f32.mxu1 %vm228_vm1, %v18329_v59  ;;  %20719 = vst [vmem:[#allocation29_spill] sm:$0xff] %v18343_v62  ;;  %v18350_v59 = vld [vmem:[%s20102_s2 + $0x98] sm:$0xff] }
 0x97d   :  { %20720 = vst [vmem:[#allocation30_spill] sm:$0xff] %v18350_v59 }
 0x97e   :  { %12098 = vmatmul.mubr.msk.f32.gmra.mrb[108].mxu0 %vm490_vm2, %v18135_v9 }
 0x97f   :  { %12100 = vmatprep.mubr.msk.f32.mxu0 %vm490_vm2, %v18142_v34  ;;  %12142 = vmatmul.mubr.msk.f32.gmra.mrb[116].mxu1 %vm228_vm1, %v18336_v8  ;;  %v18357_v8 = vld [vmem:[%s20102_s2 + $0xa0] sm:$0xff] }
 0x980   :  { %12144 = vmatprep.mubr.msk.f32.mxu1 %vm228_vm1, %v18343_v62  ;;  %20721 = vst [vmem:[#allocation33_spill] sm:$0xff] %v18357_v8  ;;  %v18364_v62 = vld [vmem:[%s20102_s2 + $0xa8] sm:$0xff] }
 0x981   :  { %20722 = vst [vmem:[#allocation34_spill] sm:$0xff] %v18364_v62 }
 0x982   :  { %12101 = vmatmul.mubr.msk.f32.gmra.mrb[110].mxu0 %vm490_vm2, %v18149_v42 }
 0x983   :  { %12103 = vmatprep.mubr.msk.f32.mxu0 %vm490_vm2, %v18156_v1  ;;  %12145 = vmatmul.mubr.msk.f32.gmra.mrb[118].mxu1 %vm228_vm1, %v18350_v59  ;;  %v18371_v59 = vld [vmem:[%s20102_s2 + $0xb0] sm:$0xff] }
 0x984   :  { %12147 = vmatprep.mubr.msk.f32.mxu1 %vm228_vm1, %v18357_v8  ;;  %20723 = vst [vmem:[#allocation38_spill] sm:$0xff] %v18371_v59  ;;  %v18378_v8 = vld [vmem:[%s20102_s2 + $0xb8] sm:$0xff] }
 0x985   :  { %20724 = vst [vmem:[#allocation39_spill] sm:$0xff] %v18378_v8 }
 0x986   :  { %12104 = vmatmul.mubr.msk.f32.gmra.mrb[112].mxu0 %vm490_vm2, %v18163_v27 }
 0x987   :  { %12106 = vmatprep.mubr.msk.f32.mxu0 %vm490_vm2, %v18170_v37  ;;  %12148 = vmatmul.mubr.msk.f32.gmra.mrb[120].mxu1 %vm228_vm1, %v18364_v62  ;;  %v18385_v62 = vld [vmem:[%s20104_s4] sm:$0xff] }
 0x988   :  { %12150 = vmatprep.mubr.msk.f32.mxu1 %vm228_vm1, %v18371_v59  ;;  %20725 = vst [vmem:[#allocation40_spill] sm:$0xff] %v18385_v62 }
 0x98a   :  { %12107 = vmatmul.mubr.msk.f32.gmra.mrb[114].mxu0 %vm490_vm2, %v18177_v56 }
 0x98b   :  { %12109 = vmatprep.mubr.msk.f32.mxu0 %vm490_vm2, %v18184_v35  ;;  %12151 = vmatmul.mubr.msk.f32.gmra.mrb[122].mxu1 %vm228_vm1, %v18378_v8 }
 0x98c   :  { %12165 = vmatprep.mubr.msk.f32.mxu1 %vm490_vm2, %v18385_v62 }
 0x98e   :  { %12110 = vmatmul.mubr.msk.f32.gmra.mrb[116].mxu0 %vm490_vm2, %v18191_v12 }
 0x98f   :  { %12112 = vmatprep.mubr.msk.f32.mxu0 %vm490_vm2, %v18198_v41 }
 0x992   :  { %12113 = vmatmul.mubr.msk.f32.gmra.mrb[118].mxu0 %vm490_vm2, %v18205_v32 }
 0x993   :  { %12203 = vmatprep.mubr.msk.f32.mxu0 %vm228_vm1, %v18212_v16 }
 0xa39   :  { %v12081_v13 = vpop.f32.mrb[96].mxu0 }
 0xa3a   :  { %v13131_v60 = vadd.f32 %v12081_v13, %v20475_v15  ;;  %v4972_v59 = vpop.f32.mrb[97].mxu0 }
 0xa3b   :  { %v13132_v57 = vadd.f32 %v4972_v59, %v20687_v61 }
 0xa3c   :  { %v9960_v43 = vmul.f32 -1.442695, %v13131_v60 }
 0xa3d   :  { %v9959_v39 = vmul.f32 -1.442695, %v13132_v57  ;;  %v12084_v46 = vpop.f32.mrb[98].mxu0 }
 0xa3e   :  { %14476 = vpow2.f32 %v9960_v43  ;;  %v13133_v8 = vadd.f32 %v12084_v46, %v20477_v45  ;;  %v4982_v22 = vpop.f32.mrb[99].mxu0 }
 0xa3f   :  { %14478 = vpow2.f32 %v9959_v39  ;;  %v13134_v16 = vadd.f32 %v4982_v22, %v20688_v29 }
 0xa40   :  { %v9962_v32 = vmul.f32 -1.442695, %v13133_v8 }
 0xa41   :  { %v9961_v41 = vmul.f32 -1.442695, %v13134_v16  ;;  %v12087_v12 = vpop.f32.mrb[100].mxu0 }
 0xa42   :  { %14480 = vpow2.f32 %v9962_v32  ;;  %v13135_v62 = vadd.f32 %v12087_v12, %v20689_v38  ;;  %v4992_v13 = vpop.f32.mrb[101].mxu0 }
 0xa43   :  { %14482 = vpow2.f32 %v9961_v41  ;;  %v13136_v59 = vadd.f32 %v4992_v13, %v20480_v55 }
 0xa44   :  { %v9964_v60 = vmul.f32 -1.442695, %v13135_v62 }
 0xa45   :  { %v9963_v57 = vmul.f32 -1.442695, %v13136_v59  ;;  %v12090_v61 = vpop.f32.mrb[102].mxu0 }
 0xa46   :  { %14484 = vpow2.f32 %v9964_v60  ;;  %v13137_v46 = vadd.f32 %v12090_v61, %v20481_v47  ;;  %v5002_v43 = vpop.f32.mrb[103].mxu0 }
 0xa47   :  { %14486 = vpow2.f32 %v9963_v57  ;;  %v13138_v22 = vadd.f32 %v5002_v43, %v20690_v10 }
 0xa48   :  { %v14477_v39 = vpop.eup %14476  ;;  %v9966_v16 = vmul.f32 -1.442695, %v13137_v46 }
 0xa49   :  { %v14479_v8 = vpop.eup %14478  ;;  %v5134_v32 = vadd.f32 1.0, %v14477_v39  ;;  %v9965_v29 = vmul.f32 -1.442695, %v13138_v22  ;;  %v12093_v12 = vpop.f32.mrb[104].mxu0 }
 0xa4a   :  { %v5133_v38 = vadd.f32 1.0, %v14479_v8  ;;  %14488 = vpow2.f32 %v9966_v16  ;;  %v13139_v41 = vadd.f32 %v12093_v12, %v20483_v40  ;;  %v5012_v62 = vpop.f32.mrb[105].mxu0 }
 0xa4b   :  { %14490 = vrcp.f32 %v5134_v32  ;;  %v13140_v13 = vadd.f32 %v5012_v62, %v20484_v3 }
 0xa4c   :  { %v14481_v59 = vpop.eup %14480  ;;  %14492 = vrcp.f32 %v5133_v38  ;;  %v9968_v61 = vmul.f32 -1.442695, %v13139_v41 }
 0xa4d   :  { %v14483_v60 = vpop.eup %14482  ;;  %v5136_v57 = vadd.f32 1.0, %v14481_v59  ;;  %14494 = vpow2.f32 %v9965_v29  ;;  %v9967_v43 = vmul.f32 -1.442695, %v13140_v13  ;;  %v12096_v46 = vpop.f32.mrb[106].mxu0 }
 0xa4e   :  { %v5135_v10 = vadd.f32 1.0, %v14483_v60  ;;  %14496 = vpow2.f32 %v9968_v61  ;;  %v13141_v22 = vadd.f32 %v12096_v46, %v20485_v52  ;;  %v5022_v39 = vpop.f32.mrb[107].mxu0 }
 0xa4f   :  { %14498 = vrcp.f32 %v5136_v57  ;;  %v13142_v16 = vadd.f32 %v5022_v39, %v20486_v58 }
 0xa50   :  { %v14485_v8 = vpop.eup %14484  ;;  %14500 = vrcp.f32 %v5135_v10  ;;  %v9970_v32 = vmul.f32 -1.442695, %v13141_v22 }
 0xa51   :  { %v14487_v12 = vpop.eup %14486  ;;  %v5138_v62 = vadd.f32 1.0, %v14485_v8  ;;  %14502 = vpow2.f32 %v9967_v43  ;;  %v9969_v38 = vmul.f32 -1.442695, %v13142_v16  ;;  %v12099_v41 = vpop.f32.mrb[108].mxu0 }
 0xa52   :  { %v5137_v59 = vadd.f32 1.0, %v14487_v12  ;;  %14504 = vpow2.f32 %v9970_v32  ;;  %v13143_v29 = vadd.f32 %v12099_v41, %v20691_v24  ;;  %v5032_v13 = vpop.f32.mrb[109].mxu0 }
 0xa53   :  { %14506 = vrcp.f32 %v5138_v62  ;;  %v13144_v60 = vadd.f32 %v5032_v13, %v20692_v6 }
 0xa54   :  { %v14489_v61 = vpop.eup %14488  ;;  %14508 = vrcp.f32 %v5137_v59 }
 0xa55   :  { %v14491_v57 = vpop.eup %14490  ;;  %v5170_v46 = vadd.f32 1.0, %v14489_v61  ;;  %14510 = vpow2.f32 %v9969_v38  ;;  %v12102_v10 = vpop.f32.mrb[110].mxu0 }
 0xa56   :  { %v14493_v22 = vpop.eup %14492  ;;  %14512 = vtanh.f32 %v13143_v29  ;;  %v13145_v43 = vadd.f32 %v12102_v10, %v20693_v4  ;;  %v5042_v39 = vpop.f32.mrb[111].mxu0 }
 0xa57   :  { %v14495_v16 = vpop.eup %14494  ;;  %14514 = vrcp.f32 %v5170_v46  ;;  %v13146_v12 = vadd.f32 %v5042_v39, %v20694_v54 }
 0xa58   :  { %v14497_v8 = vpop.eup %14496  ;;  %v5169_v32 = vadd.f32 1.0, %v14495_v16  ;;  %14516 = vtanh.f32 %v13144_v60 }
 0xa59   :  { %v14499_v62 = vpop.eup %14498  ;;  %v5172_v41 = vadd.f32 1.0, %v14497_v8  ;;  %14518 = vtanh.f32 %v13145_v43  ;;  %v12105_v59 = vpop.f32.mrb[112].mxu0 }
 0xa5a   :  { %v14501_v13 = vpop.eup %14500  ;;  %14520 = vrcp.f32 %v5169_v32  ;;  %v13147_v38 = vadd.f32 %v12105_v59, %v20695_v48  ;;  %v5052_v61 = vpop.f32.mrb[113].mxu0 }
 0xa5b   :  { %v14503_v29 = vpop.eup %14502  ;;  %14522 = vrcp.f32 %v5172_v41  ;;  %v13148_v46 = vadd.f32 %v5052_v61, %v20696_v2 }
 0xa5c   :  { %v14505_v10 = vpop.eup %14504  ;;  %v5171_v4 = vadd.f32 1.0, %v14503_v29  ;;  %14524 = vtanh.f32 %v13146_v12 }
 0xa5d   :  { %v14507_v16 = vpop.eup %14506  ;;  %v5174_v60 = vadd.f32 1.0, %v14505_v10  ;;  %14526 = vtanh.f32 %v13147_v38  ;;  %v12108_v39 = vpop.f32.mrb[114].mxu0 }
 0xa5e   :  { %v14509_v54 = vpop.eup %14508  ;;  %14528 = vrcp.f32 %v5171_v4  ;;  %v13149_v43 = vadd.f32 %v12108_v39, %v20697_v11  ;;  %v5062_v8 = vpop.f32.mrb[115].mxu0 }
 0xa5f   :  { %v14511_v32 = vpop.eup %14510  ;;  %14530 = vrcp.f32 %v5174_v60  ;;  %v13150_v59 = vadd.f32 %v5062_v8, %v20494_v0 }
 0xa60   :  { %v14513_v48 = vpop.eup %14512  ;;  %v5173_v41 = vadd.f32 1.0, %v14511_v32  ;;  %14532 = vtanh.f32 %v13148_v46  ;;  %v9972_v29 = vmul.f32 -1.442695, %v13149_v43 }
 0xa61   :  { %v14515_v12 = vpop.eup %14514  ;;  %v5236_v6 = vmul.f32 %v14513_v48, %v14491_v57  ;;  %v9971_v61 = vmul.f32 -1.442695, %v13150_v59  ;;  %v12111_v2 = vpop.f32.mrb[116].mxu0 }
 0xa62   :  { %v14517_v10 = vpop.eup %14516  ;;  %v5230_v38 = vmul.f32 %v14515_v12, %v18023_v53  ;;  %14534 = vrcp.f32 %v5173_v41  ;;  %v13151_v4 = vadd.f32 %v12111_v2, %v20495_v26  ;;  %v5072_v39 = vpop.f32.mrb[117].mxu0 }
 0xa63   :  { %v14519_v11 = vpop.eup %14518  ;;  %v5235_v24 = vmul.f32 %v14517_v10, %v14493_v22  ;;  %14536 = vpow2.f32 %v9972_v29  ;;  %v13152_v60 = vadd.f32 %v5072_v39, %v20496_v19 }
 0xa64   :  { %v14521_v8 = vpop.eup %14520  ;;  %v18412_v32 = vadd.f32 %v5236_v6, %v5230_v38  ;;  %v5238_v46 = vmul.f32 %v14519_v11, %v14499_v62  ;;  %14538 = vpow2.f32 %v9971_v61  ;;  %v9974_v48 = vmul.f32 -1.442695, %v13151_v4 }
 0xa65   :  { %v14523_v57 = vpop.eup %14522  ;;  %v5229_v43 = vmul.f32 %v14521_v8, %v18028_v31  ;;  %v9973_v59 = vmul.f32 -1.442695, %v13152_v60  ;;  %v12114_v53 = vpop.f32.mrb[118].mxu0 }
 0xa66   :  { %v14525_v41 = vpop.eup %14524  ;;  %v5232_v2 = vmul.f32 %v14523_v57, %v18031_v23  ;;  %v13153_v12 = vadd.f32 %v12114_v53, %v16244_v30  ;;  %v5082_v22 = vpop.f32.mrb[119].mxu0  ;;  %14540 = vpow2.f32 %v9974_v48 }
 0xa67   :  { %v14527_v29 = vpop.eup %14526  ;;  %v18417_v10 = vadd.f32 %v5235_v24, %v5229_v43  ;;  %v5237_v39 = vmul.f32 %v14525_v41, %v14501_v13  ;;  %v13154_v6 = vadd.f32 %v5082_v22, %v16247_v28  ;;  %14542 = vpow2.f32 %v9973_v59 }
 0xa68   :  { %v14529_v11 = vpop.eup %14528  ;;  %v18420_v62 = vadd.f32 %v5238_v46, %v5232_v2  ;;  %v5240_v61 = vmul.f32 %v14527_v29, %v14507_v16  ;;  %v9976_v31 = vmul.f32 -1.442695, %v13153_v12 }
 0xa69   :  { %v14531_v38 = vpop.eup %14530  ;;  %v5231_v4 = vmul.f32 %v14529_v11, %v18035_v20  ;;  %v9975_v23 = vmul.f32 -1.442695, %v13154_v6 }
 0xa6a   :  { %v14533_v60 = vpop.eup %14532  ;;  %v5234_v8 = vmul.f32 %v14531_v38, %v18037_v49  ;;  %14544 = vpow2.f32 %v9976_v31 }
 0xa6b   :  { %v18424_v57 = vadd.f32 %v5237_v39, %v5231_v4  ;;  %v5239_v24 = vmul.f32 %v14533_v60, %v14509_v54  ;;  %14546 = vpow2.f32 %v9975_v23 }
 0xa6c   :  { %v14535_v13 = vpop.eup %14534  ;;  %v18426_v48 = vadd.f32 %v5240_v61, %v5234_v8  ;;  %14548 = vtanh.f32 %v18412_v32 }
 0xa6d   :  { %v14537_v46 = vpop.eup %14536  ;;  %v5233_v16 = vmul.f32 %v14535_v13, %v18042_v5  ;;  %14550 = vtanh.f32 %v18417_v10 }
 0xa6e   :  { %v14539_v43 = vpop.eup %14538  ;;  %v5212_v59 = vadd.f32 1.0, %v14537_v46 }
 0xa6f   :  { %v18431_v20 = vadd.f32 %v5239_v24, %v5233_v16  ;;  %v5211_v49 = vadd.f32 1.0, %v14539_v43 }
 0xa70   :  { %14552 = vrcp.f32 %v5212_v59  ;;  %v14541_v53 = vpop.eup %14540 }
 0xa71   :  { %14554 = vtanh.f32 %v18420_v62  ;;  %v14543_v54 = vpop.eup %14542  ;;  %v5214_v41 = vadd.f32 1.0, %v14541_v53 }
 0xa72   :  { %14556 = vrcp.f32 %v5211_v49  ;;  %v5213_v2 = vadd.f32 1.0, %v14543_v54 }
 0xa73   :  { %14558 = vtanh.f32 %v18424_v57 }
 0xa74   :  { %14560 = vrcp.f32 %v5214_v41  ;;  %v14545_v5 = vpop.eup %14544 }
 0xa75   :  { %14562 = vrcp.f32 %v5213_v2  ;;  %v14547_v12 = vpop.eup %14546  ;;  %v5216_v22 = vadd.f32 1.0, %v14545_v5  ;;  %v20745_v5 = vld [vmem:[#allocation32_spill] sm:$0xff] }
 0xa76   :  { %14564 = vtanh.f32 %v18426_v48  ;;  %v5215_v29 = vadd.f32 1.0, %v14547_v12  ;;  %v14549_v39 = vpop.eup %14548  ;;  %v20746_v12 = vld [vmem:[#allocation25_spill] sm:$0xff] }
 0xa77   :  { %14566 = vtanh.f32 %v18431_v20  ;;  %v14551_v6 = vpop.eup %14550 }
 0xa78   :  { %14568 = vrcp.f32 %v5216_v22  ;;  %v20747_v22 = vld [vmem:[#allocation29_spill] sm:$0xff] }
 0xa79   :  { %14570 = vrcp.f32 %v5215_v29  ;;  %v20748_v29 = vld [vmem:[#allocation30_spill] sm:$0xff] }
 0xa7a   :  { %v14553_v11 = vpop.eup %14552 }
 0xa7b   :  { %v14555_v61 = vpop.eup %14554  ;;  %v5254_v31 = vmul.f32 %v14553_v11, %v14549_v39  ;;  %v20749_v39 = vld [vmem:[#allocation33_spill] sm:$0xff]  ;;  %v20751_v11 = vld [vmem:[#allocation38_spill] sm:$0xff] }
 0xa7c   :  { %v14557_v38 = vpop.eup %14556 }
 0xa7d   :  { %v14559_v4 = vpop.eup %14558  ;;  %v5253_v23 = vmul.f32 %v14557_v38, %v14551_v6  ;;  %v20750_v6 = vld [vmem:[#allocation34_spill] sm:$0xff] }
 0xa7e   :  { %v14561_v60 = vpop.eup %14560 }
 0xa7f   :  { %v14563_v8 = vpop.eup %14562  ;;  %v12837_v24 = vpack.c.bf16 %v5254_v31, %v5253_v23  ;;  %v5256_v13 = vmul.f32 %v14561_v60, %v14555_v61  ;;  %v20752_v61 = vld [vmem:[#allocation39_spill] sm:$0xff]  ;;  %v20753_v31 = vld [vmem:[#allocation40_spill] sm:$0xff] }
 0xa80   :  { %v14565_v46 = vpop.eup %14564  ;;  %v5255_v16 = vmul.f32 %v14563_v8, %v14559_v4  ;;  %v20754_v60 = vld [vmem:[#allocation24_spill] sm:$0xff] }
 0xa81   :  { %v14567_v43 = vpop.eup %14566  ;;  %12838 = vmatprep.subr.bf16.mxu1 %v12837_v24 }
 0xa82   :  { %v14569_v59 = vpop.eup %14568  ;;  %12840 = vmatpush3.bf16.msra.mxu1 %v12837_v24  ;;  %v12841_v49 = vpack.c.bf16 %v5256_v13, %v5255_v16 }
 0xa83   :  { %v14571_v53 = vpop.eup %14570  ;;  %v5258_v54 = vmul.f32 %v14569_v59, %v14565_v46  ;;  %v20755_v59 = vld [vmem:[#allocation28_spill] sm:$0xff] }
 0xa84   :  { %12842 = vmatprep.subr.bf16.mxu1 %v12841_v49  ;;  %v5257_v41 = vmul.f32 %v14571_v53, %v14567_v43 }
 0xa86   :  { %12844 = vmatpush3.bf16.msra.mxu1 %v12841_v49  ;;  %v12845_v2 = vpack.c.bf16 %v5258_v54, %v5257_v41 }
 0xa88   :  { %12846 = vmatprep.subr.bf16.mxu1 %v12845_v2 }
 0xa8a   :  { %12848 = vmatpush3.bf16.msra.mxu1 %v12845_v2  ;;  %v20756_v2 = vld [vmem:[#allocation31_spill] sm:$0xff] }
 0xa8d   :  { %12166 = vmatmul.mubr.msk.f32.vlgmr.msra.gmra.mrb[100].mxu1 %vm490_vm2, %v18051_v7  ;;  %v20726_v7 = vld [vmem:[#allocation10_spill] sm:$0xff] }
 0xa8e   :  { %12168 = vmatprep.mubr.msk.f32.mxu1 %vm490_vm2, %v18058_v14  ;;  %v20727_v14 = vld [vmem:[#allocation11_spill] sm:$0xff] }
 0xa91   :  { %12169 = vmatmul.mubr.msk.f32.gmra.mrb[102].mxu1 %vm490_vm2, %v18065_v18  ;;  %v20728_v18 = vld [vmem:[#allocation12_spill] sm:$0xff] }
 0xa92   :  { %12171 = vmatprep.mubr.msk.f32.mxu1 %vm490_vm2, %v18072_v44  ;;  %v20729_v44 = vld [vmem:[#allocation13_spill] sm:$0xff] }
 0xa95   :  { %12172 = vmatmul.mubr.msk.f32.gmra.mrb[104].mxu1 %vm490_vm2, %v18079_v51  ;;  %v10045_v51 = vld [vmem:[%s20101_s1 + $0x4] sm:$0x3] }
 0xa96   :  { %12174 = vmatprep.mubr.msk.f32.mxu1 %vm490_vm2, %v18086_v17  ;;  %12201 = vmatprep.subr.msk.mxu0 %vm301_vm0, %v10045_v51  ;;  %v20730_v17 = vld [vmem:[#allocation14_spill] sm:$0xff] }
 0xa97   :  { %12202 = vmatpush3.msk.msra.mxu0 %vm301_vm0, %v10045_v51 }
 0xa98   :  { %12204 = vmatmul.mubr.msk.f32.vlgmr.msra.gmra.mrb[120].mxu0 %vm228_vm1, %v20730_v17 }
 0xa99   :  { %12175 = vmatmul.mubr.msk.f32.gmra.mrb[106].mxu1 %vm490_vm2, %v18093_v21  ;;  %v20731_v21 = vld [vmem:[#allocation15_spill] sm:$0xff] }
 0xa9a   :  { %12177 = vmatprep.mubr.msk.f32.mxu1 %vm490_vm2, %v18100_v25  ;;  %12206 = vmatprep.mubr.msk.f32.mxu0 %vm228_vm1, %v20731_v21  ;;  %v20732_v25 = vld [vmem:[#allocation16_spill] sm:$0xff] }
 0xa9c   :  { %12207 = vmatmul.mubr.msk.f32.gmra.mrb[122].mxu0 %vm228_vm1, %v20732_v25 }
 0xa9d   :  { %12178 = vmatmul.mubr.msk.f32.gmra.mrb[108].mxu1 %vm490_vm2, %v18107_v36  ;;  %v20733_v36 = vld [vmem:[#allocation17_spill] sm:$0xff] }
 0xa9e   :  { %12180 = vmatprep.mubr.msk.f32.mxu1 %vm490_vm2, %v18114_v50  ;;  %12209 = vmatprep.mubr.msk.f32.mxu0 %vm228_vm1, %v20733_v36  ;;  %v20734_v50 = vld [vmem:[#allocation18_spill] sm:$0xff]  ;;  %v20757_v36 = vld [vmem:[#allocation23_spill] sm:$0xff] }
 0xaa0   :  { %12210 = vmatmul.mubr.msk.f32.gmra.mrb[124].mxu0 %vm228_vm1, %v20734_v50 }
 0xaa1   :  { %12181 = vmatmul.mubr.msk.f32.gmra.mrb[110].mxu1 %vm490_vm2, %v18121_v63  ;;  %v20735_v63 = vld [vmem:[#allocation19_spill] sm:$0xff] }
 0xaa2   :  { %12183 = vmatprep.mubr.msk.f32.mxu1 %vm490_vm2, %v18128_v33  ;;  %12212 = vmatprep.mubr.msk.f32.mxu0 %vm228_vm1, %v20735_v63  ;;  %v20736_v33 = vld [vmem:[#allocation20_spill] sm:$0xff] }
 0xaa4   :  { %12213 = vmatmul.mubr.msk.f32.gmra.mrb[126].mxu0 %vm228_vm1, %v20736_v33 }
 0xaa5   :  { %12184 = vmatmul.mubr.msk.f32.gmra.mrb[112].mxu1 %vm490_vm2, %v18135_v9  ;;  %v20737_v9 = vld [vmem:[#allocation21_spill] sm:$0xff] }
 0xaa6   :  { %12186 = vmatprep.mubr.msk.f32.mxu1 %vm490_vm2, %v18142_v34  ;;  %12215 = vmatprep.mubr.msk.f32.mxu0 %vm228_vm1, %v20737_v9  ;;  %v20738_v34 = vld [vmem:[#allocation6_spill] sm:$0xff] }
 0xaa8   :  { %12216 = vmatmul.mubr.msk.f32.gmra.mrb[128].mxu0 %vm228_vm1, %v20738_v34 }
 0xaa9   :  { %12187 = vmatmul.mubr.msk.f32.gmra.mrb[114].mxu1 %vm490_vm2, %v18149_v42  ;;  %v20739_v42 = vld [vmem:[#allocation7_spill] sm:$0xff] }
 0xaaa   :  { %12189 = vmatprep.mubr.msk.f32.mxu1 %vm490_vm2, %v18156_v1  ;;  %12218 = vmatprep.mubr.msk.f32.mxu0 %vm228_vm1, %v20739_v42  ;;  %v20740_v1 = vld [vmem:[#allocation8_spill] sm:$0xff] }
 0xaac   :  { %12219 = vmatmul.mubr.msk.f32.gmra.mrb[130].mxu0 %vm228_vm1, %v20740_v1 }
 0xaad   :  { %12190 = vmatmul.mubr.msk.f32.gmra.mrb[116].mxu1 %vm490_vm2, %v18163_v27  ;;  %v20741_v27 = vld [vmem:[#allocation9_spill] sm:$0xff] }
 0xaae   :  { %12192 = vmatprep.mubr.msk.f32.mxu1 %vm490_vm2, %v18170_v37  ;;  %12221 = vmatprep.mubr.msk.f32.mxu0 %vm228_vm1, %v20741_v27  ;;  %v20742_v37 = vld [vmem:[#allocation22_spill] sm:$0xff] }
 0xab0   :  { %12222 = vmatmul.mubr.msk.f32.gmra.mrb[132].mxu0 %vm228_vm1, %v20742_v37 }
 0xab1   :  { %12193 = vmatmul.mubr.msk.f32.gmra.mrb[118].mxu1 %vm490_vm2, %v18177_v56  ;;  %v20743_v56 = vld [vmem:[#allocation26_spill] sm:$0xff] }
 0xab2   :  { %12195 = vmatprep.mubr.msk.f32.mxu1 %vm490_vm2, %v18184_v35  ;;  %12224 = vmatprep.mubr.msk.f32.mxu0 %vm228_vm1, %v20743_v56  ;;  %v20744_v35 = vld [vmem:[#allocation27_spill] sm:$0xff] }
 0xab4   :  { %12225 = vmatmul.mubr.msk.f32.gmra.mrb[134].mxu0 %vm228_vm1, %v20744_v35 }
 0xab5   :  { %12196 = vmatmul.mubr.msk.f32.gmra.mrb[120].mxu1 %vm490_vm2, %v20726_v7  ;;  %12227 = vmatprep.mubr.msk.f32.mxu0 %vm228_vm1, %v20745_v5 }
 0xab6   :  { %12198 = vmatprep.mubr.msk.f32.mxu1 %vm490_vm2, %v20727_v14 }
 0xab8   :  { %12228 = vmatmul.mubr.msk.f32.gmra.mrb[136].mxu0 %vm228_vm1, %v20746_v12 }
 0xab9   :  { %12199 = vmatmul.mubr.msk.f32.gmra.mrb[122].mxu1 %vm490_vm2, %v20728_v18  ;;  %12230 = vmatprep.mubr.msk.f32.mxu0 %vm228_vm1, %v20747_v22 }
 0xaba   :  { %12289 = vmatprep.mubr.msk.f32.mxu1 %vm228_vm1, %v20729_v44 }
 0xabc   :  { %12231 = vmatmul.mubr.msk.f32.gmra.mrb[138].mxu0 %vm228_vm1, %v20748_v29 }
 0xabd   :  { %12233 = vmatprep.mubr.msk.f32.mxu0 %vm228_vm1, %v20749_v39 }
 0xac0   :  { %12234 = vmatmul.mubr.msk.f32.gmra.mrb[140].mxu0 %vm228_vm1, %v20750_v6 }
 0xac1   :  { %12236 = vmatprep.mubr.msk.f32.mxu0 %vm228_vm1, %v20751_v11 }
 0xac4   :  { %12237 = vmatmul.mubr.msk.f32.gmra.mrb[142].mxu0 %vm228_vm1, %v20752_v61 }
 0xac5   :  { %12251 = vmatprep.mubr.msk.f32.mxu0 %vm490_vm2, %v20753_v31 }
 0xb60   :  { %v12167_v38 = vpop.f32.mrb[100].mxu1 }
 0xb61   :  { %v13155_v4 = vadd.f32 %v12167_v38, %v20475_v15  ;;  %v5515_v23 = vpop.f32.mrb[101].mxu1 }
 0xb62   :  { %v13156_v8 = vadd.f32 %v5515_v23, %v20754_v60 }
 0xb63   :  { %v10028_v24 = vmul.f32 -1.442695, %v13155_v4 }
 0xb64   :  { %v10027_v13 = vmul.f32 -1.442695, %v13156_v8  ;;  %v12170_v46 = vpop.f32.mrb[102].mxu1 }
 0xb65   :  { %14572 = vpow2.f32 %v10028_v24  ;;  %v13157_v16 = vadd.f32 %v12170_v46, %v20477_v45  ;;  %v5525_v43 = vpop.f32.mrb[103].mxu1 }
 0xb66   :  { %14574 = vpow2.f32 %v10027_v13  ;;  %v13158_v49 = vadd.f32 %v5525_v43, %v20755_v59  ;;  %v20758_v43 = vld [vmem:[#allocation35_spill] sm:$0xff] }
 0xb67   :  { %v10030_v53 = vmul.f32 -1.442695, %v13157_v16 }
 0xb68   :  { %v10029_v54 = vmul.f32 -1.442695, %v13158_v49  ;;  %v12173_v41 = vpop.f32.mrb[104].mxu1 }
 0xb69   :  { %14576 = vpow2.f32 %v10030_v53  ;;  %v13159_v7 = vadd.f32 %v12173_v41, %v20756_v2  ;;  %v5535_v14 = vpop.f32.mrb[105].mxu1  ;;  %v20759_v41 = vld [vmem:[#allocation36_spill] sm:$0xff] }
 0xb6a   :  { %14578 = vpow2.f32 %v10029_v54  ;;  %v13160_v18 = vadd.f32 %v5535_v14, %v20480_v55 }
 0xb6b   :  { %v10032_v44 = vmul.f32 -1.442695, %v13159_v7 }
 0xb6c   :  { %v10031_v51 = vmul.f32 -1.442695, %v13160_v18  ;;  %v12176_v17 = vpop.f32.mrb[106].mxu1 }
 0xb6d   :  { %14580 = vpow2.f32 %v10032_v44  ;;  %v13161_v21 = vadd.f32 %v12176_v17, %v20481_v47  ;;  %v5545_v25 = vpop.f32.mrb[107].mxu1  ;;  %v20760_v17 = vld [vmem:[#allocation41_spill] sm:$0xff] }
 0xb6e   :  { %14582 = vpow2.f32 %v10031_v51  ;;  %v13162_v50 = vadd.f32 %v5545_v25, %v20757_v36 }
 0xb6f   :  { %v14573_v63 = vpop.eup %14572  ;;  %v10034_v33 = vmul.f32 -1.442695, %v13161_v21 }
 0xb70   :  { %v14575_v9 = vpop.eup %14574  ;;  %v5677_v34 = vadd.f32 1.0, %v14573_v63  ;;  %v10033_v42 = vmul.f32 -1.442695, %v13162_v50  ;;  %v12179_v1 = vpop.f32.mrb[108].mxu1 }
 0xb71   :  { %v5676_v27 = vadd.f32 1.0, %v14575_v9  ;;  %14584 = vpow2.f32 %v10034_v33  ;;  %v13163_v37 = vadd.f32 %v12179_v1, %v20483_v40  ;;  %v5555_v56 = vpop.f32.mrb[109].mxu1  ;;  %v20761_v9 = vld [vmem:[#allocation42_spill] sm:$0xff] }
 0xb72   :  { %14586 = vrcp.f32 %v5677_v34  ;;  %v13164_v35 = vadd.f32 %v5555_v56, %v20484_v3  ;;  %v20762_v56 = vld [vmem:[#allocation43_spill] sm:$0xff] }
 0xb73   :  { %v14577_v5 = vpop.eup %14576  ;;  %14588 = vrcp.f32 %v5676_v27  ;;  %v10036_v12 = vmul.f32 -1.442695, %v13163_v37 }
 0xb74   :  { %v14579_v22 = vpop.eup %14578  ;;  %v5679_v29 = vadd.f32 1.0, %v14577_v5  ;;  %14590 = vpow2.f32 %v10033_v42  ;;  %v10035_v39 = vmul.f32 -1.442695, %v13164_v35  ;;  %v12182_v6 = vpop.f32.mrb[110].mxu1 }
 0xb75   :  { %v5678_v11 = vadd.f32 1.0, %v14579_v22  ;;  %14592 = vpow2.f32 %v10036_v12  ;;  %v13165_v61 = vadd.f32 %v12182_v6, %v20485_v52  ;;  %v5565_v31 = vpop.f32.mrb[111].mxu1 }
 0xb76   :  { %14594 = vrcp.f32 %v5679_v29  ;;  %v13166_v38 = vadd.f32 %v5565_v31, %v20486_v58 }
 0xb77   :  { %v14581_v4 = vpop.eup %14580  ;;  %14596 = vrcp.f32 %v5678_v11  ;;  %v10038_v23 = vmul.f32 -1.442695, %v13165_v61 }
 0xb78   :  { %v14583_v8 = vpop.eup %14582  ;;  %v5681_v24 = vadd.f32 1.0, %v14581_v4  ;;  %14598 = vpow2.f32 %v10035_v39  ;;  %v10037_v13 = vmul.f32 -1.442695, %v13166_v38  ;;  %v12185_v46 = vpop.f32.mrb[112].mxu1  ;;  %v20763_v39 = vld [vmem:[#allocation44_spill] sm:$0xff]  ;;  %v20764_v4 = vld [vmem:[#allocation37_spill] sm:$0xff] }
 0xb79   :  { %v5680_v16 = vadd.f32 1.0, %v14583_v8  ;;  %14600 = vpow2.f32 %v10038_v23  ;;  %v13167_v49 = vadd.f32 %v12185_v46, %v20758_v43  ;;  %v5575_v53 = vpop.f32.mrb[113].mxu1 }
 0xb7a   :  { %14602 = vrcp.f32 %v5681_v24  ;;  %v13168_v7 = vadd.f32 %v5575_v53, %v20759_v41 }
 0xb7b   :  { %v14585_v54 = vpop.eup %14584  ;;  %14604 = vrcp.f32 %v5680_v16 }
 0xb7c   :  { %v14587_v14 = vpop.eup %14586  ;;  %v5713_v18 = vadd.f32 1.0, %v14585_v54  ;;  %14606 = vpow2.f32 %v10037_v13  ;;  %v12188_v44 = vpop.f32.mrb[114].mxu1 }
 0xb7d   :  { %v14589_v51 = vpop.eup %14588  ;;  %14608 = vtanh.f32 %v13167_v49  ;;  %v13169_v21 = vadd.f32 %v12188_v44, %v20760_v17  ;;  %v5585_v25 = vpop.f32.mrb[115].mxu1 }
 0xb7e   :  { %v14591_v50 = vpop.eup %14590  ;;  %14610 = vrcp.f32 %v5713_v18  ;;  %v13170_v34 = vadd.f32 %v5585_v25, %v20761_v9 }
 0xb7f   :  { %v14593_v63 = vpop.eup %14592  ;;  %v5712_v33 = vadd.f32 1.0, %v14591_v50  ;;  %14612 = vtanh.f32 %v13168_v7 }
 0xb80   :  { %v14595_v42 = vpop.eup %14594  ;;  %v5715_v1 = vadd.f32 1.0, %v14593_v63  ;;  %14614 = vtanh.f32 %v13169_v21  ;;  %v12191_v27 = vpop.f32.mrb[116].mxu1 }
 0xb81   :  { %v14597_v37 = vpop.eup %14596  ;;  %14616 = vrcp.f32 %v5712_v33  ;;  %v13171_v35 = vadd.f32 %v12191_v27, %v20762_v56  ;;  %v5595_v5 = vpop.f32.mrb[117].mxu1 }
 0xb82   :  { %v14599_v12 = vpop.eup %14598  ;;  %14618 = vrcp.f32 %v5715_v1  ;;  %v13172_v6 = vadd.f32 %v5595_v5, %v20763_v39 }
 0xb83   :  { %v14601_v22 = vpop.eup %14600  ;;  %v5714_v29 = vadd.f32 1.0, %v14599_v12  ;;  %14620 = vtanh.f32 %v13170_v34 }
 0xb84   :  { %v14603_v11 = vpop.eup %14602  ;;  %v5717_v61 = vadd.f32 1.0, %v14601_v22  ;;  %14622 = vtanh.f32 %v13171_v35  ;;  %v12194_v31 = vpop.f32.mrb[118].mxu1 }
 0xb85   :  { %v14605_v38 = vpop.eup %14604  ;;  %14624 = vrcp.f32 %v5714_v29  ;;  %v13173_v23 = vadd.f32 %v12194_v31, %v20764_v4  ;;  %v5605_v8 = vpop.f32.mrb[119].mxu1 }
 0xb86   :  { %v14607_v24 = vpop.eup %14606  ;;  %14626 = vrcp.f32 %v5717_v61  ;;  %v13174_v13 = vadd.f32 %v5605_v8, %v20494_v0 }
 0xb87   :  { %v14609_v46 = vpop.eup %14608  ;;  %v5716_v16 = vadd.f32 1.0, %v14607_v24  ;;  %14628 = vtanh.f32 %v13172_v6  ;;  %v10040_v49 = vmul.f32 -1.442695, %v13173_v23 }
 0xb88   :  { %v14611_v53 = vpop.eup %14610  ;;  %v5779_v54 = vmul.f32 %v14609_v46, %v14587_v14  ;;  %v10039_v7 = vmul.f32 -1.442695, %v13174_v13  ;;  %v12197_v18 = vpop.f32.mrb[120].mxu1 }
 0xb89   :  { %v14613_v44 = vpop.eup %14612  ;;  %v5773_v21 = vmul.f32 %v14611_v53, %v18412_v32  ;;  %14630 = vrcp.f32 %v5716_v16  ;;  %v13175_v25 = vadd.f32 %v12197_v18, %v20495_v26  ;;  %v5615_v50 = vpop.f32.mrb[121].mxu1 }
 0xb8a   :  { %v14615_v63 = vpop.eup %14614  ;;  %v5778_v33 = vmul.f32 %v14613_v44, %v14589_v51  ;;  %14632 = vpow2.f32 %v10040_v49  ;;  %v13176_v34 = vadd.f32 %v5615_v50, %v20496_v19 }
 0xb8b   :  { %v14617_v1 = vpop.eup %14616  ;;  %v18561_v27 = vadd.f32 %v5779_v54, %v5773_v21  ;;  %v5781_v35 = vmul.f32 %v14615_v63, %v14595_v42  ;;  %14634 = vpow2.f32 %v10039_v7  ;;  %v10042_v14 = vmul.f32 -1.442695, %v13175_v25 }
 0xb8c   :  { %v14619_v5 = vpop.eup %14618  ;;  %v5772_v12 = vmul.f32 %v14617_v1, %v18417_v10  ;;  %v10041_v22 = vmul.f32 -1.442695, %v13176_v34  ;;  %v12200_v32 = vpop.f32.mrb[122].mxu1 }
 0xb8d   :  { %v14621_v29 = vpop.eup %14620  ;;  %v5775_v6 = vmul.f32 %v14619_v5, %v18420_v62  ;;  %v13177_v61 = vadd.f32 %v12200_v32, %v16244_v30  ;;  %v5625_v51 = vpop.f32.mrb[123].mxu1  ;;  %14636 = vpow2.f32 %v10042_v14 }
 0xb8e   :  { %v14623_v31 = vpop.eup %14622  ;;  %v18566_v23 = vadd.f32 %v5778_v33, %v5772_v12  ;;  %v5780_v8 = vmul.f32 %v14621_v29, %v14597_v37  ;;  %v13178_v42 = vadd.f32 %v5625_v51, %v16247_v28  ;;  %14638 = vpow2.f32 %v10041_v22 }
 0xb8f   :  { %v14625_v24 = vpop.eup %14624  ;;  %v18569_v13 = vadd.f32 %v5781_v35, %v5775_v6  ;;  %v5783_v46 = vmul.f32 %v14623_v31, %v14603_v11  ;;  %v10044_v10 = vmul.f32 -1.442695, %v13177_v61 }
 0xb90   :  { %v14627_v16 = vpop.eup %14626  ;;  %v5774_v49 = vmul.f32 %v14625_v24, %v18424_v57  ;;  %v10043_v62 = vmul.f32 -1.442695, %v13178_v42 }
 0xb91   :  { %v14629_v53 = vpop.eup %14628  ;;  %v5777_v54 = vmul.f32 %v14627_v16, %v18426_v48  ;;  %14640 = vpow2.f32 %v10044_v10 }
 0xb92   :  { %v18573_v7 = vadd.f32 %v5780_v8, %v5774_v49  ;;  %v5782_v18 = vmul.f32 %v14629_v53, %v14605_v38  ;;  %14642 = vpow2.f32 %v10043_v62 }
 0xb93   :  { %v14631_v37 = vpop.eup %14630  ;;  %v18575_v44 = vadd.f32 %v5783_v46, %v5777_v54  ;;  %14644 = vtanh.f32 %v18561_v27 }
 0xb94   :  { %v14633_v21 = vpop.eup %14632  ;;  %v5776_v11 = vmul.f32 %v14631_v37, %v18431_v20  ;;  %14646 = vtanh.f32 %v18566_v23 }
 0xb95   :  { %v14635_v25 = vpop.eup %14634  ;;  %v5755_v50 = vadd.f32 1.0, %v14633_v21  ;;  %v18589_v21 = vld [vmem:[%s20104_s4 + $0x8] sm:$0xff] }
 0xb96   :  { %v18580_v57 = vadd.f32 %v5782_v18, %v5776_v11  ;;  %v5754_v48 = vadd.f32 1.0, %v14635_v25  ;;  %v18596_v11 = vld [vmem:[%s20104_s4 + $0x10] sm:$0xff]  ;;  %v18603_v25 = vld [vmem:[%s20104_s4 + $0x18] sm:$0xff] }
 0xb97   :  { %14648 = vrcp.f32 %v5755_v50  ;;  %v14637_v63 = vpop.eup %14636  ;;  %v18610_v50 = vld [vmem:[%s20104_s4 + $0x20] sm:$0xff] }
 0xb98   :  { %14650 = vtanh.f32 %v18569_v13  ;;  %v14639_v38 = vpop.eup %14638  ;;  %v5757_v33 = vadd.f32 1.0, %v14637_v63  ;;  %v18624_v63 = vld [vmem:[%s20104_s4 + $0x30] sm:$0xff] }
 0xb99   :  { %14652 = vrcp.f32 %v5754_v48  ;;  %v5756_v34 = vadd.f32 1.0, %v14639_v38  ;;  %v18617_v48 = vld [vmem:[%s20104_s4 + $0x28] sm:$0xff]  ;;  %v18631_v38 = vld [vmem:[%s20104_s4 + $0x38] sm:$0xff] }
 0xb9a   :  { %14654 = vtanh.f32 %v18573_v7 }
 0xb9b   :  { %14656 = vrcp.f32 %v5757_v33  ;;  %v14641_v20 = vpop.eup %14640  ;;  %v18638_v33 = vld [vmem:[%s20104_s4 + $0x40] sm:$0xff] }
 0xb9c   :  { %14658 = vrcp.f32 %v5756_v34  ;;  %v14643_v1 = vpop.eup %14642  ;;  %v5759_v35 = vadd.f32 1.0, %v14641_v20  ;;  %v18645_v34 = vld [vmem:[%s20104_s4 + $0x48] sm:$0xff]  ;;  %v18652_v20 = vld [vmem:[%s20104_s4 + $0x50] sm:$0xff] }
 0xb9d   :  { %14660 = vtanh.f32 %v18575_v44  ;;  %v5758_v14 = vadd.f32 1.0, %v14643_v1  ;;  %v14645_v5 = vpop.eup %14644  ;;  %v18659_v1 = vld [vmem:[%s20104_s4 + $0x58] sm:$0xff] }
 0xb9e   :  { %14662 = vtanh.f32 %v18580_v57  ;;  %v14647_v12 = vpop.eup %14646 }
 0xb9f   :  { %14664 = vrcp.f32 %v5759_v35  ;;  %v18666_v35 = vld [vmem:[%s20104_s4 + $0x60] sm:$0xff] }
 0xba0   :  { %14666 = vrcp.f32 %v5758_v14  ;;  %v18673_v14 = vld [vmem:[%s20104_s4 + $0x68] sm:$0xff] }
 0xba1   :  { %v14649_v22 = vpop.eup %14648 }
 0xba2   :  { %v14651_v32 = vpop.eup %14650  ;;  %v5797_v29 = vmul.f32 %v14649_v22, %v14645_v5  ;;  %v18680_v5 = vld [vmem:[%s20104_s4 + $0x70] sm:$0xff]  ;;  %v18694_v22 = vld [vmem:[%s20104_s4 + $0x80] sm:$0xff] }
 0xba3   :  { %v14653_v6 = vpop.eup %14652 }
 0xba4   :  { %v14655_v61 = vpop.eup %14654  ;;  %v5796_v51 = vmul.f32 %v14653_v6, %v14647_v12  ;;  %v18687_v12 = vld [vmem:[%s20104_s4 + $0x78] sm:$0xff] }
 0xba5   :  { %v14657_v31 = vpop.eup %14656  ;;  %v18715_v6 = vld [vmem:[%s20104_s4 + $0x98] sm:$0xff] }
 0xba6   :  { %v14659_v8 = vpop.eup %14658  ;;  %v12849_v42 = vpack.c.bf16 %v5797_v29, %v5796_v51  ;;  %v5799_v24 = vmul.f32 %v14657_v31, %v14651_v32  ;;  %v18701_v32 = vld [vmem:[%s20104_s4 + $0x88] sm:$0xff]  ;;  %v18708_v29 = vld [vmem:[%s20104_s4 + $0x90] sm:$0xff] }
 0xba7   :  { %v14661_v46 = vpop.eup %14660  ;;  %v5798_v10 = vmul.f32 %v14659_v8, %v14655_v61  ;;  %v18722_v61 = vld [vmem:[%s20104_s4 + $0xa0] sm:$0xff]  ;;  %v18729_v51 = vld [vmem:[%s20104_s4 + $0xa8] sm:$0xff]  ;;  %v18736_v31 = vld [vmem:[%s20104_s4 + $0xb0] sm:$0xff] }
 0xba8   :  { %v14663_v16 = vpop.eup %14662  ;;  %12850 = vmatprep.subr.bf16.mxu0 %v12849_v42  ;;  %20765 = vst [vmem:[#allocation10_spill] sm:$0xff] %v18729_v51  ;;  %20766 = vst [vmem:[#allocation11_spill] sm:$0xff] %v18736_v31  ;;  %v18743_v8 = vld [vmem:[%s20104_s4 + $0xb8] sm:$0xff] }
 0xba9   :  { %v14665_v49 = vpop.eup %14664  ;;  %12852 = vmatpush3.bf16.msra.mxu0 %v12849_v42  ;;  %v12853_v62 = vpack.c.bf16 %v5799_v24, %v5798_v10  ;;  %20767 = vst [vmem:[#allocation12_spill] sm:$0xff] %v18743_v8  ;;  %v18750_v42 = vld [vmem:[%s20102_s2] sm:$0xff]  ;;  %v18769_v10 = vld [vmem:[%s20102_s2 + $0x10] sm:$0xff] }
 0xbaa   :  { %v14667_v53 = vpop.eup %14666  ;;  %v5801_v54 = vmul.f32 %v14665_v49, %v14661_v46  ;;  %20768 = vst [vmem:[#allocation13_spill] sm:$0xff] %v18750_v42  ;;  %v10113_v24 = vld [vmem:[%s20101_s1 + $0x6] sm:$0x3]  ;;  %v18762_v46 = vld [vmem:[%s20102_s2 + $0x8] sm:$0xff]  ;;  %20770 = vst [vmem:[#allocation15_spill] sm:$0xff] %v18769_v10 }
 0xbab   :  { %12854 = vmatprep.subr.bf16.mxu0 %v12853_v62  ;;  %v5800_v18 = vmul.f32 %v14667_v53, %v14663_v16  ;;  %12287 = vmatprep.subr.msk.mxu1 %vm301_vm0, %v10113_v24  ;;  %20769 = vst [vmem:[#allocation14_spill] sm:$0xff] %v18762_v46  ;;  %v18776_v16 = vld [vmem:[%s20102_s2 + $0x18] sm:$0xff]  ;;  %v18783_v49 = vld [vmem:[%s20102_s2 + $0x20] sm:$0xff]  ;;  %v18797_v53 = vld [vmem:[%s20102_s2 + $0x30] sm:$0xff] }
 0xbac   :  { %12288 = vmatpush3.msk.msra.mxu1 %vm301_vm0, %v10113_v24  ;;  %20771 = vst [vmem:[#allocation16_spill] sm:$0xff] %v18776_v16  ;;  %20772 = vst [vmem:[#allocation17_spill] sm:$0xff] %v18783_v49  ;;  %v18825_v24 = vld [vmem:[%s20102_s2 + $0x50] sm:$0xff] }
 0xbad   :  { %12856 = vmatpush3.bf16.msra.mxu0 %v12853_v62  ;;  %v12857_v37 = vpack.c.bf16 %v5801_v54, %v5800_v18  ;;  %12290 = vmatmul.mubr.msk.f32.vlgmr.msra.gmra.mrb[124].mxu1 %vm228_vm1, %v18762_v46  ;;  %v18790_v62 = vld [vmem:[%s20102_s2 + $0x28] sm:$0xff]  ;;  %20774 = vst [vmem:[#allocation19_spill] sm:$0xff] %v18797_v53  ;;  %v18804_v54 = vld [vmem:[%s20102_s2 + $0x38] sm:$0xff]  ;;  %v18811_v18 = vld [vmem:[%s20102_s2 + $0x40] sm:$0xff] }
 0xbae   :  { %12292 = vmatprep.mubr.msk.f32.mxu1 %vm228_vm1, %v18769_v10  ;;  %20773 = vst [vmem:[#allocation18_spill] sm:$0xff] %v18790_v62  ;;  %20775 = vst [vmem:[#allocation20_spill] sm:$0xff] %v18804_v54 }
 0xbaf   :  { %12858 = vmatprep.subr.bf16.mxu0 %v12857_v37  ;;  %20776 = vst [vmem:[#allocation21_spill] sm:$0xff] %v18811_v18  ;;  %20778 = vst [vmem:[#allocation7_spill] sm:$0xff] %v18825_v24 }
 0xbb1   :  { %12860 = vmatpush3.bf16.msra.mxu0 %v12857_v37  ;;  %12293 = vmatmul.mubr.msk.f32.gmra.mrb[126].mxu1 %vm228_vm1, %v18776_v16  ;;  %v18818_v37 = vld [vmem:[%s20102_s2 + $0x48] sm:$0xff] }
 0xbb2   :  { %12295 = vmatprep.mubr.msk.f32.mxu1 %vm228_vm1, %v18783_v49  ;;  %20777 = vst [vmem:[#allocation6_spill] sm:$0xff] %v18818_v37 }
 0xbb4   :  { %12252 = vmatmul.mubr.msk.f32.vlgmr.msra.gmra.mrb[120].mxu0 %vm490_vm2, %v18589_v21 }
 0xbb5   :  { %12254 = vmatprep.mubr.msk.f32.mxu0 %vm490_vm2, %v18596_v11  ;;  %12296 = vmatmul.mubr.msk.f32.gmra.mrb[128].mxu1 %vm228_vm1, %v18790_v62 }
 0xbb6   :  { %12298 = vmatprep.mubr.msk.f32.mxu1 %vm228_vm1, %v18797_v53 }
 0xbb8   :  { %12255 = vmatmul.mubr.msk.f32.gmra.mrb[122].mxu0 %vm490_vm2, %v18603_v25 }
 0xbb9   :  { %12257 = vmatprep.mubr.msk.f32.mxu0 %vm490_vm2, %v18610_v50  ;;  %12299 = vmatmul.mubr.msk.f32.gmra.mrb[130].mxu1 %vm228_vm1, %v18804_v54 }
 0xbba   :  { %12301 = vmatprep.mubr.msk.f32.mxu1 %vm228_vm1, %v18811_v18  ;;  %v18832_v18 = vld [vmem:[%s20102_s2 + $0x58] sm:$0xff] }
 0xbbb   :  { %20779 = vst [vmem:[#allocation8_spill] sm:$0xff] %v18832_v18 }
 0xbbc   :  { %12258 = vmatmul.mubr.msk.f32.gmra.mrb[124].mxu0 %vm490_vm2, %v18617_v48 }
 0xbbd   :  { %12260 = vmatprep.mubr.msk.f32.mxu0 %vm490_vm2, %v18624_v63  ;;  %12302 = vmatmul.mubr.msk.f32.gmra.mrb[132].mxu1 %vm228_vm1, %v18818_v37  ;;  %v18839_v37 = vld [vmem:[%s20102_s2 + $0x60] sm:$0xff] }
 0xbbe   :  { %12304 = vmatprep.mubr.msk.f32.mxu1 %vm228_vm1, %v18825_v24  ;;  %20780 = vst [vmem:[#allocation9_spill] sm:$0xff] %v18839_v37  ;;  %v18846_v24 = vld [vmem:[%s20102_s2 + $0x68] sm:$0xff] }
 0xbbf   :  { %20781 = vst [vmem:[#allocation22_spill] sm:$0xff] %v18846_v24 }
 0xbc0   :  { %12261 = vmatmul.mubr.msk.f32.gmra.mrb[126].mxu0 %vm490_vm2, %v18631_v38 }
 0xbc1   :  { %12263 = vmatprep.mubr.msk.f32.mxu0 %vm490_vm2, %v18638_v33  ;;  %12305 = vmatmul.mubr.msk.f32.gmra.mrb[134].mxu1 %vm228_vm1, %v18832_v18  ;;  %v18853_v18 = vld [vmem:[%s20102_s2 + $0x70] sm:$0xff] }
 0xbc2   :  { %12307 = vmatprep.mubr.msk.f32.mxu1 %vm228_vm1, %v18839_v37  ;;  %20782 = vst [vmem:[#allocation26_spill] sm:$0xff] %v18853_v18  ;;  %v18860_v37 = vld [vmem:[%s20102_s2 + $0x78] sm:$0xff] }
 0xbc3   :  { %20783 = vst [vmem:[#allocation27_spill] sm:$0xff] %v18860_v37 }
 0xbc4   :  { %12264 = vmatmul.mubr.msk.f32.gmra.mrb[128].mxu0 %vm490_vm2, %v18645_v34 }
 0xbc5   :  { %12266 = vmatprep.mubr.msk.f32.mxu0 %vm490_vm2, %v18652_v20  ;;  %12308 = vmatmul.mubr.msk.f32.gmra.mrb[136].mxu1 %vm228_vm1, %v18846_v24  ;;  %v18867_v24 = vld [vmem:[%s20102_s2 + $0x80] sm:$0xff] }
 0xbc6   :  { %12310 = vmatprep.mubr.msk.f32.mxu1 %vm228_vm1, %v18853_v18  ;;  %20784 = vst [vmem:[#allocation32_spill] sm:$0xff] %v18867_v24  ;;  %v18874_v18 = vld [vmem:[%s20102_s2 + $0x88] sm:$0xff] }
 0xbc7   :  { %20785 = vst [vmem:[#allocation25_spill] sm:$0xff] %v18874_v18 }
 0xbc8   :  { %12267 = vmatmul.mubr.msk.f32.gmra.mrb[130].mxu0 %vm490_vm2, %v18659_v1 }
 0xbc9   :  { %12269 = vmatprep.mubr.msk.f32.mxu0 %vm490_vm2, %v18666_v35  ;;  %12311 = vmatmul.mubr.msk.f32.gmra.mrb[138].mxu1 %vm228_vm1, %v18860_v37  ;;  %v18881_v37 = vld [vmem:[%s20102_s2 + $0x90] sm:$0xff] }
 0xbca   :  { %12313 = vmatprep.mubr.msk.f32.mxu1 %vm228_vm1, %v18867_v24  ;;  %20786 = vst [vmem:[#allocation29_spill] sm:$0xff] %v18881_v37  ;;  %v18888_v24 = vld [vmem:[%s20102_s2 + $0x98] sm:$0xff] }
 0xbcb   :  { %20787 = vst [vmem:[#allocation30_spill] sm:$0xff] %v18888_v24 }
 0xbcc   :  { %12270 = vmatmul.mubr.msk.f32.gmra.mrb[132].mxu0 %vm490_vm2, %v18673_v14 }
 0xbcd   :  { %12272 = vmatprep.mubr.msk.f32.mxu0 %vm490_vm2, %v18680_v5  ;;  %12314 = vmatmul.mubr.msk.f32.gmra.mrb[140].mxu1 %vm228_vm1, %v18874_v18  ;;  %v18895_v18 = vld [vmem:[%s20102_s2 + $0xa0] sm:$0xff] }
 0xbce   :  { %12316 = vmatprep.mubr.msk.f32.mxu1 %vm228_vm1, %v18881_v37  ;;  %20788 = vst [vmem:[#allocation33_spill] sm:$0xff] %v18895_v18  ;;  %v18902_v37 = vld [vmem:[%s20102_s2 + $0xa8] sm:$0xff] }
 0xbcf   :  { %20789 = vst [vmem:[#allocation34_spill] sm:$0xff] %v18902_v37 }
 0xbd0   :  { %12273 = vmatmul.mubr.msk.f32.gmra.mrb[134].mxu0 %vm490_vm2, %v18687_v12 }
 0xbd1   :  { %12275 = vmatprep.mubr.msk.f32.mxu0 %vm490_vm2, %v18694_v22  ;;  %12317 = vmatmul.mubr.msk.f32.gmra.mrb[142].mxu1 %vm228_vm1, %v18888_v24  ;;  %v18909_v24 = vld [vmem:[%s20102_s2 + $0xb0] sm:$0xff] }
 0xbd2   :  { %12319 = vmatprep.mubr.msk.f32.mxu1 %vm228_vm1, %v18895_v18  ;;  %20790 = vst [vmem:[#allocation38_spill] sm:$0xff] %v18909_v24  ;;  %v18916_v18 = vld [vmem:[%s20102_s2 + $0xb8] sm:$0xff] }
 0xbd3   :  { %20791 = vst [vmem:[#allocation39_spill] sm:$0xff] %v18916_v18 }
 0xbd4   :  { %12276 = vmatmul.mubr.msk.f32.gmra.mrb[136].mxu0 %vm490_vm2, %v18701_v32 }
 0xbd5   :  { %12278 = vmatprep.mubr.msk.f32.mxu0 %vm490_vm2, %v18708_v29  ;;  %12320 = vmatmul.mubr.msk.f32.gmra.mrb[144].mxu1 %vm228_vm1, %v18902_v37  ;;  %v18923_v37 = vld [vmem:[%s20104_s4] sm:$0xff] }
 0xbd6   :  { %12322 = vmatprep.mubr.msk.f32.mxu1 %vm228_vm1, %v18909_v24  ;;  %20792 = vst [vmem:[#allocation40_spill] sm:$0xff] %v18923_v37 }
 0xbd8   :  { %12279 = vmatmul.mubr.msk.f32.gmra.mrb[138].mxu0 %vm490_vm2, %v18715_v6 }
 0xbd9   :  { %12281 = vmatprep.mubr.msk.f32.mxu0 %vm490_vm2, %v18722_v61  ;;  %12323 = vmatmul.mubr.msk.f32.gmra.mrb[146].mxu1 %vm228_vm1, %v18916_v18 }
 0xbda   :  { %12337 = vmatprep.mubr.msk.f32.mxu1 %vm490_vm2, %v18923_v37 }
 0xbdc   :  { %12282 = vmatmul.mubr.msk.f32.gmra.mrb[140].mxu0 %vm490_vm2, %v18729_v51 }
 0xbdd   :  { %12284 = vmatprep.mubr.msk.f32.mxu0 %vm490_vm2, %v18736_v31 }
 0xbe0   :  { %12285 = vmatmul.mubr.msk.f32.gmra.mrb[142].mxu0 %vm490_vm2, %v18743_v8 }
 0xbe1   :  { %12375 = vmatprep.mubr.msk.f32.mxu0 %vm228_vm1, %v18750_v42 }
 0xc87   :  { %v12253_v54 = vpop.f32.mrb[120].mxu0 }
 0xc88   :  { %v13179_v53 = vadd.f32 %v12253_v54, %v20475_v15  ;;  %v6058_v24 = vpop.f32.mrb[121].mxu0 }
 0xc89   :  { %v13180_v62 = vadd.f32 %v6058_v24, %v20754_v60 }
 0xc8a   :  { %v10096_v49 = vmul.f32 -1.442695, %v13179_v53 }
 0xc8b   :  { %v10095_v16 = vmul.f32 -1.442695, %v13180_v62  ;;  %v12256_v10 = vpop.f32.mrb[122].mxu0 }
 0xc8c   :  { %14668 = vpow2.f32 %v10096_v49  ;;  %v13181_v18 = vadd.f32 %v12256_v10, %v20477_v45  ;;  %v6068_v46 = vpop.f32.mrb[123].mxu0 }
 0xc8d   :  { %14670 = vpow2.f32 %v10095_v16  ;;  %v13182_v42 = vadd.f32 %v6068_v46, %v20755_v59 }
 0xc8e   :  { %v10098_v8 = vmul.f32 -1.442695, %v13181_v18 }
 0xc8f   :  { %v10097_v31 = vmul.f32 -1.442695, %v13182_v42  ;;  %v12259_v51 = vpop.f32.mrb[124].mxu0 }
 0xc90   :  { %14672 = vpow2.f32 %v10098_v8  ;;  %v13183_v37 = vadd.f32 %v12259_v51, %v20756_v2  ;;  %v6078_v54 = vpop.f32.mrb[125].mxu0 }
 0xc91   :  { %14674 = vpow2.f32 %v10097_v31  ;;  %v13184_v24 = vadd.f32 %v6078_v54, %v20480_v55 }
 0xc92   :  { %v10100_v53 = vmul.f32 -1.442695, %v13183_v37 }
 0xc93   :  { %v10099_v62 = vmul.f32 -1.442695, %v13184_v24  ;;  %v12262_v60 = vpop.f32.mrb[126].mxu0 }
 0xc94   :  { %14676 = vpow2.f32 %v10100_v53  ;;  %v13185_v10 = vadd.f32 %v12262_v60, %v20481_v47  ;;  %v6088_v49 = vpop.f32.mrb[127].mxu0 }
 0xc95   :  { %14678 = vpow2.f32 %v10099_v62  ;;  %v13186_v46 = vadd.f32 %v6088_v49, %v20757_v36 }
 0xc96   :  { %v14669_v16 = vpop.eup %14668  ;;  %v10102_v42 = vmul.f32 -1.442695, %v13185_v10 }
 0xc97   :  { %v14671_v18 = vpop.eup %14670  ;;  %v6220_v8 = vadd.f32 1.0, %v14669_v16  ;;  %v10101_v59 = vmul.f32 -1.442695, %v13186_v46  ;;  %v12265_v51 = vpop.f32.mrb[128].mxu0 }
 0xc98   :  { %v6219_v2 = vadd.f32 1.0, %v14671_v18  ;;  %14680 = vpow2.f32 %v10102_v42  ;;  %v13187_v31 = vadd.f32 %v12265_v51, %v20483_v40  ;;  %v6098_v37 = vpop.f32.mrb[129].mxu0 }
 0xc99   :  { %14682 = vrcp.f32 %v6220_v8  ;;  %v13188_v54 = vadd.f32 %v6098_v37, %v20484_v3 }
 0xc9a   :  { %v14673_v24 = vpop.eup %14672  ;;  %14684 = vrcp.f32 %v6219_v2  ;;  %v10104_v60 = vmul.f32 -1.442695, %v13187_v31 }
 0xc9b   :  { %v14675_v53 = vpop.eup %14674  ;;  %v6222_v62 = vadd.f32 1.0, %v14673_v24  ;;  %14686 = vpow2.f32 %v10101_v59  ;;  %v10103_v49 = vmul.f32 -1.442695, %v13188_v54  ;;  %v12268_v10 = vpop.f32.mrb[130].mxu0 }
 0xc9c   :  { %v6221_v36 = vadd.f32 1.0, %v14675_v53  ;;  %14688 = vpow2.f32 %v10104_v60  ;;  %v13189_v46 = vadd.f32 %v12268_v10, %v20485_v52  ;;  %v6108_v16 = vpop.f32.mrb[131].mxu0 }
 0xc9d   :  { %14690 = vrcp.f32 %v6222_v62  ;;  %v13190_v42 = vadd.f32 %v6108_v16, %v20486_v58 }
 0xc9e   :  { %v14677_v18 = vpop.eup %14676  ;;  %14692 = vrcp.f32 %v6221_v36  ;;  %v10106_v8 = vmul.f32 -1.442695, %v13189_v46 }
 0xc9f   :  { %v14679_v51 = vpop.eup %14678  ;;  %v6224_v37 = vadd.f32 1.0, %v14677_v18  ;;  %14694 = vpow2.f32 %v10103_v49  ;;  %v10105_v2 = vmul.f32 -1.442695, %v13190_v42  ;;  %v12271_v31 = vpop.f32.mrb[132].mxu0 }
 0xca0   :  { %v6223_v24 = vadd.f32 1.0, %v14679_v51  ;;  %14696 = vpow2.f32 %v10106_v8  ;;  %v13191_v59 = vadd.f32 %v12271_v31, %v20758_v43  ;;  %v6118_v54 = vpop.f32.mrb[133].mxu0 }
 0xca1   :  { %14698 = vrcp.f32 %v6224_v37  ;;  %v13192_v53 = vadd.f32 %v6118_v54, %v20759_v41 }
 0xca2   :  { %v14681_v60 = vpop.eup %14680  ;;  %14700 = vrcp.f32 %v6223_v24 }
 0xca3   :  { %v14683_v62 = vpop.eup %14682  ;;  %v6256_v10 = vadd.f32 1.0, %v14681_v60  ;;  %14702 = vpow2.f32 %v10105_v2  ;;  %v12274_v36 = vpop.f32.mrb[134].mxu0 }
 0xca4   :  { %v14685_v46 = vpop.eup %14684  ;;  %14704 = vtanh.f32 %v13191_v59  ;;  %v13193_v49 = vadd.f32 %v12274_v36, %v20760_v17  ;;  %v6128_v16 = vpop.f32.mrb[135].mxu0 }
 0xca5   :  { %v14687_v42 = vpop.eup %14686  ;;  %14706 = vrcp.f32 %v6256_v10  ;;  %v13194_v51 = vadd.f32 %v6128_v16, %v20761_v9 }
 0xca6   :  { %v14689_v18 = vpop.eup %14688  ;;  %v6255_v8 = vadd.f32 1.0, %v14687_v42  ;;  %14708 = vtanh.f32 %v13192_v53 }
 0xca7   :  { %v14691_v37 = vpop.eup %14690  ;;  %v6258_v31 = vadd.f32 1.0, %v14689_v18  ;;  %14710 = vtanh.f32 %v13193_v49  ;;  %v12277_v24 = vpop.f32.mrb[136].mxu0 }
 0xca8   :  { %v14693_v54 = vpop.eup %14692  ;;  %14712 = vrcp.f32 %v6255_v8  ;;  %v13195_v2 = vadd.f32 %v12277_v24, %v20762_v56  ;;  %v6138_v60 = vpop.f32.mrb[137].mxu0 }
 0xca9   :  { %v14695_v59 = vpop.eup %14694  ;;  %14714 = vrcp.f32 %v6258_v31  ;;  %v13196_v10 = vadd.f32 %v6138_v60, %v20763_v39 }
 0xcaa   :  { %v14697_v36 = vpop.eup %14696  ;;  %v6257_v17 = vadd.f32 1.0, %v14695_v59  ;;  %14716 = vtanh.f32 %v13194_v51 }
 0xcab   :  { %v14699_v42 = vpop.eup %14698  ;;  %v6260_v53 = vadd.f32 1.0, %v14697_v36  ;;  %14718 = vtanh.f32 %v13195_v2  ;;  %v12280_v16 = vpop.f32.mrb[138].mxu0 }
 0xcac   :  { %v14701_v9 = vpop.eup %14700  ;;  %14720 = vrcp.f32 %v6257_v17  ;;  %v13197_v49 = vadd.f32 %v12280_v16, %v20764_v4  ;;  %v6148_v18 = vpop.f32.mrb[139].mxu0 }
 0xcad   :  { %v14703_v8 = vpop.eup %14702  ;;  %14722 = vrcp.f32 %v6260_v53  ;;  %v13198_v24 = vadd.f32 %v6148_v18, %v20494_v0 }
 0xcae   :  { %v14705_v56 = vpop.eup %14704  ;;  %v6259_v31 = vadd.f32 1.0, %v14703_v8  ;;  %14724 = vtanh.f32 %v13196_v10  ;;  %v10108_v59 = vmul.f32 -1.442695, %v13197_v49 }
 0xcaf   :  { %v14707_v51 = vpop.eup %14706  ;;  %v6322_v41 = vmul.f32 %v14705_v56, %v14683_v62  ;;  %v10107_v60 = vmul.f32 -1.442695, %v13198_v24  ;;  %v12283_v39 = vpop.f32.mrb[140].mxu0 }
 0xcb0   :  { %v14709_v36 = vpop.eup %14708  ;;  %v6316_v2 = vmul.f32 %v14707_v51, %v18561_v27  ;;  %14726 = vrcp.f32 %v6259_v31  ;;  %v13199_v17 = vadd.f32 %v12283_v39, %v20495_v26  ;;  %v6158_v16 = vpop.f32.mrb[141].mxu0 }
 0xcb1   :  { %v14711_v4 = vpop.eup %14710  ;;  %v6321_v43 = vmul.f32 %v14709_v36, %v14685_v46  ;;  %14728 = vpow2.f32 %v10108_v59  ;;  %v13200_v53 = vadd.f32 %v6158_v16, %v20496_v19 }
 0xcb2   :  { %v14713_v18 = vpop.eup %14712  ;;  %v18950_v8 = vadd.f32 %v6322_v41, %v6316_v2  ;;  %v6324_v10 = vmul.f32 %v14711_v4, %v14691_v37  ;;  %14730 = vpow2.f32 %v10107_v60  ;;  %v10110_v56 = vmul.f32 -1.442695, %v13199_v17 }
 0xcb3   :  { %v14715_v62 = vpop.eup %14714  ;;  %v6315_v49 = vmul.f32 %v14713_v18, %v18566_v23  ;;  %v10109_v24 = vmul.f32 -1.442695, %v13200_v53  ;;  %v12286_v27 = vpop.f32.mrb[142].mxu0 }
 0xcb4   :  { %v14717_v31 = vpop.eup %14716  ;;  %v6318_v39 = vmul.f32 %v14715_v62, %v18569_v13  ;;  %v13201_v51 = vadd.f32 %v12286_v27, %v16244_v30  ;;  %v6168_v46 = vpop.f32.mrb[143].mxu0  ;;  %14732 = vpow2.f32 %v10110_v56 }
 0xcb5   :  { %v14719_v59 = vpop.eup %14718  ;;  %v18955_v36 = vadd.f32 %v6321_v43, %v6315_v49  ;;  %v6323_v16 = vmul.f32 %v14717_v31, %v14693_v54  ;;  %v13202_v41 = vadd.f32 %v6168_v46, %v16247_v28  ;;  %14734 = vpow2.f32 %v10109_v24 }
 0xcb6   :  { %v14721_v4 = vpop.eup %14720  ;;  %v18958_v37 = vadd.f32 %v6324_v10, %v6318_v39  ;;  %v6326_v60 = vmul.f32 %v14719_v59, %v14699_v42  ;;  %v10112_v23 = vmul.f32 -1.442695, %v13201_v51 }
 0xcb7   :  { %v14723_v2 = vpop.eup %14722  ;;  %v6317_v17 = vmul.f32 %v14721_v4, %v18573_v7  ;;  %v10111_v13 = vmul.f32 -1.442695, %v13202_v41 }
 0xcb8   :  { %v14725_v53 = vpop.eup %14724  ;;  %v6320_v18 = vmul.f32 %v14723_v2, %v18575_v44  ;;  %14736 = vpow2.f32 %v10112_v23 }
 0xcb9   :  { %v18962_v62 = vadd.f32 %v6323_v16, %v6317_v17  ;;  %v6325_v43 = vmul.f32 %v14725_v53, %v14701_v9  ;;  %14738 = vpow2.f32 %v10111_v13 }
 0xcba   :  { %v14727_v54 = vpop.eup %14726  ;;  %v18964_v56 = vadd.f32 %v6326_v60, %v6320_v18  ;;  %14740 = vtanh.f32 %v18950_v8 }
 0xcbb   :  { %v14729_v10 = vpop.eup %14728  ;;  %v6319_v42 = vmul.f32 %v14727_v54, %v18580_v57  ;;  %14742 = vtanh.f32 %v18955_v36 }
 0xcbc   :  { %v14731_v49 = vpop.eup %14730  ;;  %v6298_v24 = vadd.f32 1.0, %v14729_v10 }
 0xcbd   :  { %v18969_v7 = vadd.f32 %v6325_v43, %v6319_v42  ;;  %v6297_v44 = vadd.f32 1.0, %v14731_v49 }
 0xcbe   :  { %14744 = vrcp.f32 %v6298_v24  ;;  %v14733_v27 = vpop.eup %14732 }
 0xcbf   :  { %14746 = vtanh.f32 %v18958_v37  ;;  %v14735_v9 = vpop.eup %14734  ;;  %v6300_v31 = vadd.f32 1.0, %v14733_v27 }
 0xcc0   :  { %14748 = vrcp.f32 %v6297_v44  ;;  %v6299_v39 = vadd.f32 1.0, %v14735_v9 }
 0xcc1   :  { %14750 = vtanh.f32 %v18962_v62 }
 0xcc2   :  { %14752 = vrcp.f32 %v6300_v31  ;;  %v14737_v57 = vpop.eup %14736 }
 0xcc3   :  { %14754 = vrcp.f32 %v6299_v39  ;;  %v14739_v51 = vpop.eup %14738  ;;  %v6302_v46 = vadd.f32 1.0, %v14737_v57  ;;  %v20812_v57 = vld [vmem:[#allocation32_spill] sm:$0xff] }
 0xcc4   :  { %14756 = vtanh.f32 %v18964_v56  ;;  %v6301_v59 = vadd.f32 1.0, %v14739_v51  ;;  %v14741_v16 = vpop.eup %14740  ;;  %v20813_v51 = vld [vmem:[#allocation25_spill] sm:$0xff] }
 0xcc5   :  { %14758 = vtanh.f32 %v18969_v7  ;;  %v14743_v41 = vpop.eup %14742 }
 0xcc6   :  { %14760 = vrcp.f32 %v6302_v46  ;;  %v20814_v46 = vld [vmem:[#allocation29_spill] sm:$0xff] }
 0xcc7   :  { %14762 = vrcp.f32 %v6301_v59  ;;  %v20815_v59 = vld [vmem:[#allocation30_spill] sm:$0xff] }
 0xcc8   :  { %v14745_v4 = vpop.eup %14744 }
 0xcc9   :  { %v14747_v60 = vpop.eup %14746  ;;  %v6340_v23 = vmul.f32 %v14745_v4, %v14741_v16  ;;  %v20816_v16 = vld [vmem:[#allocation33_spill] sm:$0xff]  ;;  %v20818_v4 = vld [vmem:[#allocation38_spill] sm:$0xff] }
 0xcca   :  { %v14749_v2 = vpop.eup %14748 }
 0xccb   :  { %v14751_v17 = vpop.eup %14750  ;;  %v6339_v13 = vmul.f32 %v14749_v2, %v14743_v41  ;;  %v20817_v41 = vld [vmem:[#allocation34_spill] sm:$0xff] }
 0xccc   :  { %v14753_v53 = vpop.eup %14752 }
 0xccd   :  { %v14755_v18 = vpop.eup %14754  ;;  %v12861_v43 = vpack.c.bf16 %v6340_v23, %v6339_v13  ;;  %v6342_v54 = vmul.f32 %v14753_v53, %v14747_v60  ;;  %v20819_v60 = vld [vmem:[#allocation39_spill] sm:$0xff]  ;;  %v20820_v23 = vld [vmem:[#allocation40_spill] sm:$0xff] }
 0xcce   :  { %v14757_v10 = vpop.eup %14756  ;;  %v6341_v42 = vmul.f32 %v14755_v18, %v14751_v17  ;;  %v20821_v53 = vld [vmem:[#allocation24_spill] sm:$0xff] }
 0xccf   :  { %v14759_v49 = vpop.eup %14758  ;;  %12862 = vmatprep.subr.bf16.mxu1 %v12861_v43 }
 0xcd0   :  { %v14761_v24 = vpop.eup %14760  ;;  %12864 = vmatpush3.bf16.msra.mxu1 %v12861_v43  ;;  %v12865_v44 = vpack.c.bf16 %v6342_v54, %v6341_v42 }
 0xcd1   :  { %v14763_v27 = vpop.eup %14762  ;;  %v6344_v9 = vmul.f32 %v14761_v24, %v14757_v10  ;;  %v20822_v24 = vld [vmem:[#allocation28_spill] sm:$0xff] }
 0xcd2   :  { %12866 = vmatprep.subr.bf16.mxu1 %v12865_v44  ;;  %v6343_v31 = vmul.f32 %v14763_v27, %v14759_v49 }
 0xcd4   :  { %12868 = vmatpush3.bf16.msra.mxu1 %v12865_v44  ;;  %v12869_v39 = vpack.c.bf16 %v6344_v9, %v6343_v31 }
 0xcd6   :  { %12870 = vmatprep.subr.bf16.mxu1 %v12869_v39 }
 0xcd8   :  { %12872 = vmatpush3.bf16.msra.mxu1 %v12869_v39  ;;  %v20823_v39 = vld [vmem:[#allocation31_spill] sm:$0xff] }
 0xcdb   :  { %12338 = vmatmul.mubr.msk.f32.vlgmr.msra.gmra.mrb[124].mxu1 %vm490_vm2, %v18589_v21  ;;  %v20793_v21 = vld [vmem:[#allocation10_spill] sm:$0xff] }
 0xcdc   :  { %12340 = vmatprep.mubr.msk.f32.mxu1 %vm490_vm2, %v18596_v11  ;;  %v20794_v11 = vld [vmem:[#allocation11_spill] sm:$0xff] }
 0xcdf   :  { %12341 = vmatmul.mubr.msk.f32.gmra.mrb[126].mxu1 %vm490_vm2, %v18603_v25  ;;  %v20795_v25 = vld [vmem:[#allocation12_spill] sm:$0xff] }
 0xce0   :  { %12343 = vmatprep.mubr.msk.f32.mxu1 %vm490_vm2, %v18610_v50  ;;  %v20796_v50 = vld [vmem:[#allocation13_spill] sm:$0xff] }
 0xce3   :  { %12344 = vmatmul.mubr.msk.f32.gmra.mrb[128].mxu1 %vm490_vm2, %v18617_v48  ;;  %v10181_v48 = vld [vmem:[%s20101_s1 + $0x8] sm:$0x3] }
 0xce4   :  { %12346 = vmatprep.mubr.msk.f32.mxu1 %vm490_vm2, %v18624_v63  ;;  %12373 = vmatprep.subr.msk.mxu0 %vm301_vm0, %v10181_v48  ;;  %v20797_v63 = vld [vmem:[#allocation14_spill] sm:$0xff] }
 0xce5   :  { %12374 = vmatpush3.msk.msra.mxu0 %vm301_vm0, %v10181_v48 }
 0xce6   :  { %12376 = vmatmul.mubr.msk.f32.vlgmr.msra.gmra.mrb[144].mxu0 %vm228_vm1, %v20797_v63 }
 0xce7   :  { %12347 = vmatmul.mubr.msk.f32.gmra.mrb[130].mxu1 %vm490_vm2, %v18631_v38  ;;  %v20798_v38 = vld [vmem:[#allocation15_spill] sm:$0xff] }
 0xce8   :  { %12349 = vmatprep.mubr.msk.f32.mxu1 %vm490_vm2, %v18638_v33  ;;  %12378 = vmatprep.mubr.msk.f32.mxu0 %vm228_vm1, %v20798_v38  ;;  %v20799_v33 = vld [vmem:[#allocation16_spill] sm:$0xff] }
 0xcea   :  { %12379 = vmatmul.mubr.msk.f32.gmra.mrb[146].mxu0 %vm228_vm1, %v20799_v33 }
 0xceb   :  { %12350 = vmatmul.mubr.msk.f32.gmra.mrb[132].mxu1 %vm490_vm2, %v18645_v34  ;;  %v20800_v34 = vld [vmem:[#allocation17_spill] sm:$0xff] }
 0xcec   :  { %12352 = vmatprep.mubr.msk.f32.mxu1 %vm490_vm2, %v18652_v20  ;;  %12381 = vmatprep.mubr.msk.f32.mxu0 %vm228_vm1, %v20800_v34  ;;  %v20801_v20 = vld [vmem:[#allocation18_spill] sm:$0xff]  ;;  %v20824_v34 = vld [vmem:[#allocation23_spill] sm:$0xff] }
 0xcee   :  { %12382 = vmatmul.mubr.msk.f32.gmra.mrb[148].mxu0 %vm228_vm1, %v20801_v20 }
 0xcef   :  { %12353 = vmatmul.mubr.msk.f32.gmra.mrb[134].mxu1 %vm490_vm2, %v18659_v1  ;;  %v20802_v1 = vld [vmem:[#allocation19_spill] sm:$0xff] }
 0xcf0   :  { %12355 = vmatprep.mubr.msk.f32.mxu1 %vm490_vm2, %v18666_v35  ;;  %12384 = vmatprep.mubr.msk.f32.mxu0 %vm228_vm1, %v20802_v1  ;;  %v20803_v35 = vld [vmem:[#allocation20_spill] sm:$0xff] }
 0xcf2   :  { %12385 = vmatmul.mubr.msk.f32.gmra.mrb[150].mxu0 %vm228_vm1, %v20803_v35 }
 0xcf3   :  { %12356 = vmatmul.mubr.msk.f32.gmra.mrb[136].mxu1 %vm490_vm2, %v18673_v14  ;;  %v20804_v14 = vld [vmem:[#allocation21_spill] sm:$0xff] }
 0xcf4   :  { %12358 = vmatprep.mubr.msk.f32.mxu1 %vm490_vm2, %v18680_v5  ;;  %12387 = vmatprep.mubr.msk.f32.mxu0 %vm228_vm1, %v20804_v14  ;;  %v20805_v5 = vld [vmem:[#allocation6_spill] sm:$0xff] }
 0xcf6   :  { %12388 = vmatmul.mubr.msk.f32.gmra.mrb[152].mxu0 %vm228_vm1, %v20805_v5 }
 0xcf7   :  { %12359 = vmatmul.mubr.msk.f32.gmra.mrb[138].mxu1 %vm490_vm2, %v18687_v12  ;;  %v20806_v12 = vld [vmem:[#allocation7_spill] sm:$0xff] }
 0xcf8   :  { %12361 = vmatprep.mubr.msk.f32.mxu1 %vm490_vm2, %v18694_v22  ;;  %12390 = vmatprep.mubr.msk.f32.mxu0 %vm228_vm1, %v20806_v12  ;;  %v20807_v22 = vld [vmem:[#allocation8_spill] sm:$0xff] }
 0xcfa   :  { %12391 = vmatmul.mubr.msk.f32.gmra.mrb[154].mxu0 %vm228_vm1, %v20807_v22 }
 0xcfb   :  { %12362 = vmatmul.mubr.msk.f32.gmra.mrb[140].mxu1 %vm490_vm2, %v18701_v32  ;;  %v20808_v32 = vld [vmem:[#allocation9_spill] sm:$0xff] }
 0xcfc   :  { %12364 = vmatprep.mubr.msk.f32.mxu1 %vm490_vm2, %v18708_v29  ;;  %12393 = vmatprep.mubr.msk.f32.mxu0 %vm228_vm1, %v20808_v32  ;;  %v20809_v29 = vld [vmem:[#allocation22_spill] sm:$0xff] }
 0xcfe   :  { %12394 = vmatmul.mubr.msk.f32.gmra.mrb[156].mxu0 %vm228_vm1, %v20809_v29 }
 0xcff   :  { %12365 = vmatmul.mubr.msk.f32.gmra.mrb[142].mxu1 %vm490_vm2, %v18715_v6  ;;  %v20810_v6 = vld [vmem:[#allocation26_spill] sm:$0xff] }
 0xd00   :  { %12367 = vmatprep.mubr.msk.f32.mxu1 %vm490_vm2, %v18722_v61  ;;  %12396 = vmatprep.mubr.msk.f32.mxu0 %vm228_vm1, %v20810_v6  ;;  %v20811_v61 = vld [vmem:[#allocation27_spill] sm:$0xff] }
 0xd02   :  { %12397 = vmatmul.mubr.msk.f32.gmra.mrb[158].mxu0 %vm228_vm1, %v20811_v61 }
 0xd03   :  { %12368 = vmatmul.mubr.msk.f32.gmra.mrb[144].mxu1 %vm490_vm2, %v20793_v21  ;;  %12399 = vmatprep.mubr.msk.f32.mxu0 %vm228_vm1, %v20812_v57 }
 0xd04   :  { %12370 = vmatprep.mubr.msk.f32.mxu1 %vm490_vm2, %v20794_v11 }
 0xd06   :  { %12400 = vmatmul.mubr.msk.f32.gmra.mrb[160].mxu0 %vm228_vm1, %v20813_v51 }
 0xd07   :  { %12371 = vmatmul.mubr.msk.f32.gmra.mrb[146].mxu1 %vm490_vm2, %v20795_v25  ;;  %12402 = vmatprep.mubr.msk.f32.mxu0 %vm228_vm1, %v20814_v46 }
 0xd08   :  { %12461 = vmatprep.mubr.msk.f32.mxu1 %vm228_vm1, %v20796_v50 }
 0xd0a   :  { %12403 = vmatmul.mubr.msk.f32.gmra.mrb[162].mxu0 %vm228_vm1, %v20815_v59 }
 0xd0b   :  { %12405 = vmatprep.mubr.msk.f32.mxu0 %vm228_vm1, %v20816_v16 }
 0xd0e   :  { %12406 = vmatmul.mubr.msk.f32.gmra.mrb[164].mxu0 %vm228_vm1, %v20817_v41 }
 0xd0f   :  { %12408 = vmatprep.mubr.msk.f32.mxu0 %vm228_vm1, %v20818_v4 }
 0xd12   :  { %12409 = vmatmul.mubr.msk.f32.gmra.mrb[166].mxu0 %vm228_vm1, %v20819_v60 }
 0xd13   :  { %12423 = vmatprep.mubr.msk.f32.mxu0 %vm490_vm2, %v20820_v23 }
 0xdae   :  { %v12339_v2 = vpop.f32.mrb[124].mxu1 }
 0xdaf   :  { %v13203_v17 = vadd.f32 %v12339_v2, %v20475_v15  ;;  %v6601_v13 = vpop.f32.mrb[125].mxu1 }
 0xdb0   :  { %v13204_v18 = vadd.f32 %v6601_v13, %v20821_v53 }
 0xdb1   :  { %v10164_v43 = vmul.f32 -1.442695, %v13203_v17 }
 0xdb2   :  { %v10163_v54 = vmul.f32 -1.442695, %v13204_v18  ;;  %v12342_v10 = vpop.f32.mrb[126].mxu1 }
 0xdb3   :  { %14764 = vpow2.f32 %v10164_v43  ;;  %v13205_v42 = vadd.f32 %v12342_v10, %v20477_v45  ;;  %v6611_v49 = vpop.f32.mrb[127].mxu1 }
 0xdb4   :  { %14766 = vpow2.f32 %v10163_v54  ;;  %v13206_v44 = vadd.f32 %v6611_v49, %v20822_v24  ;;  %v20825_v49 = vld [vmem:[#allocation35_spill] sm:$0xff] }
 0xdb5   :  { %v10166_v27 = vmul.f32 -1.442695, %v13205_v42 }
 0xdb6   :  { %v10165_v9 = vmul.f32 -1.442695, %v13206_v44  ;;  %v12345_v31 = vpop.f32.mrb[128].mxu1 }
 0xdb7   :  { %14768 = vpow2.f32 %v10166_v27  ;;  %v13207_v21 = vadd.f32 %v12345_v31, %v20823_v39  ;;  %v6621_v11 = vpop.f32.mrb[129].mxu1  ;;  %v20826_v31 = vld [vmem:[#allocation36_spill] sm:$0xff] }
 0xdb8   :  { %14770 = vpow2.f32 %v10165_v9  ;;  %v13208_v25 = vadd.f32 %v6621_v11, %v20480_v55 }
 0xdb9   :  { %v10168_v50 = vmul.f32 -1.442695, %v13207_v21 }
 0xdba   :  { %v10167_v48 = vmul.f32 -1.442695, %v13208_v25  ;;  %v12348_v63 = vpop.f32.mrb[130].mxu1 }
 0xdbb   :  { %14772 = vpow2.f32 %v10168_v50  ;;  %v13209_v38 = vadd.f32 %v12348_v63, %v20481_v47  ;;  %v6631_v33 = vpop.f32.mrb[131].mxu1  ;;  %v20827_v63 = vld [vmem:[#allocation41_spill] sm:$0xff] }
 0xdbc   :  { %14774 = vpow2.f32 %v10167_v48  ;;  %v13210_v20 = vadd.f32 %v6631_v33, %v20824_v34 }
 0xdbd   :  { %v14765_v1 = vpop.eup %14764  ;;  %v10170_v35 = vmul.f32 -1.442695, %v13209_v38 }
 0xdbe   :  { %v14767_v14 = vpop.eup %14766  ;;  %v6763_v5 = vadd.f32 1.0, %v14765_v1  ;;  %v10169_v12 = vmul.f32 -1.442695, %v13210_v20  ;;  %v12351_v22 = vpop.f32.mrb[132].mxu1 }
 0xdbf   :  { %v6762_v32 = vadd.f32 1.0, %v14767_v14  ;;  %14776 = vpow2.f32 %v10170_v35  ;;  %v13211_v29 = vadd.f32 %v12351_v22, %v20483_v40  ;;  %v6641_v6 = vpop.f32.mrb[133].mxu1  ;;  %v20828_v14 = vld [vmem:[#allocation42_spill] sm:$0xff] }
 0xdc0   :  { %14778 = vrcp.f32 %v6763_v5  ;;  %v13212_v61 = vadd.f32 %v6641_v6, %v20484_v3  ;;  %v20829_v6 = vld [vmem:[#allocation43_spill] sm:$0xff] }
 0xdc1   :  { %v14769_v57 = vpop.eup %14768  ;;  %14780 = vrcp.f32 %v6762_v32  ;;  %v10172_v51 = vmul.f32 -1.442695, %v13211_v29 }
 0xdc2   :  { %v14771_v46 = vpop.eup %14770  ;;  %v6765_v59 = vadd.f32 1.0, %v14769_v57  ;;  %14782 = vpow2.f32 %v10169_v12  ;;  %v10171_v16 = vmul.f32 -1.442695, %v13212_v61  ;;  %v12354_v41 = vpop.f32.mrb[134].mxu1 }
 0xdc3   :  { %v6764_v4 = vadd.f32 1.0, %v14771_v46  ;;  %14784 = vpow2.f32 %v10172_v51  ;;  %v13213_v60 = vadd.f32 %v12354_v41, %v20485_v52  ;;  %v6651_v23 = vpop.f32.mrb[135].mxu1 }
 0xdc4   :  { %14786 = vrcp.f32 %v6765_v59  ;;  %v13214_v2 = vadd.f32 %v6651_v23, %v20486_v58 }
 0xdc5   :  { %v14773_v17 = vpop.eup %14772  ;;  %14788 = vrcp.f32 %v6764_v4  ;;  %v10174_v13 = vmul.f32 -1.442695, %v13213_v60 }
 0xdc6   :  { %v14775_v18 = vpop.eup %14774  ;;  %v6767_v43 = vadd.f32 1.0, %v14773_v17  ;;  %14790 = vpow2.f32 %v10171_v16  ;;  %v10173_v54 = vmul.f32 -1.442695, %v13214_v2  ;;  %v12357_v10 = vpop.f32.mrb[136].mxu1  ;;  %v20830_v16 = vld [vmem:[#allocation44_spill] sm:$0xff]  ;;  %v20831_v17 = vld [vmem:[#allocation37_spill] sm:$0xff] }
 0xdc7   :  { %v6766_v42 = vadd.f32 1.0, %v14775_v18  ;;  %14792 = vpow2.f32 %v10174_v13  ;;  %v13215_v44 = vadd.f32 %v12357_v10, %v20825_v49  ;;  %v6661_v27 = vpop.f32.mrb[137].mxu1 }
 0xdc8   :  { %14794 = vrcp.f32 %v6767_v43  ;;  %v13216_v21 = vadd.f32 %v6661_v27, %v20826_v31 }
 0xdc9   :  { %v14777_v9 = vpop.eup %14776  ;;  %14796 = vrcp.f32 %v6766_v42 }
 0xdca   :  { %v14779_v11 = vpop.eup %14778  ;;  %v6799_v25 = vadd.f32 1.0, %v14777_v9  ;;  %14798 = vpow2.f32 %v10173_v54  ;;  %v12360_v50 = vpop.f32.mrb[138].mxu1 }
 0xdcb   :  { %v14781_v48 = vpop.eup %14780  ;;  %14800 = vtanh.f32 %v13215_v44  ;;  %v13217_v38 = vadd.f32 %v12360_v50, %v20827_v63  ;;  %v6671_v33 = vpop.f32.mrb[139].mxu1 }
 0xdcc   :  { %v14783_v20 = vpop.eup %14782  ;;  %14802 = vrcp.f32 %v6799_v25  ;;  %v13218_v5 = vadd.f32 %v6671_v33, %v20828_v14 }
 0xdcd   :  { %v14785_v1 = vpop.eup %14784  ;;  %v6798_v35 = vadd.f32 1.0, %v14783_v20  ;;  %14804 = vtanh.f32 %v13216_v21 }
 0xdce   :  { %v14787_v12 = vpop.eup %14786  ;;  %v6801_v22 = vadd.f32 1.0, %v14785_v1  ;;  %14806 = vtanh.f32 %v13217_v38  ;;  %v12363_v32 = vpop.f32.mrb[140].mxu1 }
 0xdcf   :  { %v14789_v29 = vpop.eup %14788  ;;  %14808 = vrcp.f32 %v6798_v35  ;;  %v13219_v61 = vadd.f32 %v12363_v32, %v20829_v6  ;;  %v6681_v57 = vpop.f32.mrb[141].mxu1 }
 0xdd0   :  { %v14791_v51 = vpop.eup %14790  ;;  %14810 = vrcp.f32 %v6801_v22  ;;  %v13220_v41 = vadd.f32 %v6681_v57, %v20830_v16 }
 0xdd1   :  { %v14793_v46 = vpop.eup %14792  ;;  %v6800_v59 = vadd.f32 1.0, %v14791_v51  ;;  %14812 = vtanh.f32 %v13218_v5 }
 0xdd2   :  { %v14795_v4 = vpop.eup %14794  ;;  %v6803_v60 = vadd.f32 1.0, %v14793_v46  ;;  %14814 = vtanh.f32 %v13219_v61  ;;  %v12366_v23 = vpop.f32.mrb[142].mxu1 }
 0xdd3   :  { %v14797_v2 = vpop.eup %14796  ;;  %14816 = vrcp.f32 %v6800_v59  ;;  %v13221_v13 = vadd.f32 %v12366_v23, %v20831_v17  ;;  %v6691_v18 = vpop.f32.mrb[143].mxu1 }
 0xdd4   :  { %v14799_v43 = vpop.eup %14798  ;;  %14818 = vrcp.f32 %v6803_v60  ;;  %v13222_v54 = vadd.f32 %v6691_v18, %v20494_v0 }
 0xdd5   :  { %v14801_v10 = vpop.eup %14800  ;;  %v6802_v42 = vadd.f32 1.0, %v14799_v43  ;;  %14820 = vtanh.f32 %v13220_v41  ;;  %v10176_v44 = vmul.f32 -1.442695, %v13221_v13 }
 0xdd6   :  { %v14803_v27 = vpop.eup %14802  ;;  %v6865_v9 = vmul.f32 %v14801_v10, %v14779_v11  ;;  %v10175_v21 = vmul.f32 -1.442695, %v13222_v54  ;;  %v12369_v25 = vpop.f32.mrb[144].mxu1 }
 0xdd7   :  { %v14805_v50 = vpop.eup %14804  ;;  %v6859_v38 = vmul.f32 %v14803_v27, %v18950_v8  ;;  %14822 = vrcp.f32 %v6802_v42  ;;  %v13223_v33 = vadd.f32 %v12369_v25, %v20495_v26  ;;  %v6701_v20 = vpop.f32.mrb[145].mxu1 }
 0xdd8   :  { %v14807_v1 = vpop.eup %14806  ;;  %v6864_v35 = vmul.f32 %v14805_v50, %v14781_v48  ;;  %14824 = vpow2.f32 %v10176_v44  ;;  %v13224_v5 = vadd.f32 %v6701_v20, %v20496_v19 }
 0xdd9   :  { %v14809_v22 = vpop.eup %14808  ;;  %v19099_v32 = vadd.f32 %v6865_v9, %v6859_v38  ;;  %v6867_v61 = vmul.f32 %v14807_v1, %v14787_v12  ;;  %14826 = vpow2.f32 %v10175_v21  ;;  %v10178_v11 = vmul.f32 -1.442695, %v13223_v33 }
 0xdda   :  { %v14811_v57 = vpop.eup %14810  ;;  %v6858_v51 = vmul.f32 %v14809_v22, %v18955_v36  ;;  %v10177_v46 = vmul.f32 -1.442695, %v13224_v5  ;;  %v12372_v8 = vpop.f32.mrb[146].mxu1 }
 0xddb   :  { %v14813_v59 = vpop.eup %14812  ;;  %v6861_v41 = vmul.f32 %v14811_v57, %v18958_v37  ;;  %v13225_v60 = vadd.f32 %v12372_v8, %v16244_v30  ;;  %v6711_v48 = vpop.f32.mrb[147].mxu1  ;;  %14828 = vpow2.f32 %v10178_v11 }
 0xddc   :  { %v14815_v23 = vpop.eup %14814  ;;  %v19104_v13 = vadd.f32 %v6864_v35, %v6858_v51  ;;  %v6866_v18 = vmul.f32 %v14813_v59, %v14789_v29  ;;  %v13226_v12 = vadd.f32 %v6711_v48, %v16247_v28  ;;  %14830 = vpow2.f32 %v10177_v46 }
 0xddd   :  { %v14817_v43 = vpop.eup %14816  ;;  %v19107_v54 = vadd.f32 %v6867_v61, %v6861_v41  ;;  %v6869_v10 = vmul.f32 %v14815_v23, %v14795_v4  ;;  %v10180_v36 = vmul.f32 -1.442695, %v13225_v60 }
 0xdde   :  { %v14819_v42 = vpop.eup %14818  ;;  %v6860_v44 = vmul.f32 %v14817_v43, %v18962_v62  ;;  %v10179_v37 = vmul.f32 -1.442695, %v13226_v12 }
 0xddf   :  { %v14821_v27 = vpop.eup %14820  ;;  %v6863_v9 = vmul.f32 %v14819_v42, %v18964_v56  ;;  %14832 = vpow2.f32 %v10180_v36 }
 0xde0   :  { %v19111_v21 = vadd.f32 %v6866_v18, %v6860_v44  ;;  %v6868_v25 = vmul.f32 %v14821_v27, %v14797_v2  ;;  %14834 = vpow2.f32 %v10179_v37 }
 0xde1   :  { %v14823_v29 = vpop.eup %14822  ;;  %v19113_v50 = vadd.f32 %v6869_v10, %v6863_v9  ;;  %14836 = vtanh.f32 %v19099_v32 }
 0xde2   :  { %v14825_v38 = vpop.eup %14824  ;;  %v6862_v4 = vmul.f32 %v14823_v29, %v18969_v7  ;;  %14838 = vtanh.f32 %v19104_v13 }
 0xde3   :  { %v14827_v33 = vpop.eup %14826  ;;  %v6841_v20 = vadd.f32 1.0, %v14825_v38  ;;  %v19127_v38 = vld [vmem:[%s20104_s4 + $0x8] sm:$0xff] }
 0xde4   :  { %v19118_v62 = vadd.f32 %v6868_v25, %v6862_v4  ;;  %v6840_v56 = vadd.f32 1.0, %v14827_v33  ;;  %v19134_v4 = vld [vmem:[%s20104_s4 + $0x10] sm:$0xff]  ;;  %v19141_v33 = vld [vmem:[%s20104_s4 + $0x18] sm:$0xff] }
 0xde5   :  { %14840 = vrcp.f32 %v6841_v20  ;;  %v14829_v1 = vpop.eup %14828  ;;  %v19148_v20 = vld [vmem:[%s20104_s4 + $0x20] sm:$0xff] }
 0xde6   :  { %14842 = vtanh.f32 %v19107_v54  ;;  %v14831_v2 = vpop.eup %14830  ;;  %v6843_v35 = vadd.f32 1.0, %v14829_v1  ;;  %v19162_v1 = vld [vmem:[%s20104_s4 + $0x30] sm:$0xff] }
 0xde7   :  { %14844 = vrcp.f32 %v6840_v56  ;;  %v6842_v5 = vadd.f32 1.0, %v14831_v2  ;;  %v19155_v56 = vld [vmem:[%s20104_s4 + $0x28] sm:$0xff]  ;;  %v19169_v2 = vld [vmem:[%s20104_s4 + $0x38] sm:$0xff] }
 0xde8   :  { %14846 = vtanh.f32 %v19111_v21 }
 0xde9   :  { %14848 = vrcp.f32 %v6843_v35  ;;  %v14833_v7 = vpop.eup %14832  ;;  %v19176_v35 = vld [vmem:[%s20104_s4 + $0x40] sm:$0xff] }
 0xdea   :  { %14850 = vrcp.f32 %v6842_v5  ;;  %v14835_v22 = vpop.eup %14834  ;;  %v6845_v61 = vadd.f32 1.0, %v14833_v7  ;;  %v19183_v5 = vld [vmem:[%s20104_s4 + $0x48] sm:$0xff]  ;;  %v19190_v7 = vld [vmem:[%s20104_s4 + $0x50] sm:$0xff] }
 0xdeb   :  { %14852 = vtanh.f32 %v19113_v50  ;;  %v6844_v11 = vadd.f32 1.0, %v14835_v22  ;;  %v14837_v57 = vpop.eup %14836  ;;  %v19197_v22 = vld [vmem:[%s20104_s4 + $0x58] sm:$0xff] }
 0xdec   :  { %14854 = vtanh.f32 %v19118_v62  ;;  %v14839_v51 = vpop.eup %14838 }
 0xded   :  { %14856 = vrcp.f32 %v6845_v61  ;;  %v19204_v61 = vld [vmem:[%s20104_s4 + $0x60] sm:$0xff] }
 0xdee   :  { %14858 = vrcp.f32 %v6844_v11  ;;  %v19211_v11 = vld [vmem:[%s20104_s4 + $0x68] sm:$0xff] }
 0xdef   :  { %v14841_v46 = vpop.eup %14840 }
 0xdf0   :  { %v14843_v8 = vpop.eup %14842  ;;  %v6883_v59 = vmul.f32 %v14841_v46, %v14837_v57  ;;  %v19218_v57 = vld [vmem:[%s20104_s4 + $0x70] sm:$0xff]  ;;  %v19232_v46 = vld [vmem:[%s20104_s4 + $0x80] sm:$0xff] }
 0xdf1   :  { %v14845_v41 = vpop.eup %14844 }
 0xdf2   :  { %v14847_v60 = vpop.eup %14846  ;;  %v6882_v48 = vmul.f32 %v14845_v41, %v14839_v51  ;;  %v19225_v51 = vld [vmem:[%s20104_s4 + $0x78] sm:$0xff] }
 0xdf3   :  { %v14849_v23 = vpop.eup %14848  ;;  %v19253_v41 = vld [vmem:[%s20104_s4 + $0x98] sm:$0xff] }
 0xdf4   :  { %v14851_v18 = vpop.eup %14850  ;;  %v12873_v12 = vpack.c.bf16 %v6883_v59, %v6882_v48  ;;  %v6885_v43 = vmul.f32 %v14849_v23, %v14843_v8  ;;  %v19239_v8 = vld [vmem:[%s20104_s4 + $0x88] sm:$0xff]  ;;  %v19246_v59 = vld [vmem:[%s20104_s4 + $0x90] sm:$0xff] }
 0xdf5   :  { %v14853_v10 = vpop.eup %14852  ;;  %v6884_v36 = vmul.f32 %v14851_v18, %v14847_v60  ;;  %v19260_v60 = vld [vmem:[%s20104_s4 + $0xa0] sm:$0xff]  ;;  %v19267_v48 = vld [vmem:[%s20104_s4 + $0xa8] sm:$0xff]  ;;  %v19274_v23 = vld [vmem:[%s20104_s4 + $0xb0] sm:$0xff] }
 0xdf6   :  { %v14855_v42 = vpop.eup %14854  ;;  %12874 = vmatprep.subr.bf16.mxu0 %v12873_v12  ;;  %20832 = vst [vmem:[#allocation10_spill] sm:$0xff] %v19267_v48  ;;  %20833 = vst [vmem:[#allocation11_spill] sm:$0xff] %v19274_v23  ;;  %v19281_v18 = vld [vmem:[%s20104_s4 + $0xb8] sm:$0xff] }
 0xdf7   :  { %v14857_v44 = vpop.eup %14856  ;;  %12876 = vmatpush3.bf16.msra.mxu0 %v12873_v12  ;;  %v12877_v37 = vpack.c.bf16 %v6885_v43, %v6884_v36  ;;  %20834 = vst [vmem:[#allocation12_spill] sm:$0xff] %v19281_v18  ;;  %v19288_v12 = vld [vmem:[%s20102_s2] sm:$0xff]  ;;  %v10249_v43 = vld [vmem:[%s20101_s1 + $0xa] sm:$0x3]  ;;  %v19307_v36 = vld [vmem:[%s20102_s2 + $0x10] sm:$0xff] }
 0xdf8   :  { %v14859_v27 = vpop.eup %14858  ;;  %v6887_v9 = vmul.f32 %v14857_v44, %v14853_v10  ;;  %20835 = vst [vmem:[#allocation13_spill] sm:$0xff] %v19288_v12  ;;  %12459 = vmatprep.subr.msk.mxu1 %vm301_vm0, %v10249_v43  ;;  %v19300_v10 = vld [vmem:[%s20102_s2 + $0x8] sm:$0xff]  ;;  %20837 = vst [vmem:[#allocation15_spill] sm:$0xff] %v19307_v36  ;;  %v19321_v44 = vld [vmem:[%s20102_s2 + $0x20] sm:$0xff] }
 0xdf9   :  { %12878 = vmatprep.subr.bf16.mxu0 %v12877_v37  ;;  %v6886_v25 = vmul.f32 %v14859_v27, %v14855_v42  ;;  %12460 = vmatpush3.msk.msra.mxu1 %vm301_vm0, %v10249_v43  ;;  %20836 = vst [vmem:[#allocation14_spill] sm:$0xff] %v19300_v10  ;;  %v19314_v42 = vld [vmem:[%s20102_s2 + $0x18] sm:$0xff]  ;;  %20839 = vst [vmem:[#allocation17_spill] sm:$0xff] %v19321_v44  ;;  %v19335_v27 = vld [vmem:[%s20102_s2 + $0x30] sm:$0xff] }
 0xdfa   :  { %12462 = vmatmul.mubr.msk.f32.vlgmr.msra.gmra.mrb[148].mxu1 %vm228_vm1, %v19300_v10  ;;  %20838 = vst [vmem:[#allocation16_spill] sm:$0xff] %v19314_v42  ;;  %20841 = vst [vmem:[#allocation19_spill] sm:$0xff] %v19335_v27  ;;  %v19363_v43 = vld [vmem:[%s20102_s2 + $0x50] sm:$0xff] }
 0xdfb   :  { %12880 = vmatpush3.bf16.msra.mxu0 %v12877_v37  ;;  %v12881_v29 = vpack.c.bf16 %v6887_v9, %v6886_v25  ;;  %12464 = vmatprep.mubr.msk.f32.mxu1 %vm228_vm1, %v19307_v36  ;;  %v19328_v37 = vld [vmem:[%s20102_s2 + $0x28] sm:$0xff]  ;;  %v19342_v9 = vld [vmem:[%s20102_s2 + $0x38] sm:$0xff]  ;;  %v19349_v25 = vld [vmem:[%s20102_s2 + $0x40] sm:$0xff]  ;;  %20845 = vst [vmem:[#allocation7_spill] sm:$0xff] %v19363_v43 }
 0xdfc   :  { %20840 = vst [vmem:[#allocation18_spill] sm:$0xff] %v19328_v37  ;;  %20842 = vst [vmem:[#allocation20_spill] sm:$0xff] %v19342_v9 }
 0xdfd   :  { %12882 = vmatprep.subr.bf16.mxu0 %v12881_v29  ;;  %20843 = vst [vmem:[#allocation21_spill] sm:$0xff] %v19349_v25 }
 0xdfe   :  { %12465 = vmatmul.mubr.msk.f32.gmra.mrb[150].mxu1 %vm228_vm1, %v19314_v42 }
 0xdff   :  { %12884 = vmatpush3.bf16.msra.mxu0 %v12881_v29  ;;  %12467 = vmatprep.mubr.msk.f32.mxu1 %vm228_vm1, %v19321_v44  ;;  %v19356_v29 = vld [vmem:[%s20102_s2 + $0x48] sm:$0xff] }
 0xe00   :  { %20844 = vst [vmem:[#allocation6_spill] sm:$0xff] %v19356_v29 }
 0xe02   :  { %12424 = vmatmul.mubr.msk.f32.vlgmr.msra.gmra.mrb[144].mxu0 %vm490_vm2, %v19127_v38  ;;  %12468 = vmatmul.mubr.msk.f32.gmra.mrb[152].mxu1 %vm228_vm1, %v19328_v37 }
 0xe03   :  { %12426 = vmatprep.mubr.msk.f32.mxu0 %vm490_vm2, %v19134_v4  ;;  %12470 = vmatprep.mubr.msk.f32.mxu1 %vm228_vm1, %v19335_v27 }
 0xe06   :  { %12427 = vmatmul.mubr.msk.f32.gmra.mrb[146].mxu0 %vm490_vm2, %v19141_v33  ;;  %12471 = vmatmul.mubr.msk.f32.gmra.mrb[154].mxu1 %vm228_vm1, %v19342_v9 }
 0xe07   :  { %12429 = vmatprep.mubr.msk.f32.mxu0 %vm490_vm2, %v19148_v20  ;;  %12473 = vmatprep.mubr.msk.f32.mxu1 %vm228_vm1, %v19349_v25  ;;  %v19370_v25 = vld [vmem:[%s20102_s2 + $0x58] sm:$0xff] }
 0xe08   :  { %20846 = vst [vmem:[#allocation8_spill] sm:$0xff] %v19370_v25 }
 0xe0a   :  { %12430 = vmatmul.mubr.msk.f32.gmra.mrb[148].mxu0 %vm490_vm2, %v19155_v56  ;;  %12474 = vmatmul.mubr.msk.f32.gmra.mrb[156].mxu1 %vm228_vm1, %v19356_v29  ;;  %v19377_v29 = vld [vmem:[%s20102_s2 + $0x60] sm:$0xff] }
 0xe0b   :  { %12432 = vmatprep.mubr.msk.f32.mxu0 %vm490_vm2, %v19162_v1  ;;  %12476 = vmatprep.mubr.msk.f32.mxu1 %vm228_vm1, %v19363_v43  ;;  %20847 = vst [vmem:[#allocation9_spill] sm:$0xff] %v19377_v29  ;;  %v19384_v43 = vld [vmem:[%s20102_s2 + $0x68] sm:$0xff] }
 0xe0c   :  { %20848 = vst [vmem:[#allocation22_spill] sm:$0xff] %v19384_v43 }
 0xe0e   :  { %12433 = vmatmul.mubr.msk.f32.gmra.mrb[150].mxu0 %vm490_vm2, %v19169_v2  ;;  %12477 = vmatmul.mubr.msk.f32.gmra.mrb[158].mxu1 %vm228_vm1, %v19370_v25  ;;  %v19391_v25 = vld [vmem:[%s20102_s2 + $0x70] sm:$0xff] }
 0xe0f   :  { %12435 = vmatprep.mubr.msk.f32.mxu0 %vm490_vm2, %v19176_v35  ;;  %12479 = vmatprep.mubr.msk.f32.mxu1 %vm228_vm1, %v19377_v29  ;;  %20849 = vst [vmem:[#allocation26_spill] sm:$0xff] %v19391_v25  ;;  %v19398_v29 = vld [vmem:[%s20102_s2 + $0x78] sm:$0xff] }
 0xe10   :  { %20850 = vst [vmem:[#allocation27_spill] sm:$0xff] %v19398_v29 }
 0xe12   :  { %12436 = vmatmul.mubr.msk.f32.gmra.mrb[152].mxu0 %vm490_vm2, %v19183_v5  ;;  %12480 = vmatmul.mubr.msk.f32.gmra.mrb[160].mxu1 %vm228_vm1, %v19384_v43  ;;  %v19405_v43 = vld [vmem:[%s20102_s2 + $0x80] sm:$0xff] }
 0xe13   :  { %12438 = vmatprep.mubr.msk.f32.mxu0 %vm490_vm2, %v19190_v7  ;;  %12482 = vmatprep.mubr.msk.f32.mxu1 %vm228_vm1, %v19391_v25  ;;  %20851 = vst [vmem:[#allocation32_spill] sm:$0xff] %v19405_v43  ;;  %v19412_v25 = vld [vmem:[%s20102_s2 + $0x88] sm:$0xff] }
 0xe14   :  { %20852 = vst [vmem:[#allocation25_spill] sm:$0xff] %v19412_v25 }
 0xe16   :  { %12439 = vmatmul.mubr.msk.f32.gmra.mrb[154].mxu0 %vm490_vm2, %v19197_v22  ;;  %12483 = vmatmul.mubr.msk.f32.gmra.mrb[162].mxu1 %vm228_vm1, %v19398_v29  ;;  %v19419_v29 = vld [vmem:[%s20102_s2 + $0x90] sm:$0xff] }
 0xe17   :  { %12441 = vmatprep.mubr.msk.f32.mxu0 %vm490_vm2, %v19204_v61  ;;  %12485 = vmatprep.mubr.msk.f32.mxu1 %vm228_vm1, %v19405_v43  ;;  %20853 = vst [vmem:[#allocation29_spill] sm:$0xff] %v19419_v29  ;;  %v19426_v43 = vld [vmem:[%s20102_s2 + $0x98] sm:$0xff] }
 0xe18   :  { %20854 = vst [vmem:[#allocation30_spill] sm:$0xff] %v19426_v43 }
 0xe1a   :  { %12442 = vmatmul.mubr.msk.f32.gmra.mrb[156].mxu0 %vm490_vm2, %v19211_v11  ;;  %12486 = vmatmul.mubr.msk.f32.gmra.mrb[164].mxu1 %vm228_vm1, %v19412_v25  ;;  %v19433_v25 = vld [vmem:[%s20102_s2 + $0xa0] sm:$0xff] }
 0xe1b   :  { %12444 = vmatprep.mubr.msk.f32.mxu0 %vm490_vm2, %v19218_v57  ;;  %12488 = vmatprep.mubr.msk.f32.mxu1 %vm228_vm1, %v19419_v29  ;;  %20855 = vst [vmem:[#allocation33_spill] sm:$0xff] %v19433_v25  ;;  %v19440_v29 = vld [vmem:[%s20102_s2 + $0xa8] sm:$0xff] }
 0xe1c   :  { %20856 = vst [vmem:[#allocation34_spill] sm:$0xff] %v19440_v29 }
 0xe1e   :  { %12445 = vmatmul.mubr.msk.f32.gmra.mrb[158].mxu0 %vm490_vm2, %v19225_v51  ;;  %12489 = vmatmul.mubr.msk.f32.gmra.mrb[166].mxu1 %vm228_vm1, %v19426_v43  ;;  %v19447_v43 = vld [vmem:[%s20102_s2 + $0xb0] sm:$0xff] }
 0xe1f   :  { %12447 = vmatprep.mubr.msk.f32.mxu0 %vm490_vm2, %v19232_v46  ;;  %12491 = vmatprep.mubr.msk.f32.mxu1 %vm228_vm1, %v19433_v25  ;;  %20857 = vst [vmem:[#allocation38_spill] sm:$0xff] %v19447_v43  ;;  %v19454_v25 = vld [vmem:[%s20102_s2 + $0xb8] sm:$0xff] }
 0xe20   :  { %20858 = vst [vmem:[#allocation39_spill] sm:$0xff] %v19454_v25 }
 0xe22   :  { %12448 = vmatmul.mubr.msk.f32.gmra.mrb[160].mxu0 %vm490_vm2, %v19239_v8  ;;  %12492 = vmatmul.mubr.msk.f32.gmra.mrb[168].mxu1 %vm228_vm1, %v19440_v29  ;;  %v19461_v29 = vld [vmem:[%s20104_s4] sm:$0xff] }
 0xe23   :  { %12450 = vmatprep.mubr.msk.f32.mxu0 %vm490_vm2, %v19246_v59  ;;  %12494 = vmatprep.mubr.msk.f32.mxu1 %vm228_vm1, %v19447_v43  ;;  %20859 = vst [vmem:[#allocation40_spill] sm:$0xff] %v19461_v29 }
 0xe26   :  { %12451 = vmatmul.mubr.msk.f32.gmra.mrb[162].mxu0 %vm490_vm2, %v19253_v41  ;;  %12495 = vmatmul.mubr.msk.f32.gmra.mrb[170].mxu1 %vm228_vm1, %v19454_v25 }
 0xe27   :  { %12453 = vmatprep.mubr.msk.f32.mxu0 %vm490_vm2, %v19260_v60  ;;  %12509 = vmatprep.mubr.msk.f32.mxu1 %vm490_vm2, %v19461_v29 }
 0xe2a   :  { %12454 = vmatmul.mubr.msk.f32.gmra.mrb[164].mxu0 %vm490_vm2, %v19267_v48 }
 0xe2b   :  { %12456 = vmatprep.mubr.msk.f32.mxu0 %vm490_vm2, %v19274_v23 }
 0xe2e   :  { %12457 = vmatmul.mubr.msk.f32.gmra.mrb[166].mxu0 %vm490_vm2, %v19281_v18 }
 0xe2f   :  { %12547 = vmatprep.mubr.msk.f32.mxu0 %vm228_vm1, %v19288_v12 }
 0xed5   :  { %v12425_v9 = vpop.f32.mrb[144].mxu0 }
 0xed6   :  { %v13227_v27 = vadd.f32 %v12425_v9, %v20475_v15  ;;  %v7144_v43 = vpop.f32.mrb[145].mxu0 }
 0xed7   :  { %v13228_v37 = vadd.f32 %v7144_v43, %v20821_v53 }
 0xed8   :  { %v10232_v44 = vmul.f32 -1.442695, %v13227_v27 }
 0xed9   :  { %v10231_v42 = vmul.f32 -1.442695, %v13228_v37  ;;  %v12428_v36 = vpop.f32.mrb[146].mxu0 }
 0xeda   :  { %14860 = vpow2.f32 %v10232_v44  ;;  %v13229_v25 = vadd.f32 %v12428_v36, %v20477_v45  ;;  %v7154_v10 = vpop.f32.mrb[147].mxu0 }
 0xedb   :  { %14862 = vpow2.f32 %v10231_v42  ;;  %v13230_v12 = vadd.f32 %v7154_v10, %v20822_v24 }
 0xedc   :  { %v10234_v18 = vmul.f32 -1.442695, %v13229_v25 }
 0xedd   :  { %v10233_v23 = vmul.f32 -1.442695, %v13230_v12  ;;  %v12431_v48 = vpop.f32.mrb[148].mxu0 }
 0xede   :  { %14864 = vpow2.f32 %v10234_v18  ;;  %v13231_v29 = vadd.f32 %v12431_v48, %v20823_v39  ;;  %v7164_v9 = vpop.f32.mrb[149].mxu0 }
 0xedf   :  { %14866 = vpow2.f32 %v10233_v23  ;;  %v13232_v43 = vadd.f32 %v7164_v9, %v20480_v55 }
 0xee0   :  { %v10236_v27 = vmul.f32 -1.442695, %v13231_v29 }
 0xee1   :  { %v10235_v37 = vmul.f32 -1.442695, %v13232_v43  ;;  %v12434_v53 = vpop.f32.mrb[150].mxu0 }
 0xee2   :  { %14868 = vpow2.f32 %v10236_v27  ;;  %v13233_v36 = vadd.f32 %v12434_v53, %v20481_v47  ;;  %v7174_v44 = vpop.f32.mrb[151].mxu0 }
 0xee3   :  { %14870 = vpow2.f32 %v10235_v37  ;;  %v13234_v10 = vadd.f32 %v7174_v44, %v20824_v34 }
 0xee4   :  { %v14861_v42 = vpop.eup %14860  ;;  %v10238_v12 = vmul.f32 -1.442695, %v13233_v36 }
 0xee5   :  { %v14863_v25 = vpop.eup %14862  ;;  %v7306_v18 = vadd.f32 1.0, %v14861_v42  ;;  %v10237_v24 = vmul.f32 -1.442695, %v13234_v10  ;;  %v12437_v48 = vpop.f32.mrb[152].mxu0 }
 0xee6   :  { %v7305_v39 = vadd.f32 1.0, %v14863_v25  ;;  %14872 = vpow2.f32 %v10238_v12  ;;  %v13235_v23 = vadd.f32 %v12437_v48, %v20483_v40  ;;  %v7184_v29 = vpop.f32.mrb[153].mxu0 }
 0xee7   :  { %14874 = vrcp.f32 %v7306_v18  ;;  %v13236_v9 = vadd.f32 %v7184_v29, %v20484_v3 }
 0xee8   :  { %v14865_v43 = vpop.eup %14864  ;;  %14876 = vrcp.f32 %v7305_v39  ;;  %v10240_v53 = vmul.f32 -1.442695, %v13235_v23 }
 0xee9   :  { %v14867_v27 = vpop.eup %14866  ;;  %v7308_v37 = vadd.f32 1.0, %v14865_v43  ;;  %14878 = vpow2.f32 %v10237_v24  ;;  %v10239_v44 = vmul.f32 -1.442695, %v13236_v9  ;;  %v12440_v36 = vpop.f32.mrb[154].mxu0 }
 0xeea   :  { %v7307_v34 = vadd.f32 1.0, %v14867_v27  ;;  %14880 = vpow2.f32 %v10240_v53  ;;  %v13237_v10 = vadd.f32 %v12440_v36, %v20485_v52  ;;  %v7194_v42 = vpop.f32.mrb[155].mxu0 }
 0xeeb   :  { %14882 = vrcp.f32 %v7308_v37  ;;  %v13238_v12 = vadd.f32 %v7194_v42, %v20486_v58 }
 0xeec   :  { %v14869_v25 = vpop.eup %14868  ;;  %14884 = vrcp.f32 %v7307_v34  ;;  %v10242_v18 = vmul.f32 -1.442695, %v13237_v10 }
 0xeed   :  { %v14871_v48 = vpop.eup %14870  ;;  %v7310_v29 = vadd.f32 1.0, %v14869_v25  ;;  %14886 = vpow2.f32 %v10239_v44  ;;  %v10241_v39 = vmul.f32 -1.442695, %v13238_v12  ;;  %v12443_v23 = vpop.f32.mrb[156].mxu0 }
 0xeee   :  { %v7309_v43 = vadd.f32 1.0, %v14871_v48  ;;  %14888 = vpow2.f32 %v10242_v18  ;;  %v13239_v24 = vadd.f32 %v12443_v23, %v20825_v49  ;;  %v7204_v9 = vpop.f32.mrb[157].mxu0 }
 0xeef   :  { %14890 = vrcp.f32 %v7310_v29  ;;  %v13240_v27 = vadd.f32 %v7204_v9, %v20826_v31 }
 0xef0   :  { %v14873_v53 = vpop.eup %14872  ;;  %14892 = vrcp.f32 %v7309_v43 }
 0xef1   :  { %v14875_v37 = vpop.eup %14874  ;;  %v7342_v36 = vadd.f32 1.0, %v14873_v53  ;;  %14894 = vpow2.f32 %v10241_v39  ;;  %v12446_v34 = vpop.f32.mrb[158].mxu0 }
 0xef2   :  { %v14877_v10 = vpop.eup %14876  ;;  %14896 = vtanh.f32 %v13239_v24  ;;  %v13241_v44 = vadd.f32 %v12446_v34, %v20827_v63  ;;  %v7214_v42 = vpop.f32.mrb[159].mxu0 }
 0xef3   :  { %v14879_v12 = vpop.eup %14878  ;;  %14898 = vrcp.f32 %v7342_v36  ;;  %v13242_v48 = vadd.f32 %v7214_v42, %v20828_v14 }
 0xef4   :  { %v14881_v25 = vpop.eup %14880  ;;  %v7341_v18 = vadd.f32 1.0, %v14879_v12  ;;  %14900 = vtanh.f32 %v13240_v27 }
 0xef5   :  { %v14883_v29 = vpop.eup %14882  ;;  %v7344_v23 = vadd.f32 1.0, %v14881_v25  ;;  %14902 = vtanh.f32 %v13241_v44  ;;  %v12449_v43 = vpop.f32.mrb[160].mxu0 }
 0xef6   :  { %v14885_v9 = vpop.eup %14884  ;;  %14904 = vrcp.f32 %v7341_v18  ;;  %v13243_v39 = vadd.f32 %v12449_v43, %v20829_v6  ;;  %v7224_v53 = vpop.f32.mrb[161].mxu0 }
 0xef7   :  { %v14887_v24 = vpop.eup %14886  ;;  %14906 = vrcp.f32 %v7344_v23  ;;  %v13244_v36 = vadd.f32 %v7224_v53, %v20830_v16 }
 0xef8   :  { %v14889_v34 = vpop.eup %14888  ;;  %v7343_v63 = vadd.f32 1.0, %v14887_v24  ;;  %14908 = vtanh.f32 %v13242_v48 }
 0xef9   :  { %v14891_v12 = vpop.eup %14890  ;;  %v7346_v27 = vadd.f32 1.0, %v14889_v34  ;;  %14910 = vtanh.f32 %v13243_v39  ;;  %v12452_v42 = vpop.f32.mrb[162].mxu0 }
 0xefa   :  { %v14893_v14 = vpop.eup %14892  ;;  %14912 = vrcp.f32 %v7343_v63  ;;  %v13245_v44 = vadd.f32 %v12452_v42, %v20831_v17  ;;  %v7234_v25 = vpop.f32.mrb[163].mxu0 }
 0xefb   :  { %v14895_v18 = vpop.eup %14894  ;;  %14914 = vrcp.f32 %v7346_v27  ;;  %v13246_v43 = vadd.f32 %v7234_v25, %v20494_v0 }
 0xefc   :  { %v14897_v6 = vpop.eup %14896  ;;  %v7345_v23 = vadd.f32 1.0, %v14895_v18  ;;  %14916 = vtanh.f32 %v13244_v36  ;;  %v10244_v24 = vmul.f32 -1.442695, %v13245_v44 }
 0xefd   :  { %v14899_v48 = vpop.eup %14898  ;;  %v7408_v31 = vmul.f32 %v14897_v6, %v14875_v37  ;;  %v10243_v53 = vmul.f32 -1.442695, %v13246_v43  ;;  %v12455_v16 = vpop.f32.mrb[164].mxu0 }
 0xefe   :  { %v14901_v34 = vpop.eup %14900  ;;  %v7402_v39 = vmul.f32 %v14899_v48, %v19099_v32  ;;  %14918 = vrcp.f32 %v7345_v23  ;;  %v13247_v63 = vadd.f32 %v12455_v16, %v20495_v26  ;;  %v7244_v42 = vpop.f32.mrb[165].mxu0 }
 0xeff   :  { %v14903_v17 = vpop.eup %14902  ;;  %v7407_v49 = vmul.f32 %v14901_v34, %v14877_v10  ;;  %14920 = vpow2.f32 %v10244_v24  ;;  %v13248_v27 = vadd.f32 %v7244_v42, %v20496_v19 }
 0xf00   :  { %v14905_v25 = vpop.eup %14904  ;;  %v19488_v18 = vadd.f32 %v7408_v31, %v7402_v39  ;;  %v7410_v36 = vmul.f32 %v14903_v17, %v14883_v29  ;;  %14922 = vpow2.f32 %v10243_v53  ;;  %v10246_v6 = vmul.f32 -1.442695, %v13247_v63 }
 0xf01   :  { %v14907_v37 = vpop.eup %14906  ;;  %v7401_v44 = vmul.f32 %v14905_v25, %v19104_v13  ;;  %v10245_v43 = vmul.f32 -1.442695, %v13248_v27  ;;  %v12458_v32 = vpop.f32.mrb[166].mxu0 }
 0xf02   :  { %v14909_v23 = vpop.eup %14908  ;;  %v7404_v16 = vmul.f32 %v14907_v37, %v19107_v54  ;;  %v13249_v48 = vadd.f32 %v12458_v32, %v16244_v30  ;;  %v7254_v10 = vpop.f32.mrb[167].mxu0  ;;  %14924 = vpow2.f32 %v10246_v6 }
 0xf03   :  { %v14911_v24 = vpop.eup %14910  ;;  %v19493_v34 = vadd.f32 %v7407_v49, %v7401_v44  ;;  %v7409_v42 = vmul.f32 %v14909_v23, %v14885_v9  ;;  %v13250_v31 = vadd.f32 %v7254_v10, %v16247_v28  ;;  %14926 = vpow2.f32 %v10245_v43 }
 0xf04   :  { %v14913_v17 = vpop.eup %14912  ;;  %v19496_v29 = vadd.f32 %v7410_v36, %v7404_v16  ;;  %v7412_v53 = vmul.f32 %v14911_v24, %v14891_v12  ;;  %v10248_v13 = vmul.f32 -1.442695, %v13249_v48 }
 0xf05   :  { %v14915_v39 = vpop.eup %14914  ;;  %v7403_v63 = vmul.f32 %v14913_v17, %v19111_v21  ;;  %v10247_v54 = vmul.f32 -1.442695, %v13250_v31 }
 0xf06   :  { %v14917_v27 = vpop.eup %14916  ;;  %v7406_v25 = vmul.f32 %v14915_v39, %v19113_v50  ;;  %14928 = vpow2.f32 %v10248_v13 }
 0xf07   :  { %v19500_v37 = vadd.f32 %v7409_v42, %v7403_v63  ;;  %v7411_v49 = vmul.f32 %v14917_v27, %v14893_v14  ;;  %14930 = vpow2.f32 %v10247_v54 }
 0xf08   :  { %v14919_v9 = vpop.eup %14918  ;;  %v19502_v6 = vadd.f32 %v7412_v53, %v7406_v25  ;;  %14932 = vtanh.f32 %v19488_v18 }
 0xf09   :  { %v14921_v36 = vpop.eup %14920  ;;  %v7405_v12 = vmul.f32 %v14919_v9, %v19118_v62  ;;  %14934 = vtanh.f32 %v19493_v34 }
 0xf0a   :  { %v14923_v44 = vpop.eup %14922  ;;  %v7384_v43 = vadd.f32 1.0, %v14921_v36 }
 0xf0b   :  { %v19507_v21 = vadd.f32 %v7411_v49, %v7405_v12  ;;  %v7383_v50 = vadd.f32 1.0, %v14923_v44 }
 0xf0c   :  { %14936 = vrcp.f32 %v7384_v43  ;;  %v14925_v32 = vpop.eup %14924 }
 0xf0d   :  { %14938 = vtanh.f32 %v19496_v29  ;;  %v14927_v14 = vpop.eup %14926  ;;  %v7386_v23 = vadd.f32 1.0, %v14925_v32 }
 0xf0e   :  { %14940 = vrcp.f32 %v7383_v50  ;;  %v7385_v16 = vadd.f32 1.0, %v14927_v14 }
 0xf0f   :  { %14942 = vtanh.f32 %v19500_v37 }
 0xf10   :  { %14944 = vrcp.f32 %v7386_v23  ;;  %v14929_v62 = vpop.eup %14928 }
 0xf11   :  { %14946 = vrcp.f32 %v7385_v16  ;;  %v14931_v48 = vpop.eup %14930  ;;  %v7388_v10 = vadd.f32 1.0, %v14929_v62  ;;  %v20879_v62 = vld [vmem:[#allocation32_spill] sm:$0xff] }
 0xf12   :  { %14948 = vtanh.f32 %v19502_v6  ;;  %v7387_v24 = vadd.f32 1.0, %v14931_v48  ;;  %v14933_v42 = vpop.eup %14932  ;;  %v20880_v48 = vld [vmem:[#allocation25_spill] sm:$0xff] }
 0xf13   :  { %14950 = vtanh.f32 %v19507_v21  ;;  %v14935_v31 = vpop.eup %14934 }
 0xf14   :  { %14952 = vrcp.f32 %v7388_v10  ;;  %v20881_v10 = vld [vmem:[#allocation29_spill] sm:$0xff] }
 0xf15   :  { %14954 = vrcp.f32 %v7387_v24  ;;  %v20882_v24 = vld [vmem:[#allocation30_spill] sm:$0xff] }
 0xf16   :  { %v14937_v17 = vpop.eup %14936 }
 0xf17   :  { %v14939_v53 = vpop.eup %14938  ;;  %v7426_v13 = vmul.f32 %v14937_v17, %v14933_v42  ;;  %v20883_v42 = vld [vmem:[#allocation33_spill] sm:$0xff]  ;;  %v20885_v17 = vld [vmem:[#allocation38_spill] sm:$0xff] }
 0xf18   :  { %v14941_v39 = vpop.eup %14940 }
 0xf19   :  { %v14943_v63 = vpop.eup %14942  ;;  %v7425_v54 = vmul.f32 %v14941_v39, %v14935_v31  ;;  %v20884_v31 = vld [vmem:[#allocation34_spill] sm:$0xff] }
 0xf1a   :  { %v14945_v27 = vpop.eup %14944 }
 0xf1b   :  { %v14947_v25 = vpop.eup %14946  ;;  %v12885_v49 = vpack.c.bf16 %v7426_v13, %v7425_v54  ;;  %v7428_v9 = vmul.f32 %v14945_v27, %v14939_v53  ;;  %v20886_v53 = vld [vmem:[#allocation39_spill] sm:$0xff]  ;;  %v20887_v13 = vld [vmem:[#allocation40_spill] sm:$0xff] }
 0xf1c   :  { %v14949_v36 = vpop.eup %14948  ;;  %v7427_v12 = vmul.f32 %v14947_v25, %v14943_v63  ;;  %v20888_v27 = vld [vmem:[#allocation24_spill] sm:$0xff] }
 0xf1d   :  { %v14951_v44 = vpop.eup %14950  ;;  %12886 = vmatprep.subr.bf16.mxu1 %v12885_v49 }
 0xf1e   :  { %v14953_v43 = vpop.eup %14952  ;;  %12888 = vmatpush3.bf16.msra.mxu1 %v12885_v49  ;;  %v12889_v50 = vpack.c.bf16 %v7428_v9, %v7427_v12 }
 0xf1f   :  { %v14955_v32 = vpop.eup %14954  ;;  %v7430_v14 = vmul.f32 %v14953_v43, %v14949_v36  ;;  %v20889_v43 = vld [vmem:[#allocation28_spill] sm:$0xff] }
 0xf20   :  { %12890 = vmatprep.subr.bf16.mxu1 %v12889_v50  ;;  %v7429_v23 = vmul.f32 %v14955_v32, %v14951_v44 }
 0xf22   :  { %12892 = vmatpush3.bf16.msra.mxu1 %v12889_v50  ;;  %v12893_v16 = vpack.c.bf16 %v7430_v14, %v7429_v23 }
 0xf24   :  { %12894 = vmatprep.subr.bf16.mxu1 %v12893_v16 }
 0xf26   :  { %12896 = vmatpush3.bf16.msra.mxu1 %v12893_v16  ;;  %v20890_v16 = vld [vmem:[#allocation31_spill] sm:$0xff] }
 0xf29   :  { %12510 = vmatmul.mubr.msk.f32.vlgmr.msra.gmra.mrb[148].mxu1 %vm490_vm2, %v19127_v38  ;;  %v20860_v38 = vld [vmem:[#allocation10_spill] sm:$0xff] }
 0xf2a   :  { %12512 = vmatprep.mubr.msk.f32.mxu1 %vm490_vm2, %v19134_v4  ;;  %v20861_v4 = vld [vmem:[#allocation11_spill] sm:$0xff] }
 0xf2d   :  { %12513 = vmatmul.mubr.msk.f32.gmra.mrb[150].mxu1 %vm490_vm2, %v19141_v33  ;;  %v20862_v33 = vld [vmem:[#allocation12_spill] sm:$0xff] }
 0xf2e   :  { %12515 = vmatprep.mubr.msk.f32.mxu1 %vm490_vm2, %v19148_v20  ;;  %v20863_v20 = vld [vmem:[#allocation13_spill] sm:$0xff] }
 0xf31   :  { %12516 = vmatmul.mubr.msk.f32.gmra.mrb[152].mxu1 %vm490_vm2, %v19155_v56  ;;  %v10317_v56 = vld [vmem:[%s20101_s1 + $0xc] sm:$0x3] }
 0xf32   :  { %12518 = vmatprep.mubr.msk.f32.mxu1 %vm490_vm2, %v19162_v1  ;;  %12545 = vmatprep.subr.msk.mxu0 %vm301_vm0, %v10317_v56  ;;  %v20864_v1 = vld [vmem:[#allocation14_spill] sm:$0xff] }
 0xf33   :  { %12546 = vmatpush3.msk.msra.mxu0 %vm301_vm0, %v10317_v56 }
 0xf34   :  { %12548 = vmatmul.mubr.msk.f32.vlgmr.msra.gmra.mrb[168].mxu0 %vm228_vm1, %v20864_v1 }
 0xf35   :  { %12519 = vmatmul.mubr.msk.f32.gmra.mrb[154].mxu1 %vm490_vm2, %v19169_v2  ;;  %v20865_v2 = vld [vmem:[#allocation15_spill] sm:$0xff] }
 0xf36   :  { %12521 = vmatprep.mubr.msk.f32.mxu1 %vm490_vm2, %v19176_v35  ;;  %12550 = vmatprep.mubr.msk.f32.mxu0 %vm228_vm1, %v20865_v2  ;;  %v20866_v35 = vld [vmem:[#allocation16_spill] sm:$0xff] }
 0xf38   :  { %12551 = vmatmul.mubr.msk.f32.gmra.mrb[170].mxu0 %vm228_vm1, %v20866_v35 }
 0xf39   :  { %12522 = vmatmul.mubr.msk.f32.gmra.mrb[156].mxu1 %vm490_vm2, %v19183_v5  ;;  %v20867_v5 = vld [vmem:[#allocation17_spill] sm:$0xff] }
 0xf3a   :  { %12524 = vmatprep.mubr.msk.f32.mxu1 %vm490_vm2, %v19190_v7  ;;  %12553 = vmatprep.mubr.msk.f32.mxu0 %vm228_vm1, %v20867_v5  ;;  %v20868_v7 = vld [vmem:[#allocation18_spill] sm:$0xff]  ;;  %v20891_v5 = vld [vmem:[#allocation23_spill] sm:$0xff] }
 0xf3c   :  { %12554 = vmatmul.mubr.msk.f32.gmra.mrb[172].mxu0 %vm228_vm1, %v20868_v7 }
 0xf3d   :  { %12525 = vmatmul.mubr.msk.f32.gmra.mrb[158].mxu1 %vm490_vm2, %v19197_v22  ;;  %v20869_v22 = vld [vmem:[#allocation19_spill] sm:$0xff] }
 0xf3e   :  { %12527 = vmatprep.mubr.msk.f32.mxu1 %vm490_vm2, %v19204_v61  ;;  %12556 = vmatprep.mubr.msk.f32.mxu0 %vm228_vm1, %v20869_v22  ;;  %v20870_v61 = vld [vmem:[#allocation20_spill] sm:$0xff] }
 0xf40   :  { %12557 = vmatmul.mubr.msk.f32.gmra.mrb[174].mxu0 %vm228_vm1, %v20870_v61 }
 0xf41   :  { %12528 = vmatmul.mubr.msk.f32.gmra.mrb[160].mxu1 %vm490_vm2, %v19211_v11  ;;  %v20871_v11 = vld [vmem:[#allocation21_spill] sm:$0xff] }
 0xf42   :  { %12530 = vmatprep.mubr.msk.f32.mxu1 %vm490_vm2, %v19218_v57  ;;  %12559 = vmatprep.mubr.msk.f32.mxu0 %vm228_vm1, %v20871_v11  ;;  %v20872_v57 = vld [vmem:[#allocation6_spill] sm:$0xff] }
 0xf44   :  { %12560 = vmatmul.mubr.msk.f32.gmra.mrb[176].mxu0 %vm228_vm1, %v20872_v57 }
 0xf45   :  { %12531 = vmatmul.mubr.msk.f32.gmra.mrb[162].mxu1 %vm490_vm2, %v19225_v51  ;;  %v20873_v51 = vld [vmem:[#allocation7_spill] sm:$0xff] }
 0xf46   :  { %12533 = vmatprep.mubr.msk.f32.mxu1 %vm490_vm2, %v19232_v46  ;;  %12562 = vmatprep.mubr.msk.f32.mxu0 %vm228_vm1, %v20873_v51  ;;  %v20874_v46 = vld [vmem:[#allocation8_spill] sm:$0xff] }
 0xf48   :  { %12563 = vmatmul.mubr.msk.f32.gmra.mrb[178].mxu0 %vm228_vm1, %v20874_v46 }
 0xf49   :  { %12534 = vmatmul.mubr.msk.f32.gmra.mrb[164].mxu1 %vm490_vm2, %v19239_v8  ;;  %v20875_v8 = vld [vmem:[#allocation9_spill] sm:$0xff] }
 0xf4a   :  { %12536 = vmatprep.mubr.msk.f32.mxu1 %vm490_vm2, %v19246_v59  ;;  %12565 = vmatprep.mubr.msk.f32.mxu0 %vm228_vm1, %v20875_v8  ;;  %v20876_v59 = vld [vmem:[#allocation22_spill] sm:$0xff] }
 0xf4c   :  { %12566 = vmatmul.mubr.msk.f32.gmra.mrb[180].mxu0 %vm228_vm1, %v20876_v59 }
 0xf4d   :  { %12537 = vmatmul.mubr.msk.f32.gmra.mrb[166].mxu1 %vm490_vm2, %v19253_v41  ;;  %v20877_v41 = vld [vmem:[#allocation26_spill] sm:$0xff] }
 0xf4e   :  { %12539 = vmatprep.mubr.msk.f32.mxu1 %vm490_vm2, %v19260_v60  ;;  %12568 = vmatprep.mubr.msk.f32.mxu0 %vm228_vm1, %v20877_v41  ;;  %v20878_v60 = vld [vmem:[#allocation27_spill] sm:$0xff] }
 0xf50   :  { %12569 = vmatmul.mubr.msk.f32.gmra.mrb[182].mxu0 %vm228_vm1, %v20878_v60 }
 0xf51   :  { %12540 = vmatmul.mubr.msk.f32.gmra.mrb[168].mxu1 %vm490_vm2, %v20860_v38  ;;  %12571 = vmatprep.mubr.msk.f32.mxu0 %vm228_vm1, %v20879_v62 }
 0xf52   :  { %12542 = vmatprep.mubr.msk.f32.mxu1 %vm490_vm2, %v20861_v4 }
 0xf54   :  { %12572 = vmatmul.mubr.msk.f32.gmra.mrb[184].mxu0 %vm228_vm1, %v20880_v48 }
 0xf55   :  { %12543 = vmatmul.mubr.msk.f32.gmra.mrb[170].mxu1 %vm490_vm2, %v20862_v33  ;;  %12574 = vmatprep.mubr.msk.f32.mxu0 %vm228_vm1, %v20881_v10 }
 0xf56   :  { %12633 = vmatprep.mubr.msk.f32.mxu1 %vm228_vm1, %v20863_v20 }
 0xf58   :  { %12575 = vmatmul.mubr.msk.f32.gmra.mrb[186].mxu0 %vm228_vm1, %v20882_v24 }
 0xf59   :  { %12577 = vmatprep.mubr.msk.f32.mxu0 %vm228_vm1, %v20883_v42 }
 0xf5c   :  { %12578 = vmatmul.mubr.msk.f32.gmra.mrb[188].mxu0 %vm228_vm1, %v20884_v31 }
 0xf5d   :  { %12580 = vmatprep.mubr.msk.f32.mxu0 %vm228_vm1, %v20885_v17 }
 0xf60   :  { %12581 = vmatmul.mubr.msk.f32.gmra.mrb[190].mxu0 %vm228_vm1, %v20886_v53 }
 0xf61   :  { %12595 = vmatprep.mubr.msk.f32.mxu0 %vm490_vm2, %v20887_v13 }
 0xffc   :  { %v12511_v39 = vpop.f32.mrb[148].mxu1 }
 0xffd   :  { %v13251_v63 = vadd.f32 %v12511_v39, %v20475_v15  ;;  %v7687_v54 = vpop.f32.mrb[149].mxu1 }
 0xffe   :  { %v13252_v25 = vadd.f32 %v7687_v54, %v20888_v27 }
 0xfff   :  { %v10300_v49 = vmul.f32 -1.442695, %v13251_v63 }
0x1000   :  { %v10299_v9 = vmul.f32 -1.442695, %v13252_v25  ;;  %v12514_v36 = vpop.f32.mrb[150].mxu1 }
0x1001   :  { %14956 = vpow2.f32 %v10300_v49  ;;  %v13253_v12 = vadd.f32 %v12514_v36, %v20477_v45  ;;  %v7697_v44 = vpop.f32.mrb[151].mxu1 }
0x1002   :  { %14958 = vpow2.f32 %v10299_v9  ;;  %v13254_v50 = vadd.f32 %v7697_v44, %v20889_v43  ;;  %v20892_v44 = vld [vmem:[#allocation35_spill] sm:$0xff] }
0x1003   :  { %v10302_v32 = vmul.f32 -1.442695, %v13253_v12 }
0x1004   :  { %v10301_v14 = vmul.f32 -1.442695, %v13254_v50  ;;  %v12517_v23 = vpop.f32.mrb[152].mxu1 }
0x1005   :  { %14960 = vpow2.f32 %v10302_v32  ;;  %v13255_v38 = vadd.f32 %v12517_v23, %v20890_v16  ;;  %v7707_v4 = vpop.f32.mrb[153].mxu1  ;;  %v20893_v23 = vld [vmem:[#allocation36_spill] sm:$0xff] }
0x1006   :  { %14962 = vpow2.f32 %v10301_v14  ;;  %v13256_v33 = vadd.f32 %v7707_v4, %v20480_v55 }
0x1007   :  { %v10304_v20 = vmul.f32 -1.442695, %v13255_v38 }
0x1008   :  { %v10303_v56 = vmul.f32 -1.442695, %v13256_v33  ;;  %v12520_v1 = vpop.f32.mrb[154].mxu1 }
0x1009   :  { %14964 = vpow2.f32 %v10304_v20  ;;  %v13257_v2 = vadd.f32 %v12520_v1, %v20481_v47  ;;  %v7717_v35 = vpop.f32.mrb[155].mxu1  ;;  %v20894_v1 = vld [vmem:[#allocation41_spill] sm:$0xff] }
0x100a   :  { %14966 = vpow2.f32 %v10303_v56  ;;  %v13258_v7 = vadd.f32 %v7717_v35, %v20891_v5 }
0x100b   :  { %v14957_v22 = vpop.eup %14956  ;;  %v10306_v61 = vmul.f32 -1.442695, %v13257_v2 }
0x100c   :  { %v14959_v11 = vpop.eup %14958  ;;  %v7849_v57 = vadd.f32 1.0, %v14957_v22  ;;  %v10305_v51 = vmul.f32 -1.442695, %v13258_v7  ;;  %v12523_v46 = vpop.f32.mrb[156].mxu1 }
0x100d   :  { %v7848_v8 = vadd.f32 1.0, %v14959_v11  ;;  %14968 = vpow2.f32 %v10306_v61  ;;  %v13259_v59 = vadd.f32 %v12523_v46, %v20483_v40  ;;  %v7727_v41 = vpop.f32.mrb[157].mxu1  ;;  %v20895_v11 = vld [vmem:[#allocation42_spill] sm:$0xff] }
0x100e   :  { %14970 = vrcp.f32 %v7849_v57  ;;  %v13260_v60 = vadd.f32 %v7727_v41, %v20484_v3  ;;  %v20896_v41 = vld [vmem:[#allocation43_spill] sm:$0xff] }
0x100f   :  { %v14961_v62 = vpop.eup %14960  ;;  %14972 = vrcp.f32 %v7848_v8  ;;  %v10308_v48 = vmul.f32 -1.442695, %v13259_v59 }
0x1010   :  { %v14963_v10 = vpop.eup %14962  ;;  %v7851_v24 = vadd.f32 1.0, %v14961_v62  ;;  %14974 = vpow2.f32 %v10305_v51  ;;  %v10307_v42 = vmul.f32 -1.442695, %v13260_v60  ;;  %v12526_v31 = vpop.f32.mrb[158].mxu1 }
0x1011   :  { %v7850_v17 = vadd.f32 1.0, %v14963_v10  ;;  %14976 = vpow2.f32 %v10308_v48  ;;  %v13261_v53 = vadd.f32 %v12526_v31, %v20485_v52  ;;  %v7737_v13 = vpop.f32.mrb[159].mxu1 }
0x1012   :  { %14978 = vrcp.f32 %v7851_v24  ;;  %v13262_v39 = vadd.f32 %v7737_v13, %v20486_v58 }
0x1013   :  { %v14965_v63 = vpop.eup %14964  ;;  %14980 = vrcp.f32 %v7850_v17  ;;  %v10310_v54 = vmul.f32 -1.442695, %v13261_v53 }
0x1014   :  { %v14967_v25 = vpop.eup %14966  ;;  %v7853_v49 = vadd.f32 1.0, %v14965_v63  ;;  %14982 = vpow2.f32 %v10307_v42  ;;  %v10309_v9 = vmul.f32 -1.442695, %v13262_v39  ;;  %v12529_v36 = vpop.f32.mrb[160].mxu1  ;;  %v20897_v42 = vld [vmem:[#allocation44_spill] sm:$0xff]  ;;  %v20898_v63 = vld [vmem:[#allocation37_spill] sm:$0xff] }
0x1015   :  { %v7852_v12 = vadd.f32 1.0, %v14967_v25  ;;  %14984 = vpow2.f32 %v10310_v54  ;;  %v13263_v50 = vadd.f32 %v12529_v36, %v20892_v44  ;;  %v7747_v32 = vpop.f32.mrb[161].mxu1 }
0x1016   :  { %14986 = vrcp.f32 %v7853_v49  ;;  %v13264_v38 = vadd.f32 %v7747_v32, %v20893_v23 }
0x1017   :  { %v14969_v14 = vpop.eup %14968  ;;  %14988 = vrcp.f32 %v7852_v12 }
0x1018   :  { %v14971_v4 = vpop.eup %14970  ;;  %v7885_v33 = vadd.f32 1.0, %v14969_v14  ;;  %14990 = vpow2.f32 %v10309_v9  ;;  %v12532_v20 = vpop.f32.mrb[162].mxu1 }
0x1019   :  { %v14973_v56 = vpop.eup %14972  ;;  %14992 = vtanh.f32 %v13263_v50  ;;  %v13265_v2 = vadd.f32 %v12532_v20, %v20894_v1  ;;  %v7757_v35 = vpop.f32.mrb[163].mxu1 }
0x101a   :  { %v14975_v7 = vpop.eup %14974  ;;  %14994 = vrcp.f32 %v7885_v33  ;;  %v13266_v57 = vadd.f32 %v7757_v35, %v20895_v11 }
0x101b   :  { %v14977_v22 = vpop.eup %14976  ;;  %v7884_v61 = vadd.f32 1.0, %v14975_v7  ;;  %14996 = vtanh.f32 %v13264_v38 }
0x101c   :  { %v14979_v51 = vpop.eup %14978  ;;  %v7887_v46 = vadd.f32 1.0, %v14977_v22  ;;  %14998 = vtanh.f32 %v13265_v2  ;;  %v12535_v8 = vpop.f32.mrb[164].mxu1 }
0x101d   :  { %v14981_v59 = vpop.eup %14980  ;;  %15000 = vrcp.f32 %v7884_v61  ;;  %v13267_v60 = vadd.f32 %v12535_v8, %v20896_v41  ;;  %v7767_v62 = vpop.f32.mrb[165].mxu1 }
0x101e   :  { %v14983_v48 = vpop.eup %14982  ;;  %15002 = vrcp.f32 %v7887_v46  ;;  %v13268_v31 = vadd.f32 %v7767_v62, %v20897_v42 }
0x101f   :  { %v14985_v10 = vpop.eup %14984  ;;  %v7886_v24 = vadd.f32 1.0, %v14983_v48  ;;  %15004 = vtanh.f32 %v13266_v57 }
0x1020   :  { %v14987_v17 = vpop.eup %14986  ;;  %v7889_v53 = vadd.f32 1.0, %v14985_v10  ;;  %15006 = vtanh.f32 %v13267_v60  ;;  %v12538_v13 = vpop.f32.mrb[166].mxu1 }
0x1021   :  { %v14989_v39 = vpop.eup %14988  ;;  %15008 = vrcp.f32 %v7886_v24  ;;  %v13269_v54 = vadd.f32 %v12538_v13, %v20898_v63  ;;  %v7777_v25 = vpop.f32.mrb[167].mxu1 }
0x1022   :  { %v14991_v49 = vpop.eup %14990  ;;  %15010 = vrcp.f32 %v7889_v53  ;;  %v13270_v9 = vadd.f32 %v7777_v25, %v20494_v0 }
0x1023   :  { %v14993_v36 = vpop.eup %14992  ;;  %v7888_v12 = vadd.f32 1.0, %v14991_v49  ;;  %15012 = vtanh.f32 %v13268_v31  ;;  %v10312_v50 = vmul.f32 -1.442695, %v13269_v54 }
0x1024   :  { %v14995_v32 = vpop.eup %14994  ;;  %v7951_v14 = vmul.f32 %v14993_v36, %v14971_v4  ;;  %v10311_v38 = vmul.f32 -1.442695, %v13270_v9  ;;  %v12541_v33 = vpop.f32.mrb[168].mxu1 }
0x1025   :  { %v14997_v20 = vpop.eup %14996  ;;  %v7945_v2 = vmul.f32 %v14995_v32, %v19488_v18  ;;  %15014 = vrcp.f32 %v7888_v12  ;;  %v13271_v35 = vadd.f32 %v12541_v33, %v20495_v26  ;;  %v7787_v7 = vpop.f32.mrb[169].mxu1 }
0x1026   :  { %v14999_v22 = vpop.eup %14998  ;;  %v7950_v61 = vmul.f32 %v14997_v20, %v14973_v56  ;;  %15016 = vpow2.f32 %v10312_v50  ;;  %v13272_v57 = vadd.f32 %v7787_v7, %v20496_v19 }
0x1027   :  { %v15001_v46 = vpop.eup %15000  ;;  %v19637_v8 = vadd.f32 %v7951_v14, %v7945_v2  ;;  %v7953_v60 = vmul.f32 %v14999_v22, %v14979_v51  ;;  %15018 = vpow2.f32 %v10311_v38  ;;  %v10314_v4 = vmul.f32 -1.442695, %v13271_v35 }
0x1028   :  { %v15003_v62 = vpop.eup %15002  ;;  %v7944_v48 = vmul.f32 %v15001_v46, %v19493_v34  ;;  %v10313_v10 = vmul.f32 -1.442695, %v13272_v57  ;;  %v12544_v18 = vpop.f32.mrb[170].mxu1 }
0x1029   :  { %v15005_v24 = vpop.eup %15004  ;;  %v7947_v31 = vmul.f32 %v15003_v62, %v19496_v29  ;;  %v13273_v53 = vadd.f32 %v12544_v18, %v16244_v30  ;;  %v7797_v56 = vpop.f32.mrb[171].mxu1  ;;  %15020 = vpow2.f32 %v10314_v4 }
0x102a   :  { %v15007_v13 = vpop.eup %15006  ;;  %v19642_v54 = vadd.f32 %v7950_v61, %v7944_v48  ;;  %v7952_v25 = vmul.f32 %v15005_v24, %v14981_v59  ;;  %v13274_v51 = vadd.f32 %v7797_v56, %v16247_v28  ;;  %15022 = vpow2.f32 %v10313_v10 }
0x102b   :  { %v15009_v49 = vpop.eup %15008  ;;  %v19645_v9 = vadd.f32 %v7953_v60, %v7947_v31  ;;  %v7955_v36 = vmul.f32 %v15007_v13, %v14987_v17  ;;  %v10316_v34 = vmul.f32 -1.442695, %v13273_v53 }
0x102c   :  { %v15011_v12 = vpop.eup %15010  ;;  %v7946_v50 = vmul.f32 %v15009_v49, %v19500_v37  ;;  %v10315_v29 = vmul.f32 -1.442695, %v13274_v51 }
0x102d   :  { %v15013_v32 = vpop.eup %15012  ;;  %v7949_v14 = vmul.f32 %v15011_v12, %v19502_v6  ;;  %15024 = vpow2.f32 %v10316_v34 }
0x102e   :  { %v19649_v38 = vadd.f32 %v7952_v25, %v7946_v50  ;;  %v7954_v33 = vmul.f32 %v15013_v32, %v14989_v39  ;;  %15026 = vpow2.f32 %v10315_v29 }
0x102f   :  { %v15015_v59 = vpop.eup %15014  ;;  %v19651_v20 = vadd.f32 %v7955_v36, %v7949_v14  ;;  %15028 = vtanh.f32 %v19637_v8 }
0x1030   :  { %v15017_v2 = vpop.eup %15016  ;;  %v7948_v17 = vmul.f32 %v15015_v59, %v19507_v21  ;;  %15030 = vtanh.f32 %v19642_v54 }
0x1031   :  { %v15019_v35 = vpop.eup %15018  ;;  %v7927_v7 = vadd.f32 1.0, %v15017_v2  ;;  %v19665_v2 = vld [vmem:[%s20104_s4 + $0x8] sm:$0xff] }
0x1032   :  { %v19656_v37 = vadd.f32 %v7954_v33, %v7948_v17  ;;  %v7926_v6 = vadd.f32 1.0, %v15019_v35  ;;  %v19672_v17 = vld [vmem:[%s20104_s4 + $0x10] sm:$0xff]  ;;  %v19679_v35 = vld [vmem:[%s20104_s4 + $0x18] sm:$0xff] }
0x1033   :  { %15032 = vrcp.f32 %v7927_v7  ;;  %v15021_v22 = vpop.eup %15020  ;;  %v19686_v7 = vld [vmem:[%s20104_s4 + $0x20] sm:$0xff] }
0x1034   :  { %15034 = vtanh.f32 %v19645_v9  ;;  %v15023_v39 = vpop.eup %15022  ;;  %v7929_v61 = vadd.f32 1.0, %v15021_v22  ;;  %v19700_v22 = vld [vmem:[%s20104_s4 + $0x30] sm:$0xff] }
0x1035   :  { %15036 = vrcp.f32 %v7926_v6  ;;  %v7928_v57 = vadd.f32 1.0, %v15023_v39  ;;  %v19693_v6 = vld [vmem:[%s20104_s4 + $0x28] sm:$0xff]  ;;  %v19707_v39 = vld [vmem:[%s20104_s4 + $0x38] sm:$0xff] }
0x1036   :  { %15038 = vtanh.f32 %v19649_v38 }
0x1037   :  { %15040 = vrcp.f32 %v7929_v61  ;;  %v15025_v21 = vpop.eup %15024  ;;  %v19714_v61 = vld [vmem:[%s20104_s4 + $0x40] sm:$0xff] }
0x1038   :  { %15042 = vrcp.f32 %v7928_v57  ;;  %v15027_v46 = vpop.eup %15026  ;;  %v7931_v60 = vadd.f32 1.0, %v15025_v21  ;;  %v19721_v57 = vld [vmem:[%s20104_s4 + $0x48] sm:$0xff]  ;;  %v19728_v21 = vld [vmem:[%s20104_s4 + $0x50] sm:$0xff] }
0x1039   :  { %15044 = vtanh.f32 %v19651_v20  ;;  %v7930_v4 = vadd.f32 1.0, %v15027_v46  ;;  %v15029_v62 = vpop.eup %15028  ;;  %v19735_v46 = vld [vmem:[%s20104_s4 + $0x58] sm:$0xff] }
0x103a   :  { %15046 = vtanh.f32 %v19656_v37  ;;  %v15031_v48 = vpop.eup %15030 }
0x103b   :  { %15048 = vrcp.f32 %v7931_v60  ;;  %v19742_v60 = vld [vmem:[%s20104_s4 + $0x60] sm:$0xff] }
0x103c   :  { %15050 = vrcp.f32 %v7930_v4  ;;  %v19749_v4 = vld [vmem:[%s20104_s4 + $0x68] sm:$0xff] }
0x103d   :  { %v15033_v10 = vpop.eup %15032 }
0x103e   :  { %v15035_v18 = vpop.eup %15034  ;;  %v7969_v24 = vmul.f32 %v15033_v10, %v15029_v62  ;;  %v19756_v62 = vld [vmem:[%s20104_s4 + $0x70] sm:$0xff]  ;;  %v19770_v10 = vld [vmem:[%s20104_s4 + $0x80] sm:$0xff] }
0x103f   :  { %v15037_v31 = vpop.eup %15036 }
0x1040   :  { %v15039_v53 = vpop.eup %15038  ;;  %v7968_v56 = vmul.f32 %v15037_v31, %v15031_v48  ;;  %v19763_v48 = vld [vmem:[%s20104_s4 + $0x78] sm:$0xff] }
0x1041   :  { %v15041_v13 = vpop.eup %15040  ;;  %v19791_v31 = vld [vmem:[%s20104_s4 + $0x98] sm:$0xff] }
0x1042   :  { %v15043_v25 = vpop.eup %15042  ;;  %v12897_v51 = vpack.c.bf16 %v7969_v24, %v7968_v56  ;;  %v7971_v49 = vmul.f32 %v15041_v13, %v15035_v18  ;;  %v19777_v18 = vld [vmem:[%s20104_s4 + $0x88] sm:$0xff]  ;;  %v19784_v24 = vld [vmem:[%s20104_s4 + $0x90] sm:$0xff] }
0x1043   :  { %v15045_v36 = vpop.eup %15044  ;;  %v7970_v34 = vmul.f32 %v15043_v25, %v15039_v53  ;;  %v19798_v53 = vld [vmem:[%s20104_s4 + $0xa0] sm:$0xff]  ;;  %v19805_v56 = vld [vmem:[%s20104_s4 + $0xa8] sm:$0xff]  ;;  %v19812_v13 = vld [vmem:[%s20104_s4 + $0xb0] sm:$0xff] }
0x1044   :  { %v15047_v12 = vpop.eup %15046  ;;  %12898 = vmatprep.subr.bf16.mxu0 %v12897_v51  ;;  %20899 = vst [vmem:[#allocation10_spill] sm:$0xff] %v19805_v56  ;;  %20900 = vst [vmem:[#allocation11_spill] sm:$0xff] %v19812_v13  ;;  %v19819_v25 = vld [vmem:[%s20104_s4 + $0xb8] sm:$0xff] }
0x1045   :  { %v15049_v50 = vpop.eup %15048  ;;  %12900 = vmatpush3.bf16.msra.mxu0 %v12897_v51  ;;  %v12901_v29 = vpack.c.bf16 %v7971_v49, %v7970_v34  ;;  %20901 = vst [vmem:[#allocation12_spill] sm:$0xff] %v19819_v25  ;;  %v10385_v51 = vld [vmem:[%s20101_s1 + $0xe] sm:$0x3]  ;;  %v15561_v34 = vld [vmem:[%s20102_s2 + $0x18] sm:$0xff] }
0x1046   :  { %v15051_v32 = vpop.eup %15050  ;;  %v7973_v14 = vmul.f32 %v15049_v50, %v15045_v36  ;;  %12631 = vmatprep.subr.msk.mxu1 %vm301_vm0, %v10385_v51  ;;  %v15559_v49 = vld [vmem:[%s20102_s2 + $0x8] sm:$0xff]  ;;  %v15560_v36 = vld [vmem:[%s20102_s2 + $0x10] sm:$0xff] }
0x1047   :  { %12902 = vmatprep.subr.bf16.mxu0 %v12901_v29  ;;  %v7972_v33 = vmul.f32 %v15051_v32, %v15047_v12  ;;  %12632 = vmatpush3.msk.msra.mxu1 %vm301_vm0, %v10385_v51  ;;  %v15562_v12 = vld [vmem:[%s20102_s2 + $0x20] sm:$0xff]  ;;  %v15563_v50 = vld [vmem:[%s20102_s2 + $0x28] sm:$0xff]  ;;  %v15565_v32 = vld [vmem:[%s20102_s2 + $0x38] sm:$0xff] }
0x1048   :  { %12634 = vmatmul.mubr.msk.f32.vlgmr.msra.gmra.mrb[172].mxu1 %vm228_vm1, %v15559_v49  ;;  %v15569_v51 = vld [vmem:[%s20102_s2 + $0x58] sm:$0xff]  ;;  %v15570_v49 = vld [vmem:[%s20102_s2 + $0x60] sm:$0xff] }
0x1049   :  { %12904 = vmatpush3.bf16.msra.mxu0 %v12901_v29  ;;  %v12905_v59 = vpack.c.bf16 %v7973_v14, %v7972_v33  ;;  %12636 = vmatprep.mubr.msk.f32.mxu1 %vm228_vm1, %v15560_v36  ;;  %v15564_v29 = vld [vmem:[%s20102_s2 + $0x30] sm:$0xff]  ;;  %v15566_v14 = vld [vmem:[%s20102_s2 + $0x40] sm:$0xff]  ;;  %v15567_v33 = vld [vmem:[%s20102_s2 + $0x48] sm:$0xff] }
0x104a   :  { %v15571_v36 = vld [vmem:[%s20102_s2 + $0x68] sm:$0xff] }
0x104b   :  { %12906 = vmatprep.subr.bf16.mxu0 %v12905_v59 }
0x104c   :  { %12637 = vmatmul.mubr.msk.f32.gmra.mrb[174].mxu1 %vm228_vm1, %v15561_v34  ;;  %v15572_v34 = vld [vmem:[%s20102_s2 + $0x70] sm:$0xff] }
0x104d   :  { %12908 = vmatpush3.bf16.msra.mxu0 %v12905_v59  ;;  %12639 = vmatprep.mubr.msk.f32.mxu1 %vm228_vm1, %v15562_v12  ;;  %v15568_v59 = vld [vmem:[%s20102_s2 + $0x50] sm:$0xff]  ;;  %v15573_v12 = vld [vmem:[%s20102_s2 + $0x78] sm:$0xff] }
0x1050   :  { %12596 = vmatmul.mubr.msk.f32.vlgmr.msra.gmra.mrb[168].mxu0 %vm490_vm2, %v19665_v2  ;;  %12640 = vmatmul.mubr.msk.f32.gmra.mrb[176].mxu1 %vm228_vm1, %v15563_v50  ;;  %v15574_v50 = vld [vmem:[%s20102_s2 + $0x80] sm:$0xff] }
0x1051   :  { %12598 = vmatprep.mubr.msk.f32.mxu0 %vm490_vm2, %v19672_v17  ;;  %12642 = vmatprep.mubr.msk.f32.mxu1 %vm228_vm1, %v15564_v29  ;;  %v15575_v29 = vld [vmem:[%s20102_s2 + $0x88] sm:$0xff] }
0x1054   :  { %12599 = vmatmul.mubr.msk.f32.gmra.mrb[170].mxu0 %vm490_vm2, %v19679_v35  ;;  %12643 = vmatmul.mubr.msk.f32.gmra.mrb[178].mxu1 %vm228_vm1, %v15565_v32  ;;  %v15576_v32 = vld [vmem:[%s20102_s2 + $0x90] sm:$0xff] }
0x1055   :  { %12601 = vmatprep.mubr.msk.f32.mxu0 %vm490_vm2, %v19686_v7  ;;  %12645 = vmatprep.mubr.msk.f32.mxu1 %vm228_vm1, %v15566_v14  ;;  %v15577_v14 = vld [vmem:[%s20102_s2 + $0x98] sm:$0xff] }
0x1058   :  { %12602 = vmatmul.mubr.msk.f32.gmra.mrb[172].mxu0 %vm490_vm2, %v19693_v6  ;;  %12646 = vmatmul.mubr.msk.f32.gmra.mrb[180].mxu1 %vm228_vm1, %v15567_v33  ;;  %v15578_v33 = vld [vmem:[%s20102_s2 + $0xa0] sm:$0xff] }
0x1059   :  { %12604 = vmatprep.mubr.msk.f32.mxu0 %vm490_vm2, %v19700_v22  ;;  %12648 = vmatprep.mubr.msk.f32.mxu1 %vm228_vm1, %v15568_v59  ;;  %v15579_v59 = vld [vmem:[%s20102_s2 + $0xa8] sm:$0xff] }
0x105c   :  { %12605 = vmatmul.mubr.msk.f32.gmra.mrb[174].mxu0 %vm490_vm2, %v19707_v39  ;;  %12649 = vmatmul.mubr.msk.f32.gmra.mrb[182].mxu1 %vm228_vm1, %v15569_v51  ;;  %v15580_v51 = vld [vmem:[%s20102_s2 + $0xb0] sm:$0xff] }
0x105d   :  { %12607 = vmatprep.mubr.msk.f32.mxu0 %vm490_vm2, %v19714_v61  ;;  %12651 = vmatprep.mubr.msk.f32.mxu1 %vm228_vm1, %v15570_v49  ;;  %v15581_v49 = vld [vmem:[%s20102_s2 + $0xb8] sm:$0xff] }
0x1060   :  { %12608 = vmatmul.mubr.msk.f32.gmra.mrb[176].mxu0 %vm490_vm2, %v19721_v57  ;;  %12652 = vmatmul.mubr.msk.f32.gmra.mrb[184].mxu1 %vm228_vm1, %v15571_v36  ;;  %v15582_v36 = vld [vmem:[%s20104_s4] sm:$0xff] }
0x1061   :  { %12610 = vmatprep.mubr.msk.f32.mxu0 %vm490_vm2, %v19728_v21  ;;  %12654 = vmatprep.mubr.msk.f32.mxu1 %vm228_vm1, %v15572_v34 }
0x1064   :  { %12611 = vmatmul.mubr.msk.f32.gmra.mrb[178].mxu0 %vm490_vm2, %v19735_v46  ;;  %12655 = vmatmul.mubr.msk.f32.gmra.mrb[186].mxu1 %vm228_vm1, %v15573_v12 }
0x1065   :  { %12613 = vmatprep.mubr.msk.f32.mxu0 %vm490_vm2, %v19742_v60  ;;  %12657 = vmatprep.mubr.msk.f32.mxu1 %vm228_vm1, %v15574_v50 }
0x1068   :  { %12614 = vmatmul.mubr.msk.f32.gmra.mrb[180].mxu0 %vm490_vm2, %v19749_v4  ;;  %12658 = vmatmul.mubr.msk.f32.gmra.mrb[188].mxu1 %vm228_vm1, %v15575_v29 }
0x1069   :  { %12616 = vmatprep.mubr.msk.f32.mxu0 %vm490_vm2, %v19756_v62  ;;  %12660 = vmatprep.mubr.msk.f32.mxu1 %vm228_vm1, %v15576_v32 }
0x106c   :  { %12617 = vmatmul.mubr.msk.f32.gmra.mrb[182].mxu0 %vm490_vm2, %v19763_v48  ;;  %12661 = vmatmul.mubr.msk.f32.gmra.mrb[190].mxu1 %vm228_vm1, %v15577_v14 }
0x106d   :  { %12619 = vmatprep.mubr.msk.f32.mxu0 %vm490_vm2, %v19770_v10  ;;  %12663 = vmatprep.mubr.msk.f32.mxu1 %vm228_vm1, %v15578_v33 }
0x1070   :  { %12620 = vmatmul.mubr.msk.f32.gmra.mrb[184].mxu0 %vm490_vm2, %v19777_v18  ;;  %12664 = vmatmul.mubr.msk.f32.gmra.mrb[192].mxu1 %vm228_vm1, %v15579_v59 }
0x1071   :  { %12622 = vmatprep.mubr.msk.f32.mxu0 %vm490_vm2, %v19784_v24  ;;  %12666 = vmatprep.mubr.msk.f32.mxu1 %vm228_vm1, %v15580_v51 }
0x1074   :  { %12623 = vmatmul.mubr.msk.f32.gmra.mrb[186].mxu0 %vm490_vm2, %v19791_v31  ;;  %12667 = vmatmul.mubr.msk.f32.gmra.mrb[194].mxu1 %vm228_vm1, %v15581_v49 }
0x1075   :  { %12625 = vmatprep.mubr.msk.f32.mxu0 %vm490_vm2, %v19798_v53  ;;  %12681 = vmatprep.mubr.msk.f32.mxu1 %vm490_vm2, %v15582_v36 }
0x1078   :  { %12626 = vmatmul.mubr.msk.f32.gmra.mrb[188].mxu0 %vm490_vm2, %v19805_v56 }
0x1079   :  { %12628 = vmatprep.mubr.msk.f32.mxu0 %vm490_vm2, %v19812_v13 }
0x107c   :  { %12629 = vmatmul.mubr.msk.f32.gmra.mrb[190].mxu0 %vm490_vm2, %v19819_v25 }
0x1123   :  { %v12597_v34 = vpop.f32.mrb[168].mxu0 }
0x1124   :  { %v13275_v12 = vadd.f32 %v12597_v34, %v20475_v15  ;;  %v8230_v50 = vpop.f32.mrb[169].mxu0 }
0x1125   :  { %v13276_v29 = vadd.f32 %v8230_v50, %v20888_v27 }
0x1126   :  { %v10368_v32 = vmul.f32 -1.442695, %v13275_v12 }
0x1127   :  { %v10367_v14 = vmul.f32 -1.442695, %v13276_v29  ;;  %v12600_v33 = vpop.f32.mrb[170].mxu0 }
0x1128   :  { %15052 = vpow2.f32 %v10368_v32  ;;  %v13277_v59 = vadd.f32 %v12600_v33, %v20477_v45  ;;  %v8240_v51 = vpop.f32.mrb[171].mxu0 }
0x1129   :  { %15054 = vpow2.f32 %v10367_v14  ;;  %v13278_v49 = vadd.f32 %v8240_v51, %v20889_v43 }
0x112a   :  { %v10370_v25 = vmul.f32 -1.442695, %v13277_v59 }
0x112b   :  { %v10369_v13 = vmul.f32 -1.442695, %v13278_v49  ;;  %v12603_v56 = vpop.f32.mrb[172].mxu0 }
0x112c   :  { %15056 = vpow2.f32 %v10370_v25  ;;  %v13279_v36 = vadd.f32 %v12603_v56, %v20890_v16  ;;  %v8250_v34 = vpop.f32.mrb[173].mxu0 }
0x112d   :  { %15058 = vpow2.f32 %v10369_v13  ;;  %v13280_v50 = vadd.f32 %v8250_v34, %v20480_v55 }
0x112e   :  { %v10372_v12 = vmul.f32 -1.442695, %v13279_v36 }
0x112f   :  { %v10371_v29 = vmul.f32 -1.442695, %v13280_v50  ;;  %v12606_v27 = vpop.f32.mrb[174].mxu0 }
0x1130   :  { %15060 = vpow2.f32 %v10372_v12  ;;  %v13281_v32 = vadd.f32 %v12606_v27, %v20481_v47  ;;  %v8260_v33 = vpop.f32.mrb[175].mxu0 }
0x1131   :  { %15062 = vpow2.f32 %v10371_v29  ;;  %v13282_v14 = vadd.f32 %v8260_v33, %v20891_v5 }
0x1132   :  { %v15053_v59 = vpop.eup %15052  ;;  %v10374_v51 = vmul.f32 -1.442695, %v13281_v32 }
0x1133   :  { %v15055_v49 = vpop.eup %15054  ;;  %v8392_v25 = vadd.f32 1.0, %v15053_v59  ;;  %v10373_v43 = vmul.f32 -1.442695, %v13282_v14  ;;  %v12609_v56 = vpop.f32.mrb[176].mxu0 }
0x1134   :  { %v8391_v16 = vadd.f32 1.0, %v15055_v49  ;;  %15064 = vpow2.f32 %v10374_v51  ;;  %v13283_v13 = vadd.f32 %v12609_v56, %v20483_v40  ;;  %v8270_v36 = vpop.f32.mrb[177].mxu0 }
0x1135   :  { %15066 = vrcp.f32 %v8392_v25  ;;  %v13284_v34 = vadd.f32 %v8270_v36, %v20484_v3 }
0x1136   :  { %v15057_v50 = vpop.eup %15056  ;;  %15068 = vrcp.f32 %v8391_v16  ;;  %v10376_v27 = vmul.f32 -1.442695, %v13283_v13 }
0x1137   :  { %v15059_v12 = vpop.eup %15058  ;;  %v8394_v29 = vadd.f32 1.0, %v15057_v50  ;;  %15070 = vpow2.f32 %v10373_v43  ;;  %v10375_v33 = vmul.f32 -1.442695, %v13284_v34  ;;  %v12612_v32 = vpop.f32.mrb[178].mxu0 }
0x1138   :  { %v8393_v5 = vadd.f32 1.0, %v15059_v12  ;;  %15072 = vpow2.f32 %v10376_v27  ;;  %v13285_v14 = vadd.f32 %v12612_v32, %v20485_v52  ;;  %v8280_v59 = vpop.f32.mrb[179].mxu0 }
0x1139   :  { %15074 = vrcp.f32 %v8394_v29  ;;  %v13286_v51 = vadd.f32 %v8280_v59, %v20486_v58 }
0x113a   :  { %v15061_v49 = vpop.eup %15060  ;;  %15076 = vrcp.f32 %v8393_v5  ;;  %v10378_v25 = vmul.f32 -1.442695, %v13285_v14 }
0x113b   :  { %v15063_v56 = vpop.eup %15062  ;;  %v8396_v36 = vadd.f32 1.0, %v15061_v49  ;;  %15078 = vpow2.f32 %v10375_v33  ;;  %v10377_v16 = vmul.f32 -1.442695, %v13286_v51  ;;  %v12615_v13 = vpop.f32.mrb[180].mxu0 }
0x113c   :  { %v8395_v50 = vadd.f32 1.0, %v15063_v56  ;;  %15080 = vpow2.f32 %v10378_v25  ;;  %v13287_v43 = vadd.f32 %v12615_v13, %v20892_v44  ;;  %v8290_v34 = vpop.f32.mrb[181].mxu0 }
0x113d   :  { %15082 = vrcp.f32 %v8396_v36  ;;  %v13288_v12 = vadd.f32 %v8290_v34, %v20893_v23 }
0x113e   :  { %v15065_v27 = vpop.eup %15064  ;;  %15084 = vrcp.f32 %v8395_v50 }
0x113f   :  { %v15067_v29 = vpop.eup %15066  ;;  %v8428_v32 = vadd.f32 1.0, %v15065_v27  ;;  %15086 = vpow2.f32 %v10377_v16  ;;  %v12618_v5 = vpop.f32.mrb[182].mxu0 }
0x1140   :  { %v15069_v14 = vpop.eup %15068  ;;  %15088 = vtanh.f32 %v13287_v43  ;;  %v13289_v33 = vadd.f32 %v12618_v5, %v20894_v1  ;;  %v8300_v59 = vpop.f32.mrb[183].mxu0 }
0x1141   :  { %v15071_v51 = vpop.eup %15070  ;;  %15090 = vrcp.f32 %v8428_v32  ;;  %v13290_v56 = vadd.f32 %v8300_v59, %v20895_v11 }
0x1142   :  { %v15073_v49 = vpop.eup %15072  ;;  %v8427_v25 = vadd.f32 1.0, %v15071_v51  ;;  %15092 = vtanh.f32 %v13288_v12 }
0x1143   :  { %v15075_v36 = vpop.eup %15074  ;;  %v8430_v13 = vadd.f32 1.0, %v15073_v49  ;;  %15094 = vtanh.f32 %v13289_v33  ;;  %v12621_v50 = vpop.f32.mrb[184].mxu0 }
0x1144   :  { %v15077_v34 = vpop.eup %15076  ;;  %15096 = vrcp.f32 %v8427_v25  ;;  %v13291_v16 = vadd.f32 %v12621_v50, %v20896_v41  ;;  %v8310_v27 = vpop.f32.mrb[185].mxu0 }
0x1145   :  { %v15079_v43 = vpop.eup %15078  ;;  %15098 = vrcp.f32 %v8430_v13  ;;  %v13292_v32 = vadd.f32 %v8310_v27, %v20897_v42 }
0x1146   :  { %v15081_v5 = vpop.eup %15080  ;;  %v8429_v1 = vadd.f32 1.0, %v15079_v43  ;;  %15100 = vtanh.f32 %v13290_v56 }
0x1147   :  { %v15083_v51 = vpop.eup %15082  ;;  %v8432_v12 = vadd.f32 1.0, %v15081_v5  ;;  %15102 = vtanh.f32 %v13291_v16  ;;  %v12624_v59 = vpop.f32.mrb[186].mxu0 }
0x1148   :  { %v15085_v11 = vpop.eup %15084  ;;  %15104 = vrcp.f32 %v8429_v1  ;;  %v13293_v33 = vadd.f32 %v12624_v59, %v20898_v63  ;;  %v8320_v49 = vpop.f32.mrb[187].mxu0 }
0x1149   :  { %v15087_v25 = vpop.eup %15086  ;;  %15106 = vrcp.f32 %v8432_v12  ;;  %v13294_v50 = vadd.f32 %v8320_v49, %v20494_v0 }
0x114a   :  { %v15089_v41 = vpop.eup %15088  ;;  %v8431_v13 = vadd.f32 1.0, %v15087_v25  ;;  %15108 = vtanh.f32 %v13292_v32  ;;  %v10380_v43 = vmul.f32 -1.442695, %v13293_v33 }
0x114b   :  { %v15091_v56 = vpop.eup %15090  ;;  %v8494_v23 = vmul.f32 %v15089_v41, %v15067_v29  ;;  %v10379_v27 = vmul.f32 -1.442695, %v13294_v50  ;;  %v12627_v42 = vpop.f32.mrb[188].mxu0 }
0x114c   :  { %v15093_v5 = vpop.eup %15092  ;;  %v8488_v16 = vmul.f32 %v15091_v56, %v19637_v8  ;;  %15110 = vrcp.f32 %v8431_v13  ;;  %v13295_v1 = vadd.f32 %v12627_v42, %v20495_v26  ;;  %v8330_v59 = vpop.f32.mrb[189].mxu0 }
0x114d   :  { %v15095_v63 = vpop.eup %15094  ;;  %v8493_v44 = vmul.f32 %v15093_v5, %v15069_v14  ;;  %15112 = vpow2.f32 %v10380_v43  ;;  %v13296_v12 = vadd.f32 %v8330_v59, %v20496_v19 }
0x114e   :  { %v15097_v49 = vpop.eup %15096  ;;  %v19947_v25 = vadd.f32 %v8494_v23, %v8488_v16  ;;  %v8496_v32 = vmul.f32 %v15095_v63, %v15075_v36  ;;  %15114 = vpow2.f32 %v10379_v27  ;;  %v10382_v41 = vmul.f32 -1.442695, %v13295_v1 }
0x114f   :  { %v15099_v29 = vpop.eup %15098  ;;  %v8487_v33 = vmul.f32 %v15097_v49, %v19642_v54  ;;  %v10381_v50 = vmul.f32 -1.442695, %v13296_v12  ;;  %v12630_v8 = vpop.f32.mrb[190].mxu0 }
0x1150   :  { %v15101_v13 = vpop.eup %15100  ;;  %v8490_v42 = vmul.f32 %v15099_v29, %v19645_v9  ;;  %v13297_v56 = vadd.f32 %v12630_v8, %v16244_v30  ;;  %v8340_v14 = vpop.f32.mrb[191].mxu0  ;;  %15116 = vpow2.f32 %v10382_v41 }
0x1151   :  { %v15103_v43 = vpop.eup %15102  ;;  %v19952_v5 = vadd.f32 %v8493_v44, %v8487_v33  ;;  %v8495_v59 = vmul.f32 %v15101_v13, %v15077_v34  ;;  %v13298_v23 = vadd.f32 %v8340_v14, %v16247_v28  ;;  %15118 = vpow2.f32 %v10381_v50 }
0x1152   :  { %v15105_v63 = vpop.eup %15104  ;;  %v19955_v36 = vadd.f32 %v8496_v32, %v8490_v42  ;;  %v8498_v27 = vmul.f32 %v15103_v43, %v15083_v51  ;;  %v10384_v54 = vmul.f32 -1.442695, %v13297_v56 }
0x1153   :  { %v15107_v16 = vpop.eup %15106  ;;  %v8489_v1 = vmul.f32 %v15105_v63, %v19649_v38  ;;  %v10383_v9 = vmul.f32 -1.442695, %v13298_v23 }
0x1154   :  { %v15109_v12 = vpop.eup %15108  ;;  %v8492_v49 = vmul.f32 %v15107_v16, %v19651_v20  ;;  %15120 = vpow2.f32 %v10384_v54 }
0x1155   :  { %v19959_v29 = vadd.f32 %v8495_v59, %v8489_v1  ;;  %v8497_v44 = vmul.f32 %v15109_v12, %v15085_v11  ;;  %15122 = vpow2.f32 %v10383_v9 }
0x1156   :  { %v15111_v34 = vpop.eup %15110  ;;  %v19961_v41 = vadd.f32 %v8498_v27, %v8492_v49  ;;  %15124 = vtanh.f32 %v19947_v25 }
0x1157   :  { %v15113_v32 = vpop.eup %15112  ;;  %v8491_v51 = vmul.f32 %v15111_v34, %v19656_v37  ;;  %15126 = vtanh.f32 %v19952_v5 }
0x1158   :  { %v15115_v33 = vpop.eup %15114  ;;  %v8470_v50 = vadd.f32 1.0, %v15113_v32 }
0x1159   :  { %v19966_v38 = vadd.f32 %v8497_v44, %v8491_v51  ;;  %v8469_v20 = vadd.f32 1.0, %v15115_v33 }
0x115a   :  { %15128 = vrcp.f32 %v8470_v50  ;;  %v15117_v8 = vpop.eup %15116 }
0x115b   :  { %15130 = vtanh.f32 %v19955_v36  ;;  %v15119_v11 = vpop.eup %15118  ;;  %v8472_v13 = vadd.f32 1.0, %v15117_v8 }
0x115c   :  { %15132 = vrcp.f32 %v8469_v20  ;;  %v8471_v42 = vadd.f32 1.0, %v15119_v11 }
0x115d   :  { %15134 = vtanh.f32 %v19959_v29 }
0x115e   :  { %15136 = vrcp.f32 %v8472_v13  ;;  %v15121_v37 = vpop.eup %15120 }
0x115f   :  { %15138 = vrcp.f32 %v8471_v42  ;;  %v15123_v56 = vpop.eup %15122  ;;  %v8474_v14 = vadd.f32 1.0, %v15121_v37 }
0x1160   :  { %15140 = vtanh.f32 %v19961_v41  ;;  %v8473_v43 = vadd.f32 1.0, %v15123_v56  ;;  %v15125_v59 = vpop.eup %15124 }
0x1161   :  { %15142 = vtanh.f32 %v19966_v38  ;;  %v15127_v23 = vpop.eup %15126 }
0x1162   :  { %15144 = vrcp.f32 %v8474_v14 }
0x1163   :  { %15146 = vrcp.f32 %v8473_v43 }
0x1164   :  { %v15129_v63 = vpop.eup %15128 }
0x1165   :  { %v15131_v27 = vpop.eup %15130  ;;  %v8512_v54 = vmul.f32 %v15129_v63, %v15125_v59  ;;  %v20908_v63 = vld [vmem:[#allocation23_spill] sm:$0xff] }
0x1166   :  { %v15133_v16 = vpop.eup %15132 }
0x1167   :  { %v15135_v1 = vpop.eup %15134  ;;  %v8511_v9 = vmul.f32 %v15133_v16, %v15127_v23 }
0x1168   :  { %v15137_v12 = vpop.eup %15136 }
0x1169   :  { %v15139_v49 = vpop.eup %15138  ;;  %v12909_v44 = vpack.c.bf16 %v8512_v54, %v8511_v9  ;;  %v8514_v34 = vmul.f32 %v15137_v12, %v15131_v27 }
0x116a   :  { %v15141_v32 = vpop.eup %15140  ;;  %v8513_v51 = vmul.f32 %v15139_v49, %v15135_v1 }
0x116b   :  { %v15143_v33 = vpop.eup %15142  ;;  %12910 = vmatprep.subr.bf16.mxu1 %v12909_v44 }
0x116c   :  { %v15145_v50 = vpop.eup %15144  ;;  %12912 = vmatpush3.bf16.msra.mxu1 %v12909_v44  ;;  %v12913_v20 = vpack.c.bf16 %v8514_v34, %v8513_v51 }
0x116d   :  { %v15147_v8 = vpop.eup %15146  ;;  %v8516_v11 = vmul.f32 %v15145_v50, %v15141_v32 }
0x116e   :  { %12914 = vmatprep.subr.bf16.mxu1 %v12913_v20  ;;  %v8515_v13 = vmul.f32 %v15147_v8, %v15143_v33 }
0x1170   :  { %12916 = vmatpush3.bf16.msra.mxu1 %v12913_v20  ;;  %v12917_v42 = vpack.c.bf16 %v8516_v11, %v8515_v13 }
0x1172   :  { %12918 = vmatprep.subr.bf16.mxu1 %v12917_v42 }
0x1174   :  { %12920 = vmatpush3.bf16.msra.mxu1 %v12917_v42 }
0x1177   :  { %12682 = vmatmul.mubr.msk.f32.vlgmr.msra.gmra.mrb[172].mxu1 %vm490_vm2, %v19665_v2  ;;  %v20902_v2 = vld [vmem:[#allocation10_spill] sm:$0xff] }
0x1178   :  { %12684 = vmatprep.mubr.msk.f32.mxu1 %vm490_vm2, %v19672_v17  ;;  %v20903_v17 = vld [vmem:[#allocation11_spill] sm:$0xff] }
0x117b   :  { %12685 = vmatmul.mubr.msk.f32.gmra.mrb[174].mxu1 %vm490_vm2, %v19679_v35  ;;  %v20904_v35 = vld [vmem:[#allocation12_spill] sm:$0xff] }
0x117c   :  { %12687 = vmatprep.mubr.msk.f32.mxu1 %vm490_vm2, %v19686_v7  ;;  %v9060_v7 = vld [vmem:[%s20105_s5] sm:$0xff] }
0x117d   :  { %12729 = vmatprep.mubr.msk.f32.mxu0 %vm490_vm2, %v9060_v7 }
0x117f   :  { %12688 = vmatmul.mubr.msk.f32.gmra.mrb[176].mxu1 %vm490_vm2, %v19693_v6 }
0x1180   :  { %12690 = vmatprep.mubr.msk.f32.mxu1 %vm490_vm2, %v19700_v22 }
0x1183   :  { %12691 = vmatmul.mubr.msk.f32.gmra.mrb[178].mxu1 %vm490_vm2, %v19707_v39 }
0x1184   :  { %12693 = vmatprep.mubr.msk.f32.mxu1 %vm490_vm2, %v19714_v61  ;;  %v20905_v61 = vld [vmem:[#allocation24_spill] sm:$0xff] }
0x1187   :  { %12694 = vmatmul.mubr.msk.f32.gmra.mrb[180].mxu1 %vm490_vm2, %v19721_v57 }
0x1188   :  { %12696 = vmatprep.mubr.msk.f32.mxu1 %vm490_vm2, %v19728_v21 }
0x118b   :  { %12697 = vmatmul.mubr.msk.f32.gmra.mrb[182].mxu1 %vm490_vm2, %v19735_v46 }
0x118c   :  { %12699 = vmatprep.mubr.msk.f32.mxu1 %vm490_vm2, %v19742_v60 }
0x118f   :  { %12700 = vmatmul.mubr.msk.f32.gmra.mrb[184].mxu1 %vm490_vm2, %v19749_v4 }
0x1190   :  { %12702 = vmatprep.mubr.msk.f32.mxu1 %vm490_vm2, %v19756_v62 }
0x1193   :  { %12703 = vmatmul.mubr.msk.f32.gmra.mrb[186].mxu1 %vm490_vm2, %v19763_v48  ;;  %v20906_v48 = vld [vmem:[#allocation28_spill] sm:$0xff] }
0x1194   :  { %12705 = vmatprep.mubr.msk.f32.mxu1 %vm490_vm2, %v19770_v10 }
0x1197   :  { %12706 = vmatmul.mubr.msk.f32.gmra.mrb[188].mxu1 %vm490_vm2, %v19777_v18 }
0x1198   :  { %12708 = vmatprep.mubr.msk.f32.mxu1 %vm490_vm2, %v19784_v24 }
0x119b   :  { %12709 = vmatmul.mubr.msk.f32.gmra.mrb[190].mxu1 %vm490_vm2, %v19791_v31 }
0x119c   :  { %12711 = vmatprep.mubr.msk.f32.mxu1 %vm490_vm2, %v19798_v53  ;;  %v20907_v53 = vld [vmem:[#allocation31_spill] sm:$0xff] }
0x119f   :  { %12712 = vmatmul.mubr.msk.f32.gmra.mrb[192].mxu1 %vm490_vm2, %v20902_v2 }
0x11a0   :  { %12714 = vmatprep.mubr.msk.f32.mxu1 %vm490_vm2, %v20903_v17 }
0x11a3   :  { %12715 = vmatmul.mubr.msk.f32.gmra.mrb[194].mxu1 %vm490_vm2, %v20904_v35 }
0x124a   :  { %v12683_v6 = vpop.f32.mrb[172].mxu1 }
0x124b   :  { %v13299_v22 = vadd.f32 %v12683_v6, %v20475_v15  ;;  %v8773_v39 = vpop.f32.mrb[173].mxu1 }
0x124c   :  { %v13300_v57 = vadd.f32 %v8773_v39, %v20905_v61  ;;  %v20909_v39 = vld [vmem:[#allocation35_spill] sm:$0xff] }
0x124d   :  { %v10436_v21 = vmul.f32 -1.442695, %v13299_v22 }
0x124e   :  { %v10435_v46 = vmul.f32 -1.442695, %v13300_v57  ;;  %v12686_v60 = vpop.f32.mrb[174].mxu1 }
0x124f   :  { %15148 = vpow2.f32 %v10436_v21  ;;  %v13301_v4 = vadd.f32 %v12686_v60, %v20477_v45  ;;  %v8783_v62 = vpop.f32.mrb[175].mxu1 }
0x1250   :  { %15150 = vpow2.f32 %v10435_v46  ;;  %v13302_v10 = vadd.f32 %v8783_v62, %v20906_v48  ;;  %v20911_v48 = vld [vmem:[#allocation41_spill] sm:$0xff] }
0x1251   :  { %v10438_v18 = vmul.f32 -1.442695, %v13301_v4 }
0x1252   :  { %v10437_v24 = vmul.f32 -1.442695, %v13302_v10  ;;  %v12689_v31 = vpop.f32.mrb[176].mxu1 }
0x1253   :  { %15152 = vpow2.f32 %v10438_v18  ;;  %v13303_v37 = vadd.f32 %v12689_v31, %v20907_v53  ;;  %v8793_v15 = vpop.f32.mrb[177].mxu1 }
0x1254   :  { %15154 = vpow2.f32 %v10437_v24  ;;  %v13304_v56 = vadd.f32 %v8793_v15, %v20480_v55 }
0x1255   :  { %v10440_v14 = vmul.f32 -1.442695, %v13303_v37  ;;  %v20912_v37 = vld [vmem:[#allocation42_spill] sm:$0xff] }
0x1256   :  { %v10439_v43 = vmul.f32 -1.442695, %v13304_v56  ;;  %v12692_v59 = vpop.f32.mrb[178].mxu1 }
0x1257   :  { %15156 = vpow2.f32 %v10440_v14  ;;  %v13305_v45 = vadd.f32 %v12692_v59, %v20481_v47  ;;  %v8803_v23 = vpop.f32.mrb[179].mxu1 }
0x1258   :  { %15158 = vpow2.f32 %v10439_v43  ;;  %v13306_v27 = vadd.f32 %v8803_v23, %v20908_v63 }
0x1259   :  { %v15149_v54 = vpop.eup %15148  ;;  %v10442_v16 = vmul.f32 -1.442695, %v13305_v45  ;;  %v20913_v45 = vld [vmem:[#allocation43_spill] sm:$0xff] }
0x125a   :  { %v15151_v1 = vpop.eup %15150  ;;  %v8935_v9 = vadd.f32 1.0, %v15149_v54  ;;  %v10441_v12 = vmul.f32 -1.442695, %v13306_v27  ;;  %v12695_v49 = vpop.f32.mrb[180].mxu1 }
0x125b   :  { %v8934_v44 = vadd.f32 1.0, %v15151_v1  ;;  %15160 = vpow2.f32 %v10442_v16  ;;  %v13307_v55 = vadd.f32 %v12695_v49, %v20483_v40  ;;  %v8813_v34 = vpop.f32.mrb[181].mxu1  ;;  %v20914_v1 = vld [vmem:[#allocation44_spill] sm:$0xff] }
0x125c   :  { %15162 = vrcp.f32 %v8935_v9  ;;  %v13308_v32 = vadd.f32 %v8813_v34, %v20484_v3  ;;  %v20915_v34 = vld [vmem:[#allocation37_spill] sm:$0xff] }
0x125d   :  { %v15153_v51 = vpop.eup %15152  ;;  %15164 = vrcp.f32 %v8934_v44  ;;  %v10444_v47 = vmul.f32 -1.442695, %v13307_v55 }
0x125e   :  { %v15155_v33 = vpop.eup %15154  ;;  %v8937_v50 = vadd.f32 1.0, %v15153_v51  ;;  %15166 = vpow2.f32 %v10441_v12  ;;  %v10443_v20 = vmul.f32 -1.442695, %v13308_v32  ;;  %v12698_v8 = vpop.f32.mrb[182].mxu1 }
0x125f   :  { %v8936_v11 = vadd.f32 1.0, %v15155_v33  ;;  %15168 = vpow2.f32 %v10444_v47  ;;  %v13309_v13 = vadd.f32 %v12698_v8, %v20485_v52  ;;  %v8823_v42 = vpop.f32.mrb[183].mxu1  ;;  %v20910_v52 = vld [vmem:[#allocation36_spill] sm:$0xff] }
0x1260   :  { %15170 = vrcp.f32 %v8937_v50  ;;  %v13310_v40 = vadd.f32 %v8823_v42, %v20486_v58 }
0x1261   :  { %v15157_v2 = vpop.eup %15156  ;;  %15172 = vrcp.f32 %v8936_v11  ;;  %v10446_v17 = vmul.f32 -1.442695, %v13309_v13 }
0x1262   :  { %v15159_v3 = vpop.eup %15158  ;;  %v8939_v35 = vadd.f32 1.0, %v15157_v2  ;;  %15174 = vpow2.f32 %v10443_v20  ;;  %v10445_v7 = vmul.f32 -1.442695, %v13310_v40  ;;  %v12701_v6 = vpop.f32.mrb[184].mxu1 }
0x1263   :  { %v8938_v22 = vadd.f32 1.0, %v15159_v3  ;;  %15176 = vpow2.f32 %v10446_v17  ;;  %v13311_v61 = vadd.f32 %v12701_v6, %v20909_v39  ;;  %v8833_v57 = vpop.f32.mrb[185].mxu1 }
0x1264   :  { %15178 = vrcp.f32 %v8939_v35  ;;  %v13312_v46 = vadd.f32 %v8833_v57, %v20910_v52 }
0x1265   :  { %v15161_v21 = vpop.eup %15160  ;;  %15180 = vrcp.f32 %v8938_v22 }
0x1266   :  { %v15163_v60 = vpop.eup %15162  ;;  %v8971_v58 = vadd.f32 1.0, %v15161_v21  ;;  %15182 = vpow2.f32 %v10445_v7  ;;  %v12704_v4 = vpop.f32.mrb[186].mxu1 }
0x1267   :  { %v15165_v62 = vpop.eup %15164  ;;  %15184 = vtanh.f32 %v13311_v61  ;;  %v13313_v10 = vadd.f32 %v12704_v4, %v20911_v48  ;;  %v8843_v18 = vpop.f32.mrb[187].mxu1 }
0x1268   :  { %v15167_v24 = vpop.eup %15166  ;;  %15186 = vrcp.f32 %v8971_v58  ;;  %v13314_v15 = vadd.f32 %v8843_v18, %v20912_v37 }
0x1269   :  { %v15169_v31 = vpop.eup %15168  ;;  %v8970_v53 = vadd.f32 1.0, %v15167_v24  ;;  %15188 = vtanh.f32 %v13312_v46 }
0x126a   :  { %v15171_v56 = vpop.eup %15170  ;;  %v8973_v14 = vadd.f32 1.0, %v15169_v31  ;;  %15190 = vtanh.f32 %v13313_v10  ;;  %v12707_v43 = vpop.f32.mrb[188].mxu1 }
0x126b   :  { %v15173_v59 = vpop.eup %15172  ;;  %15192 = vrcp.f32 %v8970_v53  ;;  %v13315_v23 = vadd.f32 %v12707_v43, %v20913_v45  ;;  %v8853_v63 = vpop.f32.mrb[189].mxu1 }
0x126c   :  { %v15175_v27 = vpop.eup %15174  ;;  %15194 = vrcp.f32 %v8973_v14  ;;  %v13316_v9 = vadd.f32 %v8853_v63, %v20914_v1 }
0x126d   :  { %v15177_v54 = vpop.eup %15176  ;;  %v8972_v16 = vadd.f32 1.0, %v15175_v27  ;;  %15196 = vtanh.f32 %v13314_v15 }
0x126e   :  { %v15179_v12 = vpop.eup %15178  ;;  %v8975_v49 = vadd.f32 1.0, %v15177_v54  ;;  %15198 = vtanh.f32 %v13315_v23  ;;  %v12710_v44 = vpop.f32.mrb[190].mxu1 }
0x126f   :  { %v15181_v55 = vpop.eup %15180  ;;  %15200 = vrcp.f32 %v8972_v16  ;;  %v13317_v32 = vadd.f32 %v12710_v44, %v20915_v34  ;;  %v8863_v51 = vpop.f32.mrb[191].mxu1 }
0x1270   :  { %v15183_v47 = vpop.eup %15182  ;;  %15202 = vrcp.f32 %v8975_v49  ;;  %v13318_v33 = vadd.f32 %v8863_v51, %v20494_v0 }
0x1271   :  { %v15185_v50 = vpop.eup %15184  ;;  %v8974_v20 = vadd.f32 1.0, %v15183_v47  ;;  %15204 = vtanh.f32 %v13316_v9  ;;  %v10448_v8 = vmul.f32 -1.442695, %v13317_v32 }
0x1272   :  { %v15187_v11 = vpop.eup %15186  ;;  %v9037_v13 = vmul.f32 %v15185_v50, %v15163_v60  ;;  %v10447_v42 = vmul.f32 -1.442695, %v13318_v33  ;;  %v12713_v40 = vpop.f32.mrb[192].mxu1 }
0x1273   :  { %v15189_v2 = vpop.eup %15188  ;;  %v9031_v17 = vmul.f32 %v15187_v11, %v19947_v25  ;;  %15206 = vrcp.f32 %v8974_v20  ;;  %v13319_v3 = vadd.f32 %v12713_v40, %v20495_v26  ;;  %v8873_v35 = vpop.f32.mrb[193].mxu1 }
0x1274   :  { %v15191_v7 = vpop.eup %15190  ;;  %v9036_v6 = vmul.f32 %v15189_v2, %v15165_v62  ;;  %15208 = vpow2.f32 %v10448_v8  ;;  %v13320_v0 = vadd.f32 %v8873_v35, %v20496_v19 }
0x1275   :  { %v15193_v22 = vpop.eup %15192  ;;  %v9043_v39 = vadd.f32 %v9037_v13, %v9031_v17  ;;  %v9039_v61 = vmul.f32 %v15191_v7, %v15171_v56  ;;  %15210 = vpow2.f32 %v10447_v42  ;;  %v10450_v57 = vmul.f32 -1.442695, %v13319_v3 }
0x1276   :  { %v15195_v21 = vpop.eup %15194  ;;  %v9030_v52 = vmul.f32 %v15193_v22, %v19952_v5  ;;  %v10449_v46 = vmul.f32 -1.442695, %v13320_v0  ;;  %v12716_v60 = vpop.f32.mrb[194].mxu1  ;;  %v9061_v22 = vld [vmem:[%s20105_s5 + $0x8] sm:$0xff] }
0x1277   :  { %v15197_v25 = vpop.eup %15196  ;;  %v9033_v58 = vmul.f32 %v15195_v21, %v19955_v36  ;;  %v13321_v26 = vadd.f32 %v12716_v60, %v16244_v30  ;;  %v8883_v4 = vpop.f32.mrb[195].mxu1  ;;  %15212 = vpow2.f32 %v10450_v57  ;;  %v9064_v57 = vld [vmem:[%s20105_s5 + $0x20] sm:$0xff]  ;;  %v9065_v21 = vld [vmem:[%s20105_s5 + $0x28] sm:$0xff] }
0x1278   :  { %v15199_v62 = vpop.eup %15198  ;;  %v9042_v48 = vadd.f32 %v9036_v6, %v9030_v52  ;;  %v9038_v10 = vmul.f32 %v15197_v25, %v15173_v59  ;;  %v13322_v19 = vadd.f32 %v8883_v4, %v16247_v28  ;;  %15214 = vpow2.f32 %v10449_v46  ;;  %v9066_v52 = vld [vmem:[%s20105_s5 + $0x30] sm:$0xff]  ;;  %v9067_v46 = vld [vmem:[%s20105_s5 + $0x38] sm:$0xff]  ;;  %v9079_v60 = vpop.permute.xlu0 %9078 }
0x1279   :  { %v15201_v18 = vpop.eup %15200  ;;  %v9045_v24 = vadd.f32 %v9039_v61, %v9033_v58  ;;  %v9041_v31 = vmul.f32 %v15199_v62, %v15179_v12  ;;  %v10452_v53 = vmul.f32 -1.442695, %v13321_v26  ;;  %v9063_v61 = vld [vmem:[%s20105_s5 + $0x18] sm:$0xff]  ;;  %v9084_v25 = vpop.permute.xlu1 %9083 }
0x127a   :  { %v15203_v5 = vpop.eup %15202  ;;  %v9032_v37 = vmul.f32 %v15201_v18, %v19959_v29  ;;  %v10451_v15 = vmul.f32 -1.442695, %v13322_v19 }
0x127b   :  { %v15205_v56 = vpop.eup %15204  ;;  %v9035_v36 = vmul.f32 %v15203_v5, %v19961_v41  ;;  %15216 = vpow2.f32 %v10452_v53 }
0x127c   :  { %v9044_v30 = vadd.f32 %v9038_v10, %v9032_v37  ;;  %v9040_v14 = vmul.f32 %v15205_v56, %v15181_v55  ;;  %15218 = vpow2.f32 %v10451_v15  ;;  %v9089_v58 = vpop.permute.xlu0 %9088 }
0x127d   :  { %v15207_v43 = vpop.eup %15206  ;;  %v9047_v59 = vadd.f32 %v9041_v31, %v9035_v36  ;;  %15220 = vtanh.f32 %v9043_v39  ;;  %v9062_v39 = vld [vmem:[%s20105_s5 + $0x10] sm:$0xff]  ;;  %v9094_v26 = vpop.permute.xlu1 %9093  ;;  %s15609_s5 = smov [#allocation3]  }
0x127e   :  { %v15209_v45 = vpop.eup %15208  ;;  %v9034_v28 = vmul.f32 %v15207_v43, %v19966_v38  ;;  %15222 = vtanh.f32 %v9042_v48  ;;  %s9359_s24 = sshll.u32 %s15609_s5, 4  ;;  %s9360_s24 = int_to_ptr.vmem [resolvable:$true] %s9359_s24 }
0x127f   :  { %v15211_v23 = vpop.eup %15210  ;;  %v9013_v63 = vadd.f32 1.0, %v15209_v45  ;;  %s15583_s6 = scalar_lea.vmem %s9360_s24, 16  ;;  %s15587_s25 = scalar_lea.vmem %s9360_s24, 32 }
0x1280   :  { %v9046_v27 = vadd.f32 %v9040_v14, %v9034_v28  ;;  %v9012_v54 = vadd.f32 1.0, %v15211_v23  ;;  %v9264_v4 = vpop.permute.xlu0 %9263  ;;  %p15584_p0 = scmp.ne.s32.totalorder %s9360_s24, %s15583_s6  ;;  %p15588_p1 = scmp.lt.s32.totalorder %s9360_s24, %s9360_s24 }
0x1281   :  { %15224 = vrcp.f32 %v9013_v63  ;;  %v15213_v29 = vpop.eup %15212  ;;  %v9269_v62 = vpop.permute.xlu1 %9268  ;;  %p15589_p2 = scmp.lt.s32.totalorder %s15587_s25, %s15583_s6 }
0x1282   :  { %15226 = vtanh.f32 %v9045_v24  ;;  %v15215_v16 = vpop.eup %15214  ;;  %v9015_v41 = vadd.f32 1.0, %v15213_v29 }
0x1283   :  { %15228 = vrcp.f32 %v9012_v54  ;;  %v9014_v1 = vadd.f32 1.0, %v15215_v16  ;;  %p15590_p3 = por %p15589_p2, %p15588_p1 }
0x1284   :  { %15230 = vtanh.f32 %v9044_v30  ;;  %v9099_v48 = vpop.permute.xlu0 %9098 }
0x1285   :  { %15232 = vrcp.f32 %v9015_v41  ;;  %v15217_v9 = vpop.eup %15216  ;;  %v9274_v10 = vpop.permute.xlu1 %9273  ;;  %p15591_p4 = pnand %p15590_p3, %p15584_p0 }
0x1286   :  { %15234 = vrcp.f32 %v9014_v1  ;;  %v15219_v12 = vpop.eup %15218  ;;  %v9017_v38 = vadd.f32 1.0, %v15217_v9 }
0x1287   :  { %15236 = vtanh.f32 %v9047_v59  ;;  %v9016_v49 = vadd.f32 1.0, %v15219_v12  ;;  %v15221_v44 = vpop.eup %15220 }
0x1288   :  { %15238 = vtanh.f32 %v9046_v27  ;;  %v15223_v55 = vpop.eup %15222  ;;  %v9104_v19 = vpop.permute.xlu0 %9103 }
0x1289   :  { %15240 = vrcp.f32 %v9017_v38  ;;  %v9279_v18 = vpop.permute.xlu1 %9278 }
0x128a   :  { %15242 = vrcp.f32 %v9016_v49 }
0x128b   :  { %v15225_v34 = vpop.eup %15224 }
0x128c   :  { %v15227_v32 = vpop.eup %15226  ;;  %v9055_v51 = vmul.f32 %v15225_v34, %v15221_v44  ;;  %v9109_v15 = vpop.permute.xlu0 %9108 }
0x128d   :  { %v15229_v47 = vpop.eup %15228  ;;  %v9284_v30 = vpop.permute.xlu1 %9283 }
0x128e   :  { %v15231_v33 = vpop.eup %15230  ;;  %v9054_v50 = vmul.f32 %v15229_v47, %v15223_v55 }
0x128f   :  { %v15233_v20 = vpop.eup %15232 }
0x1290   :  { %v15235_v8 = vpop.eup %15234  ;;  %v12921_v11 = vpack.c.bf16 %v9055_v51, %v9054_v50  ;;  %v9057_v13 = vmul.f32 %v15233_v20, %v15227_v32  ;;  %v9114_v49 = vpop.permute.xlu0 %9113 }
0x1291   :  { %v15237_v42 = vpop.eup %15236  ;;  %v9056_v40 = vmul.f32 %v15235_v8, %v15231_v33  ;;  %v9289_v44 = vpop.permute.xlu1 %9288 }
0x1292   :  { %v15239_v2 = vpop.eup %15238  ;;  %12922 = vmatprep.subr.bf16.mxu0 %v12921_v11 }
0x1293   :  { %v15241_v17 = vpop.eup %15240  ;;  %12924 = vmatpush3.bf16.msra.mxu0 %v12921_v11  ;;  %v12925_v3 = vpack.c.bf16 %v9057_v13, %v9056_v40 }
0x1294   :  { %v15243_v35 = vpop.eup %15242  ;;  %v9059_v7 = vmul.f32 %v15241_v17, %v15237_v42 }
0x1295   :  { %12926 = vmatprep.subr.bf16.mxu0 %v12925_v3  ;;  %v9058_v6 = vmul.f32 %v15243_v35, %v15239_v2  ;;  %v9299_v35 = vpop.permute.xlu1 %9298 }
0x1297   :  { %12928 = vmatpush3.bf16.msra.mxu0 %v12925_v3  ;;  %v12929_v0 = vpack.c.bf16 %v9059_v7, %v9058_v6  ;;  %v9294_v3 = vpop.permute.xlu0 %9293 }
0x1299   :  { %12930 = vmatprep.subr.bf16.mxu0 %v12929_v0 }
0x129b   :  { %12932 = vmatpush3.bf16.msra.mxu0 %v12929_v0 }
0x129e   :  { %12730 = vmatmul.mubr.msk.f32.vlgmr.msra.gmra.mrb[192].mxu0 %vm490_vm2, %v9061_v22 }
0x129f   :  { %12732 = vmatprep.mubr.msk.f32.mxu0 %vm490_vm2, %v9062_v39 }
0x12a2   :  { %12733 = vmatmul.mubr.msk.f32.gmra.mrb[194].mxu0 %vm490_vm2, %v9063_v61 }
0x12a3   :  { %12735 = vmatprep.mubr.msk.f32.mxu0 %vm490_vm2, %v9064_v57 }
0x12a6   :  { %12736 = vmatmul.mubr.msk.f32.gmra.mrb[196].mxu0 %vm490_vm2, %v9065_v21 }
0x12a7   :  { %12738 = vmatprep.mubr.msk.f32.mxu0 %vm490_vm2, %v9066_v52  ;;  %v9337_v52 = vlaneseq }
0x12aa   :  { %12739 = vmatmul.mubr.msk.f32.gmra.mrb[198].mxu0 %vm490_vm2, %v9067_v46 }
0x1371   :  { %v12731_v24 = vpop.f32.mrb[192].mxu0 }
0x1372   :  { %v9212_v31 = vadd.f32 %v12731_v24, %v9084_v25  ;;  %v9206_v53 = vpop.f32.mrb[193].mxu0  ;;  %v9338_v25 = vshrl.u32 %v9337_v52, 7 }
0x1373   :  { %v9207_v5 = vadd.f32 %v9206_v53, %v9079_v60 }
0x1374   :  { %v9246_v37 = vmax.f32 %v9212_v31, 0.0 }
0x1375   :  { %v9245_v56 = vmax.f32 %v9207_v5, 0.0  ;;  %v12734_v36 = vpop.f32.mrb[194].mxu0 }
0x1376   :  { %v9302_v14 = vmul.f32 %v9269_v62, %v9246_v37  ;;  %v9222_v43 = vadd.f32 %v12734_v36, %v9094_v26  ;;  %v9216_v59 = vpop.f32.mrb[195].mxu0 }
0x1377   :  { %v9301_v45 = vmul.f32 %v9264_v4, %v9245_v56  ;;  %v9217_v28 = vadd.f32 %v9216_v59, %v9089_v58  ;;  %v9339_v4 = vsub.s32 0, %v9338_v25 }
0x1378   :  { %v9311_v23 = vsel %vm9309_vm3, %v9302_v14, 0.0  ;;  %v9248_v63 = vmax.f32 %v9222_v43, 0.0 }
0x1379   :  { %v9310_v27 = vsel %vm9309_vm3, %v9301_v45, 0.0  ;;  %v9247_v54 = vmax.f32 %v9217_v28, 0.0  ;;  %v12737_v29 = vpop.f32.mrb[196].mxu0 }
0x137a   :  { %v9312_v16 = vadd.f32 %v9311_v23, %v9310_v27  ;;  %v9232_v41 = vadd.f32 %v12737_v29, %v9104_v19  ;;  %v9226_v1 = vpop.f32.mrb[197].mxu0  ;;  %v9304_v9 = vmul.f32 %v9279_v18, %v9248_v63 }
0x137b   :  { %v9303_v12 = vmul.f32 %v9274_v10, %v9247_v54  ;;  %v9227_v38 = vadd.f32 %v9226_v1, %v9099_v48  ;;  %v9335_v48 = vpop.permute.xlu0 %9334 }
0x137c   :  { %v9250_v55 = vmax.f32 %v9232_v41, 0.0  ;;  %v9315_v20 = vsel %vm9309_vm3, %v9304_v9, 0.0  ;;  %v9340_v19 = vrot.slane %v9335_v48, %v9339_v4 }
0x137d   :  { %v9313_v34 = vsel %vm9309_vm3, %v9303_v12, 0.0  ;;  %v9249_v32 = vmax.f32 %v9227_v38, 0.0  ;;  %v12740_v51 = vpop.f32.mrb[198].mxu0 }
0x137e   :  { %v9314_v47 = vadd.f32 %v9313_v34, %v9312_v16  ;;  %v9242_v33 = vadd.f32 %v12740_v51, %v9114_v49  ;;  %v9236_v50 = vpop.f32.mrb[199].mxu0  ;;  %v9306_v8 = vmul.f32 %v9289_v44, %v9250_v55 }
0x137f   :  { %v9305_v11 = vmul.f32 %v9284_v30, %v9249_v32  ;;  %v9237_v13 = vadd.f32 %v9236_v50, %v9109_v15 }
0x1380   :  { %v9316_v42 = vadd.f32 %v9315_v20, %v9314_v47  ;;  %v9252_v40 = vmax.f32 %v9242_v33, 0.0  ;;  %v9319_v6 = vsel %vm9309_vm3, %v9306_v8, 0.0 }
0x1381   :  { %v9317_v2 = vsel %vm9309_vm3, %v9305_v11, 0.0  ;;  %v9251_v17 = vmax.f32 %v9237_v13, 0.0 }
0x1382   :  { %v9318_v7 = vadd.f32 %v9317_v2, %v9316_v42  ;;  %v9308_v0 = vmul.f32 %v9299_v35, %v9252_v40 }
0x1383   :  { %v9307_v22 = vmul.f32 %v9294_v3, %v9251_v17 }
0x1384   :  { %v9320_v39 = vadd.f32 %v9319_v6, %v9318_v7  ;;  %v9323_v21 = vsel %vm9309_vm3, %v9308_v0, 0.0 }
0x1385   :  { %v9321_v61 = vsel %vm9309_vm3, %v9307_v22, 0.0 }
0x1386   :  { %v9322_v57 = vadd.f32 %v9321_v61, %v9320_v39 }
0x1388   :  { %v9324_v46 = vadd.f32 %v9323_v21, %v9322_v57 }
0x138a   :  { %v9325_v60 = vrot.slane %v9324_v46, 4 }
0x138c   :  { %v9326_v58 = vadd.f32 %v9325_v60, %v9324_v46 }
0x138e   :  { %v9327_v26 = vrot.slane %v9326_v58, 2 }
0x1390   :  { %v9328_v62 = vadd.f32 %v9327_v26, %v9326_v58 }
0x1392   :  { %v9329_v10 = vrot.slane %v9328_v62, 1 }
0x1394   :  { %v9330_v18 = vadd.f32 %v9329_v10, %v9328_v62 }
0x1396   :  { %v9341_v24 = vadd.f32 %v9340_v19, %v9330_v18 }
0x1398   :  { %v9342_v31 = vmax.f32 %v9341_v24, 0.0 }
0x139a   :  { %v10461_v53 = vmul.f32 -1.442695, %v9342_v31 }
0x139c   :  { %15244 = vpow2.f32 %v10461_v53 }
0x13a6   :  { %v15245_v5 = vpop.eup %15244 }
0x13a7   :  { %v9346_v37 = vadd.f32 1.0, %v15245_v5 }
0x13a9   :  { %15246 = vrcp.f32 %v9346_v37 }
0x13b3   :  { %v15247_v15 = vpop.eup %15246 }
0x13b4   :  { %v9349_v56 = vmul.f32 0.998, %v15247_v15 }
0x13b6   :  { %v9350_v36 = vadd.f32 0.001, %v9349_v56 }
0x13b8   :  { %9352 = vst.msk [vmem:[#allocation3] sm:$0x1] %vm9351_vm4, %v9350_v36 }
0x13b9   :  { %15594 = shalt.err (!%p15591_p4)
}
0x13ba   :  { %s15595_s28 = scalar_lea.hbm %s20109_s9, 16 }
0x13bb   :  { %p15596_p5 = scmp.ne.s32.totalorder %s20109_s9, %s15595_s28  ;;  %p15599_p6 = scmp.lt.u32.totalorder %s15595_s28, %s20109_s9 }
0x13bd   :  { %p15601_p7 = pnand %p15599_p6, %p15596_p5 }
0x13bf   :  { %15604 = shalt.err (!%p15601_p7)
}
0x13c0   :  { %9362 = dma.vmem_to_hbm [thread:$0]  %s9360_s24, 16, %s20109_s9, [#allocation4]  }
0x13c1   :  { %15605 = dma.done.wait [#allocation4], 16  }
0x13c2   :  { %15606 = vsyncadd [#allocation4], 4294967280 }
0x13c3   :  { %9366 = vsyncpa [#allocation4], 1 }

</bundles_post_ra>
